<compile_context>
chip_gen: v6e
topology: v6e:2x2x1
jax: 0.10.0
libtpu: 0.0.40
codegen_flags: <defaults>
</compile_context>

<pallas_src>
import functools

import jax
import jax.numpy as jnp
from jax.experimental import pallas as pl
from jax.experimental.pallas import tpu as pltpu

NUM_LAYERS = 5
BN_EPS = 1e-5


def _batchnorm_train(x, gamma, beta):
    # nn.BatchNorm1d in training mode: biased batch statistics over axis 0.
    mu = jnp.mean(x, axis=0, keepdims=True)
    var = jnp.mean((x - mu) ** 2, axis=0, keepdims=True)
    return (x - mu) * jax.lax.rsqrt(var + BN_EPS) * gamma + beta


def _softplus(x):
    # torch.nn.Softplus(beta=1, threshold=20), with log1p for precision.
    return jnp.where(x > 20.0, x, jnp.log1p(jnp.exp(jnp.minimum(x, 20.0))))


def _layer_math(h, A, edge_b_l, w1t_l, b1_l, w2t_l, bn_g_l, bn_b_l, *, mm_dtype):
    """One GINEConv + BatchNorm + ReLU layer.  Matmul operands in mm_dtype,
    f32 MXU accumulation; bias/BN/ReLU in f32.  b2 intentionally omitted
    (cancelled exactly by the training-mode BatchNorm mean subtraction)."""
    dt = mm_dtype
    # GINEConv aggregation: agg[i] = sum_{e: dst(e)=i} (h[src(e)] + edge_emb[e])
    #                              = A @ h + edge_b_l
    agg = jnp.dot(A.astype(dt), h.astype(dt),
                  preferred_element_type=jnp.float32)
    agg = agg + edge_b_l.astype(jnp.float32)
    # update(): MLP = Linear(D, 2D) -> ReLU -> Linear(2D, D)
    z = jnp.dot(agg.astype(dt), w1t_l.astype(dt),
                preferred_element_type=jnp.float32) + b1_l
    z = jnp.maximum(z, 0.0)
    z = jnp.dot(z.astype(dt), w2t_l.astype(dt),
                preferred_element_type=jnp.float32)
    # BatchNorm1d (training stats) + ReLU (dropout p=0 is identity)
    z = _batchnorm_train(z, bn_g_l, bn_b_l)
    return jnp.maximum(z, 0.0)


def _head_math(h, P, pwt, pbn, ow1t, ob1, ow2t, ob2, *, use_proj):
    """global_mean_pool + (optional) proj_head + output_layers, all in f32
    (M = num_graphs is tiny, so the MXU cost is negligible and f32 avoids the
    2-row BatchNorm amplifying bf16 rounding)."""
    f32 = jnp.float32
    g = jnp.dot(P.astype(f32), h.astype(f32), preferred_element_type=f32)
    if use_proj:  # data.y.size(0) == 2 -> proj_head branch taken
        for i in range(3):
            g = jnp.dot(g, pwt[i].astype(f32), preferred_element_type=f32)
            g = _batchnorm_train(g, pbn[i, 0:1, :], pbn[i, 1:2, :])
            if i < 2:
                g = jnp.maximum(g, 0.0)
    # output_layers: Linear -> Softplus -> Linear
    z = jnp.dot(g, ow1t.astype(f32), preferred_element_type=f32) + ob1
    z = _softplus(z)
    return jnp.dot(z, ow2t.astype(f32), preferred_element_type=f32) + ob2


def gnnet_reference(h0, A, edge_b, w1t, w2t, vecs, P, pwt, pbn,
                    ow1t, ob1, ow2t, ob2, *, use_proj, mm_dtype, carry_dtype):
    """Plain-JAX reference with identical math (parametrized by matmul dtype
    and the dtype the per-layer activations are carried in)."""
    D = h0.shape[1]
    h = h0.astype(carry_dtype)
    for l in range(NUM_LAYERS):
        b1_l = vecs[l, 0:1, :]
        bn_g_l = vecs[l, 1:2, 0:D]
        bn_b_l = vecs[l, 1:2, D:2 * D]
        h = _layer_math(h, A, edge_b[l], w1t[l], b1_l, w2t[l], bn_g_l, bn_b_l,
                        mm_dtype=mm_dtype).astype(carry_dtype)
    return _head_math(h, P, pwt, pbn, ow1t, ob1, ow2t, ob2, use_proj=use_proj)


def gnnet_kernel(h0_ref, A_ref, edge_b_ref, w1t_ref, w2t_ref, vec_ref,
                 P_ref, pwt_ref, pbn_ref, ow1t_ref, ob1_ref, ow2t_ref, ob2_ref,
                 out_ref, h_scr, *, use_proj):
    l = pl.program_id(0)

    @pl.when(l == 0)
    def _():
        h_scr[...] = h0_ref[...]

    D = h_scr.shape[1]
    # Packed per-layer vectors: row 0 = b1 (width 2D), row 1 = [bn_gamma|bn_beta].
    b1_l = vec_ref[0:1, :]
    bn_g_l = vec_ref[1:2, 0:D]
    bn_b_l = vec_ref[1:2, D:2 * D]

    # One GIN layer per grid step; the per-layer weight blocks are already the
    # current layer's slice thanks to the BlockSpec index maps.
    h_new = _layer_math(h_scr[...], A_ref[...], edge_b_ref[...],
                        w1t_ref[...], b1_l, w2t_ref[...], bn_g_l, bn_b_l,
                        mm_dtype=jnp.bfloat16)
    h_scr[...] = h_new.astype(h_scr.dtype)   # carried in bf16

    @pl.when(l == NUM_LAYERS - 1)
    def _():
        out_ref[...] = _head_math(
            h_scr[...], P_ref[...], pwt_ref, pbn_ref,
            ow1t_ref[...], ob1_ref[...], ow2t_ref[...], ob2_ref[...],
            use_proj=use_proj).astype(out_ref.dtype)


def gnnet_pallas(args, num_graphs, use_proj):
    (h0, A, edge_b, w1t, w2t, vecs, P, pwt, pbn, ow1t, ob1, ow2t, ob2) = args
    N, D = h0.shape
    G = num_graphs
    D2 = 2 * D
    Dh = ow1t.shape[1]
    out_dim = ow2t.shape[1]

    in_specs = [
        pl.BlockSpec((N, D), lambda l: (0, 0)),             # h0   (bf16)
        pl.BlockSpec((N, N), lambda l: (0, 0)),             # A    (bf16)
        pl.BlockSpec((None, N, D), lambda l: (l, 0, 0)),    # edge_b[l] (bf16)
        pl.BlockSpec((None, D, D2), lambda l: (l, 0, 0)),   # w1t[l] (bf16)
        pl.BlockSpec((None, D2, D), lambda l: (l, 0, 0)),   # w2t[l] (bf16)
        pl.BlockSpec((None, 2, D2), lambda l: (l, 0, 0)),   # packed b1/bn[l] (f32)
        pl.BlockSpec((G, N), lambda l: (0, 0)),             # P    (f32)
        pl.BlockSpec((3, D, D), lambda l: (0, 0, 0)),       # proj weights (f32)
        pl.BlockSpec((3, 2, D), lambda l: (0, 0, 0)),       # proj BN gamma/beta (f32)
        pl.BlockSpec((D, Dh), lambda l: (0, 0)),            # ow1t (f32)
        pl.BlockSpec((1, Dh), lambda l: (0, 0)),            # ob1  (f32)
        pl.BlockSpec((Dh, out_dim), lambda l: (0, 0)),      # ow2t (f32)
        pl.BlockSpec((1, out_dim), lambda l: (0, 0)),       # ob2  (f32)
    ]

    return pl.pallas_call(
        functools.partial(gnnet_kernel, use_proj=use_proj),
        out_shape=jax.ShapeDtypeStruct((G, out_dim), jnp.float32),
        grid_spec=pltpu.PrefetchScalarGridSpec(
            num_scalar_prefetch=0,
            grid=(NUM_LAYERS,),
            in_specs=in_specs,
            out_specs=pl.BlockSpec((G, out_dim), lambda l: (0, 0)),
            scratch_shapes=[pltpu.VMEM((N, D), jnp.bfloat16)],  # carried h
        ),
        # h is carried across the layer axis -> must be "arbitrary".
        # Explicit vmem_limit (scoped defaults are 16/32 MiB) so larger node
        # batches are not capped; 48 MiB leaves headroom on v7x (64 MiB/TC).
        compiler_params=pltpu.CompilerParams(
            dimension_semantics=("arbitrary",),
            vmem_limit_bytes=48 * 1024 * 1024),
    )(*args)


if __name__ == "__main__":
    # ---- synthetic molecular graph batch: 512 nodes (M >= 256 fills MXU rows
    #      on all generations), ~3 directed edges/node + self loops ----
    N, E, D = 512, 1536, 256          # embed_dim = 256 (module default)
    L = NUM_LAYERS
    Dh, OUT = D // 2, 2
    NUM_ATOM_TYPE, NUM_CHIRALITY = 500, 500   # overridden defaults in gnnet.__init__
    NUM_BOND_TYPE, NUM_BOND_DIR = 5, 3

    key = jax.random.PRNGKey(0)
    k = iter(jax.random.split(key, 32))

    def nrm(kk, shape, scale=0.05):
        return scale * jax.random.normal(kk, shape, jnp.float32)

    x_feat = jnp.stack([jax.random.randint(next(k), (N,), 0, NUM_ATOM_TYPE),
                        jax.random.randint(next(k), (N,), 0, NUM_CHIRALITY)], axis=1)
    src = jax.random.randint(next(k), (E,), 0, N)
    dst = jax.random.randint(next(k), (E,), 0, N)
    edge_attr = jnp.stack([jax.random.randint(next(k), (E,), 0, NUM_BOND_TYPE - 1),
                           jax.random.randint(next(k), (E,), 0, NUM_BOND_DIR)], axis=1)

    # ---- deterministic parameters (shapes follow gnnet.__init__; Linear
    #      weights generated directly in the pre-transposed x @ Wt form) ----
    x_emb1 = nrm(next(k), (NUM_ATOM_TYPE, D))
    x_emb2 = nrm(next(k), (NUM_CHIRALITY, D))
    e_emb1 = nrm(next(k), (L, NUM_BOND_TYPE, D))      # per-layer edge_embedding1
    e_emb2 = nrm(next(k), (L, NUM_BOND_DIR, D))       # per-layer edge_embedding2
    w1t = nrm(next(k), (L, D, 2 * D))
    w2t = nrm(next(k), (L, 2 * D, D))
    b1 = nrm(next(k), (L, 2 * D))
    # NOTE: b2 (bias of the 2nd MLP Linear) is a no-op under training-mode
    # BatchNorm (mean subtraction cancels it) and is therefore not materialized.
    bn_g = 1.0 + nrm(next(k), (L, D), 0.1)
    bn_b = nrm(next(k), (L, D))
    pwt = nrm(next(k), (3, D, D))                     # proj_head Linears (bias=False)
    pbn_g = 1.0 + nrm(next(k), (3, D), 0.1)
    pbn_b = nrm(next(k), (3, D))
    ow1t = nrm(next(k), (D, Dh)); ob1r = nrm(next(k), (1, Dh))
    ow2t = nrm(next(k), (Dh, OUT)); ob2r = nrm(next(k), (1, OUT))

    # ---- glue (plain JAX): embedding lookups, self-loops, dense scatter/gather ----
    src_f = jnp.concatenate([src, jnp.arange(N)])     # add_self_loops
    dst_f = jnp.concatenate([dst, jnp.arange(N)])
    sl_attr = jnp.concatenate([jnp.full((N, 1), 4, edge_attr.dtype),
                               jnp.zeros((N, 1), edge_attr.dtype)], axis=1)
    ea_f = jnp.concatenate([edge_attr, sl_attr], axis=0)

    h0 = x_emb1[x_feat[:, 0]] + x_emb2[x_feat[:, 1]]                   # [N, D]
    S = jax.nn.one_hot(dst_f, N, dtype=jnp.float32).T                  # [N, E_tot] scatter-add
    Gsrc = jax.nn.one_hot(src_f, N, dtype=jnp.float32)                 # [E_tot, N] gather
    A = S @ Gsrc                                                       # [N, N] routing matrix
    edge_emb = e_emb1[:, ea_f[:, 0]] + e_emb2[:, ea_f[:, 1]]           # [L, E_tot, D]
    edge_b = jnp.einsum('ne,led->lnd', S, edge_emb)                    # [L, N, D]

    # packed per-layer vectors: row 0 = b1 (2D wide), row 1 = [bn_gamma | bn_beta]
    vecs = jnp.stack([b1, jnp.concatenate([bn_g, bn_b], axis=-1)], axis=1)  # [L,2,2D]
    pbn = jnp.stack([pbn_g, pbn_b], axis=1)                                 # [3,2,D]

    # bf16 copies of every layer-matmul operand (halves the weight/edge_b DMA
    # and the carried activation footprint); f32 accumulation stays in-kernel.
    bf = jnp.bfloat16
    h0_bf = h0.astype(bf)
    A_bf = A.astype(bf)                      # small-integer edge counts: exact in bf16
    edge_b_bf = edge_b.astype(bf)
    w1t_bf, w2t_bf = w1t.astype(bf), w2t.astype(bf)

    def make_args_bf16(P):
        return (h0_bf, A_bf, edge_b_bf, w1t_bf, w2t_bf, vecs, P,
                pwt, pbn, ow1t, ob1r, ow2t, ob2r)

    def make_args_f32(P):
        return (h0, A, edge_b, w1t, w2t, vecs, P,
                pwt, pbn, ow1t, ob1r, ow2t, ob2r)

    # Two configurations: G=2 exercises the proj_head branch (data.y.size(0)==2
    # in the module); G=4 skips it, giving a numerically robust f32 comparison.
    for G, use_proj, f32_tol in ((2, True, None), (4, False, 5e-2)):
        batch = jnp.repeat(jnp.arange(G, dtype=jnp.int32), N // G)
        onehot = jax.nn.one_hot(batch, G, dtype=jnp.float32)
        counts = jnp.maximum(onehot.sum(axis=0), 1.0)     # guard empty graphs
        P = onehot.T / counts[:, None]                    # [G, N] mean-pool

        args = make_args_bf16(P)
        out = jax.block_until_ready(gnnet_pallas(args, G, use_proj))
        assert out.shape == (G, OUT)
        assert bool(jnp.all(jnp.isfinite(out)))

        # (1) Tight check vs a precision-matched plain-JAX reference (same bf16
        #     operands, bf16 carried h, f32 head): validates the Pallas lowering.
        ref_matched = jax.block_until_ready(gnnet_reference(
            *args, use_proj=use_proj, mm_dtype=jnp.bfloat16, carry_dtype=jnp.bfloat16))
        err_m = float(jnp.max(jnp.abs(out - ref_matched)))
        assert err_m < 2e-2, f"G={G}: kernel vs matched-precision reference: {err_m}"

        # (2) Drift check vs the full-f32 reference.
        ref_f32 = jax.block_until_ready(gnnet_reference(
            *make_args_f32(P), use_proj=use_proj,
            mm_dtype=jnp.float32, carry_dtype=jnp.float32))
        err_f = float(jnp.max(jnp.abs(out - ref_f32)))
        if f32_tol is not None:
            assert err_f < f32_tol, f"G={G}: kernel vs f32 reference: {err_f}"
        else:
            # G=2: the proj_head BatchNorm normalizes over only 2 pooled rows,
            # so bf16-vs-f32 drift is sign-sensitive there; gross bound only.
            assert err_f < 5.0, f"G={G}: kernel vs f32 reference (gross): {err_f}"

    print("KERNEL_OK")
</pallas_src>

<mosaic_0001>
module attributes {stable_mosaic.version = 11 : i64} {
  func.func @gnnet_kernel(%arg0: i32, %arg1: memref<512x256xbf16, #tpu.memory_space<vmem>>, %arg2: memref<512x512xbf16, #tpu.memory_space<vmem>>, %arg3: memref<1x512x256xbf16, #tpu.memory_space<vmem>>, %arg4: memref<1x256x512xbf16, #tpu.memory_space<vmem>>, %arg5: memref<1x512x256xbf16, #tpu.memory_space<vmem>>, %arg6: memref<1x2x512xf32, #tpu.memory_space<vmem>>, %arg7: memref<2x512xf32, #tpu.memory_space<vmem>>, %arg8: memref<3x256x256xf32, #tpu.memory_space<vmem>>, %arg9: memref<3x2x256xf32, #tpu.memory_space<vmem>>, %arg10: memref<256x128xf32, #tpu.memory_space<vmem>>, %arg11: memref<1x128xf32, #tpu.memory_space<vmem>>, %arg12: memref<128x2xf32, #tpu.memory_space<vmem>>, %arg13: memref<1x2xf32, #tpu.memory_space<vmem>>, %arg14: memref<2x2xf32, #tpu.memory_space<vmem>>, %arg15: memref<512x256xbf16, #tpu.memory_space<vmem>>) attributes {dimension_semantics = [#tpu.dimension_semantics<arbitrary>], iteration_bounds = array<i64: 5>, scalar_prefetch = 0 : i64, scratch_operands = 1 : i64, tpu.core_type = #tpu.core_type<tc>, window_params = [{pipeline_mode = #tpu.pipeline_mode<synchronous>, transform_indices = @transform_0, window_bounds = array<i64: 512, 256>}, {pipeline_mode = #tpu.pipeline_mode<synchronous>, transform_indices = @transform_1, window_bounds = array<i64: 512, 512>}, {transform_indices = @transform_2, window_bounds = array<i64: 1, 512, 256>}, {transform_indices = @transform_3, window_bounds = array<i64: 1, 256, 512>}, {transform_indices = @transform_4, window_bounds = array<i64: 1, 512, 256>}, {transform_indices = @transform_5, window_bounds = array<i64: 1, 2, 512>}, {pipeline_mode = #tpu.pipeline_mode<synchronous>, transform_indices = @transform_6, window_bounds = array<i64: 2, 512>}, {pipeline_mode = #tpu.pipeline_mode<synchronous>, transform_indices = @transform_7, window_bounds = array<i64: 3, 256, 256>}, {pipeline_mode = #tpu.pipeline_mode<synchronous>, transform_indices = @transform_8, window_bounds = array<i64: 3, 2, 256>}, {pipeline_mode = #tpu.pipeline_mode<synchronous>, transform_indices = @transform_9, window_bounds = array<i64: 256, 128>}, {pipeline_mode = #tpu.pipeline_mode<synchronous>, transform_indices = @transform_10, window_bounds = array<i64: 1, 128>}, {pipeline_mode = #tpu.pipeline_mode<synchronous>, transform_indices = @transform_11, window_bounds = array<i64: 128, 2>}, {pipeline_mode = #tpu.pipeline_mode<synchronous>, transform_indices = @transform_12, window_bounds = array<i64: 1, 2>}, {pipeline_mode = #tpu.pipeline_mode<synchronous>, transform_indices = @transform_13, window_bounds = array<i64: 2, 2>}]} {
    %c0_i32 = arith.constant 0 : i32
    %0 = arith.cmpi eq, %arg0, %c0_i32 : i32
    %1 = arith.extui %0 : i1 to i32
    %c0_i32_0 = arith.constant 0 : i32
    %2 = arith.cmpi ne, %1, %c0_i32_0 : i32
    scf.if %2 {
      %c0_32 = arith.constant 0 : index
      %c0_33 = arith.constant 0 : index
      %57 = vector.load %arg1[%c0_32, %c0_33] : memref<512x256xbf16, #tpu.memory_space<vmem>>, vector<512x256xbf16>
      %c0_34 = arith.constant 0 : index
      %c0_35 = arith.constant 0 : index
      %58 = vector.load %arg15[%c0_34, %c0_35] : memref<512x256xbf16, #tpu.memory_space<vmem>>, vector<512x256xbf16>
      tpu.vector_store %arg15[%c0_34, %c0_35], %57 {strides = array<i32>} : memref<512x256xbf16, #tpu.memory_space<vmem>>, vector<512x256xbf16>,
    } else {
    }
    %c0 = arith.constant 0 : index
    %c0_1 = arith.constant 0 : index
    %c0_2 = arith.constant 0 : index
    %3 = vector.load %arg6[%c0, %c0_1, %c0_2] : memref<1x2x512xf32, #tpu.memory_space<vmem>>, vector<1x1x512xf32>
    %4 = vector.shape_cast %3 : vector<1x1x512xf32> to vector<1x512xf32>
    %c0_3 = arith.constant 0 : index
    %c1 = arith.constant 1 : index
    %c0_4 = arith.constant 0 : index
    %5 = vector.load %arg6[%c0_3, %c1, %c0_4] : memref<1x2x512xf32, #tpu.memory_space<vmem>>, vector<1x1x256xf32>
    %6 = vector.shape_cast %5 : vector<1x1x256xf32> to vector<1x256xf32>
    %c0_5 = arith.constant 0 : index
    %c1_6 = arith.constant 1 : index
    %c256 = arith.constant 256 : index
    %7 = vector.load %arg6[%c0_5, %c1_6, %c256] : memref<1x2x512xf32, #tpu.memory_space<vmem>>, vector<1x1x256xf32>
    %8 = vector.shape_cast %7 : vector<1x1x256xf32> to vector<1x256xf32>
    %c0_7 = arith.constant 0 : index
    %c0_8 = arith.constant 0 : index
    %9 = vector.load %arg15[%c0_7, %c0_8] : memref<512x256xbf16, #tpu.memory_space<vmem>>, vector<512x256xbf16>
    %c0_9 = arith.constant 0 : index
    %c0_10 = arith.constant 0 : index
    %10 = vector.load %arg2[%c0_9, %c0_10] : memref<512x512xbf16, #tpu.memory_space<vmem>>, vector<512x512xbf16>
    %c0_11 = arith.constant 0 : index
    %c0_12 = arith.constant 0 : index
    %c0_13 = arith.constant 0 : index
    %11 = vector.load %arg3[%c0_11, %c0_12, %c0_13] : memref<1x512x256xbf16, #tpu.memory_space<vmem>>, vector<1x512x256xbf16>
    %12 = vector.shape_cast %11 : vector<1x512x256xbf16> to vector<512x256xbf16>
    %c0_14 = arith.constant 0 : index
    %c0_15 = arith.constant 0 : index
    %c0_16 = arith.constant 0 : index
    %13 = vector.load %arg4[%c0_14, %c0_15, %c0_16] : memref<1x256x512xbf16, #tpu.memory_space<vmem>>, vector<1x256x512xbf16>
    %14 = vector.shape_cast %13 : vector<1x256x512xbf16> to vector<256x512xbf16>
    %c0_17 = arith.constant 0 : index
    %c0_18 = arith.constant 0 : index
    %c0_19 = arith.constant 0 : index
    %15 = vector.load %arg5[%c0_17, %c0_18, %c0_19] : memref<1x512x256xbf16, #tpu.memory_space<vmem>>, vector<1x512x256xbf16>
    %16 = vector.shape_cast %15 : vector<1x512x256xbf16> to vector<512x256xbf16>
    %cst = arith.constant dense<0.000000e+00> : vector<512x256xf32>
    %17 = tpu.matmul %10, %9, %cst {dimension_numbers = #tpu.dot_dimension_numbers<[1], [0], [0], [1], [0, 0, 1, 1], [], []>} : vector<512x512xbf16>, vector<512x256xbf16>, vector<512x256xf32> -> vector<512x256xf32>
    %18 = arith.extf %12 : vector<512x256xbf16> to vector<512x256xf32>
    %19 = arith.addf %17, %18 : vector<512x256xf32>
    %20 = arith.truncf %19 : vector<512x256xf32> to vector<512x256xbf16>
    %cst_20 = arith.constant dense<0.000000e+00> : vector<512x512xf32>
    %21 = tpu.matmul %20, %14, %cst_20 {dimension_numbers = #tpu.dot_dimension_numbers<[1], [0], [0], [1], [0, 0, 1, 1], [], []>} : vector<512x256xbf16>, vector<256x512xbf16>, vector<512x512xf32> -> vector<512x512xf32>
    %22 = vector.broadcast %4 : vector<1x512xf32> to vector<512x512xf32>
    %23 = arith.addf %21, %22 : vector<512x512xf32>
    %cst_21 = arith.constant 0.000000e+00 : f32
    %24 = vector.broadcast %cst_21 : f32 to vector<512x512xf32>
    %25 = arith.maximumf %23, %24 : vector<512x512xf32>
    %26 = arith.truncf %25 : vector<512x512xf32> to vector<512x512xbf16>
    %cst_22 = arith.constant dense<0.000000e+00> : vector<512x256xf32>
    %27 = tpu.matmul %26, %16, %cst_22 {dimension_numbers = #tpu.dot_dimension_numbers<[1], [0], [0], [1], [0, 0, 1, 1], [], []>} : vector<512x512xbf16>, vector<512x256xbf16>, vector<512x256xf32> -> vector<512x256xf32>
    %cst_23 = arith.constant dense<0.000000e+00> : vector<256xf32>
    %28 = vector.multi_reduction <add>, %27, %cst_23 [0] : vector<512x256xf32> to vector<256xf32>
    %29 = vector.shape_cast %28 : vector<256xf32> to vector<1x256xf32>
    %cst_24 = arith.constant 5.120000e+02 : f32
    %30 = vector.broadcast %cst_24 : f32 to vector<1x256xf32>
    %31 = arith.divf %29, %30 : vector<1x256xf32>
    %32 = vector.broadcast %31 : vector<1x256xf32> to vector<512x256xf32>
    %33 = arith.subf %27, %32 : vector<512x256xf32>
    %34 = arith.mulf %33, %33 : vector<512x256xf32>
    %cst_25 = arith.constant dense<0.000000e+00> : vector<256xf32>
    %35 = vector.multi_reduction <add>, %34, %cst_25 [0] : vector<512x256xf32> to vector<256xf32>
    %36 = vector.shape_cast %35 : vector<256xf32> to vector<1x256xf32>
    %cst_26 = arith.constant 5.120000e+02 : f32
    %37 = vector.broadcast %cst_26 : f32 to vector<1x256xf32>
    %38 = arith.divf %36, %37 : vector<1x256xf32>
    %39 = vector.broadcast %31 : vector<1x256xf32> to vector<512x256xf32>
    %40 = arith.subf %27, %39 : vector<512x256xf32>
    %cst_27 = arith.constant 9.99999974E-6 : f32
    %41 = vector.broadcast %cst_27 : f32 to vector<1x256xf32>
    %42 = arith.addf %38, %41 : vector<1x256xf32>
    %43 = math.rsqrt %42 : vector<1x256xf32>
    %44 = vector.broadcast %43 : vector<1x256xf32> to vector<512x256xf32>
    %45 = arith.mulf %40, %44 : vector<512x256xf32>
    %46 = vector.broadcast %6 : vector<1x256xf32> to vector<512x256xf32>
    %47 = arith.mulf %45, %46 : vector<512x256xf32>
    %48 = vector.broadcast %8 : vector<1x256xf32> to vector<512x256xf32>
    %49 = arith.addf %47, %48 : vector<512x256xf32>
    %cst_28 = arith.constant 0.000000e+00 : f32
    %50 = vector.broadcast %cst_28 : f32 to vector<512x256xf32>
    %51 = arith.maximumf %49, %50 : vector<512x256xf32>
    %52 = arith.truncf %51 : vector<512x256xf32> to vector<512x256xbf16>
    %c0_29 = arith.constant 0 : index
    %c0_30 = arith.constant 0 : index
    %53 = vector.load %arg15[%c0_29, %c0_30] : memref<512x256xbf16, #tpu.memory_space<vmem>>, vector<512x256xbf16>
    tpu.vector_store %arg15[%c0_29, %c0_30], %52 {strides = array<i32>} : memref<512x256xbf16, #tpu.memory_space<vmem>>, vector<512x256xbf16>,
    %c4_i32 = arith.constant 4 : i32
    %54 = arith.cmpi eq, %arg0, %c4_i32 : i32
    %55 = arith.extui %54 : i1 to i32
    %c0_i32_31 = arith.constant 0 : i32
    %56 = arith.cmpi ne, %55, %c0_i32_31 : i32
    scf.if %56 {
      %c0_32 = arith.constant 0 : index
      %c0_33 = arith.constant 0 : index
      %57 = vector.load %arg15[%c0_32, %c0_33] : memref<512x256xbf16, #tpu.memory_space<vmem>>, vector<512x256xbf16>
      %c0_34 = arith.constant 0 : index
      %c0_35 = arith.constant 0 : index
      %58 = vector.load %arg7[%c0_34, %c0_35] : memref<2x512xf32, #tpu.memory_space<vmem>>, vector<2x512xf32>
      %c0_36 = arith.constant 0 : index
      %c0_37 = arith.constant 0 : index
      %59 = vector.load %arg10[%c0_36, %c0_37] : memref<256x128xf32, #tpu.memory_space<vmem>>, vector<256x128xf32>
      %c0_38 = arith.constant 0 : index
      %c0_39 = arith.constant 0 : index
      %60 = vector.load %arg11[%c0_38, %c0_39] : memref<1x128xf32, #tpu.memory_space<vmem>>, vector<1x128xf32>
      %c0_40 = arith.constant 0 : index
      %c0_41 = arith.constant 0 : index
      %61 = vector.load %arg12[%c0_40, %c0_41] : memref<128x2xf32, #tpu.memory_space<vmem>>, vector<128x2xf32>
      %c0_42 = arith.constant 0 : index
      %c0_43 = arith.constant 0 : index
      %62 = vector.load %arg13[%c0_42, %c0_43] : memref<1x2xf32, #tpu.memory_space<vmem>>, vector<1x2xf32>
      %63 = arith.extf %57 : vector<512x256xbf16> to vector<512x256xf32>
      %cst_44 = arith.constant dense<0.000000e+00> : vector<2x256xf32>
      %64 = tpu.matmul %58, %63, %cst_44 {dimension_numbers = #tpu.dot_dimension_numbers<[1], [0], [0], [1], [0, 0, 1, 1], [], []>} : vector<2x512xf32>, vector<512x256xf32>, vector<2x256xf32> -> vector<2x256xf32>
      %c0_45 = arith.constant 0 : index
      %c0_46 = arith.constant 0 : index
      %c0_47 = arith.constant 0 : index
      %65 = vector.load %arg8[%c0_45, %c0_46, %c0_47] : memref<3x256x256xf32, #tpu.memory_space<vmem>>, vector<1x256x256xf32>
      %66 = vector.shape_cast %65 : vector<1x256x256xf32> to vector<256x256xf32>
      %cst_48 = arith.constant dense<0.000000e+00> : vector<2x256xf32>
      %67 = tpu.matmul %64, %66, %cst_48 {dimension_numbers = #tpu.dot_dimension_numbers<[1], [0], [0], [1], [0, 0, 1, 1], [], []>} : vector<2x256xf32>, vector<256x256xf32>, vector<2x256xf32> -> vector<2x256xf32>
      %c0_49 = arith.constant 0 : index
      %c0_50 = arith.constant 0 : index
      %c0_51 = arith.constant 0 : index
      %68 = vector.load %arg9[%c0_49, %c0_50, %c0_51] : memref<3x2x256xf32, #tpu.memory_space<vmem>>, vector<1x1x256xf32>
      %69 = vector.shape_cast %68 : vector<1x1x256xf32> to vector<1x256xf32>
      %c0_52 = arith.constant 0 : index
      %c1_53 = arith.constant 1 : index
      %c0_54 = arith.constant 0 : index
      %70 = vector.load %arg9[%c0_52, %c1_53, %c0_54] : memref<3x2x256xf32, #tpu.memory_space<vmem>>, vector<1x1x256xf32>
      %71 = vector.shape_cast %70 : vector<1x1x256xf32> to vector<1x256xf32>
      %cst_55 = arith.constant dense<0.000000e+00> : vector<256xf32>
      %72 = vector.multi_reduction <add>, %67, %cst_55 [0] : vector<2x256xf32> to vector<256xf32>
      %73 = vector.shape_cast %72 : vector<256xf32> to vector<1x256xf32>
      %cst_56 = arith.constant 2.000000e+00 : f32
      %74 = vector.broadcast %cst_56 : f32 to vector<1x256xf32>
      %75 = arith.divf %73, %74 : vector<1x256xf32>
      %76 = vector.broadcast %75 : vector<1x256xf32> to vector<2x256xf32>
      %77 = arith.subf %67, %76 : vector<2x256xf32>
      %78 = arith.mulf %77, %77 : vector<2x256xf32>
      %cst_57 = arith.constant dense<0.000000e+00> : vector<256xf32>
      %79 = vector.multi_reduction <add>, %78, %cst_57 [0] : vector<2x256xf32> to vector<256xf32>
      %80 = vector.shape_cast %79 : vector<256xf32> to vector<1x256xf32>
      %cst_58 = arith.constant 2.000000e+00 : f32
      %81 = vector.broadcast %cst_58 : f32 to vector<1x256xf32>
      %82 = arith.divf %80, %81 : vector<1x256xf32>
      %83 = vector.broadcast %75 : vector<1x256xf32> to vector<2x256xf32>
      %84 = arith.subf %67, %83 : vector<2x256xf32>
      %cst_59 = arith.constant 9.99999974E-6 : f32
      %85 = vector.broadcast %cst_59 : f32 to vector<1x256xf32>
      %86 = arith.addf %82, %85 : vector<1x256xf32>
      %87 = math.rsqrt %86 : vector<1x256xf32>
      %88 = vector.broadcast %87 : vector<1x256xf32> to vector<2x256xf32>
      %89 = arith.mulf %84, %88 : vector<2x256xf32>
      %90 = vector.broadcast %69 : vector<1x256xf32> to vector<2x256xf32>
      %91 = arith.mulf %89, %90 : vector<2x256xf32>
      %92 = vector.broadcast %71 : vector<1x256xf32> to vector<2x256xf32>
      %93 = arith.addf %91, %92 : vector<2x256xf32>
      %cst_60 = arith.constant 0.000000e+00 : f32
      %94 = vector.broadcast %cst_60 : f32 to vector<2x256xf32>
      %95 = arith.maximumf %93, %94 : vector<2x256xf32>
      %c1_61 = arith.constant 1 : index
      %c0_62 = arith.constant 0 : index
      %c0_63 = arith.constant 0 : index
      %96 = vector.load %arg8[%c1_61, %c0_62, %c0_63] : memref<3x256x256xf32, #tpu.memory_space<vmem>>, vector<1x256x256xf32>
      %97 = vector.shape_cast %96 : vector<1x256x256xf32> to vector<256x256xf32>
      %cst_64 = arith.constant dense<0.000000e+00> : vector<2x256xf32>
      %98 = tpu.matmul %95, %97, %cst_64 {dimension_numbers = #tpu.dot_dimension_numbers<[1], [0], [0], [1], [0, 0, 1, 1], [], []>} : vector<2x256xf32>, vector<256x256xf32>, vector<2x256xf32> -> vector<2x256xf32>
      %c1_65 = arith.constant 1 : index
      %c0_66 = arith.constant 0 : index
      %c0_67 = arith.constant 0 : index
      %99 = vector.load %arg9[%c1_65, %c0_66, %c0_67] : memref<3x2x256xf32, #tpu.memory_space<vmem>>, vector<1x1x256xf32>
      %100 = vector.shape_cast %99 : vector<1x1x256xf32> to vector<1x256xf32>
      %c1_68 = arith.constant 1 : index
      %c1_69 = arith.constant 1 : index
      %c0_70 = arith.constant 0 : index
      %101 = vector.load %arg9[%c1_68, %c1_69, %c0_70] : memref<3x2x256xf32, #tpu.memory_space<vmem>>, vector<1x1x256xf32>
      %102 = vector.shape_cast %101 : vector<1x1x256xf32> to vector<1x256xf32>
      %cst_71 = arith.constant dense<0.000000e+00> : vector<256xf32>
      %103 = vector.multi_reduction <add>, %98, %cst_71 [0] : vector<2x256xf32> to vector<256xf32>
      %104 = vector.shape_cast %103 : vector<256xf32> to vector<1x256xf32>
      %cst_72 = arith.constant 2.000000e+00 : f32
      %105 = vector.broadcast %cst_72 : f32 to vector<1x256xf32>
      %106 = arith.divf %104, %105 : vector<1x256xf32>
      %107 = vector.broadcast %106 : vector<1x256xf32> to vector<2x256xf32>
      %108 = arith.subf %98, %107 : vector<2x256xf32>
      %109 = arith.mulf %108, %108 : vector<2x256xf32>
      %cst_73 = arith.constant dense<0.000000e+00> : vector<256xf32>
      %110 = vector.multi_reduction <add>, %109, %cst_73 [0] : vector<2x256xf32> to vector<256xf32>
      %111 = vector.shape_cast %110 : vector<256xf32> to vector<1x256xf32>
      %cst_74 = arith.constant 2.000000e+00 : f32
      %112 = vector.broadcast %cst_74 : f32 to vector<1x256xf32>
      %113 = arith.divf %111, %112 : vector<1x256xf32>
      %114 = vector.broadcast %106 : vector<1x256xf32> to vector<2x256xf32>
      %115 = arith.subf %98, %114 : vector<2x256xf32>
      %cst_75 = arith.constant 9.99999974E-6 : f32
      %116 = vector.broadcast %cst_75 : f32 to vector<1x256xf32>
      %117 = arith.addf %113, %116 : vector<1x256xf32>
      %118 = math.rsqrt %117 : vector<1x256xf32>
      %119 = vector.broadcast %118 : vector<1x256xf32> to vector<2x256xf32>
      %120 = arith.mulf %115, %119 : vector<2x256xf32>
      %121 = vector.broadcast %100 : vector<1x256xf32> to vector<2x256xf32>
      %122 = arith.mulf %120, %121 : vector<2x256xf32>
      %123 = vector.broadcast %102 : vector<1x256xf32> to vector<2x256xf32>
      %124 = arith.addf %122, %123 : vector<2x256xf32>
      %cst_76 = arith.constant 0.000000e+00 : f32
      %125 = vector.broadcast %cst_76 : f32 to vector<2x256xf32>
      %126 = arith.maximumf %124, %125 : vector<2x256xf32>
      %c2 = arith.constant 2 : index
      %c0_77 = arith.constant 0 : index
      %c0_78 = arith.constant 0 : index
      %127 = vector.load %arg8[%c2, %c0_77, %c0_78] : memref<3x256x256xf32, #tpu.memory_space<vmem>>, vector<1x256x256xf32>
      %128 = vector.shape_cast %127 : vector<1x256x256xf32> to vector<256x256xf32>
      %cst_79 = arith.constant dense<0.000000e+00> : vector<2x256xf32>
      %129 = tpu.matmul %126, %128, %cst_79 {dimension_numbers = #tpu.dot_dimension_numbers<[1], [0], [0], [1], [0, 0, 1, 1], [], []>} : vector<2x256xf32>, vector<256x256xf32>, vector<2x256xf32> -> vector<2x256xf32>
      %c2_80 = arith.constant 2 : index
      %c0_81 = arith.constant 0 : index
      %c0_82 = arith.constant 0 : index
      %130 = vector.load %arg9[%c2_80, %c0_81, %c0_82] : memref<3x2x256xf32, #tpu.memory_space<vmem>>, vector<1x1x256xf32>
      %131 = vector.shape_cast %130 : vector<1x1x256xf32> to vector<1x256xf32>
      %c2_83 = arith.constant 2 : index
      %c1_84 = arith.constant 1 : index
      %c0_85 = arith.constant 0 : index
      %132 = vector.load %arg9[%c2_83, %c1_84, %c0_85] : memref<3x2x256xf32, #tpu.memory_space<vmem>>, vector<1x1x256xf32>
      %133 = vector.shape_cast %132 : vector<1x1x256xf32> to vector<1x256xf32>
      %cst_86 = arith.constant dense<0.000000e+00> : vector<256xf32>
      %134 = vector.multi_reduction <add>, %129, %cst_86 [0] : vector<2x256xf32> to vector<256xf32>
      %135 = vector.shape_cast %134 : vector<256xf32> to vector<1x256xf32>
      %cst_87 = arith.constant 2.000000e+00 : f32
      %136 = vector.broadcast %cst_87 : f32 to vector<1x256xf32>
      %137 = arith.divf %135, %136 : vector<1x256xf32>
      %138 = vector.broadcast %137 : vector<1x256xf32> to vector<2x256xf32>
      %139 = arith.subf %129, %138 : vector<2x256xf32>
      %140 = arith.mulf %139, %139 : vector<2x256xf32>
      %cst_88 = arith.constant dense<0.000000e+00> : vector<256xf32>
      %141 = vector.multi_reduction <add>, %140, %cst_88 [0] : vector<2x256xf32> to vector<256xf32>
      %142 = vector.shape_cast %141 : vector<256xf32> to vector<1x256xf32>
      %cst_89 = arith.constant 2.000000e+00 : f32
      %143 = vector.broadcast %cst_89 : f32 to vector<1x256xf32>
      %144 = arith.divf %142, %143 : vector<1x256xf32>
      %145 = vector.broadcast %137 : vector<1x256xf32> to vector<2x256xf32>
      %146 = arith.subf %129, %145 : vector<2x256xf32>
      %cst_90 = arith.constant 9.99999974E-6 : f32
      %147 = vector.broadcast %cst_90 : f32 to vector<1x256xf32>
      %148 = arith.addf %144, %147 : vector<1x256xf32>
      %149 = math.rsqrt %148 : vector<1x256xf32>
      %150 = vector.broadcast %149 : vector<1x256xf32> to vector<2x256xf32>
      %151 = arith.mulf %146, %150 : vector<2x256xf32>
      %152 = vector.broadcast %131 : vector<1x256xf32> to vector<2x256xf32>
      %153 = arith.mulf %151, %152 : vector<2x256xf32>
      %154 = vector.broadcast %133 : vector<1x256xf32> to vector<2x256xf32>
      %155 = arith.addf %153, %154 : vector<2x256xf32>
      %cst_91 = arith.constant dense<0.000000e+00> : vector<2x128xf32>
      %156 = tpu.matmul %155, %59, %cst_91 {dimension_numbers = #tpu.dot_dimension_numbers<[1], [0], [0], [1], [0, 0, 1, 1], [], []>} : vector<2x256xf32>, vector<256x128xf32>, vector<2x128xf32> -> vector<2x128xf32>
      %157 = vector.broadcast %60 : vector<1x128xf32> to vector<2x128xf32>
      %158 = arith.addf %156, %157 : vector<2x128xf32>
      %cst_92 = arith.constant 2.000000e+01 : f32
      %159 = vector.broadcast %cst_92 : f32 to vector<2x128xf32>
      %160 = arith.cmpf ogt, %158, %159 : vector<2x128xf32>
      %cst_93 = arith.constant 2.000000e+01 : f32
      %161 = vector.broadcast %cst_93 : f32 to vector<2x128xf32>
      %162 = arith.minimumf %158, %161 : vector<2x128xf32>
      %163 = math.exp %162 : vector<2x128xf32>
      %164 = math.log1p %163 : vector<2x128xf32>
      %165 = arith.select %160, %158, %164 : vector<2x128xi1>, vector<2x128xf32>
      %cst_94 = arith.constant dense<0.000000e+00> : vector<2x2xf32>
      %166 = tpu.matmul %165, %61, %cst_94 {dimension_numbers = #tpu.dot_dimension_numbers<[1], [0], [0], [1], [0, 0, 1, 1], [], []>} : vector<2x128xf32>, vector<128x2xf32>, vector<2x2xf32> -> vector<2x2xf32>
      %167 = vector.broadcast %62 : vector<1x2xf32> to vector<2x2xf32>
      %168 = arith.addf %166, %167 : vector<2x2xf32>
      %c0_95 = arith.constant 0 : index
      %c0_96 = arith.constant 0 : index
      %169 = vector.load %arg14[%c0_95, %c0_96] : memref<2x2xf32, #tpu.memory_space<vmem>>, vector<2x2xf32>
      tpu.vector_store %arg14[%c0_95, %c0_96], %168 {strides = array<i32>} : memref<2x2xf32, #tpu.memory_space<vmem>>, vector<2x2xf32>,
    } else {
    }
    return
  }
  func.func @transform_0(%arg0: i32) -> (i32, i32) {
    %c0_i32 = arith.constant 0 : i32
    %c0_i32_0 = arith.constant 0 : i32
    %c0_i32_1 = arith.constant 0 : i32
    return %c0_i32, %c0_i32_0 : i32, i32
  }
  func.func @transform_1(%arg0: i32) -> (i32, i32) {
    %c0_i32 = arith.constant 0 : i32
    %c0_i32_0 = arith.constant 0 : i32
    %c0_i32_1 = arith.constant 0 : i32
    return %c0_i32, %c0_i32_0 : i32, i32
  }
  func.func @transform_2(%arg0: i32) -> (i32, i32, i32) {
    %c0_i32 = arith.constant 0 : i32
    %c0_i32_0 = arith.constant 0 : i32
    %c0_i32_1 = arith.constant 0 : i32
    return %arg0, %c0_i32, %c0_i32_0 : i32, i32, i32
  }
  func.func @transform_3(%arg0: i32) -> (i32, i32, i32) {
    %c0_i32 = arith.constant 0 : i32
    %c0_i32_0 = arith.constant 0 : i32
    %c0_i32_1 = arith.constant 0 : i32
    return %arg0, %c0_i32, %c0_i32_0 : i32, i32, i32
  }
  func.func @transform_4(%arg0: i32) -> (i32, i32, i32) {
    %c0_i32 = arith.constant 0 : i32
    %c0_i32_0 = arith.constant 0 : i32
    %c0_i32_1 = arith.constant 0 : i32
    return %arg0, %c0_i32, %c0_i32_0 : i32, i32, i32
  }
  func.func @transform_5(%arg0: i32) -> (i32, i32, i32) {
    %c0_i32 = arith.constant 0 : i32
    %c0_i32_0 = arith.constant 0 : i32
    %c0_i32_1 = arith.constant 0 : i32
    return %arg0, %c0_i32, %c0_i32_0 : i32, i32, i32
  }
  func.func @transform_6(%arg0: i32) -> (i32, i32) {
    %c0_i32 = arith.constant 0 : i32
    %c0_i32_0 = arith.constant 0 : i32
    %c0_i32_1 = arith.constant 0 : i32
    return %c0_i32, %c0_i32_0 : i32, i32
  }
  func.func @transform_7(%arg0: i32) -> (i32, i32, i32) {
    %c0_i32 = arith.constant 0 : i32
    %c0_i32_0 = arith.constant 0 : i32
    %c0_i32_1 = arith.constant 0 : i32
    %c0_i32_2 = arith.constant 0 : i32
    return %c0_i32, %c0_i32_0, %c0_i32_1 : i32, i32, i32
  }
  func.func @transform_8(%arg0: i32) -> (i32, i32, i32) {
    %c0_i32 = arith.constant 0 : i32
    %c0_i32_0 = arith.constant 0 : i32
    %c0_i32_1 = arith.constant 0 : i32
    %c0_i32_2 = arith.constant 0 : i32
    return %c0_i32, %c0_i32_0, %c0_i32_1 : i32, i32, i32
  }
  func.func @transform_9(%arg0: i32) -> (i32, i32) {
    %c0_i32 = arith.constant 0 : i32
    %c0_i32_0 = arith.constant 0 : i32
    %c0_i32_1 = arith.constant 0 : i32
    return %c0_i32, %c0_i32_0 : i32, i32
  }
  func.func @transform_10(%arg0: i32) -> (i32, i32) {
    %c0_i32 = arith.constant 0 : i32
    %c0_i32_0 = arith.constant 0 : i32
    %c0_i32_1 = arith.constant 0 : i32
    return %c0_i32, %c0_i32_0 : i32, i32
  }
  func.func @transform_11(%arg0: i32) -> (i32, i32) {
    %c0_i32 = arith.constant 0 : i32
    %c0_i32_0 = arith.constant 0 : i32
    %c0_i32_1 = arith.constant 0 : i32
    return %c0_i32, %c0_i32_0 : i32, i32
  }
  func.func @transform_12(%arg0: i32) -> (i32, i32) {
    %c0_i32 = arith.constant 0 : i32
    %c0_i32_0 = arith.constant 0 : i32
    %c0_i32_1 = arith.constant 0 : i32
    return %c0_i32, %c0_i32_0 : i32, i32
  }
  func.func @transform_13(%arg0: i32) -> (i32, i32) {
    %c0_i32 = arith.constant 0 : i32
    %c0_i32_0 = arith.constant 0 : i32
    %c0_i32_1 = arith.constant 0 : i32
    return %c0_i32, %c0_i32_0 : i32, i32
  }
}

</mosaic_0001>

<bundles_post_ra>
// kernel: tpu_custom_call.1
= control target key start
LH: loop header
LB: loop body
LE: loop exit
PB: predicated region body
PF: predicated region fallthrough
CT: control target
= control target key end

     0   :  { %s15813_s0 = inlined_call_operand.hbm [shape: bf16[512,256], index: 0, kind: input, shape index: {}]   ;;  %s15814_s1 = inlined_call_operand.hbm [shape: bf16[512,512], index: 1, kind: input, shape index: {}]   ;;  %s15815_s2 = inlined_call_operand.hbm [shape: bf16[5,512,256], index: 2, kind: input, shape index: {}]   ;;  %s15816_s3 = inlined_call_operand.hbm [shape: bf16[5,256,512], index: 3, kind: input, shape index: {}]   ;;  %s15817_s4 = inlined_call_operand.hbm [shape: bf16[5,512,256], index: 4, kind: input, shape index: {}]   ;;  %s15818_s5 = inlined_call_operand.hbm [shape: f32[5,2,512], index: 5, kind: input, shape index: {}]   ;;  %s15819_s6 = inlined_call_operand.hbm [shape: f32[2,512], index: 6, kind: input, shape index: {}]   ;;  %s15820_s7 = inlined_call_operand.hbm [shape: f32[3,256,256], index: 7, kind: input, shape index: {}]   ;;  %s15821_s8 = inlined_call_operand.hbm [shape: f32[3,2,256], index: 8, kind: input, shape index: {}]   ;;  %s15822_s9 = inlined_call_operand.hbm [shape: f32[256,128], index: 9, kind: input, shape index: {}]   ;;  %s15823_s10 = inlined_call_operand.hbm [shape: f32[1,128], index: 10, kind: input, shape index: {}]   ;;  %s15824_s11 = inlined_call_operand.vmem [shape: f32[128,2], index: 11, kind: input, shape index: {}]   ;;  %s15825_s12 = inlined_call_operand.hbm [shape: f32[1,2], index: 12, kind: input, shape index: {}]   ;;  %s15826_s13 = inlined_call_operand.hbm [shape: f32[2,2], index: 13, kind: output, shape index: {}]  }
   0x1   :  { %16157 = sst [smem:[#allocation169_spill]] %s15813_s0 }
   0x2   :  { %16158 = sst [smem:[#allocation170_spill]] %s15815_s2 }
   0x3   :  { %16159 = sst [smem:[#allocation171_spill]] %s15818_s5 }
   0x4   :  { %16160 = sst [smem:[#allocation172_spill]] %s15824_s11 }
   0x5   :  { %16161 = sst [smem:[#allocation173_spill]] %s15826_s13 }
   0x6   :  { %18 = vsyncpa [#allocation4], 0 }
   0x7   :  { %19 = vsyncpa [#allocation7], 0 }
   0x8   :  { %20 = vsyncpa [#allocation14], 0 }
   0x9   :  { %21 = vsyncpa [#allocation17], 0 }
   0xa   :  { %22 = vsyncpa [#allocation20], 0 }
   0xb   :  { %23 = vsyncpa [#allocation5], 0  ;;  %s10138_s25 = smov 0   ;;  %s10140_s26 = smov 0  }
   0xc   :  { %s10142_s27 = smov 0   ;;  %s10144_s28 = smov 0  }
   0xd LB: > { %16162 = sst [smem:[#allocation30_spill]] %s10036_s26  ;;  %s10046_s29 = smov [#allocation3]   ;;  %s10044_s28 = sphi %s10144_s28, %s17257_s28   ;;  %s10040_s27 = sphi %s10142_s27, %s17261_s27   ;;  %s10036_s26 = sphi %s10140_s26, %s17260_s26   ;;  %s10032_s25 = sphi %s10138_s25, %s17258_s25  }
   0xe   : > { %s360_s30 = sshll.u32 %s10046_s29, 4  ;;  %s10159_s14 = sadd.s32 4294967295, %s10044_s28   ;;  %s361_s30 = int_to_ptr.vmem [resolvable:$true] %s360_s30 }
   0xf   : > { %16163 = sst [smem:[#allocation31_spill]] %s10159_s14  ;;  %p8426_p0 = scmp.ge.s32.totalorder %s10044_s28, 1 }
  0x10   : > { %p15838_p1 = scmp.eq.s32.totalorder %s10159_s14, 0  ;;  %p348_p2 = scmp.lt.s32.totalorder %s10044_s28, 6 }
  0x11   : > { %s10178_s17 = sadd.s32 1, %s10044_s28   ;;  %s9649_s19 = scalar_lea.vmem %s361_s30, 8192 }
  0x12   : > { %p10165_p4 = pnand %p8426_p0, %p348_p2  ;;  %16167 = sst [smem:[#allocation33_spill]] %s10178_s17 }
  0x13   : > { %p9650_p8 = scmp.ne.s32.totalorder %s361_s30, %s9649_s19  ;;  %p9657_p11 = scmp.lt.s32.totalorder %s361_s30, %s361_s30 }
  0x14   : > { %s16164_s15 = scalar_select %p10165_p4, 1, 0 }
  0x15   : > { %p9054_p5 = pneg %p10165_p4  ;;  %p9658_p12 = scmp.lt.s32.totalorder %s9649_s19, %s9649_s19 }
  0x16   : > { %16165 = sst [smem:[#allocation32_spill]] %s16164_s15 }
  0x17   : > { %p10173_p6 = pnand %p9054_p5, %p15838_p1  ;;  %p9659_p13 = por %p9658_p12, %p9657_p11 }
  0x19   : > { %s16166_s16 = scalar_select %p10173_p6, 1, 0 }
  0x1a   : > { %p10182_p7 = pneg %p10173_p6 }
  0x1c   : > { %s16168_s18 = scalar_select %p10182_p7, 1, 0 }
  0x1d   : > { %p9652_p9 = pnand %p9650_p8, %p10182_p7 }
  0x1f   : > { %p9653_p10 = pneg %p9652_p9 }
  0x21   : > { %p9660_p0 = pnand %p9659_p13, %p9653_p10 }
  0x23   : > { %9663 = shalt.err (!%p9660_p0)
}
  0x24   : > { %s15829_s20 = smov 128   ;;  %s15831_s21 = smov 8  }
  0x25   : > { %s16169_s0 = sld [smem:[#allocation169_spill]]  ;;  %s75_s24 = ssub.s32 %s10044_s28, %s10178_s17 }
  0x26   : > { %s78_s29 = sadd.s32 1, %s10040_s27  ;;  %p76_p2 = scmp.eq.s32.totalorder %s75_s24, 0 }
  0x27   : > { %p85_p5 = scmp.ne.s32.totalorder %s10040_s27, %s10036_s26  ;;  %p86_p8 = scmp.eq.s32.totalorder %s10044_s28, 0 }
  0x28   : > { %p91_p9 = scmp.ne.s32.totalorder %s10036_s26, %s10032_s25  ;;  %p9100_p12 = scmp.lt.s32.totalorder %s10044_s28, 5 }
  0x29   : > { %s10205_s19 = scalar_select %p76_p2, %s10040_s27, %s78_s29  }
  0x2a   : > { %p87_p10 = por %p86_p8, %p85_p5  ;;  %p10209_p11 = por %p15838_p1, %p91_p9 }
  0x2b   : > { %9057 = dma.hbm_to_vmem [thread:$0]  (!%p10173_p6), %s16169_s0, 8192, %s361_s30, [#allocation4], %s15829_s20, %s15829_s20, %s15831_s21  }
  0x2c   : > { %16170 = sst [smem:[#allocation34_spill]] %s10205_s19  ;;  %s462_s11 = sand.u32 1, %s10044_s28  }
  0x2d   : > { %s16171_s13 = scalar_select %p10209_p11, 1, 0 }
  0x2e   : > { %s15833_s15 = sand.u32 1, %s10040_s27   ;;  %s10221_s30 = sshll.u32 %s10044_s28, 13 }
  0x2f   : > { %16172 = sst [smem:[#allocation35_spill]] %s16171_s13  ;;  %s10218_s22 = sshll.u32 %s15833_s15, 9 }
  0x30   : > { %s16173_s2 = sld [smem:[#allocation170_spill]]  ;;  %s466_s29 = scalar_lea.vmem [#allocation8], %s10218_s22 }
  0x31   : > { %s473_s20 = sshll.u32 %s466_s29, 4  ;;  %p10230_p13 = pnand %p9100_p12, %p87_p10  ;;  %s10234_s20 = int_to_ptr.vmem [resolvable:$true] %s473_s20 }
  0x32   : > { %s10236_s15 = scalar_lea.sflag [#allocation4], %s462_s11 }
  0x33   : > { %s16174_s21 = scalar_select %p10230_p13, 1, 0 }
  0x34   : > { %p10242_p2 = pneg %p10230_p13 }
  0x36   : > { %s10227_s24 = scalar_lea.hbm %s16173_s2, %s10221_s30  ;;  %s9669_s19 = scalar_lea.hbm %s16173_s2, 40960 }
  0x37   : > { %s9664_s0 = scalar_lea.hbm %s10227_s24, 8192  ;;  %p9670_p9 = scmp.lt.s32.totalorder %s10227_s24, %s16173_s2 }
  0x38   : > { %p9665_p0 = scmp.ne.s32.totalorder %s10227_s24, %s9664_s0  ;;  %p9671_p10 = scmp.lt.s32.totalorder %s9669_s19, %s9664_s0 }
  0x39   : > { %s16175_s23 = scalar_select %p10242_p2, 1, 0 }
  0x3a   : > { %p9667_p5 = pnand %p10242_p2, %p9665_p0  ;;  %p9672_p12 = por %p9671_p10, %p9670_p9 }
  0x3c   : > { %p9668_p8 = pneg %p9667_p5 }
  0x3e   : > { %p9673_p3 = pnand %p9672_p12, %p9668_p8 }
  0x40   : > { %9676 = shalt.err (!%p9673_p3)
}
  0x41   : > { %s9677_s11 = scalar_lea.vmem %s10234_s20, 8192  ;;  %s10049_s26 = smov [#allocation8]  }
  0x42   : > { %p9678_p1 = scmp.ne.s32.totalorder %s10234_s20, %s9677_s11  ;;  %s9682_s25 = sshll.u32 %s10049_s26, 4  ;;  %s9683_s25 = int_to_ptr.vmem [resolvable:$false] %s9682_s25 }
  0x43   : > { %s9684_s29 = scalar_lea.vmem %s9683_s25, 16384  ;;  %p9685_p11 = scmp.lt.s32.totalorder %s10234_s20, %s9683_s25 }
  0x44   : > { %p9680_p0 = pnand %p9678_p1, %p10242_p2  ;;  %p9686_p4 = scmp.lt.s32.totalorder %s9684_s29, %s9677_s11 }
  0x46   : > { %p9681_p5 = pneg %p9680_p0  ;;  %p9687_p6 = por %p9686_p4, %p9685_p11 }
  0x48   : > { %p9688_p7 = pnand %p9687_p6, %p9681_p5 }
  0x4a   : > { %9691 = shalt.err (!%p9688_p7)
}
  0x4b   : > { %s16176_s0 = smov 8   ;;  %s16177_s13 = smov 128  }
  0x4c   : > { %9082 = dma.hbm_to_vmem [thread:$0]  (!%p10230_p13), %s10227_s24, 8192, %s10234_s20, %s10236_s15, %s16177_s13, %s16177_s13, %s16176_s0  }
  0x4d   : > { %s10272_s19 = scalar_lea.hbm %s15816_s3, %s10221_s30  ;;  %s487_s11 = scalar_lea.vmem [#allocation9], %s10218_s22 }
  0x4e   : > { %s494_s25 = sshll.u32 %s487_s11, 4  ;;  %s10050_s29 = smov [#allocation6]   ;;  %s10275_s25 = int_to_ptr.vmem [resolvable:$true] %s494_s25 }
  0x4f   : > { %s10277_s2 = sshll.u32 %s10050_s29, 4  ;;  %s9692_s14 = scalar_lea.hbm %s10272_s19, 8192  ;;  %s374_s2 = int_to_ptr.vmem [resolvable:$true] %s10277_s2 }
  0x50   : > { %p9693_p1 = scmp.ne.s32.totalorder %s10272_s19, %s9692_s14  ;;  %s9697_s26 = scalar_lea.hbm %s15816_s3, 40960 }
  0x51   : > { %p9698_p6 = scmp.lt.s32.totalorder %s10272_s19, %s15816_s3  ;;  %p9699_p7 = scmp.lt.s32.totalorder %s9697_s26, %s9692_s14 }
  0x52   : > { %p9695_p3 = pnand %p9693_p1, %p10242_p2 }
  0x53   : > { %p9700_p11 = por %p9699_p7, %p9698_p6 }
  0x54   : > { %p9696_p4 = pneg %p9695_p3 }
  0x56   : > { %p9701_p8 = pnand %p9700_p11, %p9696_p4 }
  0x58   : > { %9704 = shalt.err (!%p9701_p8)
}
  0x59   : > { %s9705_s11 = scalar_lea.vmem %s10275_s25, 8192  ;;  %s10051_s29 = smov [#allocation9]  }
  0x5a   : > { %p9706_p9 = scmp.ne.s32.totalorder %s10275_s25, %s9705_s11  ;;  %s9710_s20 = sshll.u32 %s10051_s29, 4  ;;  %s9711_s20 = int_to_ptr.vmem [resolvable:$false] %s9710_s20 }
  0x5b   : > { %s9712_s24 = scalar_lea.vmem %s9711_s20, 16384  ;;  %p9713_p0 = scmp.lt.s32.totalorder %s10275_s25, %s9711_s20 }
  0x5c   : > { %p9708_p10 = pnand %p9706_p9, %p10242_p2  ;;  %p9714_p5 = scmp.lt.s32.totalorder %s9712_s24, %s9705_s11 }
  0x5e   : > { %p9709_p12 = pneg %p9708_p10  ;;  %p9715_p1 = por %p9714_p5, %p9713_p0 }
  0x60   : > { %p9716_p3 = pnand %p9715_p1, %p9709_p12 }
  0x62   : > { %9719 = shalt.err (!%p9716_p3)
}
  0x63   : > { %s10052_s5 = smov 256   ;;  %s10053_s14 = smov 16  }
  0x64   : > { %9085 = dma.hbm_to_vmem [thread:$0]  (!%p10230_p13), %s10272_s19, 8192, %s10275_s25, %s10236_s15, %s10052_s5, %s10052_s5, %s10053_s14  }
  0x65   : > { %s9731_s26 = scalar_lea.vmem %s374_s2, 16384  ;;  %p16178_p6 = scmp.ne.s32.totalorder %s16168_s18, 0 }
  0x66   : > { %p9732_p4 = scmp.ne.s32.totalorder %s374_s2, %s9731_s26  ;;  %p9739_p8 = scmp.lt.s32.totalorder %s374_s2, %s374_s2 }
  0x67   : > { %p9740_p9 = scmp.lt.s32.totalorder %s9731_s26, %s9731_s26 }
  0x68   : > { %p9734_p7 = pnand %p9732_p4, %p16178_p6 }
  0x69   : > { %p9741_p10 = por %p9740_p9, %p9739_p8 }
  0x6a   : > { %p9735_p11 = pneg %p9734_p7 }
  0x6c   : > { %p9742_p12 = pnand %p9741_p10, %p9735_p11 }
  0x6e   : > { %9745 = shalt.err (!%p9742_p12)
}
  0x6f   : > { %p16179_p0 = scmp.ne.s32.totalorder %s16166_s16, 0  ;;  %s10054_s19 = smov [#allocation13]  }
  0x70   : > { %s397_s25 = sshll.u32 %s10054_s19, 4  ;;  %s10055_s29 = smov [#allocation16]   ;;  %s398_s25 = int_to_ptr.vmem [resolvable:$true] %s397_s25 }
  0x71   : > { %9060 = dma.hbm_to_vmem [thread:$0]  (!%p16179_p0), %s15814_s1, 16384, %s374_s2, [#allocation7], %s10052_s5, %s10052_s5, %s10053_s14  }
  0x72   : > { %s423_s20 = sshll.u32 %s10055_s29, 4  ;;  %s9757_s24 = scalar_lea.vmem %s398_s25, 24576  ;;  %s424_s20 = int_to_ptr.vmem [resolvable:$true] %s423_s20 }
  0x73   : > { %p9758_p5 = scmp.ne.s32.totalorder %s398_s25, %s9757_s24  ;;  %p9765_p4 = scmp.lt.s32.totalorder %s398_s25, %s398_s25 }
  0x74   : > { %p9766_p7 = scmp.lt.s32.totalorder %s9757_s24, %s9757_s24 }
  0x75   : > { %p9760_p1 = pnand %p9758_p5, %p16178_p6 }
  0x76   : > { %p9767_p11 = por %p9766_p7, %p9765_p4 }
  0x77   : > { %p9761_p3 = pneg %p9760_p1 }
  0x79   : > { %p9768_p8 = pnand %p9767_p11, %p9761_p3 }
  0x7b   : > { %9771 = shalt.err (!%p9768_p8)
}
  0x7c   : > { %9066 = dma.hbm_to_vmem [thread:$0]  (!%p16179_p0), %s15820_s7, 24576, %s398_s25, [#allocation14], %s10052_s5, %s10052_s5, %s10053_s14  }
  0x7d   : > { %s9783_s17 = scalar_lea.vmem %s424_s20, 4096  ;;  %p9791_p5 = scmp.lt.s32.totalorder %s424_s20, %s424_s20 }
  0x7e   : > { %p9784_p9 = scmp.ne.s32.totalorder %s424_s20, %s9783_s17  ;;  %p9792_p1 = scmp.lt.s32.totalorder %s9783_s17, %s9783_s17 }
  0x80   : > { %p9786_p10 = pnand %p9784_p9, %p16178_p6  ;;  %p9793_p3 = por %p9792_p1, %p9791_p5 }
  0x82   : > { %p9787_p12 = pneg %p9786_p10 }
  0x84   : > { %p9794_p4 = pnand %p9793_p3, %p9787_p12 }
  0x86   : > { %9797 = shalt.err (!%p9794_p4)
}
  0x87   : > { %9072 = dma.hbm_to_vmem [thread:$0]  (!%p16179_p0), %s15822_s9, 4096, %s424_s20, [#allocation17], %s16177_s13, %s16177_s13, %s16176_s0  }
  0x88   : > { %s10338_s25 = scalar_lea.hbm %s15817_s4, %s10221_s30  ;;  %s508_s29 = scalar_lea.vmem [#allocation10], %s10218_s22 }
  0x89   : > { %s515_s24 = sshll.u32 %s508_s29, 4  ;;  %s9798_s2 = scalar_lea.hbm %s10338_s25, 8192  ;;  %s516_s24 = int_to_ptr.vmem [resolvable:$true] %s515_s24 }
  0x8a   : > { %p9799_p7 = scmp.ne.s32.totalorder %s10338_s25, %s9798_s2  ;;  %s9803_s20 = scalar_lea.hbm %s15817_s4, 40960 }
  0x8b   : > { %p9804_p9 = scmp.lt.s32.totalorder %s10338_s25, %s15817_s4  ;;  %p9805_p10 = scmp.lt.s32.totalorder %s9803_s20, %s9798_s2 }
  0x8c   : > { %p9801_p11 = pnand %p9799_p7, %p10242_p2 }
  0x8d   : > { %p9806_p12 = por %p9805_p10, %p9804_p9 }
  0x8e   : > { %p9802_p8 = pneg %p9801_p11 }
  0x90   : > { %p9807_p5 = pnand %p9806_p12, %p9802_p8 }
  0x92   : > { %9810 = shalt.err (!%p9807_p5)
}
  0x93   : > { %s9811_s22 = scalar_lea.vmem %s516_s24, 8192  ;;  %s10056_s30 = smov [#allocation10]  }
  0x94   : > { %p9812_p1 = scmp.ne.s32.totalorder %s516_s24, %s9811_s22  ;;  %s9816_s5 = sshll.u32 %s10056_s30, 4  ;;  %s9817_s5 = int_to_ptr.vmem [resolvable:$false] %s9816_s5 }
  0x95   : > { %s9818_s14 = scalar_lea.vmem %s9817_s5, 16384  ;;  %p9819_p7 = scmp.lt.s32.totalorder %s516_s24, %s9817_s5 }
  0x96   : > { %p9814_p3 = pnand %p9812_p1, %p10242_p2  ;;  %p9820_p11 = scmp.lt.s32.totalorder %s9818_s14, %s9811_s22 }
  0x98   : > { %p9815_p4 = pneg %p9814_p3  ;;  %p9821_p0 = por %p9820_p11, %p9819_p7 }
  0x9a   : > { %p9822_p6 = pnand %p9821_p0, %p9815_p4 }
  0x9c   : > { %9825 = shalt.err (!%p9822_p6)
}
  0x9d   : > { %9088 = dma.hbm_to_vmem [thread:$0]  (!%p10230_p13), %s10338_s25, 8192, %s516_s24, %s10236_s15, %s16177_s13, %s16177_s13, %s16176_s0  }
  0x9e   : > { %s10057_s29 = smov [#allocation12]   ;;  %s10058_s26 = smov [#allocation15]  }
  0x9f   : > { %s387_s2 = sshll.u32 %s10057_s29, 4  ;;  %s410_s17 = sshll.u32 %s10058_s26, 4  ;;  %s388_s2 = int_to_ptr.vmem [resolvable:$true] %s387_s2  ;;  %s411_s17 = int_to_ptr.vmem [resolvable:$true] %s410_s17 }
  0xa0   : > { %s9837_s20 = scalar_lea.vmem %s388_s2, 128  ;;  %p16180_p9 = scmp.ne.s32.totalorder %s16168_s18, 0 }
  0xa1   : > { %p9838_p8 = scmp.ne.s32.totalorder %s388_s2, %s9837_s20  ;;  %p9845_p6 = scmp.lt.s32.totalorder %s388_s2, %s388_s2 }
  0xa2   : > { %p9846_p12 = scmp.lt.s32.totalorder %s9837_s20, %s9837_s20 }
  0xa3   : > { %p9840_p10 = pnand %p9838_p8, %p16180_p9 }
  0xa4   : > { %p9847_p5 = por %p9846_p12, %p9845_p6 }
  0xa5   : > { %p9841_p0 = pneg %p9840_p10 }
  0xa7   : > { %p9848_p1 = pnand %p9847_p5, %p9841_p0 }
  0xa9   : > { %9851 = shalt.err (!%p9848_p1)
}
  0xaa   : > { %p16181_p3 = scmp.ne.s32.totalorder %s16166_s16, 0  ;;  %s9863_s0 = scalar_lea.vmem %s411_s17, 192 }
  0xab   : > { %p9864_p4 = scmp.ne.s32.totalorder %s411_s17, %s9863_s0  ;;  %p9871_p8 = scmp.lt.s32.totalorder %s411_s17, %s411_s17 }
  0xac   : > { %9063 = dma.hbm_to_vmem [thread:$0]  (!%p16181_p3), %s15819_s6, 128, %s388_s2, [#allocation7]  }
  0xad   : > { %p9866_p7 = pnand %p9864_p4, %p16180_p9  ;;  %p9872_p10 = scmp.lt.s32.totalorder %s9863_s0, %s9863_s0 }
  0xaf   : > { %p9867_p11 = pneg %p9866_p7  ;;  %p9873_p13 = por %p9872_p10, %p9871_p8 }
  0xb1   : > { %p9874_p2 = pnand %p9873_p13, %p9867_p11 }
  0xb3   : > { %9877 = shalt.err (!%p9874_p2)
}
  0xb4   : > { %s10059_s13 = smov 64   ;;  %s10060_s25 = smov 4  }
  0xb5   : > { %9069 = dma.hbm_to_vmem [thread:$0]  (!%p16181_p3), %s15821_s8, 192, %s411_s17, [#allocation14], %s10059_s13, %s10059_s13, %s10060_s25  }
  0xb6   : > { %s10061_s30 = smov [#allocation18]   ;;  %s10062_s14 = smov [#allocation19]  }
  0xb7   : > { %s437_s5 = sshll.u32 %s10061_s30, 4  ;;  %s451_s29 = sshll.u32 %s10062_s14, 4  ;;  %s438_s5 = int_to_ptr.vmem [resolvable:$true] %s437_s5  ;;  %s452_s29 = int_to_ptr.vmem [resolvable:$true] %s451_s29 }
  0xb8   : > { %s9889_s2 = scalar_lea.vmem %s438_s5, 16  ;;  %s9896_s26 = scalar_lea.vmem %s438_s5, 32 }
  0xb9   : > { %p9890_p0 = scmp.ne.s32.totalorder %s438_s5, %s9889_s2  ;;  %p9897_p2 = scmp.lt.s32.totalorder %s438_s5, %s438_s5 }
  0xba   : > { %p9898_p12 = scmp.lt.s32.totalorder %s9896_s26, %s9889_s2 }
  0xbb   : > { %p9892_p6 = pnand %p9890_p0, %p16180_p9 }
  0xbc   : > { %p9899_p5 = por %p9898_p12, %p9897_p2 }
  0xbd   : > { %p9893_p13 = pneg %p9892_p6 }
  0xbf   : > { %p9900_p1 = pnand %p9899_p5, %p9893_p13 }
  0xc1   : > { %9903 = shalt.err (!%p9900_p1)
}
  0xc2   : > { %9075 = dma.hbm_to_vmem [thread:$0]  (!%p16181_p3), %s15823_s10, 16, %s438_s5, [#allocation17]  }
  0xc3   : > { %s16182_s11 = sand.u32 1, %s10040_s27   ;;  %s9915_s0 = scalar_lea.vmem %s452_s29, 16 }
  0xc4   : > { %s8445_s19 = sshll.u32 %s16182_s11, 3  ;;  %p9916_p4 = scmp.ne.s32.totalorder %s452_s29, %s9915_s0 }
  0xc5   : > { %s9922_s13 = scalar_lea.vmem %s452_s29, 32  ;;  %p9923_p8 = scmp.lt.s32.totalorder %s452_s29, %s452_s29 }
  0xc6   : > { %p9918_p7 = pnand %p9916_p4, %p16180_p9  ;;  %p9924_p10 = scmp.lt.s32.totalorder %s9922_s13, %s9915_s0 }
  0xc8   : > { %p9919_p11 = pneg %p9918_p7  ;;  %p9925_p0 = por %p9924_p10, %p9923_p8 }
  0xca   : > { %p9926_p6 = pnand %p9925_p0, %p9919_p11 }
  0xcc   : > { %9929 = shalt.err (!%p9926_p6)
}
  0xcd   : > { %9078 = dma.hbm_to_vmem [thread:$0]  (!%p16181_p3), %s15825_s12, 16, %s452_s29, [#allocation20]  }
  0xce   : > { %s8858_s22 = sshll.u32 %s10044_s28, 7  ;;  %s16183_s18 = sld [smem:[#allocation171_spill]] }
  0xcf   : > { %s529_s2 = scalar_lea.vmem [#allocation11], %s8445_s19  ;;  %p16184_p13 = scmp.ne.s32.totalorder %s16175_s23, 0 }
  0xd0   : > { %s537_s26 = sshll.u32 %s529_s2, 4  ;;  %s538_s26 = int_to_ptr.vmem [resolvable:$true] %s537_s26 }
  0xd4   : > { %s535_s14 = scalar_lea.hbm %s16183_s18, %s8858_s22  ;;  %s9935_s11 = scalar_lea.hbm %s16183_s18, 640 }
  0xd5   : > { %s9930_s20 = scalar_lea.hbm %s535_s14, 128  ;;  %p9936_p3 = scmp.lt.s32.totalorder %s535_s14, %s16183_s18 }
  0xd6   : > { %p9931_p9 = scmp.ne.s32.totalorder %s535_s14, %s9930_s20  ;;  %p9937_p5 = scmp.lt.s32.totalorder %s9935_s11, %s9930_s20 }
  0xd8   : > { %p9933_p2 = pnand %p9931_p9, %p16184_p13  ;;  %p9938_p1 = por %p9937_p5, %p9936_p3 }
  0xda   : > { %p9934_p12 = pneg %p9933_p2 }
  0xdc   : > { %p9939_p4 = pnand %p9938_p1, %p9934_p12 }
  0xde   : > { %9942 = shalt.err (!%p9939_p4)
}
  0xdf   : > { %s9943_s28 = scalar_lea.vmem %s538_s26, 128  ;;  %s10063_s29 = smov [#allocation11]  }
  0xe0   : > { %p9944_p7 = scmp.ne.s32.totalorder %s538_s26, %s9943_s28  ;;  %s9948_s19 = sshll.u32 %s10063_s29, 4  ;;  %s9949_s19 = int_to_ptr.vmem [resolvable:$false] %s9948_s19 }
  0xe1   : > { %s9950_s25 = scalar_lea.vmem %s9949_s19, 256  ;;  %p9951_p10 = scmp.lt.s32.totalorder %s538_s26, %s9949_s19 }
  0xe2   : > { %p9946_p11 = pnand %p9944_p7, %p16184_p13  ;;  %p9952_p0 = scmp.lt.s32.totalorder %s9950_s25, %s9943_s28 }
  0xe4   : > { %p9947_p8 = pneg %p9946_p11  ;;  %p9953_p6 = por %p9952_p0, %p9951_p10 }
  0xe6   : > { %p9954_p9 = pnand %p9953_p6, %p9947_p8 }
  0xe8   : > { %9957 = shalt.err (!%p9954_p9)
}
  0xe9   : > { %p16185_p2 = scmp.ne.s32.totalorder %s16174_s21, 0  ;;  %s16186_s24 = sld [smem:[#allocation32_spill]] }
  0xeb   : > { %9091 = dma.hbm_to_vmem [thread:$0]  (!%p16185_p2), %s535_s14, 128, %s538_s26, %s10236_s15  }
  0xef   : > { %p16187_p12 = scmp.ne.s32.totalorder %s16186_s24, 0 }
  0xf1   : > { %546 = sbr.rel (%p16187_p12) target bundleno = 3214 (0xc8e), region = 72 }
  0xf6   : > { %s16188_s22 = sld [smem:[#allocation31_spill]] }
  0xfc   : > { %p16189_p3 = scmp.eq.s32.totalorder %s16188_s22, 0 }
  0xfe   : > { %9999 = dma.done.wait (%p16189_p3), [#allocation4], 8192   ;;  %p16190_p13 = pmov %p16189_p3 }
  0xff   : > { %p16191_p5 = pmov %p16189_p3 }
 0x100   : > { %10001 = vsyncadd (%p16190_p13), [#allocation4], 4294959104 }
 0x101   : > { %10003 = dma.done.wait (%p16191_p5), [#allocation7], 16384   ;;  %p16192_p1 = pmov %p16189_p3 }
 0x102   : > { %s16193_s23 = sld [smem:[#allocation30_spill]]  ;;  %s556_s30 = sand.u32 1, %s16188_s22  }
 0x103   : > { %10005 = vsyncadd (%p16192_p1), [#allocation7], 4294950912  ;;  %s16194_s21 = sld [smem:[#allocation35_spill]]  ;;  %s557_s14 = scalar_lea.sflag [#allocation4], %s556_s30 }
 0x108   : > { %s558_s15 = sand.u32 1, %s16193_s23  }
 0x109   : > { %s8451_s5 = sshll.u32 %s558_s15, 9  ;;  %p16195_p4 = scmp.ne.s32.totalorder %s16194_s21, 0 }
 0x10a   : > { %s10420_s2 = scalar_lea.vmem [#allocation8], %s8451_s5 }
 0x10b   : > { %10007 = dma.done.wait (%p16195_p4), %s557_s14, 24704  }
 0x10c   : > { %10009 = vsyncadd (%p16195_p4), %s557_s14, 4294942592  ;;  %s8454_s26 = sshll.u32 %s558_s15, 3  ;;  %s10426_s20 = scalar_lea.vmem [#allocation9], %s8451_s5 }
 0x10d   : > { %s10428_s16 = scalar_lea.vmem [#allocation10], %s8451_s5  ;;  %s10430_s17 = scalar_lea.vmem [#allocation11], %s8454_s26 }
 0x10e   : > { %p16196_p7 = pmov %p16192_p1 }
 0x10f   : > { %p16197_p11 = pmov %p16192_p1 }
 0x110   : > { %10011 = dma.done.wait (%p16196_p7), [#allocation7], 128  }
 0x111   : > { %10013 = vsyncadd (%p16197_p11), [#allocation7], 4294967168  ;;  %p16198_p8 = pmov %p16192_p1 }
 0x112   : > { %p16199_p10 = pmov %p16192_p1 }
 0x113   : > { %10015 = dma.done.wait (%p16198_p8), [#allocation14], 24768  }
 0x114   : > { %10017 = vsyncadd (%p16199_p10), [#allocation14], 4294942528  ;;  %p16200_p0 = pmov %p16192_p1 }
 0x116   : > { %10019 = dma.done.wait (%p16200_p0), [#allocation17], 4112   ;;  %p16201_p6 = pmov %p16200_p0 }
 0x117   : > { %p16202_p9 = pmov %p16200_p0 }
 0x118   : > { %10021 = vsyncadd (%p16201_p6), [#allocation17], 4294963184 }
 0x119   : > { %10023 = dma.done.wait (%p16202_p9), [#allocation20], 16   ;;  %p16203_p2 = pmov %p16200_p0 }
 0x11a   : > { %p16204_p12 = scmp.ne.s32.totalorder %s16188_s22, 0 }
 0x11b   : > { %10025 = vsyncadd (%p16203_p2), [#allocation20], 4294967280 }
 0x11c   : > { %667 = sbr.rel (%p16204_p12) target bundleno = 322 (0x142), region = 124 }
 0x121   : > { %v668_v0 = vld [vmem:[#allocation3] sm:$0xff]  ;;  %v669_v1 = vld [vmem:[#allocation3 + $0x8] sm:$0xff]  ;;  %v670_v2 = vld [vmem:[#allocation3 + $0x10] sm:$0xff] }
 0x122   : > { %732 = vst [vmem:[#allocation2 + $0xb0] sm:$0xff] %v668_v0  ;;  %733 = vst [vmem:[#allocation2 + $0x1b0] sm:$0xff] %v669_v1  ;;  %v671_v3 = vld [vmem:[#allocation3 + $0x18] sm:$0xff]  ;;  %v672_v4 = vld [vmem:[#allocation3 + $0x20] sm:$0xff] }
 0x123   : > { %734 = vst [vmem:[#allocation2 + $0xd8] sm:$0xff] %v670_v2  ;;  %v673_v5 = vld [vmem:[#allocation3 + $0x28] sm:$0xff]  ;;  %735 = vst [vmem:[#allocation2 + $0x18] sm:$0xff] %v671_v3  ;;  %v674_v6 = vld [vmem:[#allocation3 + $0x30] sm:$0xff] }
 0x124   : > { %736 = vst [vmem:[#allocation2 + $0x50] sm:$0xff] %v672_v4  ;;  %737 = vst [vmem:[#allocation2 + $0x168] sm:$0xff] %v673_v5  ;;  %v675_v7 = vld [vmem:[#allocation3 + $0x38] sm:$0xff]  ;;  %v676_v8 = vld [vmem:[#allocation3 + $0x40] sm:$0xff] }
 0x125   : > { %738 = vst [vmem:[#allocation2 + $0x130] sm:$0xff] %v674_v6  ;;  %739 = vst [vmem:[#allocation2 + $0x48] sm:$0xff] %v675_v7  ;;  %v677_v9 = vld [vmem:[#allocation3 + $0x48] sm:$0xff]  ;;  %v678_v10 = vld [vmem:[#allocation3 + $0x50] sm:$0xff] }
 0x126   : > { %740 = vst [vmem:[#allocation2 + $0x180] sm:$0xff] %v676_v8  ;;  %v679_v11 = vld [vmem:[#allocation3 + $0x58] sm:$0xff]  ;;  %741 = vst [vmem:[#allocation2 + $0x110] sm:$0xff] %v677_v9  ;;  %v680_v12 = vld [vmem:[#allocation3 + $0x60] sm:$0xff] }
 0x127   : > { %742 = vst [vmem:[#allocation2 + $0x118] sm:$0xff] %v678_v10  ;;  %743 = vst [vmem:[#allocation2 + $0x98] sm:$0xff] %v679_v11  ;;  %v681_v13 = vld [vmem:[#allocation3 + $0x68] sm:$0xff]  ;;  %v682_v14 = vld [vmem:[#allocation3 + $0x70] sm:$0xff] }
 0x128   : > { %744 = vst [vmem:[#allocation2 + $0x120] sm:$0xff] %v680_v12  ;;  %745 = vst [vmem:[#allocation2 + $0x150] sm:$0xff] %v681_v13  ;;  %v683_v15 = vld [vmem:[#allocation3 + $0x78] sm:$0xff]  ;;  %v684_v16 = vld [vmem:[#allocation3 + $0x80] sm:$0xff] }
 0x129   : > { %746 = vst [vmem:[#allocation2 + $0x108] sm:$0xff] %v682_v14  ;;  %v685_v17 = vld [vmem:[#allocation3 + $0x88] sm:$0xff]  ;;  %747 = vst [vmem:[#allocation2 + $0x60] sm:$0xff] %v683_v15  ;;  %v686_v18 = vld [vmem:[#allocation3 + $0x90] sm:$0xff] }
 0x12a   : > { %748 = vst [vmem:[#allocation2 + $0xe0] sm:$0xff] %v684_v16  ;;  %749 = vst [vmem:[#allocation2 + $0x188] sm:$0xff] %v685_v17  ;;  %v687_v19 = vld [vmem:[#allocation3 + $0x98] sm:$0xff]  ;;  %v688_v20 = vld [vmem:[#allocation3 + $0xa0] sm:$0xff] }
 0x12b   : > { %750 = vst [vmem:[#allocation2 + $0x138] sm:$0xff] %v686_v18  ;;  %751 = vst [vmem:[#allocation2 + $0x140] sm:$0xff] %v687_v19  ;;  %v689_v21 = vld [vmem:[#allocation3 + $0xa8] sm:$0xff]  ;;  %v690_v22 = vld [vmem:[#allocation3 + $0xb0] sm:$0xff] }
 0x12c   : > { %752 = vst [vmem:[#allocation2 + $0x80] sm:$0xff] %v688_v20  ;;  %v691_v23 = vld [vmem:[#allocation3 + $0xb8] sm:$0xff]  ;;  %753 = vst [vmem:[#allocation2 + $0x1a8] sm:$0xff] %v689_v21  ;;  %v692_v24 = vld [vmem:[#allocation3 + $0xc0] sm:$0xff] }
 0x12d   : > { %754 = vst [vmem:[#allocation2 + $0x1b8] sm:$0xff] %v690_v22  ;;  %755 = vst [vmem:[#allocation2 + $0x28] sm:$0xff] %v691_v23  ;;  %v693_v25 = vld [vmem:[#allocation3 + $0xc8] sm:$0xff]  ;;  %v694_v26 = vld [vmem:[#allocation3 + $0xd0] sm:$0xff] }
 0x12e   : > { %756 = vst [vmem:[#allocation2 + $0x1e8] sm:$0xff] %v692_v24  ;;  %757 = vst [vmem:[#allocation2 + $0xf8] sm:$0xff] %v693_v25  ;;  %v695_v27 = vld [vmem:[#allocation3 + $0xd8] sm:$0xff]  ;;  %v696_v28 = vld [vmem:[#allocation3 + $0xe0] sm:$0xff] }
 0x12f   : > { %758 = vst [vmem:[#allocation2 + $0x160] sm:$0xff] %v694_v26  ;;  %v697_v29 = vld [vmem:[#allocation3 + $0xe8] sm:$0xff]  ;;  %759 = vst [vmem:[#allocation2 + $0x30] sm:$0xff] %v695_v27  ;;  %v698_v30 = vld [vmem:[#allocation3 + $0xf0] sm:$0xff] }
 0x130   : > { %760 = vst [vmem:[#allocation2 + $0x1e0] sm:$0xff] %v696_v28  ;;  %761 = vst [vmem:[#allocation2] sm:$0xff] %v697_v29  ;;  %v699_v31 = vld [vmem:[#allocation3 + $0xf8] sm:$0xff]  ;;  %v700_v32 = vld [vmem:[#allocation3 + $0x100] sm:$0xff] }
 0x131   : > { %762 = vst [vmem:[#allocation2 + $0xf0] sm:$0xff] %v698_v30  ;;  %763 = vst [vmem:[#allocation2 + $0x8] sm:$0xff] %v699_v31  ;;  %v701_v33 = vld [vmem:[#allocation3 + $0x108] sm:$0xff]  ;;  %v702_v34 = vld [vmem:[#allocation3 + $0x110] sm:$0xff] }
 0x132   : > { %764 = vst [vmem:[#allocation2 + $0x148] sm:$0xff] %v700_v32  ;;  %v703_v35 = vld [vmem:[#allocation3 + $0x118] sm:$0xff]  ;;  %765 = vst [vmem:[#allocation2 + $0x1d0] sm:$0xff] %v701_v33  ;;  %v704_v36 = vld [vmem:[#allocation3 + $0x120] sm:$0xff] }
 0x133   : > { %766 = vst [vmem:[#allocation2 + $0x100] sm:$0xff] %v702_v34  ;;  %767 = vst [vmem:[#allocation2 + $0xc8] sm:$0xff] %v703_v35  ;;  %v705_v37 = vld [vmem:[#allocation3 + $0x128] sm:$0xff]  ;;  %v706_v38 = vld [vmem:[#allocation3 + $0x130] sm:$0xff] }
 0x134   : > { %768 = vst [vmem:[#allocation2 + $0x40] sm:$0xff] %v704_v36  ;;  %769 = vst [vmem:[#allocation2 + $0x1f8] sm:$0xff] %v705_v37  ;;  %v707_v39 = vld [vmem:[#allocation3 + $0x138] sm:$0xff]  ;;  %v708_v40 = vld [vmem:[#allocation3 + $0x140] sm:$0xff] }
 0x135   : > { %770 = vst [vmem:[#allocation2 + $0x20] sm:$0xff] %v706_v38  ;;  %v709_v41 = vld [vmem:[#allocation3 + $0x148] sm:$0xff]  ;;  %771 = vst [vmem:[#allocation2 + $0x128] sm:$0xff] %v707_v39  ;;  %v710_v42 = vld [vmem:[#allocation3 + $0x150] sm:$0xff] }
 0x136   : > { %772 = vst [vmem:[#allocation2 + $0x1a0] sm:$0xff] %v708_v40  ;;  %773 = vst [vmem:[#allocation2 + $0x1f0] sm:$0xff] %v709_v41  ;;  %v711_v43 = vld [vmem:[#allocation3 + $0x158] sm:$0xff]  ;;  %v712_v44 = vld [vmem:[#allocation3 + $0x160] sm:$0xff] }
 0x137   : > { %774 = vst [vmem:[#allocation2 + $0xe8] sm:$0xff] %v710_v42  ;;  %775 = vst [vmem:[#allocation2 + $0x78] sm:$0xff] %v711_v43  ;;  %v713_v45 = vld [vmem:[#allocation3 + $0x168] sm:$0xff]  ;;  %v714_v46 = vld [vmem:[#allocation3 + $0x170] sm:$0xff] }
 0x138   : > { %776 = vst [vmem:[#allocation2 + $0x70] sm:$0xff] %v712_v44  ;;  %v715_v47 = vld [vmem:[#allocation3 + $0x178] sm:$0xff]  ;;  %777 = vst [vmem:[#allocation2 + $0x90] sm:$0xff] %v713_v45  ;;  %v716_v48 = vld [vmem:[#allocation3 + $0x180] sm:$0xff] }
 0x139   : > { %778 = vst [vmem:[#allocation2 + $0x1d8] sm:$0xff] %v714_v46  ;;  %779 = vst [vmem:[#allocation2 + $0xd0] sm:$0xff] %v715_v47  ;;  %v717_v49 = vld [vmem:[#allocation3 + $0x188] sm:$0xff]  ;;  %v718_v50 = vld [vmem:[#allocation3 + $0x190] sm:$0xff] }
 0x13a   : > { %780 = vst [vmem:[#allocation2 + $0xb8] sm:$0xff] %v716_v48  ;;  %781 = vst [vmem:[#allocation2 + $0x88] sm:$0xff] %v717_v49  ;;  %v719_v51 = vld [vmem:[#allocation3 + $0x198] sm:$0xff]  ;;  %v720_v52 = vld [vmem:[#allocation3 + $0x1a0] sm:$0xff] }
 0x13b   : > { %782 = vst [vmem:[#allocation2 + $0xa8] sm:$0xff] %v718_v50  ;;  %v721_v53 = vld [vmem:[#allocation3 + $0x1a8] sm:$0xff]  ;;  %783 = vst [vmem:[#allocation2 + $0x1c8] sm:$0xff] %v719_v51  ;;  %v722_v54 = vld [vmem:[#allocation3 + $0x1b0] sm:$0xff] }
 0x13c   : > { %784 = vst [vmem:[#allocation2 + $0x170] sm:$0xff] %v720_v52  ;;  %785 = vst [vmem:[#allocation2 + $0x178] sm:$0xff] %v721_v53  ;;  %v723_v55 = vld [vmem:[#allocation3 + $0x1b8] sm:$0xff]  ;;  %v724_v56 = vld [vmem:[#allocation3 + $0x1c0] sm:$0xff] }
 0x13d   : > { %786 = vst [vmem:[#allocation2 + $0x68] sm:$0xff] %v722_v54  ;;  %787 = vst [vmem:[#allocation2 + $0x190] sm:$0xff] %v723_v55  ;;  %v725_v57 = vld [vmem:[#allocation3 + $0x1c8] sm:$0xff]  ;;  %v726_v58 = vld [vmem:[#allocation3 + $0x1d0] sm:$0xff] }
 0x13e   : > { %788 = vst [vmem:[#allocation2 + $0x198] sm:$0xff] %v724_v56  ;;  %v727_v59 = vld [vmem:[#allocation3 + $0x1d8] sm:$0xff]  ;;  %789 = vst [vmem:[#allocation2 + $0x38] sm:$0xff] %v725_v57  ;;  %v728_v60 = vld [vmem:[#allocation3 + $0x1e0] sm:$0xff] }
 0x13f   : > { %790 = vst [vmem:[#allocation2 + $0xc0] sm:$0xff] %v726_v58  ;;  %791 = vst [vmem:[#allocation2 + $0x1c0] sm:$0xff] %v727_v59  ;;  %v729_v61 = vld [vmem:[#allocation3 + $0x1e8] sm:$0xff]  ;;  %v730_v62 = vld [vmem:[#allocation3 + $0x1f0] sm:$0xff] }
 0x140   : > { %792 = vst [vmem:[#allocation2 + $0x158] sm:$0xff] %v728_v60  ;;  %793 = vst [vmem:[#allocation2 + $0x10] sm:$0xff] %v729_v61  ;;  %v731_v63 = vld [vmem:[#allocation3 + $0x1f8] sm:$0xff] }
 0x141   : > { %794 = vst [vmem:[#allocation2 + $0x58] sm:$0xff] %v730_v62  ;;  %795 = vst [vmem:[#allocation2 + $0xa0] sm:$0xff] %v731_v63 }
 0x142 PF: > { %v9161_v0 = vld [vmem:[#allocation2 + $0x10c] ss:$-168 sps:$4 sm:$0xff]   ;;  %v9163_v1 = vld [vmem:[#allocation2 + $0x1dc] ss:$-264 sps:$4 sm:$0xff]   ;;  %v9165_v2 = vld [vmem:[#allocation2 + $0x108] ss:$-168 sps:$4 sm:$0xff]  }
 0x143   : > { %2273 = vmatprep.subr.bf16.mxu0 %v9161_v0  ;;  %v9166_v3 = vld [vmem:[#allocation2 + $0x1d8] ss:$-264 sps:$4 sm:$0xff]   ;;  %2626 = vmatprep.subr.bf16.mxu1 %v9163_v1  ;;  %v9167_v4 = vld [vmem:[#allocation2 + $0x124] ss:$48 sps:$4 sm:$0xff]   ;;  %v9170_v13 = vld [vmem:[#allocation2 + $0xec] ss:$-112 sps:$4 sm:$0xff]  }
 0x144   : > { %v845_v5 = vld [vmem:[#allocation2 + $0x70] sm:$0xff]  ;;  %2274 = vmatpush1.bf16.msra.mxu0 %v9165_v2  ;;  %2627 = vmatpush1.bf16.msra.mxu1 %v9166_v3  ;;  %v811_v8 = vld [vmem:[#allocation2 + $0x118] sm:$0xff]  ;;  %v9181_v21 = vld [vmem:[#allocation2 + $0x24] ss:$264 sps:$4 sm:$0xff]   ;;  %s17249_s11 = sld [smem:[#allocation31_spill]] }
 0x145   : > { %v846_v6 = vld [vmem:[#allocation2 + $0x90] sm:$0xff]  ;;  %2275 = vmatprep.subr.bf16.mxu0 %v9167_v4  ;;  %v812_v11 = vld [vmem:[#allocation2 + $0x98] sm:$0xff]  ;;  %v9184_v23 = vld [vmem:[#allocation2 + $0x20] ss:$264 sps:$4 sm:$0xff]  }
 0x146   : > { %v9169_v7 = vld [vmem:[#allocation2 + $0x120] ss:$48 sps:$4 sm:$0xff]   ;;  %v8637_v9 = vcombine.high %v845_v5, %v846_v6  ;;  %v8636_v10 = vcombine.low %v845_v5, %v846_v6  ;;  %v8603_v12 = vcombine.high %v811_v8, %v812_v11  ;;  %v8602_v14 = vcombine.low %v811_v8, %v812_v11  ;;  %v9172_v15 = vld [vmem:[#allocation2 + $0xe8] ss:$-112 sps:$4 sm:$0xff]   ;;  %v9173_v16 = vld [vmem:[#allocation2 + $0x184] ss:$-112 sps:$4 sm:$0xff]  }
 0x147   : > { %v9175_v17 = vld [vmem:[#allocation2 + $0x1a4] ss:$80 sps:$4 sm:$0xff]   ;;  %v9177_v18 = vld [vmem:[#allocation2 + $0x180] ss:$-112 sps:$4 sm:$0xff]   ;;  %v803_v26 = vld [vmem:[#allocation2 + $0xd8] sm:$0xff] }
 0x148   : > { %2628 = vmatprep.subr.bf16.mxu1 %v8637_v9  ;;  %2276 = vmatpush1.bf16.msra.mxu0 %v9169_v7  ;;  %v9178_v19 = vld [vmem:[#allocation2 + $0x1a0] ss:$80 sps:$4 sm:$0xff]   ;;  %v9179_v20 = vld [vmem:[#allocation2 + $0x134] ss:$-232 sps:$4 sm:$0xff]   ;;  %v9187_v25 = vld [vmem:[#allocation2 + $0x44] ss:$440 sps:$4 sm:$0xff]  }
 0x149   : > { %2629 = vmatpush1.bf16.msra.mxu1 %v8636_v10  ;;  %2277 = vmatprep.subr.bf16.mxu0 %v8603_v12  ;;  %v9183_v22 = vld [vmem:[#allocation2 + $0x130] ss:$-232 sps:$4 sm:$0xff]   ;;  %v9185_v24 = vld [vmem:[#allocation2 + $0x54] ss:$280 sps:$4 sm:$0xff]   ;;  %v804_v27 = vld [vmem:[#allocation2 + $0x18] sm:$0xff] }
 0x14a   : > { %2630 = vmatprep.subr.bf16.mxu1 %v9170_v13  ;;  %v9189_v28 = vld [vmem:[#allocation2 + $0x50] ss:$280 sps:$4 sm:$0xff]   ;;  %v9190_v29 = vld [vmem:[#allocation2 + $0x40] ss:$440 sps:$4 sm:$0xff]   ;;  %v8595_v30 = vcombine.high %v803_v26, %v804_v27  ;;  %v9191_v31 = vld [vmem:[#allocation2 + $0x104] ss:$-56 sps:$4 sm:$0xff]   ;;  %v8594_v34 = vcombine.low %v803_v26, %v804_v27 }
 0x14b   : > { %v801_v32 = vld [vmem:[#allocation2 + $0xb0] sm:$0xff]  ;;  %v9193_v35 = vld [vmem:[#allocation2 + $0x100] ss:$-56 sps:$4 sm:$0xff]   ;;  %v9199_v41 = vld [vmem:[#allocation2 + $0x5c] ss:$72 sps:$4 sm:$0xff]   ;;  %p8848_p3 = scmp.ne.s32.totalorder %s17249_s11, 4 }
 0x14c   : > { %2278 = vmatpush1.bf16.msra.mxu0 %v8602_v14  ;;  %v802_v33 = vld [vmem:[#allocation2 + $0x1b0] sm:$0xff]  ;;  %v829_v42 = vld [vmem:[#allocation2 + $0x1e0] sm:$0xff]  ;;  %v857_v54 = vld [vmem:[#allocation2 + $0x198] sm:$0xff]  ;;  %s17253_s28 = sld [smem:[#allocation172_spill]] (!%p8848_p3) }
 0x14d   : > { %2631 = vmatpush1.bf16.msra.mxu1 %v9172_v15  ;;  %2279 = vmatprep.subr.bf16.mxu0 %v9173_v16  ;;  %v8593_v36 = vcombine.high %v801_v32, %v802_v33  ;;  %v9194_v37 = vld [vmem:[#allocation2 + $0x14c] ss:$136 sps:$4 sm:$0xff]   ;;  %v8592_v38 = vcombine.low %v801_v32, %v802_v33  ;;  %v9196_v39 = vld [vmem:[#allocation2 + $0x148] ss:$136 sps:$4 sm:$0xff]   ;;  %v830_v43 = vld [vmem:[#allocation2] sm:$0xff] }
 0x14e   : > { %2632 = vmatprep.subr.bf16.mxu1 %v9175_v17  ;;  %v9197_v40 = vld [vmem:[#allocation2 + $0xf4] ss:$-232 sps:$4 sm:$0xff]   ;;  %v9201_v44 = vld [vmem:[#allocation2 + $0xf0] ss:$-232 sps:$4 sm:$0xff]   ;;  %v9202_v45 = vld [vmem:[#allocation2 + $0x58] ss:$72 sps:$4 sm:$0xff]   ;;  %v8621_v46 = vcombine.high %v829_v42, %v830_v43  ;;  %v8620_v50 = vcombine.low %v829_v42, %v830_v43 }
 0x14f   : > { %v9203_v47 = vld [vmem:[#allocation2 + $0x15c] ss:$-328 sps:$4 sm:$0xff]   ;;  %v859_v48 = vld [vmem:[#allocation2 + $0xc0] sm:$0xff]  ;;  %v9205_v51 = vld [vmem:[#allocation2 + $0x158] ss:$-328 sps:$4 sm:$0xff]  }
 0x150   : > { %2280 = vmatpush1.bf16.msra.mxu0 %v9177_v18  ;;  %v860_v49 = vld [vmem:[#allocation2 + $0x1c0] sm:$0xff]  ;;  %v858_v55 = vld [vmem:[#allocation2 + $0x38] sm:$0xff]  ;;  %v9214_v1 = vld [vmem:[#allocation2 + $0x6c] ss:$296 sps:$4 sm:$0xff]  }
 0x151   : > { %2633 = vmatpush1.bf16.msra.mxu1 %v9178_v19  ;;  %2281 = vmatprep.subr.bf16.mxu0 %v9179_v20  ;;  %v9206_v52 = vld [vmem:[#allocation2 + $0x164] ss:$-304 sps:$4 sm:$0xff]   ;;  %v8651_v53 = vcombine.high %v859_v48, %v860_v49  ;;  %v9238_v57 = vld [vmem:[#allocation6 + $0xc] ss:$16 sps:$4 sm:$0xff]   ;;  %v9208_v58 = vld [vmem:[#allocation2 + $0x160] ss:$-304 sps:$4 sm:$0xff]   ;;  %v8650_v59 = vcombine.low %v859_v48, %v860_v49  ;;  %v8649_v61 = vcombine.high %v857_v54, %v858_v55 }
 0x152   : > { %2634 = vmatprep.subr.bf16.mxu1 %v9181_v21  ;;  %v9235_v56 = vld [vmem:[#allocation6 + $0x4] ss:$16 sps:$4 sm:$0xff]   ;;  %v9209_v60 = vld [vmem:[#allocation2 + $0x1ec] ss:$-240 sps:$4 sm:$0xff]   ;;  %2658 = vmatprep.mubr.bf16.mxu1 %v9238_v57  ;;  %v9211_v62 = vld [vmem:[#allocation2 + $0x1e8] ss:$-240 sps:$4 sm:$0xff]   ;;  %v8648_v63 = vcombine.low %v857_v54, %v858_v55  ;;  %s17254_s29 = smov (!%p8848_p3), %s17253_s28 }
 0x153   : > { %2305 = vmatprep.mubr.bf16.mxu0 %v9235_v56  ;;  %v9212_v0 = vld [vmem:[#allocation2 + $0x1bc] ss:$-400 sps:$4 sm:$0xff]   ;;  %v9216_v2 = vld [vmem:[#allocation2 + $0x1b8] ss:$-400 sps:$4 sm:$0xff]   ;;  %v9241_v18 = vld [vmem:[%s10426_s20 + $0xe4] ss:$16 sps:$4 sm:$0xff]  }
 0x154   : > { %2282 = vmatpush1.bf16.msra.mxu0 %v9183_v22  ;;  %v9217_v3 = vld [vmem:[#allocation2 + $0x68] ss:$296 sps:$4 sm:$0xff]   ;;  %v9218_v4 = vld [vmem:[#allocation2 + $0x84] ss:$296 sps:$4 sm:$0xff]   ;;  %v9220_v5 = vld [vmem:[#allocation2 + $0x174] ss:$8 sps:$4 sm:$0xff]  }
 0x155   : > { %2635 = vmatpush1.bf16.msra.mxu1 %v9184_v23  ;;  %2283 = vmatprep.subr.bf16.mxu0 %v9185_v24  ;;  %v851_v6 = vld [vmem:[#allocation2 + $0xa8] sm:$0xff]  ;;  %v9223_v9 = vld [vmem:[#allocation2 + $0x170] ss:$8 sps:$4 sm:$0xff]   ;;  %v9224_v10 = vld [vmem:[#allocation2 + $0x13c] ss:$8 sps:$4 sm:$0xff]  }
 0x156   : > { %2636 = vmatprep.subr.bf16.mxu1 %v9187_v25  ;;  %v852_v7 = vld [vmem:[#allocation2 + $0x1c8] sm:$0xff]  ;;  %v9226_v12 = vld [vmem:[#allocation2 + $0x138] ss:$8 sps:$4 sm:$0xff]   ;;  %v9245_v24 = vld [vmem:[#allocation6 + $0x24] ss:$16 sps:$4 sm:$0xff]  }
 0x157   : > { %v9222_v8 = vld [vmem:[#allocation2 + $0x80] ss:$296 sps:$4 sm:$0xff]   ;;  %v8643_v11 = vcombine.high %v851_v6, %v852_v7  ;;  %v8642_v13 = vcombine.low %v851_v6, %v852_v7  ;;  %v9227_v14 = vld [vmem:[#allocation2 + $0xe4] ss:$168 sps:$4 sm:$0xff]  }
 0x158   : > { %2284 = vmatpush1.bf16.msra.mxu0 %v9189_v28  ;;  %v9229_v15 = vld [vmem:[#allocation2 + $0xbc] ss:$-48 sps:$4 sm:$0xff]   ;;  %v9231_v16 = vld [vmem:[#allocation2 + $0xe0] ss:$168 sps:$4 sm:$0xff]   ;;  %v9259_v26 = vld [vmem:[%s10426_s20 + $0xc4] ss:$16 sps:$4 sm:$0xff]  }
 0x159   : > { %2637 = vmatpush1.bf16.msra.mxu1 %v9190_v29  ;;  %2285 = vmatprep.subr.bf16.mxu0 %v8595_v30  ;;  %v9232_v17 = vld [vmem:[#allocation2 + $0xb8] ss:$-48 sps:$4 sm:$0xff]   ;;  %v9244_v19 = vld [vmem:[%s10426_s20 + $0xec] ss:$16 sps:$4 sm:$0xff]   ;;  %v9233_v20 = vld [vmem:[#allocation6] ss:$16 sps:$4 sm:$0xff]  }
 0x15a   : > { %2638 = vmatprep.subr.bf16.mxu1 %v9191_v31  ;;  %v9236_v21 = vld [vmem:[#allocation6 + $0x8] ss:$16 sps:$4 sm:$0xff]   ;;  %v9239_v22 = vld [vmem:[%s10426_s20 + $0xe0] ss:$16 sps:$4 sm:$0xff]   ;;  %v9247_v25 = vld [vmem:[#allocation6 + $0x2c] ss:$16 sps:$4 sm:$0xff]  }
 0x15b   : > { %v9242_v23 = vld [vmem:[%s10426_s20 + $0xe8] ss:$16 sps:$4 sm:$0xff]   ;;  %v9262_v27 = vld [vmem:[%s10426_s20 + $0xcc] ss:$16 sps:$4 sm:$0xff]   ;;  %v9257_v28 = vld [vmem:[%s10426_s20 + $0xc0] ss:$16 sps:$4 sm:$0xff]  }
 0x15c   : > { %2286 = vmatpush1.bf16.msra.mxu0 %v8594_v34  ;;  %v9260_v29 = vld [vmem:[%s10426_s20 + $0xc8] ss:$16 sps:$4 sm:$0xff]   ;;  %v9277_v30 = vld [vmem:[%s10426_s20 + $0xa4] ss:$16 sps:$4 sm:$0xff]   ;;  %v9280_v31 = vld [vmem:[%s10426_s20 + $0xac] ss:$16 sps:$4 sm:$0xff]  }
 0x15d   : > { %2639 = vmatpush1.bf16.msra.mxu1 %v9193_v35  ;;  %2287 = vmatprep.subr.bf16.mxu0 %v8593_v36  ;;  %v9249_v32 = vld [vmem:[#allocation6 + $0x20] ss:$16 sps:$4 sm:$0xff]   ;;  %v9250_v33 = vld [vmem:[#allocation6 + $0x28] ss:$16 sps:$4 sm:$0xff]   ;;  %v9251_v34 = vld [vmem:[#allocation6 + $0x44] ss:$16 sps:$4 sm:$0xff]  }
 0x15e   : > { %2640 = vmatprep.subr.bf16.mxu1 %v9194_v37  ;;  %v9253_v35 = vld [vmem:[#allocation6 + $0x4c] ss:$16 sps:$4 sm:$0xff]   ;;  %v9275_v36 = vld [vmem:[%s10426_s20 + $0xa0] ss:$16 sps:$4 sm:$0xff]   ;;  %v9278_v37 = vld [vmem:[%s10426_s20 + $0xa8] ss:$16 sps:$4 sm:$0xff]  }
 0x15f   : > { %v9255_v42 = vld [vmem:[#allocation6 + $0x40] ss:$16 sps:$4 sm:$0xff]   ;;  %v9313_v43 = vld [vmem:[%s10426_s20 + $0x64] ss:$16 sps:$4 sm:$0xff]   ;;  %v9314_v49 = vld [vmem:[%s10426_s20 + $0x68] ss:$16 sps:$4 sm:$0xff]  }
 0x160   : > { %2288 = vmatpush1.bf16.msra.mxu0 %v8592_v38  ;;  %v9295_v38 = vld [vmem:[%s10426_s20 + $0x84] ss:$16 sps:$4 sm:$0xff]   ;;  %v9311_v48 = vld [vmem:[%s10426_s20 + $0x60] ss:$16 sps:$4 sm:$0xff]   ;;  %v9268_v55 = vld [vmem:[#allocation6 + $0x68] ss:$16 sps:$4 sm:$0xff]  }
 0x161   : > { %2641 = vmatpush1.bf16.msra.mxu1 %v9196_v39  ;;  %2289 = vmatprep.subr.bf16.mxu0 %v9197_v40  ;;  %v9298_v39 = vld [vmem:[%s10426_s20 + $0x8c] ss:$16 sps:$4 sm:$0xff]   ;;  %v9293_v40 = vld [vmem:[%s10426_s20 + $0x80] ss:$16 sps:$4 sm:$0xff]   ;;  %v9269_v56 = vld [vmem:[#allocation6 + $0x84] ss:$16 sps:$4 sm:$0xff]  }
 0x162   : > { %2642 = vmatprep.subr.bf16.mxu1 %v9199_v41  ;;  %v9296_v41 = vld [vmem:[%s10426_s20 + $0x88] ss:$16 sps:$4 sm:$0xff]   ;;  %v9267_v54 = vld [vmem:[#allocation6 + $0x60] ss:$16 sps:$4 sm:$0xff]   ;;  %v9271_v57 = vld [vmem:[#allocation6 + $0x8c] ss:$16 sps:$4 sm:$0xff]  }
 0x163   : > { %v9285_v6 = vld [vmem:[#allocation6 + $0xa0] ss:$16 sps:$4 sm:$0xff]   ;;  %v9286_v7 = vld [vmem:[#allocation6 + $0xa8] ss:$16 sps:$4 sm:$0xff]  }
 0x164   : > { %2290 = vmatpush2.bf16.msra.mxu0 %v9201_v44  ;;  %v9316_v44 = vld [vmem:[%s10426_s20 + $0x6c] ss:$16 sps:$4 sm:$0xff]  }
 0x165   : > { %2643 = vmatpush2.bf16.msra.mxu1 %v9202_v45  ;;  %2291 = vmatprep.subr.bf16.mxu0 %v8621_v46  ;;  %v9256_v45 = vld [vmem:[#allocation6 + $0x48] ss:$16 sps:$4 sm:$0xff]   ;;  %v9263_v46 = vld [vmem:[#allocation6 + $0x64] ss:$16 sps:$4 sm:$0xff]  }
 0x166   : > { %2644 = vmatprep.subr.bf16.mxu1 %v9203_v47  ;;  %v9265_v47 = vld [vmem:[#allocation6 + $0x6c] ss:$16 sps:$4 sm:$0xff]  }
 0x168   : > { %2292 = vmatpush2.bf16.msra.mxu0 %v8620_v50  ;;  %v9331_v50 = vld [vmem:[%s10426_s20 + $0x44] ss:$16 sps:$4 sm:$0xff]  }
 0x169   : > { %2645 = vmatpush2.bf16.msra.mxu1 %v9205_v51  ;;  %2293 = vmatprep.subr.bf16.mxu0 %v9206_v52  ;;  %v9334_v51 = vld [vmem:[%s10426_s20 + $0x4c] ss:$16 sps:$4 sm:$0xff]   ;;  %v9329_v52 = vld [vmem:[%s10426_s20 + $0x40] ss:$16 sps:$4 sm:$0xff]  }
 0x16a   : > { %2646 = vmatprep.subr.bf16.mxu1 %v8651_v53  ;;  %v9332_v53 = vld [vmem:[%s10426_s20 + $0x48] ss:$16 sps:$4 sm:$0xff]  }
 0x16c   : > { %2294 = vmatpush2.bf16.msra.mxu0 %v9208_v58  ;;  %v9347_v58 = vld [vmem:[%s10426_s20 + $0x20] ss:$16 sps:$4 sm:$0xff]  }
 0x16d   : > { %2647 = vmatpush2.bf16.msra.mxu1 %v8650_v59  ;;  %2295 = vmatprep.subr.bf16.mxu0 %v9209_v60  ;;  %v9349_v59 = vld [vmem:[%s10426_s20 + $0x24] ss:$16 sps:$4 sm:$0xff]   ;;  %v9350_v60 = vld [vmem:[%s10426_s20 + $0x28] ss:$16 sps:$4 sm:$0xff]  }
 0x16e   : > { %2648 = vmatprep.subr.bf16.mxu1 %v8649_v61  ;;  %v9352_v61 = vld [vmem:[%s10426_s20 + $0x2c] ss:$16 sps:$4 sm:$0xff]  }
 0x170   : > { %2296 = vmatpush2.bf16.msra.mxu0 %v9211_v62  ;;  %v9273_v62 = vld [vmem:[#allocation6 + $0x80] ss:$16 sps:$4 sm:$0xff]  }
 0x171   : > { %2649 = vmatpush2.bf16.msra.mxu1 %v8648_v63  ;;  %2297 = vmatprep.subr.bf16.mxu0 %v9212_v0  ;;  %v9274_v63 = vld [vmem:[#allocation6 + $0x88] ss:$16 sps:$4 sm:$0xff]   ;;  %v9281_v0 = vld [vmem:[#allocation6 + $0xa4] ss:$16 sps:$4 sm:$0xff]  }
 0x172   : > { %2650 = vmatprep.subr.bf16.mxu1 %v9214_v1  ;;  %v9283_v1 = vld [vmem:[#allocation6 + $0xac] ss:$16 sps:$4 sm:$0xff]  }
 0x174   : > { %2298 = vmatpush2.bf16.msra.mxu0 %v9216_v2  ;;  %v9365_v2 = vld [vmem:[%s10426_s20] ss:$16 sps:$4 sm:$0xff]  }
 0x175   : > { %2651 = vmatpush2.bf16.msra.mxu1 %v9217_v3  ;;  %2299 = vmatprep.subr.bf16.mxu0 %v9218_v4  ;;  %v9367_v3 = vld [vmem:[%s10426_s20 + $0x4] ss:$16 sps:$4 sm:$0xff]   ;;  %v9368_v4 = vld [vmem:[%s10426_s20 + $0x8] ss:$16 sps:$4 sm:$0xff]  }
 0x176   : > { %2652 = vmatprep.subr.bf16.mxu1 %v9220_v5  ;;  %v9370_v5 = vld [vmem:[%s10426_s20 + $0xc] ss:$16 sps:$4 sm:$0xff]  }
 0x178   : > { %2300 = vmatpush2.bf16.msra.mxu0 %v9222_v8  ;;  %v9287_v8 = vld [vmem:[#allocation6 + $0xc4] ss:$16 sps:$4 sm:$0xff]  }
 0x179   : > { %2653 = vmatpush2.bf16.msra.mxu1 %v9223_v9  ;;  %2301 = vmatprep.subr.bf16.mxu0 %v9224_v10  ;;  %v9289_v9 = vld [vmem:[#allocation6 + $0xcc] ss:$16 sps:$4 sm:$0xff]   ;;  %v9383_v10 = vld [vmem:[%s10426_s20 + $0x1e0] ss:$16 sps:$4 sm:$0xff]  }
 0x17a   : > { %2654 = vmatprep.subr.bf16.mxu1 %v8643_v11  ;;  %v9385_v11 = vld [vmem:[%s10426_s20 + $0x1e4] ss:$16 sps:$4 sm:$0xff]  }
 0x17c   : > { %2302 = vmatpush2.bf16.msra.mxu0 %v9226_v12  ;;  %v9386_v12 = vld [vmem:[%s10426_s20 + $0x1e8] ss:$16 sps:$4 sm:$0xff]  }
 0x17d   : > { %2655 = vmatpush2.bf16.msra.mxu1 %v8642_v13  ;;  %2303 = vmatprep.subr.bf16.mxu0 %v9227_v14  ;;  %v9388_v13 = vld [vmem:[%s10426_s20 + $0x1ec] ss:$16 sps:$4 sm:$0xff]   ;;  %v9291_v14 = vld [vmem:[#allocation6 + $0xc0] ss:$16 sps:$4 sm:$0xff]  }
 0x17e   : > { %2656 = vmatprep.subr.bf16.mxu1 %v9229_v15  ;;  %v9292_v15 = vld [vmem:[#allocation6 + $0xc8] ss:$16 sps:$4 sm:$0xff]  }
 0x180   : > { %2304 = vmatpush2.bf16.msra.mxu0 %v9231_v16  ;;  %v9299_v16 = vld [vmem:[#allocation6 + $0xe4] ss:$16 sps:$4 sm:$0xff]  }
 0x181   : > { %2657 = vmatpush2.bf16.msra.mxu1 %v9232_v17  ;;  %3384 = vmatprep.subr.bf16.mxu0 %v9241_v18  ;;  %v9301_v17 = vld [vmem:[#allocation6 + $0xec] ss:$16 sps:$4 sm:$0xff]   ;;  %v9401_v18 = vld [vmem:[%s10426_s20 + $0x1c0] ss:$16 sps:$4 sm:$0xff]  }
 0x182   : > { %3737 = vmatprep.subr.bf16.mxu1 %v9244_v19  ;;  %v9403_v19 = vld [vmem:[%s10426_s20 + $0x1c4] ss:$16 sps:$4 sm:$0xff]  }
 0x183   : > { %2306 = vmatmul.mubr.bf16.vlgmr.msra.gmra.mxu0 %v9233_v20  ;;  %v9404_v20 = vld [vmem:[%s10426_s20 + $0x1c8] ss:$16 sps:$4 sm:$0xff]  }
 0x184   : > { %2659 = vmatmul.mubr.bf16.vlgmr.msra.gmra.mxu1 %v9236_v21  ;;  %3385 = vmatpush1.bf16.msra.mxu0 %v9239_v22  ;;  %v9406_v21 = vld [vmem:[%s10426_s20 + $0x1cc] ss:$16 sps:$4 sm:$0xff]   ;;  %v9303_v22 = vld [vmem:[#allocation6 + $0xe0] ss:$16 sps:$4 sm:$0xff]  }
 0x185   : > { %3738 = vmatpush1.bf16.msra.mxu1 %v9242_v23  ;;  %2315 = vmatprep.mubr.bf16.mxu0 %v9245_v24  ;;  %v9304_v23 = vld [vmem:[#allocation6 + $0xe8] ss:$16 sps:$4 sm:$0xff]   ;;  %v9305_v24 = vld [vmem:[#allocation6 + $0x104] ss:$16 sps:$4 sm:$0xff]  }
 0x186   : > { %2668 = vmatprep.mubr.bf16.mxu1 %v9247_v25  ;;  %3386 = vmatprep.subr.bf16.mxu0 %v9259_v26  ;;  %v9307_v25 = vld [vmem:[#allocation6 + $0x10c] ss:$16 sps:$4 sm:$0xff]   ;;  %v9419_v26 = vld [vmem:[%s10426_s20 + $0x1a0] ss:$16 sps:$4 sm:$0xff]  }
 0x187   : > { %3739 = vmatprep.subr.bf16.mxu1 %v9262_v27  ;;  %v9421_v27 = vld [vmem:[%s10426_s20 + $0x1a4] ss:$16 sps:$4 sm:$0xff]  }
 0x188   : > { %3387 = vmatpush1.bf16.msra.mxu0 %v9257_v28  ;;  %v9422_v28 = vld [vmem:[%s10426_s20 + $0x1a8] ss:$16 sps:$4 sm:$0xff]  }
 0x189   : > { %3740 = vmatpush1.bf16.msra.mxu1 %v9260_v29  ;;  %3388 = vmatprep.subr.bf16.mxu0 %v9277_v30  ;;  %v9424_v29 = vld [vmem:[%s10426_s20 + $0x1ac] ss:$16 sps:$4 sm:$0xff]   ;;  %v9309_v30 = vld [vmem:[#allocation6 + $0x100] ss:$16 sps:$4 sm:$0xff]  }
 0x18a   : > { %3741 = vmatprep.subr.bf16.mxu1 %v9280_v31  ;;  %v9310_v31 = vld [vmem:[#allocation6 + $0x108] ss:$16 sps:$4 sm:$0xff]  }
 0x18b   : > { %2316 = vmatmul.mubr.bf16.gmra.mxu0 %v9249_v32  ;;  %v9317_v32 = vld [vmem:[#allocation6 + $0x124] ss:$16 sps:$4 sm:$0xff]  }
 0x18c   : > { %2669 = vmatmul.mubr.bf16.gmra.mxu1 %v9250_v33  ;;  %2325 = vmatprep.mubr.bf16.mxu0 %v9251_v34  ;;  %v9319_v33 = vld [vmem:[#allocation6 + $0x12c] ss:$16 sps:$4 sm:$0xff]   ;;  %v9437_v34 = vld [vmem:[%s10426_s20 + $0x180] ss:$16 sps:$4 sm:$0xff]  }
 0x18d   : > { %2678 = vmatprep.mubr.bf16.mxu1 %v9253_v35  ;;  %3389 = vmatpush1.bf16.msra.mxu0 %v9275_v36  ;;  %v9439_v35 = vld [vmem:[%s10426_s20 + $0x184] ss:$16 sps:$4 sm:$0xff]   ;;  %v9440_v36 = vld [vmem:[%s10426_s20 + $0x188] ss:$16 sps:$4 sm:$0xff]  }
 0x18e   : > { %3742 = vmatpush1.bf16.msra.mxu1 %v9278_v37  ;;  %3390 = vmatprep.subr.bf16.mxu0 %v9295_v38  ;;  %v9442_v37 = vld [vmem:[%s10426_s20 + $0x18c] ss:$16 sps:$4 sm:$0xff]   ;;  %v9321_v38 = vld [vmem:[#allocation6 + $0x120] ss:$16 sps:$4 sm:$0xff]  }
 0x18f   : > { %3743 = vmatprep.subr.bf16.mxu1 %v9298_v39  ;;  %v9322_v39 = vld [vmem:[#allocation6 + $0x128] ss:$16 sps:$4 sm:$0xff]  }
 0x191   : > { %3391 = vmatpush1.bf16.msra.mxu0 %v9293_v40  ;;  %v9323_v40 = vld [vmem:[#allocation6 + $0x144] ss:$16 sps:$4 sm:$0xff]  }
 0x192   : > { %3744 = vmatpush1.bf16.msra.mxu1 %v9296_v41  ;;  %3392 = vmatprep.subr.bf16.mxu0 %v9313_v43  ;;  %v9325_v41 = vld [vmem:[#allocation6 + $0x14c] ss:$16 sps:$4 sm:$0xff]   ;;  %v9457_v43 = vld [vmem:[%s10426_s20 + $0x164] ss:$16 sps:$4 sm:$0xff]  }
 0x193   : > { %3745 = vmatprep.subr.bf16.mxu1 %v9316_v44  ;;  %2326 = vmatmul.mubr.bf16.gmra.mxu0 %v9255_v42  ;;  %v9455_v42 = vld [vmem:[%s10426_s20 + $0x160] ss:$16 sps:$4 sm:$0xff]   ;;  %v9458_v44 = vld [vmem:[%s10426_s20 + $0x168] ss:$16 sps:$4 sm:$0xff]  }
 0x194   : > { %2679 = vmatmul.mubr.bf16.gmra.mxu1 %v9256_v45  ;;  %2335 = vmatprep.mubr.bf16.mxu0 %v9263_v46  ;;  %v9460_v45 = vld [vmem:[%s10426_s20 + $0x16c] ss:$16 sps:$4 sm:$0xff]   ;;  %v9327_v46 = vld [vmem:[#allocation6 + $0x140] ss:$16 sps:$4 sm:$0xff]  }
 0x195   : > { %2688 = vmatprep.mubr.bf16.mxu1 %v9265_v47  ;;  %3393 = vmatpush1.bf16.msra.mxu0 %v9311_v48  ;;  %v9328_v47 = vld [vmem:[#allocation6 + $0x148] ss:$16 sps:$4 sm:$0xff]   ;;  %v9335_v48 = vld [vmem:[#allocation6 + $0x164] ss:$16 sps:$4 sm:$0xff]  }
 0x196   : > { %3746 = vmatpush1.bf16.msra.mxu1 %v9314_v49  ;;  %3394 = vmatprep.subr.bf16.mxu0 %v9331_v50  ;;  %v9337_v49 = vld [vmem:[#allocation6 + $0x16c] ss:$16 sps:$4 sm:$0xff]   ;;  %v9339_v50 = vld [vmem:[#allocation6 + $0x160] ss:$16 sps:$4 sm:$0xff]  }
 0x197   : > { %3747 = vmatprep.subr.bf16.mxu1 %v9334_v51  ;;  %v9340_v51 = vld [vmem:[#allocation6 + $0x168] ss:$16 sps:$4 sm:$0xff]  }
 0x199   : > { %3395 = vmatpush1.bf16.msra.mxu0 %v9329_v52  ;;  %v9473_v52 = vld [vmem:[%s10426_s20 + $0x140] ss:$16 sps:$4 sm:$0xff]  }
 0x19a   : > { %3748 = vmatpush1.bf16.msra.mxu1 %v9332_v53  ;;  %3396 = vmatprep.subr.bf16.mxu0 %v9349_v59  ;;  %v9475_v53 = vld [vmem:[%s10426_s20 + $0x144] ss:$16 sps:$4 sm:$0xff]   ;;  %v9346_v59 = vld [vmem:[#allocation6 + $0x188] ss:$16 sps:$4 sm:$0xff]  }
 0x19b   : > { %2336 = vmatmul.mubr.bf16.gmra.mxu0 %v9267_v54  ;;  %3749 = vmatprep.subr.bf16.mxu1 %v9352_v61  ;;  %v9476_v54 = vld [vmem:[%s10426_s20 + $0x148] ss:$16 sps:$4 sm:$0xff]   ;;  %v9355_v61 = vld [vmem:[#allocation6 + $0x1ac] ss:$16 sps:$4 sm:$0xff]  }
 0x19c   : > { %2689 = vmatmul.mubr.bf16.gmra.mxu1 %v9268_v55  ;;  %2345 = vmatprep.mubr.bf16.mxu0 %v9269_v56  ;;  %v9478_v55 = vld [vmem:[%s10426_s20 + $0x14c] ss:$16 sps:$4 sm:$0xff]   ;;  %v9341_v56 = vld [vmem:[#allocation6 + $0x184] ss:$16 sps:$4 sm:$0xff]  }
 0x19d   : > { %2698 = vmatprep.mubr.bf16.mxu1 %v9271_v57  ;;  %3397 = vmatpush1.bf16.msra.mxu0 %v9347_v58  ;;  %v9343_v57 = vld [vmem:[#allocation6 + $0x18c] ss:$16 sps:$4 sm:$0xff]   ;;  %v9345_v58 = vld [vmem:[#allocation6 + $0x180] ss:$16 sps:$4 sm:$0xff]  }
 0x19e   : > { %3750 = vmatpush1.bf16.msra.mxu1 %v9350_v60  ;;  %3398 = vmatprep.subr.bf16.mxu0 %v9367_v3  ;;  %v9353_v60 = vld [vmem:[#allocation6 + $0x1a4] ss:$16 sps:$4 sm:$0xff]   ;;  %v9496_v3 = vld [vmem:[%s10426_s20 + $0x12c] ss:$16 sps:$4 sm:$0xff]  }
 0x19f   : > { %3751 = vmatprep.subr.bf16.mxu1 %v9370_v5  ;;  %v9361_v5 = vld [vmem:[#allocation6 + $0x1cc] ss:$16 sps:$4 sm:$0xff]  }
 0x1a1   : > { %3399 = vmatpush1.bf16.msra.mxu0 %v9365_v2  ;;  %v9494_v2 = vld [vmem:[%s10426_s20 + $0x128] ss:$16 sps:$4 sm:$0xff]  }
 0x1a2   : > { %3752 = vmatpush1.bf16.msra.mxu1 %v9368_v4  ;;  %3400 = vmatprep.subr.bf16.mxu0 %v9385_v11  ;;  %v9359_v4 = vld [vmem:[#allocation6 + $0x1c4] ss:$16 sps:$4 sm:$0xff]   ;;  %v9376_v11 = vld [vmem:[#allocation6 + $0x1e8] ss:$16 sps:$4 sm:$0xff]  }
 0x1a3   : > { %2346 = vmatmul.mubr.bf16.gmra.mxu0 %v9273_v62  ;;  %3753 = vmatprep.subr.bf16.mxu1 %v9388_v13  ;;  %v9357_v62 = vld [vmem:[#allocation6 + $0x1a0] ss:$16 sps:$4 sm:$0xff]   ;;  %v9511_v13 = vld [vmem:[%s10426_s20 + $0x104] ss:$16 sps:$4 sm:$0xff]  }
 0x1a4   : > { %2699 = vmatmul.mubr.bf16.gmra.mxu1 %v9274_v63  ;;  %2355 = vmatprep.mubr.bf16.mxu0 %v9281_v0  ;;  %v9358_v63 = vld [vmem:[#allocation6 + $0x1a8] ss:$16 sps:$4 sm:$0xff]   ;;  %v9491_v0 = vld [vmem:[%s10426_s20 + $0x120] ss:$16 sps:$4 sm:$0xff]  }
 0x1a5   : > { %2708 = vmatprep.mubr.bf16.mxu1 %v9283_v1  ;;  %3401 = vmatpush2.bf16.msra.mxu0 %v9383_v10  ;;  %v9493_v1 = vld [vmem:[%s10426_s20 + $0x124] ss:$16 sps:$4 sm:$0xff]   ;;  %v9375_v10 = vld [vmem:[#allocation6 + $0x1e0] ss:$16 sps:$4 sm:$0xff]  }
 0x1a6   : > { %3754 = vmatpush2.bf16.msra.mxu1 %v9386_v12  ;;  %3402 = vmatprep.subr.bf16.mxu0 %v9403_v19  ;;  %v9509_v12 = vld [vmem:[%s10426_s20 + $0x100] ss:$16 sps:$4 sm:$0xff]   ;;  %v9382_v19 = vld [vmem:[#allocation6 + $0x208] ss:$16 sps:$4 sm:$0xff]  }
 0x1a7   : > { %3755 = vmatprep.subr.bf16.mxu1 %v9406_v21  ;;  %v9391_v21 = vld [vmem:[#allocation6 + $0x22c] ss:$16 sps:$4 sm:$0xff]  }
 0x1a9   : > { %3403 = vmatpush2.bf16.msra.mxu0 %v9401_v18  ;;  %v9381_v18 = vld [vmem:[#allocation6 + $0x200] ss:$16 sps:$4 sm:$0xff]  }
 0x1aa   : > { %3756 = vmatpush2.bf16.msra.mxu1 %v9404_v20  ;;  %3404 = vmatprep.subr.bf16.mxu0 %v9421_v27  ;;  %v9389_v20 = vld [vmem:[#allocation6 + $0x224] ss:$16 sps:$4 sm:$0xff]   ;;  %v9397_v27 = vld [vmem:[#allocation6 + $0x24c] ss:$16 sps:$4 sm:$0xff]  }
 0x1ab   : > { %2356 = vmatmul.mubr.bf16.gmra.mxu0 %v9285_v6  ;;  %3757 = vmatprep.subr.bf16.mxu1 %v9424_v29  ;;  %v9363_v6 = vld [vmem:[#allocation6 + $0x1c0] ss:$16 sps:$4 sm:$0xff]   ;;  %v9400_v29 = vld [vmem:[#allocation6 + $0x248] ss:$16 sps:$4 sm:$0xff]  }
 0x1ac   : > { %2709 = vmatmul.mubr.bf16.gmra.mxu1 %v9286_v7  ;;  %2365 = vmatprep.mubr.bf16.mxu0 %v9287_v8  ;;  %v9364_v7 = vld [vmem:[#allocation6 + $0x1c8] ss:$16 sps:$4 sm:$0xff]   ;;  %v9371_v8 = vld [vmem:[#allocation6 + $0x1e4] ss:$16 sps:$4 sm:$0xff]  }
 0x1ad   : > { %2718 = vmatprep.mubr.bf16.mxu1 %v9289_v9  ;;  %3405 = vmatpush2.bf16.msra.mxu0 %v9419_v26  ;;  %v9373_v9 = vld [vmem:[#allocation6 + $0x1ec] ss:$16 sps:$4 sm:$0xff]   ;;  %v9395_v26 = vld [vmem:[#allocation6 + $0x244] ss:$16 sps:$4 sm:$0xff]  }
 0x1ae   : > { %3758 = vmatpush2.bf16.msra.mxu1 %v9422_v28  ;;  %3406 = vmatprep.subr.bf16.mxu0 %v9439_v35  ;;  %v9399_v28 = vld [vmem:[#allocation6 + $0x240] ss:$16 sps:$4 sm:$0xff]   ;;  %v9415_v35 = vld [vmem:[#allocation6 + $0x28c] ss:$16 sps:$4 sm:$0xff]  }
 0x1af   : > { %3759 = vmatprep.subr.bf16.mxu1 %v9442_v37  ;;  %v9418_v37 = vld [vmem:[#allocation6 + $0x288] ss:$16 sps:$4 sm:$0xff]  }
 0x1b1   : > { %3407 = vmatpush2.bf16.msra.mxu0 %v9437_v34  ;;  %v9413_v34 = vld [vmem:[#allocation6 + $0x284] ss:$16 sps:$4 sm:$0xff]  }
 0x1b2   : > { %3760 = vmatpush2.bf16.msra.mxu1 %v9440_v36  ;;  %3408 = vmatprep.subr.bf16.mxu0 %v9457_v43  ;;  %v9417_v36 = vld [vmem:[#allocation6 + $0x280] ss:$16 sps:$4 sm:$0xff]   ;;  %v9433_v43 = vld [vmem:[#allocation6 + $0x2cc] ss:$16 sps:$4 sm:$0xff]  }
 0x1b3   : > { %2366 = vmatmul.mubr.bf16.gmra.mxu0 %v9291_v14  ;;  %3761 = vmatprep.subr.bf16.mxu1 %v9460_v45  ;;  %v9512_v14 = vld [vmem:[%s10426_s20 + $0x108] ss:$16 sps:$4 sm:$0xff]  }
 0x1b4   : > { %2719 = vmatmul.mubr.bf16.gmra.mxu1 %v9292_v15  ;;  %2375 = vmatprep.mubr.bf16.mxu0 %v9299_v16  ;;  %v9514_v15 = vld [vmem:[%s10426_s20 + $0x10c] ss:$16 sps:$4 sm:$0xff]   ;;  %v9377_v16 = vld [vmem:[#allocation6 + $0x204] ss:$16 sps:$4 sm:$0xff]   ;;  %v9436_v45 = vld [vmem:[#allocation6 + $0x2c8] ss:$16 sps:$4 sm:$0xff]  }
 0x1b5   : > { %2728 = vmatprep.mubr.bf16.mxu1 %v9301_v17  ;;  %3409 = vmatpush2.bf16.msra.mxu0 %v9455_v42  ;;  %v9379_v17 = vld [vmem:[#allocation6 + $0x20c] ss:$16 sps:$4 sm:$0xff]   ;;  %v9431_v42 = vld [vmem:[#allocation6 + $0x2c4] ss:$16 sps:$4 sm:$0xff]  }
 0x1b6   : > { %3762 = vmatpush2.bf16.msra.mxu1 %v9458_v44  ;;  %3410 = vmatprep.subr.bf16.mxu0 %v9475_v53  ;;  %v9435_v44 = vld [vmem:[#allocation6 + $0x2c0] ss:$16 sps:$4 sm:$0xff]   ;;  %v9454_v53 = vld [vmem:[#allocation6 + $0x308] ss:$16 sps:$4 sm:$0xff]  }
 0x1b7   : > { %3763 = vmatprep.subr.bf16.mxu1 %v9478_v55  ;;  %v9463_v55 = vld [vmem:[#allocation6 + $0x32c] ss:$16 sps:$4 sm:$0xff]  }
 0x1b9   : > { %3411 = vmatpush2.bf16.msra.mxu0 %v9473_v52  ;;  %v9453_v52 = vld [vmem:[#allocation6 + $0x300] ss:$16 sps:$4 sm:$0xff]  }
 0x1ba   : > { %3764 = vmatpush2.bf16.msra.mxu1 %v9476_v54  ;;  %3412 = vmatprep.subr.bf16.mxu0 %v9493_v1  ;;  %v9461_v54 = vld [vmem:[#allocation6 + $0x324] ss:$16 sps:$4 sm:$0xff]   ;;  %v9469_v1 = vld [vmem:[#allocation6 + $0x34c] ss:$16 sps:$4 sm:$0xff]  }
 0x1bb   : > { %2376 = vmatmul.mubr.bf16.gmra.mxu0 %v9303_v22  ;;  %3765 = vmatprep.subr.bf16.mxu1 %v9496_v3  ;;  %v9523_v22 = vld [vmem:[%s10428_s16 + $0x74] ss:$8 sps:$4 sm:$0xff]  }
 0x1bc   : > { %2729 = vmatmul.mubr.bf16.gmra.mxu1 %v9304_v23  ;;  %2385 = vmatprep.mubr.bf16.mxu0 %v9305_v24  ;;  %v9393_v23 = vld [vmem:[#allocation6 + $0x220] ss:$16 sps:$4 sm:$0xff]   ;;  %v9394_v24 = vld [vmem:[#allocation6 + $0x228] ss:$16 sps:$4 sm:$0xff]  }
 0x1bd   : > { %2738 = vmatprep.mubr.bf16.mxu1 %v9307_v25  ;;  %3413 = vmatpush2.bf16.msra.mxu0 %v9491_v0  ;;  %v9526_v25 = vld [vmem:[%s10428_s16 + $0x174] ss:$8 sps:$4 sm:$0xff]  }
 0x1be   : > { %3766 = vmatpush2.bf16.msra.mxu1 %v9494_v2  ;;  %3414 = vmatprep.subr.bf16.mxu0 %v9511_v13  ;;  %v9467_v0 = vld [vmem:[#allocation6 + $0x344] ss:$16 sps:$4 sm:$0xff]   ;;  %v9481_v13 = vld [vmem:[#allocation6 + $0x36c] ss:$16 sps:$4 sm:$0xff]  }
 0x1bf   : > { %3767 = vmatprep.subr.bf16.mxu1 %v9514_v15 }
 0x1c1   : > { %3415 = vmatpush2.bf16.msra.mxu0 %v9509_v12  ;;  %v9479_v12 = vld [vmem:[#allocation6 + $0x364] ss:$16 sps:$4 sm:$0xff]  }
 0x1c2   : > { %3768 = vmatpush2.bf16.msra.mxu1 %v9512_v14  ;;  %4794 = vmatprep.subr.bf16.mxu0 %v9523_v22  ;;  %v9483_v22 = vld [vmem:[#allocation6 + $0x360] ss:$16 sps:$4 sm:$0xff]  }
 0x1c3   : > { %2386 = vmatmul.mubr.bf16.gmra.mxu0 %v9309_v30  ;;  %5147 = vmatprep.subr.bf16.mxu1 %v9526_v25  ;;  %v9407_v30 = vld [vmem:[#allocation6 + $0x264] ss:$16 sps:$4 sm:$0xff]   ;;  %v9490_v25 = vld [vmem:[#allocation6 + $0x38c] ss:$16 sps:$4 sm:$0xff]  }
 0x1c4   : > { %2739 = vmatmul.mubr.bf16.gmra.mxu1 %v9310_v31  ;;  %2395 = vmatprep.mubr.bf16.mxu0 %v9317_v32  ;;  %v9409_v31 = vld [vmem:[#allocation6 + $0x26c] ss:$16 sps:$4 sm:$0xff]   ;;  %v9411_v32 = vld [vmem:[#allocation6 + $0x260] ss:$16 sps:$4 sm:$0xff]  }
 0x1c5   : > { %2748 = vmatprep.mubr.bf16.mxu1 %v9319_v33  ;;  %v9412_v33 = vld [vmem:[#allocation6 + $0x268] ss:$16 sps:$4 sm:$0xff]  }
 0x1cb   : > { %2396 = vmatmul.mubr.bf16.gmra.mxu0 %v9321_v38  ;;  %v9425_v38 = vld [vmem:[#allocation6 + $0x2a4] ss:$16 sps:$4 sm:$0xff]  }
 0x1cc   : > { %2749 = vmatmul.mubr.bf16.gmra.mxu1 %v9322_v39  ;;  %2405 = vmatprep.mubr.bf16.mxu0 %v9323_v40  ;;  %v9427_v39 = vld [vmem:[#allocation6 + $0x2ac] ss:$16 sps:$4 sm:$0xff]   ;;  %v9429_v40 = vld [vmem:[#allocation6 + $0x2a0] ss:$16 sps:$4 sm:$0xff]  }
 0x1cd   : > { %2758 = vmatprep.mubr.bf16.mxu1 %v9325_v41  ;;  %v9430_v41 = vld [vmem:[#allocation6 + $0x2a8] ss:$16 sps:$4 sm:$0xff]  }
 0x1d3   : > { %2406 = vmatmul.mubr.bf16.gmra.mxu0 %v9327_v46  ;;  %v9443_v46 = vld [vmem:[#allocation6 + $0x2e4] ss:$16 sps:$4 sm:$0xff]  }
 0x1d4   : > { %2759 = vmatmul.mubr.bf16.gmra.mxu1 %v9328_v47  ;;  %2415 = vmatprep.mubr.bf16.mxu0 %v9335_v48  ;;  %v9445_v47 = vld [vmem:[#allocation6 + $0x2ec] ss:$16 sps:$4 sm:$0xff]   ;;  %v9447_v48 = vld [vmem:[#allocation6 + $0x2e0] ss:$16 sps:$4 sm:$0xff]  }
 0x1d5   : > { %2768 = vmatprep.mubr.bf16.mxu1 %v9337_v49  ;;  %v9448_v49 = vld [vmem:[#allocation6 + $0x2e8] ss:$16 sps:$4 sm:$0xff]  }
 0x1db   : > { %2416 = vmatmul.mubr.bf16.gmra.mxu0 %v9339_v50  ;;  %v9449_v50 = vld [vmem:[#allocation6 + $0x304] ss:$16 sps:$4 sm:$0xff]  }
 0x1dc   : > { %2769 = vmatmul.mubr.bf16.gmra.mxu1 %v9340_v51  ;;  %2425 = vmatprep.mubr.bf16.mxu0 %v9341_v56  ;;  %v9451_v51 = vld [vmem:[#allocation6 + $0x30c] ss:$16 sps:$4 sm:$0xff]  }
 0x1dd   : > { %2778 = vmatprep.mubr.bf16.mxu1 %v9343_v57 }
 0x1e3   : > { %2426 = vmatmul.mubr.bf16.gmra.mxu0 %v9345_v58 }
 0x1e4   : > { %2779 = vmatmul.mubr.bf16.gmra.mxu1 %v9346_v59  ;;  %2435 = vmatprep.mubr.bf16.mxu0 %v9353_v60 }
 0x1e5   : > { %2788 = vmatprep.mubr.bf16.mxu1 %v9355_v61 }
 0x1eb   : > { %2436 = vmatmul.mubr.bf16.gmra.mxu0 %v9357_v62  ;;  %v9465_v62 = vld [vmem:[#allocation6 + $0x320] ss:$16 sps:$4 sm:$0xff]  }
 0x1ec   : > { %2789 = vmatmul.mubr.bf16.gmra.mxu1 %v9358_v63  ;;  %2445 = vmatprep.mubr.bf16.mxu0 %v9359_v4  ;;  %v9466_v63 = vld [vmem:[#allocation6 + $0x328] ss:$16 sps:$4 sm:$0xff]  }
 0x1ed   : > { %2798 = vmatprep.mubr.bf16.mxu1 %v9361_v5 }
 0x1f3   : > { %2446 = vmatmul.mubr.bf16.gmra.mxu0 %v9363_v6 }
 0x1f4   : > { %2799 = vmatmul.mubr.bf16.gmra.mxu1 %v9364_v7  ;;  %2455 = vmatprep.mubr.bf16.mxu0 %v9371_v8 }
 0x1f5   : > { %2808 = vmatprep.mubr.bf16.mxu1 %v9373_v9 }
 0x1fb   : > { %2456 = vmatmul.mubr.bf16.gmra.mxu0 %v9375_v10  ;;  %v9471_v10 = vld [vmem:[#allocation6 + $0x340] ss:$16 sps:$4 sm:$0xff]  }
 0x1fc   : > { %2809 = vmatmul.mubr.bf16.gmra.mxu1 %v9376_v11  ;;  %2465 = vmatprep.mubr.bf16.mxu0 %v9377_v16  ;;  %v9472_v11 = vld [vmem:[#allocation6 + $0x348] ss:$16 sps:$4 sm:$0xff]  }
 0x1fd   : > { %2818 = vmatprep.mubr.bf16.mxu1 %v9379_v17 }
 0x203   : > { %2466 = vmatmul.mubr.bf16.gmra.mxu0 %v9381_v18 }
 0x204   : > { %2819 = vmatmul.mubr.bf16.gmra.mxu1 %v9382_v19  ;;  %2475 = vmatprep.mubr.bf16.mxu0 %v9389_v20 }
 0x205   : > { %2828 = vmatprep.mubr.bf16.mxu1 %v9391_v21 }
 0x20b   : > { %2476 = vmatmul.mubr.bf16.gmra.mxu0 %v9393_v23  ;;  %v9484_v23 = vld [vmem:[#allocation6 + $0x368] ss:$16 sps:$4 sm:$0xff]  }
 0x20c   : > { %2829 = vmatmul.mubr.bf16.gmra.mxu1 %v9394_v24  ;;  %2485 = vmatprep.mubr.bf16.mxu0 %v9395_v26  ;;  %v9487_v24 = vld [vmem:[#allocation6 + $0x384] ss:$16 sps:$4 sm:$0xff]  }
 0x20d   : > { %2838 = vmatprep.mubr.bf16.mxu1 %v9397_v27 }
 0x213   : > { %2486 = vmatmul.mubr.bf16.gmra.mxu0 %v9399_v28 }
 0x214   : > { %2839 = vmatmul.mubr.bf16.gmra.mxu1 %v9400_v29  ;;  %2495 = vmatprep.mubr.bf16.mxu0 %v9407_v30 }
 0x215   : > { %2848 = vmatprep.mubr.bf16.mxu1 %v9409_v31 }
 0x21b   : > { %2496 = vmatmul.mubr.bf16.gmra.mxu0 %v9411_v32 }
 0x21c   : > { %2849 = vmatmul.mubr.bf16.gmra.mxu1 %v9412_v33  ;;  %2505 = vmatprep.mubr.bf16.mxu0 %v9413_v34  ;;  %v9485_v34 = vld [vmem:[#allocation6 + $0x380] ss:$16 sps:$4 sm:$0xff]  }
 0x21d   : > { %2858 = vmatprep.mubr.bf16.mxu1 %v9415_v35  ;;  %v9488_v35 = vld [vmem:[#allocation6 + $0x388] ss:$16 sps:$4 sm:$0xff]  }
 0x223   : > { %2506 = vmatmul.mubr.bf16.gmra.mxu0 %v9417_v36  ;;  %v9499_v36 = vld [vmem:[#allocation6 + $0x3a4] ss:$16 sps:$4 sm:$0xff]  }
 0x224   : > { %2859 = vmatmul.mubr.bf16.gmra.mxu1 %v9418_v37  ;;  %2515 = vmatprep.mubr.bf16.mxu0 %v9425_v38  ;;  %v9502_v37 = vld [vmem:[#allocation6 + $0x3ac] ss:$16 sps:$4 sm:$0xff]  }
 0x225   : > { %2868 = vmatprep.mubr.bf16.mxu1 %v9427_v39 }
 0x22b   : > { %2516 = vmatmul.mubr.bf16.gmra.mxu0 %v9429_v40 }
 0x22c   : > { %2869 = vmatmul.mubr.bf16.gmra.mxu1 %v9430_v41  ;;  %2525 = vmatprep.mubr.bf16.mxu0 %v9431_v42 }
 0x22d   : > { %2878 = vmatprep.mubr.bf16.mxu1 %v9433_v43 }
 0x233   : > { %2526 = vmatmul.mubr.bf16.gmra.mxu0 %v9435_v44 }
 0x234   : > { %2879 = vmatmul.mubr.bf16.gmra.mxu1 %v9436_v45  ;;  %2535 = vmatprep.mubr.bf16.mxu0 %v9443_v46  ;;  %v9497_v46 = vld [vmem:[#allocation6 + $0x3a0] ss:$16 sps:$4 sm:$0xff]  }
 0x235   : > { %2888 = vmatprep.mubr.bf16.mxu1 %v9445_v47  ;;  %v9500_v47 = vld [vmem:[#allocation6 + $0x3a8] ss:$16 sps:$4 sm:$0xff]  }
 0x23b   : > { %2536 = vmatmul.mubr.bf16.gmra.mxu0 %v9447_v48  ;;  %v9505_v48 = vld [vmem:[#allocation6 + $0x3c4] ss:$16 sps:$4 sm:$0xff]  }
 0x23c   : > { %2889 = vmatmul.mubr.bf16.gmra.mxu1 %v9448_v49  ;;  %2545 = vmatprep.mubr.bf16.mxu0 %v9449_v50  ;;  %v9508_v49 = vld [vmem:[#allocation6 + $0x3cc] ss:$16 sps:$4 sm:$0xff]  }
 0x23d   : > { %2898 = vmatprep.mubr.bf16.mxu1 %v9451_v51 }
 0x243   : > { %v10516_v56 = vpop.f32.mrf.mxu0  ;;  %2546 = vmatmul.mubr.bf16.gmra.mxu0 %v9453_v52 }
 0x244   : > { %v10518_v57 = vpop.f32.mrf.mxu1  ;;  %2899 = vmatmul.mubr.bf16.gmra.mxu1 %v9454_v53  ;;  %2555 = vmatprep.mubr.bf16.mxu0 %v9461_v54  ;;  %v994_v54 = vld [vmem:[%s10420_s2 + $0x8] sm:$0xff] }
 0x245   : > { %2908 = vmatprep.mubr.bf16.mxu1 %v9463_v55  ;;  %v10520_v58 = vpop.f32.mrf.mxu0 }
 0x246   : > { %v10522_v59 = vpop.f32.mrf.mxu1 }
 0x247   : > { %v10524_v60 = vpop.f32.mrf.mxu0 }
 0x248   : > { %v10526_v61 = vpop.f32.mrf.mxu1 }
 0x249   : > { %v10528_v2 = vpop.f32.mrf.mxu0 }
 0x24a   : > { %v10530_v3 = vpop.f32.mrf.mxu1 }
 0x24b   : > { %v10532_v4 = vpop.f32.mrf.mxu0  ;;  %2556 = vmatmul.mubr.bf16.gmra.mxu0 %v9465_v62 }
 0x24c   : > { %v10534_v5 = vpop.f32.mrf.mxu1  ;;  %2909 = vmatmul.mubr.bf16.gmra.mxu1 %v9466_v63  ;;  %2565 = vmatprep.mubr.bf16.mxu0 %v9467_v0  ;;  %v1188_v63 = vunpack.c.h.bf16 %v994_v54  ;;  %v993_v0 = vld [vmem:[%s10420_s2] sm:$0xff] }
 0x24d   : > { %2918 = vmatprep.mubr.bf16.mxu1 %v9469_v1  ;;  %v10536_v6 = vpop.f32.mrf.mxu0 }
 0x24e   : > { %v10538_v7 = vpop.f32.mrf.mxu1 }
 0x24f   : > { %v10540_v8 = vpop.f32.mrf.mxu0 }
 0x250   : > { %v10542_v9 = vpop.f32.mrf.mxu1 }
 0x251   : > { %v10544_v14 = vpop.f32.mrf.mxu0 }
 0x252   : > { %v10546_v15 = vpop.f32.mrf.mxu1 }
 0x253   : > { %v10548_v16 = vpop.f32.mrf.mxu0  ;;  %2566 = vmatmul.mubr.bf16.gmra.mxu0 %v9471_v10 }
 0x254   : > { %v10550_v17 = vpop.f32.mrf.mxu1  ;;  %2919 = vmatmul.mubr.bf16.gmra.mxu1 %v9472_v11  ;;  %2575 = vmatprep.mubr.bf16.mxu0 %v9479_v12  ;;  %v9503_v11 = vld [vmem:[#allocation6 + $0x3c0] ss:$16 sps:$4 sm:$0xff]   ;;  %v9506_v12 = vld [vmem:[#allocation6 + $0x3c8] ss:$16 sps:$4 sm:$0xff]  }
 0x255   : > { %2928 = vmatprep.mubr.bf16.mxu1 %v9481_v13  ;;  %v10552_v18 = vpop.f32.mrf.mxu0  ;;  %v1186_v13 = vunpack.c.h.bf16 %v993_v0 }
 0x256   : > { %v10554_v19 = vpop.f32.mrf.mxu1 }
 0x257   : > { %v10556_v20 = vpop.f32.mrf.mxu0 }
 0x258   : > { %v10558_v21 = vpop.f32.mrf.mxu1 }
 0x259   : > { %v10560_v26 = vpop.f32.mrf.mxu0 }
 0x25a   : > { %v10562_v27 = vpop.f32.mrf.mxu1 }
 0x25b   : > { %v10564_v28 = vpop.f32.mrf.mxu0  ;;  %2576 = vmatmul.mubr.bf16.gmra.mxu0 %v9483_v22  ;;  %v9517_v22 = vld [vmem:[#allocation6 + $0x3e4] ss:$16 sps:$4 sm:$0xff]  }
 0x25c   : > { %v10566_v29 = vpop.f32.mrf.mxu1  ;;  %2929 = vmatmul.mubr.bf16.gmra.mxu1 %v9484_v23  ;;  %2585 = vmatprep.mubr.bf16.mxu0 %v9487_v24  ;;  %v9520_v23 = vld [vmem:[#allocation6 + $0x3ec] ss:$16 sps:$4 sm:$0xff]  }
 0x25d   : > { %2938 = vmatprep.mubr.bf16.mxu1 %v9490_v25  ;;  %v10568_v30 = vpop.f32.mrf.mxu0 }
 0x25e   : > { %v10570_v31 = vpop.f32.mrf.mxu1 }
 0x25f   : > { %v10572_v32 = vpop.f32.mrf.mxu0 }
 0x260   : > { %v10574_v33 = vpop.f32.mrf.mxu1 }
 0x261   : > { %v10576_v38 = vpop.f32.mrf.mxu0 }
 0x262   : > { %v10578_v39 = vpop.f32.mrf.mxu1 }
 0x263   : > { %v10580_v40 = vpop.f32.mrf.mxu0  ;;  %2586 = vmatmul.mubr.bf16.gmra.mxu0 %v9485_v34  ;;  %v2314_v34 = vadd.f32 %v10528_v2, %v1188_v63  ;;  %v1185_v2 = vunpack.c.l.bf16 %v993_v0  ;;  %v995_v63 = vld [vmem:[%s10420_s2 + $0x10] sm:$0xff] }
 0x264   : > { %v10582_v41 = vpop.f32.mrf.mxu1  ;;  %2939 = vmatmul.mubr.bf16.gmra.mxu1 %v9488_v35  ;;  %2595 = vmatprep.mubr.bf16.mxu0 %v9499_v36 }
 0x265   : > { %2948 = vmatprep.mubr.bf16.mxu1 %v9502_v37  ;;  %v10584_v42 = vpop.f32.mrf.mxu0  ;;  %v2310_v37 = vadd.f32 %v10520_v58, %v1186_v13  ;;  %v1190_v13 = vunpack.c.h.bf16 %v995_v63 }
 0x266   : > { %v10586_v43 = vpop.f32.mrf.mxu1 }
 0x267   : > { %v10588_v44 = vpop.f32.mrf.mxu0  ;;  %v2663_v58 = vadd.f32 %v10522_v59, %v2310_v37  ;;  %v2320_v59 = vadd.f32 %v10536_v6, %v1190_v13  ;;  %v1189_v6 = vunpack.c.l.bf16 %v995_v63 }
 0x268   : > { %v10590_v45 = vpop.f32.mrf.mxu1 }
 0x269   : > { %v10592_v50 = vpop.f32.mrf.mxu0 }
 0x26a   : > { %v10594_v51 = vpop.f32.mrf.mxu1 }
 0x26b   : > { %v10596_v52 = vpop.f32.mrf.mxu0  ;;  %2596 = vmatmul.mubr.bf16.gmra.mxu0 %v9497_v46  ;;  %v1187_v46 = vunpack.c.l.bf16 %v994_v54 }
 0x26c   : > { %v10598_v53 = vpop.f32.mrf.mxu1  ;;  %2949 = vmatmul.mubr.bf16.gmra.mxu1 %v9500_v47  ;;  %2605 = vmatprep.mubr.bf16.mxu0 %v9505_v48  ;;  %v996_v47 = vld [vmem:[%s10420_s2 + $0x18] sm:$0xff] }
 0x26d   : > { %16205 = vst [vmem:[#allocation36_spill] sm:$0xff] %v10598_v53  ;;  %2958 = vmatprep.mubr.bf16.mxu1 %v9508_v49  ;;  %v10601_v55 = vpop.f32.mrf.mxu0  ;;  %v2667_v53 = vadd.f32 %v10530_v3, %v2314_v34  ;;  %v2312_v54 = vadd.f32 %v10524_v60, %v1187_v46  ;;  %v2308_v34 = vadd.f32 %v10516_v56, %v1185_v2  ;;  %v1191_v37 = vunpack.c.l.bf16 %v996_v47  ;;  %v998_v46 = vld [vmem:[%s10420_s2 + $0x28] sm:$0xff]  ;;  %v997_v2 = vld [vmem:[%s10420_s2 + $0x20] sm:$0xff] }
 0x26e   : > { %v10603_v62 = vpop.f32.mrf.mxu1 }
 0x26f   : > { %v10606_v1 = vpop.f32.mrf.mxu0  ;;  %v2980_v3 = vpack.c.bf16 %v2667_v53, %v2663_v58  ;;  %v2665_v60 = vadd.f32 %v10526_v61, %v2312_v54  ;;  %v1194_v58 = vunpack.c.h.bf16 %v997_v2  ;;  %v2322_v54 = vadd.f32 %v10540_v8, %v1191_v37  ;;  %v10676_v37 = vld [vmem:[%s10420_s2 + $0x38] sm:$0xff] }
 0x270   : > { %v10608_v10 = vpop.f32.mrf.mxu1 }
 0x271   : > { %16206 = vst [vmem:[#allocation37_spill] sm:$0xff] %v10608_v10  ;;  %v10610_v24 = vpop.f32.mrf.mxu0  ;;  %v1192_v10 = vunpack.c.h.bf16 %v996_v47  ;;  %v2673_v47 = vadd.f32 %v10538_v7, %v2320_v59  ;;  %v2330_v8 = vadd.f32 %v10552_v18, %v1194_v58  ;;  %v1193_v58 = vunpack.c.l.bf16 %v997_v2  ;;  %v9536_v2 = vld [vmem:[%s10428_s16 + $0x150] ss:$8 sps:$4 sm:$0xff]  }
 0x272   : > { %v10612_v25 = vpop.f32.mrf.mxu1 }
 0x273   : > { %v10615_v35 = vpop.f32.mrf.mxu0  ;;  %2606 = vmatmul.mubr.bf16.gmra.mxu0 %v9503_v11  ;;  %v2324_v0 = vadd.f32 %v10544_v14, %v1192_v10  ;;  %v1196_v10 = vunpack.c.h.bf16 %v998_v46 }
 0x274   : > { %16207 = vst [vmem:[#allocation38_spill] sm:$0xff] %v10615_v35  ;;  %v10617_v36 = vpop.f32.mrf.mxu1  ;;  %2959 = vmatmul.mubr.bf16.gmra.mxu1 %v9506_v12  ;;  %2615 = vmatprep.mubr.bf16.mxu0 %v9517_v22  ;;  %v9515_v12 = vld [vmem:[#allocation6 + $0x3e0] ss:$16 sps:$4 sm:$0xff]  }
 0x275   : > { %16208 = vst [vmem:[#allocation39_spill] sm:$0xff] %v10617_v36  ;;  %2968 = vmatprep.mubr.bf16.mxu1 %v9520_v23  ;;  %v10621_v48 = vpop.f32.mrf.mxu0  ;;  %v9518_v36 = vld [vmem:[#allocation6 + $0x3e8] ss:$16 sps:$4 sm:$0xff]   ;;  %v2677_v14 = vadd.f32 %v10546_v15, %v2324_v0  ;;  %v2334_v63 = vadd.f32 %v10560_v26, %v1196_v10  ;;  %v2675_v26 = vadd.f32 %v10542_v9, %v2322_v54  ;;  %v9535_v9 = vld [vmem:[%s10428_s16 + $0x54] ss:$8 sps:$4 sm:$0xff]  }
 0x276   : > { %v10623_v49 = vpop.f32.mrf.mxu1  ;;  %v9521_v0 = vld [vmem:[%s10428_s16 + $0x70] ss:$8 sps:$4 sm:$0xff]   ;;  %v9527_v10 = vld [vmem:[%s10428_s16 + $0x60] ss:$8 sps:$4 sm:$0xff]  }
 0x277   : > { %v10627_v35 = vpop.f32.mrf.mxu0  ;;  %v2687_v18 = vadd.f32 %v10562_v27, %v2334_v63  ;;  %v2683_v27 = vadd.f32 %v10554_v19, %v2330_v8  ;;  %v9541_v19 = vld [vmem:[%s10428_s16 + $0x44] ss:$8 sps:$4 sm:$0xff]  }
 0x278   : > { %16209 = vst [vmem:[#allocation40_spill] sm:$0xff] %v10627_v35  ;;  %v10629_v11 = vpop.f32.mrf.mxu1  ;;  %v9544_v8 = vld [vmem:[%s10428_s16 + $0x144] ss:$8 sps:$4 sm:$0xff]  }
 0x279   : > { %16210 = vst [vmem:[#allocation41_spill] sm:$0xff] %v10629_v11  ;;  %v10633_v22 = vpop.f32.mrf.mxu0 }
 0x27a   : > { %v10635_v23 = vpop.f32.mrf.mxu1 }
 0x27b   : > { %v10639_v35 = vpop.f32.mrf.mxu0  ;;  %2616 = vmatmul.mubr.bf16.gmra.mxu0 %v9515_v12 }
 0x27c   : > { %16211 = vst [vmem:[#allocation42_spill] sm:$0xff] %v10639_v35  ;;  %v10641_v11 = vpop.f32.mrf.mxu1  ;;  %2969 = vmatmul.mubr.bf16.gmra.mxu1 %v9518_v36  ;;  %3416 = vmatprep.mubr.bf16.mxu0 %v2980_v3  ;;  %v2661_v36 = vadd.f32 %v10518_v57, %v2308_v34  ;;  %v9524_v57 = vld [vmem:[%s10428_s16 + $0x170] ss:$8 sps:$4 sm:$0xff]   ;;  %v2982_v34 = vpack.c.bf16 %v2677_v14, %v2673_v47  ;;  %v9532_v35 = vld [vmem:[%s10428_s16 + $0x164] ss:$8 sps:$4 sm:$0xff]  }
 0x27d   : > { %16212 = vst [vmem:[#allocation43_spill] sm:$0xff] %v10641_v11  ;;  %3769 = vmatprep.mubr.bf16.mxu1 %v2980_v3  ;;  %v10646_v53 = vpop.f32.mrf.mxu0  ;;  %v9529_v11 = vld [vmem:[%s10428_s16 + $0x64] ss:$8 sps:$4 sm:$0xff]  }
 0x27e   : > { %v10648_v56 = vpop.f32.mrf.mxu1  ;;  %v2979_v13 = vpack.c.bf16 %v2665_v60, %v2661_v36  ;;  %v1195_v60 = vunpack.c.l.bf16 %v998_v46  ;;  %v9530_v36 = vld [vmem:[%s10428_s16 + $0x160] ss:$8 sps:$4 sm:$0xff]   ;;  %v9538_v46 = vld [vmem:[%s10428_s16 + $0x154] ss:$8 sps:$4 sm:$0xff]  }
 0x27f   : > { %v10653_v12 = vpop.f32.mrf.mxu0 }
 0x280   : > { %v10655_v61 = vpop.f32.mrf.mxu1 }
 0x281   : > { %16213 = vst [vmem:[#allocation44_spill] sm:$0xff] %v10655_v61  ;;  %v10659_v3 = vpop.f32.mrf.mxu0  ;;  %v2318_v61 = vadd.f32 %v10532_v4, %v1189_v6  ;;  %v1200_v6 = vunpack.c.h.bf16 %v10676_v37 }
 0x282   : > { %v10661_v15 = vpop.f32.mrf.mxu1 }
 0x283   : > { %v10669_v7 = vpop.f32.mrf.mxu0  ;;  %3417 = vmatmul.mubr.bf16.vlgmr.msra.gmra.mxu0 %v2979_v13  ;;  %v2671_v47 = vadd.f32 %v10534_v5, %v2318_v61  ;;  %v9533_v5 = vld [vmem:[%s10428_s16 + $0x50] ss:$8 sps:$4 sm:$0xff]   ;;  %v2984_v61 = vpack.c.bf16 %v2687_v18, %v2683_v27  ;;  %v10717_v18 = vld [vmem:[%s10420_s2 + $0x48] sm:$0xff] }
 0x284   : > { %v10671_v59 = vpop.f32.mrf.mxu1  ;;  %3770 = vmatmul.mubr.bf16.vlgmr.msra.gmra.mxu1 %v2979_v13  ;;  %3426 = vmatprep.mubr.bf16.mxu0 %v2982_v34  ;;  %v10690_v13 = vld [vmem:[%s10420_s2 + $0x30] sm:$0xff] }
 0x285   : > { %16214 = vst [vmem:[#allocation45_spill] sm:$0xff] %v10671_v59  ;;  %3779 = vmatprep.mubr.bf16.mxu1 %v2982_v34  ;;  %4795 = vmatpush1.bf16.msra.mxu0 %v9521_v0  ;;  %v10678_v4 = vpop.f32.mrf.mxu0  ;;  %v2344_v59 = vadd.f32 %v10576_v38, %v1200_v6  ;;  %v1197_v27 = vunpack.c.l.bf16 %v10690_v13 }
 0x286   : > { %5148 = vmatpush1.bf16.msra.mxu1 %v9524_v57  ;;  %v10680_v14 = vpop.f32.mrf.mxu1  ;;  %4796 = vmatprep.subr.bf16.mxu0 %v9529_v11  ;;  %v1198_v11 = vunpack.c.h.bf16 %v10690_v13  ;;  %v2332_v57 = vadd.f32 %v10556_v20, %v1195_v60  ;;  %v9545_v13 = vld [vmem:[%s10428_s16 + $0x30] ss:$8 sps:$4 sm:$0xff]  }
 0x287   : > { %5149 = vmatprep.subr.bf16.mxu1 %v9532_v35  ;;  %v10692_v54 = vpop.f32.mrf.mxu0  ;;  %v2981_v35 = vpack.c.bf16 %v2675_v26, %v2671_v47  ;;  %v2328_v26 = vadd.f32 %v10548_v16, %v1193_v58  ;;  %v1204_v47 = vunpack.c.h.bf16 %v10717_v18 }
 0x288   : > { %v10694_v0 = vpop.f32.mrf.mxu1  ;;  %v2685_v38 = vadd.f32 %v10558_v21, %v2332_v57  ;;  %v9547_v21 = vld [vmem:[%s10428_s16 + $0x34] ss:$8 sps:$4 sm:$0xff]  }
 0x289   : > { %v10699_v34 = vpop.f32.mrf.mxu0  ;;  %4797 = vmatpush1.bf16.msra.mxu0 %v9527_v10  ;;  %v2340_v10 = vadd.f32 %v10568_v30, %v1198_v11  ;;  %v2697_v30 = vadd.f32 %v10578_v39, %v2344_v59  ;;  %v2681_v58 = vadd.f32 %v10550_v17, %v2328_v26  ;;  %v10732_v11 = vld [vmem:[%s10420_s2 + $0x40] sm:$0xff]  ;;  %v2354_v26 = vadd.f32 %v10592_v50, %v1204_v47 }
 0x28a   : > { %v10701_v63 = vpop.f32.mrf.mxu1  ;;  %5150 = vmatpush1.bf16.msra.mxu1 %v9530_v36  ;;  %4798 = vmatprep.subr.bf16.mxu0 %v9535_v9  ;;  %v1199_v36 = vunpack.c.l.bf16 %v10676_v37  ;;  %v9539_v9 = vld [vmem:[%s10428_s16 + $0x40] ss:$8 sps:$4 sm:$0xff]   ;;  %v9550_v37 = vld [vmem:[%s10428_s16 + $0x134] ss:$8 sps:$4 sm:$0xff]   ;;  %v1202_v59 = vunpack.c.h.bf16 %v10732_v11 }
 0x28b   : > { %5151 = vmatprep.subr.bf16.mxu1 %v9538_v46  ;;  %v10709_v20 = vpop.f32.mrf.mxu0  ;;  %3427 = vmatmul.mubr.bf16.gmra.mxu0 %v2981_v35  ;;  %v9542_v46 = vld [vmem:[%s10428_s16 + $0x140] ss:$8 sps:$4 sm:$0xff]   ;;  %v2693_v39 = vadd.f32 %v10570_v31, %v2340_v10  ;;  %v9553_v31 = vld [vmem:[%s10428_s16 + $0x24] ss:$8 sps:$4 sm:$0xff]  }
 0x28c   : > { %v10711_v60 = vpop.f32.mrf.mxu1  ;;  %3780 = vmatmul.mubr.bf16.gmra.mxu1 %v2981_v35  ;;  %3436 = vmatprep.mubr.bf16.mxu0 %v2984_v61  ;;  %v9556_v10 = vld [vmem:[%s10428_s16 + $0x124] ss:$8 sps:$4 sm:$0xff]  }
 0x28d   : > { %3789 = vmatprep.mubr.bf16.mxu1 %v2984_v61  ;;  %v10719_v16 = vpop.f32.mrf.mxu0  ;;  %4799 = vmatpush1.bf16.msra.mxu0 %v9533_v5  ;;  %v2983_v5 = vpack.c.bf16 %v2685_v38, %v2681_v58  ;;  %v2338_v38 = vadd.f32 %v10564_v28, %v1197_v27 }
 0x28e   : > { %v10721_v6 = vpop.f32.mrf.mxu1  ;;  %5152 = vmatpush1.bf16.msra.mxu1 %v9536_v2  ;;  %4800 = vmatprep.subr.bf16.mxu0 %v9541_v19  ;;  %v2342_v2 = vadd.f32 %v10572_v32, %v1199_v36  ;;  %v9548_v19 = vld [vmem:[%s10428_s16 + $0x130] ss:$8 sps:$4 sm:$0xff]  }
 0x28f   : > { %5153 = vmatprep.subr.bf16.mxu1 %v9544_v8  ;;  %v10734_v35 = vpop.f32.mrf.mxu0  ;;  %v2986_v8 = vpack.c.bf16 %v2697_v30, %v2693_v39  ;;  %v10759_v30 = vld [vmem:[%s10420_s2 + $0x58] sm:$0xff]  ;;  %v2691_v27 = vadd.f32 %v10566_v29, %v2338_v38  ;;  %v1201_v39 = vunpack.c.l.bf16 %v10732_v11 }
 0x290   : > { %v10736_v57 = vpop.f32.mrf.mxu1  ;;  %v2695_v50 = vadd.f32 %v10574_v33, %v2342_v2  ;;  %v1208_v58 = vunpack.c.h.bf16 %v10759_v30  ;;  %v9559_v33 = vld [vmem:[%s10428_s16 + $0x14] ss:$8 sps:$4 sm:$0xff]   ;;  %v9557_v11 = vld [vmem:[%s10428_s16 + $0x10] ss:$8 sps:$4 sm:$0xff]  }
 0x291   : > { %v10741_v61 = vpop.f32.mrf.mxu0  ;;  %4801 = vmatpush1.bf16.msra.mxu0 %v9539_v9  ;;  %v2350_v9 = vadd.f32 %v10584_v42, %v1202_v59  ;;  %v2707_v42 = vadd.f32 %v10594_v51, %v2354_v26  ;;  %v10774_v59 = vld [vmem:[%s10420_s2 + $0x50] sm:$0xff] }
 0x292   : > { %v10743_v17 = vpop.f32.mrf.mxu1  ;;  %5154 = vmatpush1.bf16.msra.mxu1 %v9542_v46  ;;  %4802 = vmatprep.subr.bf16.mxu0 %v9547_v21  ;;  %v1203_v46 = vunpack.c.l.bf16 %v10717_v18  ;;  %v9551_v21 = vld [vmem:[%s10428_s16 + $0x20] ss:$8 sps:$4 sm:$0xff]   ;;  %v9562_v18 = vld [vmem:[%s10428_s16 + $0x114] ss:$8 sps:$4 sm:$0xff]   ;;  %v2364_v38 = vadd.f32 %v10610_v24, %v1208_v58 }
 0x293   : > { %5155 = vmatprep.subr.bf16.mxu1 %v9550_v37  ;;  %v10751_v32 = vpop.f32.mrf.mxu0  ;;  %3437 = vmatmul.mubr.bf16.gmra.mxu0 %v2983_v5  ;;  %v9554_v37 = vld [vmem:[%s10428_s16 + $0x120] ss:$8 sps:$4 sm:$0xff]   ;;  %v2703_v51 = vadd.f32 %v10586_v43, %v2350_v9  ;;  %v9565_v43 = vld [vmem:[%s10428_s16 + $0x4] ss:$8 sps:$4 sm:$0xff]  }
 0x294   : > { %v10753_v36 = vpop.f32.mrf.mxu1  ;;  %3790 = vmatmul.mubr.bf16.gmra.mxu1 %v2983_v5  ;;  %3446 = vmatprep.mubr.bf16.mxu0 %v2986_v8  ;;  %v9568_v9 = vld [vmem:[%s10428_s16 + $0x104] ss:$8 sps:$4 sm:$0xff]  }
 0x295   : > { %3799 = vmatprep.mubr.bf16.mxu1 %v2986_v8  ;;  %v10761_v28 = vpop.f32.mrf.mxu0  ;;  %4803 = vmatpush1.bf16.msra.mxu0 %v9545_v13  ;;  %v1206_v13 = vunpack.c.h.bf16 %v10774_v59  ;;  %v2352_v8 = vadd.f32 %v10588_v44, %v1203_v46 }
 0x296   : > { %v10763_v47 = vpop.f32.mrf.mxu1  ;;  %5156 = vmatpush1.bf16.msra.mxu1 %v9548_v19  ;;  %4804 = vmatprep.subr.bf16.mxu0 %v9553_v31  ;;  %v2985_v19 = vpack.c.bf16 %v2695_v50, %v2691_v27  ;;  %v9560_v31 = vld [vmem:[%s10428_s16 + $0x110] ss:$8 sps:$4 sm:$0xff]   ;;  %v2348_v50 = vadd.f32 %v10580_v40, %v1201_v39 }
 0x297   : > { %5157 = vmatprep.subr.bf16.mxu1 %v9556_v10  ;;  %v10776_v5 = vpop.f32.mrf.mxu0  ;;  %v2988_v10 = vpack.c.bf16 %v2707_v42, %v2703_v51  ;;  %v2705_v24 = vadd.f32 %v10590_v45, %v2352_v8  ;;  %v10801_v42 = vld [vmem:[%s10420_s2 + $0x68] sm:$0xff]  ;;  %v9571_v45 = vld [vmem:[%s10428_s16 + $0xf4] ss:$8 sps:$4 sm:$0xff]   ;;  %v1205_v51 = vunpack.c.l.bf16 %v10774_v59  ;;  %v9572_v59 = vld [vmem:[%s10428_s16 + $0x1f0] ss:$8 sps:$4 sm:$0xff]  }
 0x298   : > { %v10778_v2 = vpop.f32.mrf.mxu1  ;;  %v1212_v27 = vunpack.c.h.bf16 %v10801_v42  ;;  %v2701_v39 = vadd.f32 %v10582_v41, %v2348_v50  ;;  %v9569_v41 = vld [vmem:[%s10428_s16 + $0xf0] ss:$8 sps:$4 sm:$0xff]  }
 0x299   : > { %v10783_v26 = vpop.f32.mrf.mxu0  ;;  %4805 = vmatpush1.bf16.msra.mxu0 %v9551_v21  ;;  %v2360_v21 = vadd.f32 %v10601_v55, %v1206_v13  ;;  %v2717_v55 = vadd.f32 %v10612_v25, %v2364_v38  ;;  %v1005_v13 = vld [vmem:[%s10420_s2 + $0x60] sm:$0xff] }
 0x29a   : > { %v10785_v29 = vpop.f32.mrf.mxu1  ;;  %5158 = vmatpush1.bf16.msra.mxu1 %v9554_v37  ;;  %4806 = vmatprep.subr.bf16.mxu0 %v9559_v33  ;;  %v1207_v37 = vunpack.c.l.bf16 %v10759_v30  ;;  %v9563_v33 = vld [vmem:[%s10428_s16] ss:$8 sps:$4 sm:$0xff]   ;;  %v9574_v30 = vld [vmem:[%s10428_s16 + $0x1f4] ss:$8 sps:$4 sm:$0xff]   ;;  %v2374_v50 = vadd.f32 %v10633_v22, %v1212_v27 }
 0x29b   : > { %5159 = vmatprep.subr.bf16.mxu1 %v9562_v18  ;;  %v10793_v44 = vpop.f32.mrf.mxu0  ;;  %3447 = vmatmul.mubr.bf16.gmra.mxu0 %v2985_v19  ;;  %v9566_v18 = vld [vmem:[%s10428_s16 + $0x100] ss:$8 sps:$4 sm:$0xff]   ;;  %v2713_v25 = vadd.f32 %v10603_v62, %v2360_v21  ;;  %v9580_v62 = vld [vmem:[%s10428_s16 + $0x1e4] ss:$8 sps:$4 sm:$0xff]   ;;  %v2358_v21 = vadd.f32 %v10596_v52, %v1205_v51  ;;  %v16218_v22 = vld [vmem:[#allocation37_spill] sm:$0xff] }
 0x29c   : > { %v10795_v46 = vpop.f32.mrf.mxu1  ;;  %3800 = vmatmul.mubr.bf16.gmra.mxu1 %v2985_v19  ;;  %3456 = vmatprep.mubr.bf16.mxu0 %v2988_v10  ;;  %v9583_v51 = vld [vmem:[%s10428_s16 + $0xd4] ss:$8 sps:$4 sm:$0xff]  }
 0x29d   : > { %16215 = vst [vmem:[#allocation46_spill] sm:$0xff] %v10795_v46  ;;  %3809 = vmatprep.mubr.bf16.mxu1 %v2988_v10  ;;  %v10803_v40 = vpop.f32.mrf.mxu0  ;;  %4807 = vmatpush1.bf16.msra.mxu0 %v9557_v11  ;;  %v1210_v11 = vunpack.c.h.bf16 %v1005_v13  ;;  %v2362_v10 = vadd.f32 %v10606_v1, %v1207_v37  ;;  %v9577_v46 = vld [vmem:[%s10428_s16 + $0xe4] ss:$8 sps:$4 sm:$0xff]  }
 0x29e   : > { %v10805_v58 = vpop.f32.mrf.mxu1  ;;  %5160 = vmatpush1.bf16.msra.mxu1 %v9560_v31  ;;  %4808 = vmatprep.subr.bf16.mxu0 %v9565_v43  ;;  %v2987_v31 = vpack.c.bf16 %v2705_v24, %v2701_v39 }
 0x29f   : > { %5161 = vmatprep.subr.bf16.mxu1 %v9568_v9  ;;  %v10816_v19 = vpop.f32.mrf.mxu0  ;;  %v2990_v9 = vpack.c.bf16 %v2717_v55, %v2713_v25  ;;  %v2370_v37 = vadd.f32 %v10621_v48, %v1210_v11  ;;  %v1008_v55 = vld [vmem:[%s10420_s2 + $0x78] sm:$0xff]  ;;  %v2727_v48 = vadd.f32 %v10635_v23, %v2374_v50  ;;  %v16219_v25 = vld [vmem:[#allocation36_spill] sm:$0xff]  ;;  %v1209_v11 = vunpack.c.l.bf16 %v1005_v13 }
 0x2a0   : > { %v10818_v8 = vpop.f32.mrf.mxu1  ;;  %v1216_v39 = vunpack.c.h.bf16 %v1008_v55  ;;  %v16221_v23 = vld [vmem:[#allocation40_spill] sm:$0xff] }
 0x2a1   : > { %v10822_v38 = vpop.f32.mrf.mxu0  ;;  %4809 = vmatpush1.bf16.msra.mxu0 %v9563_v33  ;;  %v2715_v33 = vadd.f32 %v16218_v22, %v2362_v10  ;;  %v9584_v13 = vld [vmem:[%s10428_s16 + $0x1d0] ss:$8 sps:$4 sm:$0xff]  }
 0x2a2   : > { %v10824_v43 = vpop.f32.mrf.mxu1  ;;  %5162 = vmatpush1.bf16.msra.mxu1 %v9566_v18  ;;  %4810 = vmatprep.subr.bf16.mxu0 %v9571_v45  ;;  %v1211_v18 = vunpack.c.l.bf16 %v10801_v42  ;;  %v9575_v45 = vld [vmem:[%s10428_s16 + $0xe0] ss:$8 sps:$4 sm:$0xff]   ;;  %v2711_v42 = vadd.f32 %v16219_v25, %v2358_v21  ;;  %v9581_v21 = vld [vmem:[%s10428_s16 + $0xd0] ss:$8 sps:$4 sm:$0xff]  }
 0x2a3   : > { %5163 = vmatprep.subr.bf16.mxu1 %v9574_v30  ;;  %v10832_v1 = vpop.f32.mrf.mxu0  ;;  %3457 = vmatmul.mubr.bf16.gmra.mxu0 %v2987_v31  ;;  %v9578_v30 = vld [vmem:[%s10428_s16 + $0x1e0] ss:$8 sps:$4 sm:$0xff]  }
 0x2a4   : > { %16216 = vst [vmem:[#allocation47_spill] sm:$0xff] %v10832_v1  ;;  %v10834_v24 = vpop.f32.mrf.mxu1  ;;  %3810 = vmatmul.mubr.bf16.gmra.mxu1 %v2987_v31  ;;  %3466 = vmatprep.mubr.bf16.mxu0 %v2990_v9  ;;  %v1007_v31 = vld [vmem:[%s10420_s2 + $0x70] sm:$0xff]  ;;  %v2372_v50 = vadd.f32 %v16221_v23, %v1211_v18  ;;  %v2384_v1 = vadd.f32 %v10659_v3, %v1216_v39 }
 0x2a5   : > { %16217 = vst [vmem:[#allocation48_spill] sm:$0xff] %v10834_v24  ;;  %3819 = vmatprep.mubr.bf16.mxu1 %v2990_v9  ;;  %v10840_v27 = vpop.f32.mrf.mxu0  ;;  %4811 = vmatpush2.bf16.msra.mxu0 %v9569_v41  ;;  %v9586_v41 = vld [vmem:[%s10428_s16 + $0x1d4] ss:$8 sps:$4 sm:$0xff]   ;;  %v1214_v22 = vunpack.c.h.bf16 %v1007_v31  ;;  %v2989_v24 = vpack.c.bf16 %v2715_v33, %v2711_v42  ;;  %v1010_v42 = vld [vmem:[%s10420_s2 + $0x88] sm:$0xff] }
 0x2a6   : > { %v10842_v52 = vpop.f32.mrf.mxu1  ;;  %5164 = vmatpush2.bf16.msra.mxu1 %v9572_v59  ;;  %4812 = vmatprep.subr.bf16.mxu0 %v9577_v46  ;;  %v2723_v59 = vadd.f32 %v10623_v49, %v2370_v37 }
 0x2a7   : > { %5165 = vmatprep.subr.bf16.mxu1 %v9580_v62  ;;  %v10850_v10 = vpop.f32.mrf.mxu0  ;;  %v2380_v18 = vadd.f32 %v10646_v53, %v1214_v22 }
 0x2a8   : > { %v10852_v9 = vpop.f32.mrf.mxu1  ;;  %v2992_v25 = vpack.c.bf16 %v2727_v48, %v2723_v59  ;;  %v1215_v48 = vunpack.c.l.bf16 %v1008_v55  ;;  %v1009_v59 = vld [vmem:[%s10420_s2 + $0x80] sm:$0xff] }
 0x2a9   : > { %16220 = vst [vmem:[#allocation37_spill] sm:$0xff] %v10852_v9  ;;  %v10857_v46 = vpop.f32.mrf.mxu0  ;;  %4813 = vmatpush2.bf16.msra.mxu0 %v9575_v45  ;;  %v16222_v9 = vld [vmem:[#allocation38_spill] sm:$0xff]  ;;  %v16224_v45 = vld [vmem:[#allocation41_spill] sm:$0xff]  ;;  %v2733_v55 = vadd.f32 %v10648_v56, %v2380_v18  ;;  %v1218_v23 = vunpack.c.h.bf16 %v1009_v59  ;;  %v16229_v18 = vld [vmem:[#allocation44_spill] sm:$0xff] }
 0x2aa   : > { %v10859_v62 = vpop.f32.mrf.mxu1  ;;  %5166 = vmatpush2.bf16.msra.mxu1 %v9578_v30  ;;  %4814 = vmatprep.subr.bf16.mxu0 %v9583_v51  ;;  %v2368_v49 = vadd.f32 %v16222_v9, %v1209_v11  ;;  %v2725_v30 = vadd.f32 %v16224_v45, %v2372_v50  ;;  %v2737_v51 = vadd.f32 %v10661_v15, %v2384_v1  ;;  %v1220_v11 = vunpack.c.h.bf16 %v1010_v42  ;;  %v16225_v9 = vld [vmem:[#allocation39_spill] sm:$0xff] }
 0x2ab   : > { %5167 = vmatprep.subr.bf16.mxu1 %v9586_v41  ;;  %v10865_v37 = vpop.f32.mrf.mxu0  ;;  %3467 = vmatmul.mubr.bf16.gmra.mxu0 %v2989_v24 }
 0x2ac   : > { %v10867_v33 = vpop.f32.mrf.mxu1  ;;  %3820 = vmatmul.mubr.bf16.gmra.mxu1 %v2989_v24  ;;  %3476 = vmatprep.mubr.bf16.mxu0 %v2992_v25  ;;  %v2721_v41 = vadd.f32 %v16225_v9, %v2368_v49  ;;  %v1213_v24 = vunpack.c.l.bf16 %v1007_v31  ;;  %v2994_v15 = vpack.c.bf16 %v2737_v51, %v2733_v55  ;;  %v2394_v1 = vadd.f32 %v10699_v34, %v1220_v11  ;;  %v16226_v31 = vld [vmem:[#allocation42_spill] sm:$0xff]  ;;  %v9589_v55 = vld [vmem:[%s10428_s16 + $0xc4] ss:$8 sps:$4 sm:$0xff]  }
 0x2ad   : > { %16223 = vst [vmem:[#allocation36_spill] sm:$0xff] %v10867_v33  ;;  %3829 = vmatprep.mubr.bf16.mxu1 %v2992_v25  ;;  %v10872_v3 = vpop.f32.mrf.mxu0  ;;  %4815 = vmatpush2.bf16.msra.mxu0 %v9581_v21  ;;  %v2382_v25 = vadd.f32 %v10653_v12, %v1215_v48  ;;  %v2390_v12 = vadd.f32 %v10678_v4, %v1218_v23  ;;  %v1219_v34 = vunpack.c.l.bf16 %v1010_v42  ;;  %v1012_v48 = vld [vmem:[%s10420_s2 + $0x98] sm:$0xff]  ;;  %v1217_v4 = vunpack.c.l.bf16 %v1009_v59  ;;  %v1011_v23 = vld [vmem:[%s10420_s2 + $0x90] sm:$0xff]  ;;  %v9592_v42 = vld [vmem:[%s10428_s16 + $0x1c4] ss:$8 sps:$4 sm:$0xff]  }
 0x2ae   : > { %v10874_v39 = vpop.f32.mrf.mxu1  ;;  %5168 = vmatpush2.bf16.msra.mxu1 %v9584_v13  ;;  %v2991_v50 = vpack.c.bf16 %v2725_v30, %v2721_v41  ;;  %v2378_v49 = vadd.f32 %v16226_v31, %v1213_v24  ;;  %v2747_v9 = vadd.f32 %v10701_v63, %v2394_v1  ;;  %v1224_v41 = vunpack.c.h.bf16 %v1012_v48  ;;  %v9587_v24 = vld [vmem:[%s10428_s16 + $0xc0] ss:$8 sps:$4 sm:$0xff]   ;;  %4816 = vmatprep.subr.bf16.mxu0 %v9589_v55 }
 0x2af   : > { %v10879_v53 = vpop.f32.mrf.mxu0  ;;  %v2735_v30 = vadd.f32 %v16229_v18, %v2382_v25  ;;  %v16231_v31 = vld [vmem:[#allocation43_spill] sm:$0xff]  ;;  %v2743_v25 = vadd.f32 %v10680_v14, %v2390_v12  ;;  %v1222_v18 = vunpack.c.h.bf16 %v1011_v23  ;;  %v2392_v63 = vadd.f32 %v10692_v54, %v1219_v34  ;;  %5169 = vmatprep.subr.bf16.mxu1 %v9592_v42 }
 0x2b0   : > { %v10881_v22 = vpop.f32.mrf.mxu1  ;;  %v1223_v12 = vunpack.c.l.bf16 %v1012_v48  ;;  %v1221_v55 = vunpack.c.l.bf16 %v1011_v23 }
 0x2b1   : > { %v10885_v21 = vpop.f32.mrf.mxu0  ;;  %4817 = vmatpush2.bf16.msra.mxu0 %v9587_v24  ;;  %v2996_v59 = vpack.c.bf16 %v2747_v9, %v2743_v25  ;;  %v2400_v54 = vadd.f32 %v10719_v16, %v1222_v18 }
 0x2b2   : > { %v10887_v13 = vpop.f32.mrf.mxu1  ;;  %v2402_v42 = vadd.f32 %v10734_v35, %v1223_v12  ;;  %v2398_v23 = vadd.f32 %v10709_v20, %v1221_v55  ;;  %v1015_v55 = vld [vmem:[%s10420_s2 + $0xb0] sm:$0xff] }
 0x2b3   : > { %v10891_v45 = vpop.f32.mrf.mxu0  ;;  %3477 = vmatmul.mubr.bf16.gmra.mxu0 %v2991_v50 }
 0x2b4   : > { %16227 = vst [vmem:[#allocation40_spill] sm:$0xff] %v10891_v45  ;;  %v10893_v56 = vpop.f32.mrf.mxu1  ;;  %3830 = vmatmul.mubr.bf16.gmra.mxu1 %v2991_v50  ;;  %3486 = vmatprep.mubr.bf16.mxu0 %v2994_v15  ;;  %v9590_v50 = vld [vmem:[%s10428_s16 + $0x1c0] ss:$8 sps:$4 sm:$0xff]  }
 0x2b5   : > { %16228 = vst [vmem:[#allocation38_spill] sm:$0xff] %v10893_v56  ;;  %3839 = vmatprep.mubr.bf16.mxu1 %v2994_v15  ;;  %v10898_v51 = vpop.f32.mrf.mxu0  ;;  %v2731_v56 = vadd.f32 %v16231_v31, %v2378_v49  ;;  %v2404_v49 = vadd.f32 %v10741_v61, %v1224_v41  ;;  %5170 = vmatpush2.bf16.msra.mxu1 %v9590_v50  ;;  %v16233_v41 = vld [vmem:[#allocation45_spill] sm:$0xff]  ;;  %v1013_v50 = vld [vmem:[%s10420_s2 + $0xa0] sm:$0xff] }
 0x2b6   : > { %v10900_v11 = vpop.f32.mrf.mxu1  ;;  %v2388_v31 = vadd.f32 %v10669_v7, %v1217_v4  ;;  %v2753_v4 = vadd.f32 %v10721_v6, %v2400_v54 }
 0x2b7   : > { %16230 = vst [vmem:[#allocation41_spill] sm:$0xff] %v10900_v11  ;;  %v10908_v15 = vpop.f32.mrf.mxu0  ;;  %v2993_v11 = vpack.c.bf16 %v2735_v30, %v2731_v56  ;;  %v2745_v56 = vadd.f32 %v10694_v0, %v2392_v63  ;;  %v1014_v30 = vld [vmem:[%s10420_s2 + $0xa8] sm:$0xff]  ;;  %v2757_v7 = vadd.f32 %v10743_v17, %v2404_v49  ;;  %v1226_v0 = vunpack.c.h.bf16 %v1013_v50 }
 0x2b8   : > { %v10910_v45 = vpop.f32.mrf.mxu1  ;;  %v1228_v9 = vunpack.c.h.bf16 %v1014_v30  ;;  %v2741_v24 = vadd.f32 %v16233_v41, %v2388_v31  ;;  %v2755_v49 = vadd.f32 %v10736_v57, %v2402_v42  ;;  %v1016_v31 = vld [vmem:[%s10420_s2 + $0xb8] sm:$0xff] }
 0x2b9   : > { %16232 = vst [vmem:[#allocation39_spill] sm:$0xff] %v10910_v45  ;;  %v10915_v1 = vpop.f32.mrf.mxu0  ;;  %v2998_v17 = vpack.c.bf16 %v2757_v7, %v2753_v4  ;;  %v2410_v35 = vadd.f32 %v10761_v28, %v1226_v0  ;;  %v1232_v12 = vunpack.c.h.bf16 %v1016_v31  ;;  %v9593_v7 = vld [vmem:[%s10428_s16 + $0xb0] ss:$8 sps:$4 sm:$0xff]   ;;  %v1225_v28 = vunpack.c.l.bf16 %v1013_v50  ;;  %v9598_v57 = vld [vmem:[%s10428_s16 + $0x1b4] ss:$8 sps:$4 sm:$0xff]  }
 0x2ba   : > { %v10917_v33 = vpop.f32.mrf.mxu1  ;;  %v2995_v48 = vpack.c.bf16 %v2745_v56, %v2741_v24  ;;  %v2414_v63 = vadd.f32 %v10783_v26, %v1228_v9  ;;  %v1227_v26 = vunpack.c.l.bf16 %v1014_v30  ;;  %v9595_v9 = vld [vmem:[%s10428_s16 + $0xb4] ss:$8 sps:$4 sm:$0xff]   ;;  %v9596_v41 = vld [vmem:[%s10428_s16 + $0x1b0] ss:$8 sps:$4 sm:$0xff]   ;;  %v2751_v24 = vadd.f32 %v10711_v60, %v2398_v23  ;;  %5171 = vmatprep.subr.bf16.mxu1 %v9598_v57 }
 0x2bb   : > { %v10921_v45 = vpop.f32.mrf.mxu0  ;;  %3487 = vmatmul.mubr.bf16.gmra.mxu0 %v2993_v11  ;;  %v2763_v30 = vadd.f32 %v10763_v47, %v2410_v35  ;;  %4818 = vmatprep.subr.bf16.mxu0 %v9595_v9  ;;  %v2424_v50 = vadd.f32 %v10822_v38, %v1232_v12  ;;  %v2408_v23 = vadd.f32 %v10751_v32, %v1225_v28  ;;  %v1229_v9 = vunpack.c.l.bf16 %v1015_v55 }
 0x2bc   : > { %v10923_v14 = vpop.f32.mrf.mxu1  ;;  %3840 = vmatmul.mubr.bf16.gmra.mxu1 %v2993_v11  ;;  %3496 = vmatprep.mubr.bf16.mxu0 %v2996_v59  ;;  %v2767_v56 = vadd.f32 %v10785_v29, %v2414_v63  ;;  %v2997_v42 = vpack.c.bf16 %v2755_v49, %v2751_v24  ;;  %v2412_v29 = vadd.f32 %v10776_v5, %v1227_v26  ;;  %v1231_v49 = vunpack.c.l.bf16 %v1016_v31  ;;  %v1018_v26 = vld [vmem:[%s10420_s2 + $0xc8] sm:$0xff] }
 0x2bd   : > { %3849 = vmatprep.mubr.bf16.mxu1 %v2996_v59  ;;  %v10928_v34 = vpop.f32.mrf.mxu0  ;;  %4819 = vmatpush2.bf16.msra.mxu0 %v9593_v7  ;;  %v2777_v32 = vadd.f32 %v10824_v43, %v2424_v50  ;;  %v1236_v12 = vunpack.c.h.bf16 %v1018_v26  ;;  %v2761_v7 = vadd.f32 %v10753_v36, %v2408_v23 }
 0x2be   : > { %v10930_v61 = vpop.f32.mrf.mxu1  ;;  %v3000_v60 = vpack.c.bf16 %v2767_v56, %v2763_v30  ;;  %5172 = vmatpush2.bf16.msra.mxu1 %v9596_v41  ;;  %v2765_v35 = vadd.f32 %v10778_v2, %v2412_v29  ;;  %v1017_v41 = vld [vmem:[%s10420_s2 + $0xc0] sm:$0xff]  ;;  %v2422_v57 = vadd.f32 %v10816_v19, %v1231_v49 }
 0x2bf   : > { %v10935_v11 = vpop.f32.mrf.mxu0  ;;  %v1234_v2 = vunpack.c.h.bf16 %v1017_v41  ;;  %v2434_v36 = vadd.f32 %v10857_v46, %v1236_v12  ;;  %v1020_v46 = vld [vmem:[%s10420_s2 + $0xd8] sm:$0xff] }
 0x2c0   : > { %v10937_v16 = vpop.f32.mrf.mxu1  ;;  %v2999_v31 = vpack.c.bf16 %v2765_v35, %v2761_v7  ;;  %v2775_v19 = vadd.f32 %v10818_v8, %v2422_v57  ;;  %v16236_v35 = vld [vmem:[#allocation46_spill] sm:$0xff] }
 0x2c1   : > { %v10941_v25 = vpop.f32.mrf.mxu0  ;;  %v2787_v23 = vadd.f32 %v10859_v62, %v2434_v36  ;;  %v9599_v8 = vld [vmem:[%s10428_s16 + $0xa0] ss:$8 sps:$4 sm:$0xff]  }
 0x2c2   : > { %v10943_v18 = vpop.f32.mrf.mxu1 }
 0x2c3   : > { %v10947_v59 = vpop.f32.mrf.mxu0  ;;  %3497 = vmatmul.mubr.bf16.gmra.mxu0 %v2995_v48 }
 0x2c4   : > { %v10949_v6 = vpop.f32.mrf.mxu1  ;;  %3850 = vmatmul.mubr.bf16.gmra.mxu1 %v2995_v48  ;;  %3506 = vmatprep.mubr.bf16.mxu0 %v2998_v17  ;;  %v1230_v48 = vunpack.c.h.bf16 %v1015_v55  ;;  %v2418_v55 = vadd.f32 %v10793_v44, %v1229_v9  ;;  %v9601_v9 = vld [vmem:[%s10428_s16 + $0xa4] ss:$8 sps:$4 sm:$0xff]  }
 0x2c5   : > { %16234 = vst [vmem:[#allocation42_spill] sm:$0xff] %v10949_v6  ;;  %3859 = vmatprep.mubr.bf16.mxu1 %v2998_v17  ;;  %v10954_v54 = vpop.f32.mrf.mxu0  ;;  %4820 = vmatprep.subr.bf16.mxu0 %v9601_v9  ;;  %v16239_v9 = vld [vmem:[#allocation48_spill] sm:$0xff] }
 0x2c6   : > { %v10956_v20 = vpop.f32.mrf.mxu1  ;;  %v2420_v5 = vadd.f32 %v10803_v40, %v1230_v48  ;;  %v2771_v49 = vadd.f32 %v16236_v35, %v2418_v55  ;;  %4821 = vmatpush2.bf16.msra.mxu0 %v9599_v8  ;;  %v16237_v35 = vld [vmem:[#allocation47_spill] sm:$0xff] }
 0x2c7   : > { %v10964_v4 = vpop.f32.mrf.mxu0 }
 0x2c8   : > { %v10966_v0 = vpop.f32.mrf.mxu1  ;;  %v2773_v28 = vadd.f32 %v10805_v58, %v2420_v5  ;;  %v2430_v58 = vadd.f32 %v10840_v27, %v1234_v2  ;;  %v1240_v5 = vunpack.c.h.bf16 %v1020_v46  ;;  %v1019_v27 = vld [vmem:[%s10420_s2 + $0xd0] sm:$0xff]  ;;  %v9604_v2 = vld [vmem:[%s10428_s16 + $0x1a4] ss:$8 sps:$4 sm:$0xff]  }
 0x2c9   : > { %v10971_v17 = vpop.f32.mrf.mxu0  ;;  %5173 = vmatprep.subr.bf16.mxu1 %v9604_v2  ;;  %v1237_v2 = vunpack.c.l.bf16 %v1019_v27 }
 0x2ca   : > { %v10973_v63 = vpop.f32.mrf.mxu1  ;;  %v3002_v43 = vpack.c.bf16 %v2777_v32, %v2773_v28  ;;  %v1233_v32 = vunpack.c.l.bf16 %v1017_v41  ;;  %v1238_v28 = vunpack.c.h.bf16 %v1019_v27  ;;  %v9602_v41 = vld [vmem:[%s10428_s16 + $0x1a0] ss:$8 sps:$4 sm:$0xff]   ;;  %v2444_v55 = vadd.f32 %v10885_v21, %v1240_v5 }
 0x2cb   : > { %v10977_v6 = vpop.f32.mrf.mxu0  ;;  %3507 = vmatmul.mubr.bf16.gmra.mxu0 %v2997_v42  ;;  %5174 = vmatpush2.bf16.msra.mxu1 %v9602_v41  ;;  %v2438_v27 = vadd.f32 %v10865_v37, %v1237_v2 }
 0x2cc   : > { %v10979_v47 = vpop.f32.mrf.mxu1  ;;  %3860 = vmatmul.mubr.bf16.gmra.mxu1 %v2997_v42  ;;  %3516 = vmatprep.mubr.bf16.mxu0 %v3000_v60 }
 0x2cd   : > { %3869 = vmatprep.mubr.bf16.mxu1 %v3000_v60  ;;  %v10984_v56 = vpop.f32.mrf.mxu0  ;;  %v1235_v60 = vunpack.c.l.bf16 %v1018_v26  ;;  %v2783_v26 = vadd.f32 %v10842_v52, %v2430_v58 }
 0x2ce   : > { %v10986_v38 = vpop.f32.mrf.mxu1 }
 0x2cf   : > { %v10991_v24 = vpop.f32.mrf.mxu0  ;;  %v2432_v57 = vadd.f32 %v10850_v10, %v1235_v60  ;;  %v3004_v36 = vpack.c.bf16 %v2787_v23, %v2783_v26  ;;  %v2440_v10 = vadd.f32 %v10872_v3, %v1238_v28  ;;  %v1239_v23 = vunpack.c.l.bf16 %v1020_v46 }
 0x2d0   : > { %v10993_v40 = vpop.f32.mrf.mxu1 }
 0x2d1   : > { %v10997_v30 = vpop.f32.mrf.mxu0  ;;  %v2793_v28 = vadd.f32 %v10874_v39, %v2440_v10 }
 0x2d2   : > { %v10999_v48 = vpop.f32.mrf.mxu1 }
 0x2d3   : > { %v11003_v42 = vpop.f32.mrf.mxu0  ;;  %3517 = vmatmul.mubr.bf16.gmra.mxu0 %v2999_v31 }
 0x2d4   : > { %v11005_v29 = vpop.f32.mrf.mxu1  ;;  %3870 = vmatmul.mubr.bf16.gmra.mxu1 %v2999_v31  ;;  %3526 = vmatprep.mubr.bf16.mxu0 %v3002_v43  ;;  %v3001_v31 = vpack.c.bf16 %v2775_v19, %v2771_v49  ;;  %v16238_v19 = vld [vmem:[#allocation37_spill] sm:$0xff]  ;;  %v1022_v49 = vld [vmem:[%s10420_s2 + $0xe8] sm:$0xff] }
 0x2d5   : > { %16235 = vst [vmem:[#allocation44_spill] sm:$0xff] %v11005_v29  ;;  %3879 = vmatprep.mubr.bf16.mxu1 %v3002_v43  ;;  %v11010_v50 = vpop.f32.mrf.mxu0  ;;  %v2428_v29 = vadd.f32 %v16237_v35, %v1233_v32  ;;  %v2785_v60 = vadd.f32 %v16238_v19, %v2432_v57  ;;  %v2797_v32 = vadd.f32 %v10887_v13, %v2444_v55  ;;  %v1244_v8 = vunpack.c.h.bf16 %v1022_v49 }
 0x2d6   : > { %v11012_v44 = vpop.f32.mrf.mxu1  ;;  %v1243_v10 = vunpack.c.l.bf16 %v1022_v49  ;;  %v16246_v49 = vld [vmem:[#allocation41_spill] sm:$0xff] }
 0x2d7   : > { %v11017_v12 = vpop.f32.mrf.mxu0  ;;  %v2781_v26 = vadd.f32 %v16239_v9, %v2428_v29  ;;  %v3006_v13 = vpack.c.bf16 %v2797_v32, %v2793_v28  ;;  %v2454_v29 = vadd.f32 %v10915_v1, %v1244_v8  ;;  %v1024_v1 = vld [vmem:[%s10420_s2 + $0xf8] sm:$0xff]  ;;  %v16243_v8 = vld [vmem:[#allocation36_spill] sm:$0xff] }
 0x2d8   : > { %v11019_v7 = vpop.f32.mrf.mxu1  ;;  %v1248_v32 = vunpack.c.h.bf16 %v1024_v1 }
 0x2d9   : > { %v11026_v62 = vpop.f32.mrf.mxu0  ;;  %v3003_v57 = vpack.c.bf16 %v2785_v60, %v2781_v26  ;;  %v2791_v26 = vadd.f32 %v16243_v8, %v2438_v27 }
 0x2da   : > { %v11028_v43 = vpop.f32.mrf.mxu1  ;;  %v2464_v8 = vadd.f32 %v10941_v25, %v1248_v32 }
 0x2db   : > { %v11033_v52 = vpop.f32.mrf.mxu0  ;;  %3527 = vmatmul.mubr.bf16.gmra.mxu0 %v3001_v31 }
 0x2dc   : > { %v11035_v58 = vpop.f32.mrf.mxu1  ;;  %3880 = vmatmul.mubr.bf16.gmra.mxu1 %v3001_v31  ;;  %3536 = vmatprep.mubr.bf16.mxu0 %v3004_v36  ;;  %v1021_v31 = vld [vmem:[%s10420_s2 + $0xe0] sm:$0xff]  ;;  %v2817_v32 = vadd.f32 %v10943_v18, %v2464_v8 }
 0x2dd   : > { %3889 = vmatprep.mubr.bf16.mxu1 %v3004_v36  ;;  %v11040_v21 = vpop.f32.mrf.mxu0  ;;  %v1242_v46 = vunpack.c.h.bf16 %v1021_v31  ;;  %v2442_v36 = vadd.f32 %v10879_v53, %v1239_v23  ;;  %v2807_v23 = vadd.f32 %v10917_v33, %v2454_v29  ;;  %v1241_v2 = vunpack.c.l.bf16 %v1021_v31  ;;  %v9608_v31 = vld [vmem:[%s10428_s16 + $0x190] ss:$8 sps:$4 sm:$0xff]  }
 0x2de   : > { %v11042_v5 = vpop.f32.mrf.mxu1 }
 0x2df   : > { %v11047_v35 = vpop.f32.mrf.mxu0  ;;  %v2450_v39 = vadd.f32 %v10898_v51, %v1242_v46  ;;  %v2795_v53 = vadd.f32 %v10881_v22, %v2442_v36  ;;  %v1023_v51 = vld [vmem:[%s10420_s2 + $0xf0] sm:$0xff] }
 0x2e0   : > { %v11049_v3 = vpop.f32.mrf.mxu1  ;;  %v9605_v22 = vld [vmem:[%s10428_s16 + $0x90] ss:$8 sps:$4 sm:$0xff]  }
 0x2e1   : > { %v11053_v19 = vpop.f32.mrf.mxu0  ;;  %v2803_v36 = vadd.f32 %v16246_v49, %v2450_v39 }
 0x2e2   : > { %v11055_v41 = vpop.f32.mrf.mxu1 }
 0x2e3   : > { %v11059_v55 = vpop.f32.mrf.mxu0  ;;  %3537 = vmatmul.mubr.bf16.gmra.mxu0 %v3003_v57  ;;  %v3008_v27 = vpack.c.bf16 %v2807_v23, %v2803_v36  ;;  %v1247_v23 = vunpack.c.l.bf16 %v1024_v1 }
 0x2e4   : > { %16240 = vst [vmem:[#allocation43_spill] sm:$0xff] %v11059_v55  ;;  %v11061_v9 = vpop.f32.mrf.mxu1  ;;  %3890 = vmatmul.mubr.bf16.gmra.mxu1 %v3003_v57  ;;  %3546 = vmatprep.mubr.bf16.mxu0 %v3006_v13  ;;  %v9607_v57 = vld [vmem:[%s10428_s16 + $0x94] ss:$8 sps:$4 sm:$0xff]   ;;  %v3005_v55 = vpack.c.bf16 %v2795_v53, %v2791_v26  ;;  %v16248_v53 = vld [vmem:[#allocation39_spill] sm:$0xff] }
 0x2e5   : > { %16241 = vst [vmem:[#allocation45_spill] sm:$0xff] %v11061_v9  ;;  %3899 = vmatprep.mubr.bf16.mxu1 %v3006_v13  ;;  %v11066_v60 = vpop.f32.mrf.mxu0  ;;  %v1246_v13 = vunpack.c.h.bf16 %v1023_v51  ;;  %v9610_v9 = vld [vmem:[%s10428_s16 + $0x194] ss:$8 sps:$4 sm:$0xff]   ;;  %4822 = vmatprep.subr.bf16.mxu0 %v9607_v57  ;;  %v1026_v26 = vld [vmem:[%s10420_s2 + $0x108] sm:$0xff]  ;;  %v1245_v57 = vunpack.c.l.bf16 %v1023_v51 }
 0x2e6   : > { %v11068_v37 = vpop.f32.mrf.mxu1  ;;  %5175 = vmatprep.subr.bf16.mxu1 %v9610_v9  ;;  %4823 = vmatpush2.bf16.msra.mxu0 %v9605_v22 }
 0x2e7   : > { %16242 = vst [vmem:[#allocation46_spill] sm:$0xff] %v11068_v37  ;;  %v11073_v28 = vpop.f32.mrf.mxu0  ;;  %v2452_v37 = vadd.f32 %v10908_v15, %v1243_v10  ;;  %v2460_v15 = vadd.f32 %v10928_v34, %v1246_v13  ;;  %5176 = vmatpush2.bf16.msra.mxu1 %v9608_v31  ;;  %v2458_v51 = vadd.f32 %v10921_v45, %v1245_v57 }
 0x2e8   : > { %16244 = vst [vmem:[#allocation47_spill] sm:$0xff] %v11073_v28  ;;  %v11075_v46 = vpop.f32.mrf.mxu1 }
 0x2e9   : > { %16245 = vst [vmem:[#allocation37_spill] sm:$0xff] %v11075_v46  ;;  %v11082_v33 = vpop.f32.mrf.mxu0  ;;  %v16247_v46 = vld [vmem:[#allocation40_spill] sm:$0xff]  ;;  %v2805_v10 = vadd.f32 %v16248_v53, %v2452_v37  ;;  %v2813_v37 = vadd.f32 %v10930_v61, %v2460_v15  ;;  %v1251_v15 = vunpack.c.l.bf16 %v1026_v26 }
 0x2ea   : > { %v11084_v29 = vpop.f32.mrf.mxu1  ;;  %v2448_v28 = vadd.f32 %v16247_v46, %v1241_v2  ;;  %v1252_v2 = vunpack.c.h.bf16 %v1026_v26  ;;  %v16249_v46 = vld [vmem:[#allocation38_spill] sm:$0xff] }
 0x2eb   : > { %v11089_v39 = vpop.f32.mrf.mxu0  ;;  %3547 = vmatmul.mubr.bf16.gmra.mxu0 %v3005_v55  ;;  %v3010_v18 = vpack.c.bf16 %v2817_v32, %v2813_v37 }
 0x2ec   : > { %v11091_v49 = vpop.f32.mrf.mxu1  ;;  %3900 = vmatmul.mubr.bf16.gmra.mxu1 %v3005_v55  ;;  %3556 = vmatprep.mubr.bf16.mxu0 %v3008_v27  ;;  %v2801_v22 = vadd.f32 %v16249_v46, %v2448_v28  ;;  %v1025_v55 = vld [vmem:[%s10420_s2 + $0x100] sm:$0xff]  ;;  %v2474_v28 = vadd.f32 %v10971_v17, %v1252_v2  ;;  %v1028_v17 = vld [vmem:[%s10420_s2 + $0x118] sm:$0xff]  ;;  %v2811_v2 = vadd.f32 %v10923_v14, %v2458_v51 }
 0x2ed   : > { %3909 = vmatprep.mubr.bf16.mxu1 %v3008_v27  ;;  %v11096_v25 = vpop.f32.mrf.mxu0  ;;  %v1250_v1 = vunpack.c.h.bf16 %v1025_v55  ;;  %v2462_v27 = vadd.f32 %v10935_v11, %v1247_v23  ;;  %v1256_v32 = vunpack.c.h.bf16 %v1028_v17  ;;  %v9614_v14 = vld [vmem:[%s10428_s16 + $0x180] ss:$8 sps:$4 sm:$0xff]  }
 0x2ee   : > { %v11098_v9 = vpop.f32.mrf.mxu1  ;;  %v3007_v13 = vpack.c.bf16 %v2805_v10, %v2801_v22  ;;  %v2827_v23 = vadd.f32 %v10973_v63, %v2474_v28  ;;  %v1249_v22 = vunpack.c.l.bf16 %v1025_v55 }
 0x2ef   : > { %v11103_v36 = vpop.f32.mrf.mxu0  ;;  %v2470_v61 = vadd.f32 %v10954_v54, %v1250_v1  ;;  %v2815_v11 = vadd.f32 %v10937_v16, %v2462_v27  ;;  %v1027_v54 = vld [vmem:[%s10420_s2 + $0x110] sm:$0xff]  ;;  %v9611_v16 = vld [vmem:[%s10428_s16 + $0x80] ss:$8 sps:$4 sm:$0xff]   ;;  %v9613_v1 = vld [vmem:[%s10428_s16 + $0x84] ss:$8 sps:$4 sm:$0xff]   ;;  %v2484_v51 = vadd.f32 %v10997_v30, %v1256_v32 }
 0x2f0   : > { %v11105_v34 = vpop.f32.mrf.mxu1  ;;  %v9616_v27 = vld [vmem:[%s10428_s16 + $0x184] ss:$8 sps:$4 sm:$0xff]   ;;  %4824 = vmatprep.subr.bf16.mxu0 %v9613_v1  ;;  %v1253_v1 = vunpack.c.l.bf16 %v1027_v54 }
 0x2f1   : > { %v11109_v53 = vpop.f32.mrf.mxu0  ;;  %v2823_v26 = vadd.f32 %v10956_v20, %v2470_v61  ;;  %5177 = vmatprep.subr.bf16.mxu1 %v9616_v27  ;;  %4825 = vmatpush2.bf16.msra.mxu0 %v9611_v16 }
 0x2f2   : > { %v11111_v31 = vpop.f32.mrf.mxu1  ;;  %5178 = vmatpush2.bf16.msra.mxu1 %v9614_v14 }
 0x2f3   : > { %v11115_v8 = vpop.f32.mrf.mxu0  ;;  %3557 = vmatmul.mubr.bf16.gmra.mxu0 %v3007_v13  ;;  %v3012_v55 = vpack.c.bf16 %v2827_v23, %v2823_v26  ;;  %v1030_v23 = vld [vmem:[%s10420_s2 + $0x128] sm:$0xff]  ;;  %v1029_v26 = vld [vmem:[%s10420_s2 + $0x120] sm:$0xff] }
 0x2f4   : > { %v11117_v46 = vpop.f32.mrf.mxu1  ;;  %3910 = vmatmul.mubr.bf16.gmra.mxu1 %v3007_v13  ;;  %3566 = vmatprep.mubr.bf16.mxu0 %v3010_v18  ;;  %v1254_v13 = vunpack.c.h.bf16 %v1027_v54  ;;  %v2478_v54 = vadd.f32 %v10977_v6, %v1253_v1 }
 0x2f5   : > { %16250 = vst [vmem:[#allocation48_spill] sm:$0xff] %v11117_v46  ;;  %3919 = vmatprep.mubr.bf16.mxu1 %v3010_v18  ;;  %v11122_v10 = vpop.f32.mrf.mxu0  ;;  %v3009_v18 = vpack.c.bf16 %v2815_v11, %v2811_v2  ;;  %v2472_v46 = vadd.f32 %v10964_v4, %v1251_v15  ;;  %v1255_v15 = vunpack.c.l.bf16 %v1028_v17  ;;  %v1260_v2 = vunpack.c.h.bf16 %v1030_v23 }
 0x2f6   : > { %v11124_v45 = vpop.f32.mrf.mxu1  ;;  %v2480_v4 = vadd.f32 %v10984_v56, %v1254_v13 }
 0x2f7   : > { %v11129_v57 = vpop.f32.mrf.mxu0  ;;  %v2825_v11 = vadd.f32 %v10966_v0, %v2472_v46  ;;  %v1258_v46 = vunpack.c.h.bf16 %v1029_v26  ;;  %v2482_v13 = vadd.f32 %v10991_v24, %v1255_v15 }
 0x2f8   : > { %v11131_v37 = vpop.f32.mrf.mxu1  ;;  %v2833_v0 = vadd.f32 %v10986_v38, %v2480_v4  ;;  %v1259_v4 = vunpack.c.l.bf16 %v1030_v23 }
 0x2f9   : > { %16251 = vst [vmem:[#allocation36_spill] sm:$0xff] %v11131_v37  ;;  %v11138_v63 = vpop.f32.mrf.mxu0  ;;  %v2468_v37 = vadd.f32 %v10947_v59, %v1249_v22  ;;  %v2837_v59 = vadd.f32 %v10999_v48, %v2484_v51  ;;  %v16252_v22 = vld [vmem:[#allocation42_spill] sm:$0xff]  ;;  %v2490_v38 = vadd.f32 %v11010_v50, %v1258_v46  ;;  %v2835_v24 = vadd.f32 %v10993_v40, %v2482_v13 }
 0x2fa   : > { %v11140_v28 = vpop.f32.mrf.mxu1  ;;  %v2492_v46 = vadd.f32 %v11017_v12, %v1259_v4 }
 0x2fb   : > { %v11145_v20 = vpop.f32.mrf.mxu0  ;;  %3567 = vmatmul.mubr.bf16.gmra.mxu0 %v3009_v18  ;;  %v2821_v16 = vadd.f32 %v16252_v22, %v2468_v37  ;;  %v3014_v48 = vpack.c.bf16 %v2837_v59, %v2833_v0  ;;  %v2494_v37 = vadd.f32 %v11026_v62, %v1260_v2  ;;  %v2831_v2 = vadd.f32 %v10979_v47, %v2478_v54 }
 0x2fc   : > { %v11147_v61 = vpop.f32.mrf.mxu1  ;;  %3920 = vmatmul.mubr.bf16.gmra.mxu1 %v3009_v18  ;;  %3576 = vmatprep.mubr.bf16.mxu0 %v3012_v55  ;;  %v1257_v22 = vunpack.c.l.bf16 %v1029_v26  ;;  %v2843_v0 = vadd.f32 %v11012_v44, %v2490_v38  ;;  %v2845_v12 = vadd.f32 %v11019_v7, %v2492_v46  ;;  %v1034_v38 = vld [vmem:[%s10420_s2 + $0x148] sm:$0xff] }
 0x2fd   : > { %3929 = vmatprep.mubr.bf16.mxu1 %v3012_v55  ;;  %v11152_v30 = vpop.f32.mrf.mxu0  ;;  %v3011_v17 = vpack.c.bf16 %v2825_v11, %v2821_v16  ;;  %v1032_v11 = vld [vmem:[%s10420_s2 + $0x138] sm:$0xff]  ;;  %v2847_v6 = vadd.f32 %v11028_v43, %v2494_v37  ;;  %v1031_v16 = vld [vmem:[%s10420_s2 + $0x130] sm:$0xff]  ;;  %v3013_v23 = vpack.c.bf16 %v2835_v24, %v2831_v2  ;;  %v1268_v4 = vunpack.c.h.bf16 %v1034_v38 }
 0x2fe   : > { %v11154_v32 = vpop.f32.mrf.mxu1  ;;  %v1264_v59 = vunpack.c.h.bf16 %v1032_v11  ;;  %v1262_v40 = vunpack.c.h.bf16 %v1031_v16  ;;  %v2488_v26 = vadd.f32 %v11003_v42, %v1257_v22  ;;  %v1263_v54 = vunpack.c.l.bf16 %v1032_v11  ;;  %v1033_v22 = vld [vmem:[%s10420_s2 + $0x140] sm:$0xff] }
 0x2ff   : > { %v11159_v27 = vpop.f32.mrf.mxu0  ;;  %v3016_v43 = vpack.c.bf16 %v2847_v6, %v2843_v0  ;;  %v16253_v6 = vld [vmem:[#allocation44_spill] sm:$0xff]  ;;  %v1261_v2 = vunpack.c.l.bf16 %v1031_v16  ;;  %v1266_v7 = vunpack.c.h.bf16 %v1033_v22 }
 0x300   : > { %v11161_v56 = vpop.f32.mrf.mxu1  ;;  %v2504_v47 = vadd.f32 %v11053_v19, %v1264_v59  ;;  %v2500_v44 = vadd.f32 %v11040_v21, %v1262_v40  ;;  %v2841_v59 = vadd.f32 %v16253_v6, %v2488_v26 }
 0x301   : > { %v11165_v18 = vpop.f32.mrf.mxu0  ;;  %v2498_v16 = vadd.f32 %v11033_v52, %v1261_v2  ;;  %v1035_v2 = vld [vmem:[%s10420_s2 + $0x150] sm:$0xff] }
 0x302   : > { %v11167_v14 = vpop.f32.mrf.mxu1  ;;  %v2857_v42 = vadd.f32 %v11055_v41, %v2504_v47  ;;  %v2853_v40 = vadd.f32 %v11042_v5, %v2500_v44  ;;  %v3015_v11 = vpack.c.bf16 %v2845_v12, %v2841_v59  ;;  %v2514_v47 = vadd.f32 %v11082_v33, %v1268_v4  ;;  %v1036_v12 = vld [vmem:[%s10420_s2 + $0x158] sm:$0xff] }
 0x303   : > { %v11171_v55 = vpop.f32.mrf.mxu0  ;;  %3577 = vmatmul.mubr.bf16.gmra.mxu0 %v3011_v17  ;;  %v2510_v5 = vadd.f32 %v11066_v60, %v1266_v7  ;;  %v1267_v44 = vunpack.c.l.bf16 %v1034_v38  ;;  %v2851_v4 = vadd.f32 %v11035_v58, %v2498_v16  ;;  %v1265_v59 = vunpack.c.l.bf16 %v1033_v22  ;;  %v16257_v7 = vld [vmem:[#allocation46_spill] sm:$0xff]  ;;  %v16259_v22 = vld [vmem:[#allocation43_spill] sm:$0xff] }
 0x304   : > { %v11173_v51 = vpop.f32.mrf.mxu1  ;;  %3930 = vmatmul.mubr.bf16.gmra.mxu1 %v3011_v17  ;;  %3586 = vmatprep.mubr.bf16.mxu0 %v3014_v48  ;;  %v3018_v41 = vpack.c.bf16 %v2857_v42, %v2853_v40  ;;  %v2867_v52 = vadd.f32 %v11084_v29, %v2514_v47  ;;  %v1272_v42 = vunpack.c.h.bf16 %v1036_v12 }
 0x305   : > { %3939 = vmatprep.mubr.bf16.mxu1 %v3014_v48  ;;  %v11178_v15 = vpop.f32.mrf.mxu0  ;;  %v2508_v47 = vadd.f32 %v16259_v22, %v1265_v59  ;;  %v1269_v22 = vunpack.c.l.bf16 %v1035_v2 }
 0x306   : > { %v11180_v62 = vpop.f32.mrf.mxu1  ;;  %v2524_v58 = vadd.f32 %v11109_v53, %v1272_v42 }
 0x307   : > { %v11185_v1 = vpop.f32.mrf.mxu0 }
 0x308   : > { %v11187_v50 = vpop.f32.mrf.mxu1  ;;  %v2877_v42 = vadd.f32 %v11111_v31, %v2524_v58 }
 0x309   : > { %v11191_v17 = vpop.f32.mrf.mxu0 }
 0x30a   : > { %v11193_v13 = vpop.f32.mrf.mxu1 }
 0x30b   : > { %v11197_v48 = vpop.f32.mrf.mxu0  ;;  %3587 = vmatmul.mubr.bf16.gmra.mxu0 %v3013_v23 }
 0x30c   : > { %v11199_v37 = vpop.f32.mrf.mxu1  ;;  %3940 = vmatmul.mubr.bf16.gmra.mxu1 %v3013_v23  ;;  %3596 = vmatprep.mubr.bf16.mxu0 %v3016_v43  ;;  %v2502_v23 = vadd.f32 %v11047_v35, %v1263_v54 }
 0x30d   : > { %3949 = vmatprep.mubr.bf16.mxu1 %v3016_v43  ;;  %v11204_v24 = vpop.f32.mrf.mxu0 }
 0x30e   : > { %v11206_v19 = vpop.f32.mrf.mxu1  ;;  %v2855_v35 = vadd.f32 %v11049_v3, %v2502_v23  ;;  %v1270_v3 = vunpack.c.h.bf16 %v1035_v2  ;;  %v16258_v23 = vld [vmem:[#allocation47_spill] sm:$0xff]  ;;  %v2518_v2 = vadd.f32 %v11089_v39, %v1269_v22  ;;  %v1039_v22 = vld [vmem:[%s10420_s2 + $0x170] sm:$0xff] }
 0x30f   : > { %v11211_v0 = vpop.f32.mrf.mxu0 }
 0x310   : > { %v11213_v21 = vpop.f32.mrf.mxu1  ;;  %v3017_v38 = vpack.c.bf16 %v2855_v35, %v2851_v4  ;;  %v16262_v35 = vld [vmem:[#allocation37_spill] sm:$0xff]  ;;  %v1271_v4 = vunpack.c.l.bf16 %v1036_v12 }
 0x311   : > { %v11217_v46 = vpop.f32.mrf.mxu0 }
 0x312   : > { %v11219_v43 = vpop.f32.mrf.mxu1 }
 0x313   : > { %v11223_v26 = vpop.f32.mrf.mxu0  ;;  %3597 = vmatmul.mubr.bf16.gmra.mxu0 %v3015_v11 }
 0x314   : > { %16254 = vst [vmem:[#allocation41_spill] sm:$0xff] %v11223_v26  ;;  %v11225_v6 = vpop.f32.mrf.mxu1  ;;  %3950 = vmatmul.mubr.bf16.gmra.mxu1 %v3015_v11  ;;  %3606 = vmatprep.mubr.bf16.mxu0 %v3018_v41  ;;  %v2863_v11 = vadd.f32 %v16257_v7, %v2510_v5  ;;  %v2520_v5 = vadd.f32 %v11096_v25, %v1270_v3  ;;  %v1038_v7 = vld [vmem:[%s10420_s2 + $0x168] sm:$0xff] }
 0x315   : > { %16255 = vst [vmem:[#allocation40_spill] sm:$0xff] %v11225_v6  ;;  %3959 = vmatprep.mubr.bf16.mxu1 %v3018_v41  ;;  %v11230_v54 = vpop.f32.mrf.mxu0  ;;  %v2512_v41 = vadd.f32 %v16258_v23, %v1267_v44  ;;  %v1276_v59 = vunpack.c.h.bf16 %v1038_v7 }
 0x316   : > { %v11232_v33 = vpop.f32.mrf.mxu1  ;;  %v3020_v29 = vpack.c.bf16 %v2867_v52, %v2863_v11  ;;  %v16263_v11 = vld [vmem:[#allocation45_spill] sm:$0xff]  ;;  %v2873_v3 = vadd.f32 %v11098_v9, %v2520_v5  ;;  %v1275_v5 = vunpack.c.l.bf16 %v1038_v7 }
 0x317   : > { %v11237_v40 = vpop.f32.mrf.mxu0  ;;  %v2865_v44 = vadd.f32 %v16262_v35, %v2512_v41  ;;  %v2861_v23 = vadd.f32 %v16263_v11, %v2508_v47  ;;  %v2534_v58 = vadd.f32 %v11138_v63, %v1276_v59  ;;  %v2871_v59 = vadd.f32 %v11091_v49, %v2518_v2 }
 0x318   : > { %v11239_v60 = vpop.f32.mrf.mxu1  ;;  %v3022_v31 = vpack.c.bf16 %v2877_v42, %v2873_v3 }
 0x319   : > { %16256 = vst [vmem:[#allocation39_spill] sm:$0xff] %v11239_v60  ;;  %v11243_v6 = vpop.f32.mrf.mxu0  ;;  %v3019_v12 = vpack.c.bf16 %v2865_v44, %v2861_v23  ;;  %v1040_v44 = vld [vmem:[%s10420_s2 + $0x178] sm:$0xff]  ;;  %v2887_v39 = vadd.f32 %v11140_v28, %v2534_v58 }
 0x31a   : > { %v11245_v26 = vpop.f32.mrf.mxu1  ;;  %v1280_v42 = vunpack.c.h.bf16 %v1040_v44 }
 0x31b   : > { %v11249_v16 = vpop.f32.mrf.mxu0  ;;  %3607 = vmatmul.mubr.bf16.gmra.mxu0 %v3017_v38 }
 0x31c   : > { %16260 = vst [vmem:[#allocation38_spill] sm:$0xff] %v11249_v16  ;;  %v11251_v60 = vpop.f32.mrf.mxu1  ;;  %3960 = vmatmul.mubr.bf16.gmra.mxu1 %v3017_v38  ;;  %3616 = vmatprep.mubr.bf16.mxu0 %v3020_v29  ;;  %v2544_v49 = vadd.f32 %v11165_v18, %v1280_v42 }
 0x31d   : > { %16261 = vst [vmem:[#allocation42_spill] sm:$0xff] %v11251_v60  ;;  %3969 = vmatprep.mubr.bf16.mxu1 %v3020_v29  ;;  %v11256_v52 = vpop.f32.mrf.mxu0  ;;  %v1037_v60 = vld [vmem:[%s10420_s2 + $0x160] sm:$0xff]  ;;  %v2522_v29 = vadd.f32 %v11103_v36, %v1271_v4 }
 0x31e   : > { %v11258_v53 = vpop.f32.mrf.mxu1  ;;  %v1274_v41 = vunpack.c.h.bf16 %v1037_v60  ;;  %v1273_v23 = vunpack.c.l.bf16 %v1037_v60 }
 0x31f   : > { %v11263_v38 = vpop.f32.mrf.mxu0  ;;  %v2875_v36 = vadd.f32 %v11105_v34, %v2522_v29  ;;  %v1278_v34 = vunpack.c.h.bf16 %v1039_v22 }
 0x320   : > { %v11265_v25 = vpop.f32.mrf.mxu1  ;;  %v2530_v9 = vadd.f32 %v11122_v10, %v1274_v41  ;;  %v2528_v60 = vadd.f32 %v11115_v8, %v1273_v23  ;;  %v2897_v8 = vadd.f32 %v11167_v14, %v2544_v49 }
 0x321   : > { %v11269_v35 = vpop.f32.mrf.mxu0  ;;  %v3021_v7 = vpack.c.bf16 %v2875_v36, %v2871_v59  ;;  %v1279_v36 = vunpack.c.l.bf16 %v1040_v44  ;;  %v16267_v59 = vld [vmem:[#allocation48_spill] sm:$0xff] }
 0x322   : > { %v11271_v16 = vpop.f32.mrf.mxu1  ;;  %v2883_v41 = vadd.f32 %v11124_v45, %v2530_v9  ;;  %v2540_v45 = vadd.f32 %v11152_v30, %v1278_v34  ;;  %v2881_v23 = vadd.f32 %v16267_v59, %v2528_v60 }
 0x323   : > { %v11275_v47 = vpop.f32.mrf.mxu0  ;;  %3617 = vmatmul.mubr.bf16.gmra.mxu0 %v3019_v12 }
 0x324   : > { %v11277_v11 = vpop.f32.mrf.mxu1  ;;  %3970 = vmatmul.mubr.bf16.gmra.mxu1 %v3019_v12  ;;  %3626 = vmatprep.mubr.bf16.mxu0 %v3022_v31  ;;  %v2532_v12 = vadd.f32 %v11129_v57, %v1275_v5  ;;  %v3024_v28 = vpack.c.bf16 %v2887_v39, %v2883_v41  ;;  %v16266_v57 = vld [vmem:[#allocation36_spill] sm:$0xff]  ;;  %v1277_v41 = vunpack.c.l.bf16 %v1039_v22  ;;  %v2893_v34 = vadd.f32 %v11154_v32, %v2540_v45 }
 0x325   : > { %3979 = vmatprep.mubr.bf16.mxu1 %v3022_v31  ;;  %v11282_v4 = vpop.f32.mrf.mxu0  ;;  %v1042_v5 = vld [vmem:[%s10420_s2 + $0x188] sm:$0xff] }
 0x326   : > { %v11284_v63 = vpop.f32.mrf.mxu1  ;;  %v2885_v9 = vadd.f32 %v16266_v57, %v2532_v12  ;;  %v1284_v42 = vunpack.c.h.bf16 %v1042_v5  ;;  %v3026_v14 = vpack.c.bf16 %v2897_v8, %v2893_v34  ;;  %v2538_v22 = vadd.f32 %v11145_v20, %v1277_v41  ;;  %v1043_v41 = vld [vmem:[%s10420_s2 + $0x190] sm:$0xff] }
 0x327   : > { %v11289_v3 = vpop.f32.mrf.mxu0  ;;  %v1283_v45 = vunpack.c.l.bf16 %v1042_v5 }
 0x328   : > { %v11291_v10 = vpop.f32.mrf.mxu1  ;;  %v3023_v44 = vpack.c.bf16 %v2885_v9, %v2881_v23  ;;  %v2554_v49 = vadd.f32 %v11191_v17, %v1284_v42  ;;  %v1044_v9 = vld [vmem:[%s10420_s2 + $0x198] sm:$0xff]  ;;  %v2891_v42 = vadd.f32 %v11147_v61, %v2538_v22 }
 0x329   : > { %v11295_v29 = vpop.f32.mrf.mxu0  ;;  %v1288_v8 = vunpack.c.h.bf16 %v1044_v9 }
 0x32a   : > { %v11297_v31 = vpop.f32.mrf.mxu1  ;;  %v2907_v20 = vadd.f32 %v11193_v13, %v2554_v49 }
 0x32b   : > { %v11301_v58 = vpop.f32.mrf.mxu0  ;;  %3627 = vmatmul.mubr.bf16.gmra.mxu0 %v3021_v7  ;;  %v2564_v61 = vadd.f32 %v11217_v46, %v1288_v8 }
 0x32c   : > { %16264 = vst [vmem:[#allocation44_spill] sm:$0xff] %v11301_v58  ;;  %v11303_v2 = vpop.f32.mrf.mxu1  ;;  %3980 = vmatmul.mubr.bf16.gmra.mxu1 %v3021_v7  ;;  %3636 = vmatprep.mubr.bf16.mxu0 %v3024_v28 }
 0x32d   : > { %16265 = vst [vmem:[#allocation46_spill] sm:$0xff] %v11303_v2  ;;  %3989 = vmatprep.mubr.bf16.mxu1 %v3024_v28  ;;  %v11308_v39 = vpop.f32.mrf.mxu0  ;;  %v1041_v2 = vld [vmem:[%s10420_s2 + $0x180] sm:$0xff]  ;;  %v2542_v28 = vadd.f32 %v11159_v27, %v1279_v36 }
 0x32e   : > { %v11310_v18 = vpop.f32.mrf.mxu1  ;;  %v1282_v12 = vunpack.c.h.bf16 %v1041_v2  ;;  %v1281_v23 = vunpack.c.l.bf16 %v1041_v2 }
 0x32f   : > { %v11315_v7 = vpop.f32.mrf.mxu0  ;;  %v2895_v27 = vadd.f32 %v11161_v56, %v2542_v28  ;;  %v1286_v56 = vunpack.c.h.bf16 %v1043_v41 }
 0x330   : > { %v11317_v30 = vpop.f32.mrf.mxu1  ;;  %v2550_v32 = vadd.f32 %v11178_v15, %v1282_v12  ;;  %v2548_v2 = vadd.f32 %v11171_v55, %v1281_v23  ;;  %v2917_v55 = vadd.f32 %v11219_v43, %v2564_v61  ;;  %v1045_v23 = vld [vmem:[%s10420_s2 + $0x1a0] sm:$0xff] }
 0x331   : > { %v11321_v57 = vpop.f32.mrf.mxu0  ;;  %v3025_v5 = vpack.c.bf16 %v2895_v27, %v2891_v42  ;;  %v1046_v27 = vld [vmem:[%s10420_s2 + $0x1a8] sm:$0xff]  ;;  %v1285_v42 = vunpack.c.l.bf16 %v1043_v41 }
 0x332   : > { %v11323_v58 = vpop.f32.mrf.mxu1  ;;  %v2903_v12 = vadd.f32 %v11180_v62, %v2550_v32  ;;  %v2560_v62 = vadd.f32 %v11204_v24, %v1286_v56  ;;  %v1287_v32 = vunpack.c.l.bf16 %v1044_v9  ;;  %v2901_v8 = vadd.f32 %v11173_v51, %v2548_v2 }
 0x333   : > { %v11327_v60 = vpop.f32.mrf.mxu0  ;;  %3637 = vmatmul.mubr.bf16.gmra.mxu0 %v3023_v44  ;;  %v2558_v41 = vadd.f32 %v11197_v48, %v1285_v42  ;;  %v1047_v42 = vld [vmem:[%s10420_s2 + $0x1b0] sm:$0xff] }
 0x334   : > { %v11329_v59 = vpop.f32.mrf.mxu1  ;;  %3990 = vmatmul.mubr.bf16.gmra.mxu1 %v3023_v44  ;;  %3646 = vmatprep.mubr.bf16.mxu0 %v3026_v14  ;;  %v2552_v44 = vadd.f32 %v11185_v1, %v1283_v45  ;;  %v3028_v13 = vpack.c.bf16 %v2907_v20, %v2903_v12  ;;  %v1292_v20 = vunpack.c.h.bf16 %v1046_v27  ;;  %v2913_v56 = vadd.f32 %v11206_v19, %v2560_v62 }
 0x335   : > { %3999 = vmatprep.mubr.bf16.mxu1 %v3026_v14  ;;  %v11334_v36 = vpop.f32.mrf.mxu0  ;;  %v1291_v62 = vunpack.c.l.bf16 %v1046_v27  ;;  %v1294_v27 = vunpack.c.h.bf16 %v1047_v42 }
 0x336   : > { %v11336_v17 = vpop.f32.mrf.mxu1  ;;  %v2905_v1 = vadd.f32 %v11187_v50, %v2552_v44  ;;  %v1290_v50 = vunpack.c.h.bf16 %v1045_v23  ;;  %v3030_v43 = vpack.c.bf16 %v2917_v55, %v2913_v56  ;;  %v2574_v51 = vadd.f32 %v11243_v6, %v1292_v20 }
 0x337   : > { %v11341_v34 = vpop.f32.mrf.mxu0  ;;  %v2911_v20 = vadd.f32 %v11199_v37, %v2558_v41 }
 0x338   : > { %v11343_v15 = vpop.f32.mrf.mxu1  ;;  %v3027_v9 = vpack.c.bf16 %v2905_v1, %v2901_v8  ;;  %v2570_v19 = vadd.f32 %v11230_v54, %v1290_v50  ;;  %v1048_v1 = vld [vmem:[%s10420_s2 + $0x1b8] sm:$0xff]  ;;  %v2927_v48 = vadd.f32 %v11245_v26, %v2574_v51  ;;  %v1289_v8 = vunpack.c.l.bf16 %v1045_v23 }
 0x339   : > { %v11347_v28 = vpop.f32.mrf.mxu0  ;;  %v1296_v55 = vunpack.c.h.bf16 %v1048_v1  ;;  %v16269_v23 = vld [vmem:[#allocation41_spill] sm:$0xff] }
 0x33a   : > { %v11349_v14 = vpop.f32.mrf.mxu1  ;;  %v2568_v51 = vadd.f32 %v16269_v23, %v1289_v8  ;;  %v16273_v8 = vld [vmem:[#allocation40_spill] sm:$0xff]  ;;  %v1293_v23 = vunpack.c.l.bf16 %v1047_v42  ;;  %v16275_v42 = vld [vmem:[#allocation38_spill] sm:$0xff] }
 0x33b   : > { %v11353_v49 = vpop.f32.mrf.mxu0  ;;  %3647 = vmatmul.mubr.bf16.gmra.mxu0 %v3025_v5  ;;  %v2584_v37 = vadd.f32 %v11269_v35, %v1296_v55 }
 0x33c   : > { %v11355_v22 = vpop.f32.mrf.mxu1  ;;  %4000 = vmatmul.mubr.bf16.gmra.mxu1 %v3025_v5  ;;  %3656 = vmatprep.mubr.bf16.mxu0 %v3028_v13  ;;  %v2562_v5 = vadd.f32 %v11211_v0, %v1287_v32 }
 0x33d   : > { %4009 = vmatprep.mubr.bf16.mxu1 %v3028_v13  ;;  %v11360_v45 = vpop.f32.mrf.mxu0  ;;  %v2937_v55 = vadd.f32 %v11271_v16, %v2584_v37 }
 0x33e   : > { %v11362_v46 = vpop.f32.mrf.mxu1  ;;  %v2915_v0 = vadd.f32 %v11213_v21, %v2562_v5  ;;  %v2923_v21 = vadd.f32 %v11232_v33, %v2570_v19  ;;  %v2580_v33 = vadd.f32 %v11256_v52, %v1294_v27 }
 0x33f   : > { %v11367_v12 = vpop.f32.mrf.mxu0 }
 0x340   : > { %v11369_v24 = vpop.f32.mrf.mxu1  ;;  %v3029_v50 = vpack.c.bf16 %v2915_v0, %v2911_v20  ;;  %v3032_v26 = vpack.c.bf16 %v2927_v48, %v2923_v21  ;;  %v1295_v0 = vunpack.c.l.bf16 %v1048_v1  ;;  %v2921_v21 = vadd.f32 %v16273_v8, %v2568_v51 }
 0x341   : > { %v11373_v44 = vpop.f32.mrf.mxu0  ;;  %v2933_v27 = vadd.f32 %v11258_v53, %v2580_v33  ;;  %v2578_v51 = vadd.f32 %v16275_v42, %v1293_v23  ;;  %v1051_v42 = vld [vmem:[%s10420_s2 + $0x1d0] sm:$0xff] }
 0x342   : > { %v11375_v13 = vpop.f32.mrf.mxu1 }
 0x343   : > { %v11379_v61 = vpop.f32.mrf.mxu0  ;;  %3657 = vmatmul.mubr.bf16.gmra.mxu0 %v3027_v9  ;;  %v3034_v16 = vpack.c.bf16 %v2937_v55, %v2933_v27 }
 0x344   : > { %v11381_v2 = vpop.f32.mrf.mxu1  ;;  %4010 = vmatmul.mubr.bf16.gmra.mxu1 %v3027_v9  ;;  %3666 = vmatprep.mubr.bf16.mxu0 %v3030_v43  ;;  %v2572_v9 = vadd.f32 %v11237_v40, %v1291_v62  ;;  %v16272_v40 = vld [vmem:[#allocation39_spill] sm:$0xff] }
 0x345   : > { %16268 = vst [vmem:[#allocation47_spill] sm:$0xff] %v11381_v2  ;;  %4019 = vmatprep.mubr.bf16.mxu1 %v3030_v43  ;;  %v11386_v32 = vpop.f32.mrf.mxu0  ;;  %v1050_v62 = vld [vmem:[%s10420_s2 + $0x1c8] sm:$0xff] }
 0x346   : > { %v11388_v6 = vpop.f32.mrf.mxu1  ;;  %v2925_v19 = vadd.f32 %v16272_v40, %v2572_v9  ;;  %v1300_v20 = vunpack.c.h.bf16 %v1050_v62  ;;  %v1299_v33 = vunpack.c.l.bf16 %v1050_v62 }
 0x347   : > { %v11393_v56 = vpop.f32.mrf.mxu0 }
 0x348   : > { %v11395_v54 = vpop.f32.mrf.mxu1  ;;  %v3031_v1 = vpack.c.bf16 %v2925_v19, %v2921_v21  ;;  %v2594_v37 = vadd.f32 %v11295_v29, %v1300_v20  ;;  %v1052_v19 = vld [vmem:[%s10420_s2 + $0x1d8] sm:$0xff] }
 0x349   : > { %v11399_v5 = vpop.f32.mrf.mxu0  ;;  %v1304_v20 = vunpack.c.h.bf16 %v1052_v19  ;;  %v16277_v21 = vld [vmem:[#allocation42_spill] sm:$0xff] }
 0x34a   : > { %v11401_v43 = vpop.f32.mrf.mxu1  ;;  %v2947_v55 = vadd.f32 %v11297_v31, %v2594_v37  ;;  %v2931_v23 = vadd.f32 %v16277_v21, %v2578_v51 }
 0x34b   : > { %v11405_v41 = vpop.f32.mrf.mxu0  ;;  %3667 = vmatmul.mubr.bf16.gmra.mxu0 %v3029_v50  ;;  %v2604_v37 = vadd.f32 %v11321_v57, %v1304_v20 }
 0x34c   : > { %16270 = vst [vmem:[#allocation43_spill] sm:$0xff] %v11405_v41  ;;  %v11407_v2 = vpop.f32.mrf.mxu1  ;;  %4020 = vmatmul.mubr.bf16.gmra.mxu1 %v3029_v50  ;;  %3676 = vmatprep.mubr.bf16.mxu0 %v3032_v26 }
 0x34d   : > { %16271 = vst [vmem:[#allocation37_spill] sm:$0xff] %v11407_v2  ;;  %4029 = vmatprep.mubr.bf16.mxu1 %v3032_v26  ;;  %v11412_v48 = vpop.f32.mrf.mxu0  ;;  %v1049_v2 = vld [vmem:[%s10420_s2 + $0x1c0] sm:$0xff]  ;;  %v2582_v26 = vadd.f32 %v11263_v38, %v1295_v0 }
 0x34e   : > { %v11414_v35 = vpop.f32.mrf.mxu1  ;;  %v1298_v9 = vunpack.c.h.bf16 %v1049_v2  ;;  %v1297_v27 = vunpack.c.l.bf16 %v1049_v2 }
 0x34f   : > { %v11419_v50 = vpop.f32.mrf.mxu0  ;;  %v2935_v38 = vadd.f32 %v11265_v25, %v2582_v26  ;;  %v1302_v25 = vunpack.c.h.bf16 %v1051_v42  ;;  %v2592_v26 = vadd.f32 %v11289_v3, %v1299_v33 }
 0x350   : > { %v11421_v52 = vpop.f32.mrf.mxu1  ;;  %v2590_v53 = vadd.f32 %v11282_v4, %v1298_v9  ;;  %v2588_v2 = vadd.f32 %v11275_v47, %v1297_v27  ;;  %v2957_v47 = vadd.f32 %v11323_v58, %v2604_v37  ;;  %v1053_v27 = vld [vmem:[%s10420_s2 + $0x1e0] sm:$0xff] }
 0x351   : > { %16274 = vst [vmem:[#allocation45_spill] sm:$0xff] %v11421_v52  ;;  %v11425_v40 = vpop.f32.mrf.mxu0  ;;  %v3033_v62 = vpack.c.bf16 %v2935_v38, %v2931_v23  ;;  %v2945_v3 = vadd.f32 %v11291_v10, %v2592_v26  ;;  %v1054_v38 = vld [vmem:[%s10420_s2 + $0x1e8] sm:$0xff]  ;;  %v1301_v23 = vunpack.c.l.bf16 %v1051_v42  ;;  %v1306_v10 = vunpack.c.h.bf16 %v1053_v27 }
 0x352   : > { %v11427_v41 = vpop.f32.mrf.mxu1  ;;  %v2943_v9 = vadd.f32 %v11284_v63, %v2590_v53  ;;  %v2600_v63 = vadd.f32 %v11308_v39, %v1302_v25  ;;  %v1303_v53 = vunpack.c.l.bf16 %v1052_v19  ;;  %v2941_v20 = vadd.f32 %v11277_v11, %v2588_v2  ;;  %v16279_v42 = vld [vmem:[#allocation44_spill] sm:$0xff] }
 0x353   : > { %v11431_v8 = vpop.f32.mrf.mxu0  ;;  %3677 = vmatmul.mubr.bf16.gmra.mxu0 %v3031_v1  ;;  %v2598_v37 = vadd.f32 %v16279_v42, %v1301_v23  ;;  %v16282_v23 = vld [vmem:[#allocation46_spill] sm:$0xff]  ;;  %v1305_v42 = vunpack.c.l.bf16 %v1053_v27 }
 0x354   : > { %v11433_v52 = vpop.f32.mrf.mxu1  ;;  %4030 = vmatmul.mubr.bf16.gmra.mxu1 %v3031_v1  ;;  %3686 = vmatprep.mubr.bf16.mxu0 %v3034_v16  ;;  %v3036_v31 = vpack.c.bf16 %v2947_v55, %v2943_v9  ;;  %v1308_v55 = vunpack.c.h.bf16 %v1054_v38  ;;  %v2953_v25 = vadd.f32 %v11310_v18, %v2600_v63  ;;  %v3035_v19 = vpack.c.bf16 %v2945_v3, %v2941_v20  ;;  %v1056_v3 = vld [vmem:[%s10420_s2 + $0x1f8] sm:$0xff] }
 0x355   : > { %16276 = vst [vmem:[#allocation36_spill] sm:$0xff] %v11433_v52  ;;  %4039 = vmatprep.mubr.bf16.mxu1 %v3034_v16  ;;  %v11438_v0 = vpop.f32.mrf.mxu0  ;;  %v2610_v18 = vadd.f32 %v11334_v36, %v1306_v10  ;;  %v1307_v63 = vunpack.c.l.bf16 %v1054_v38  ;;  %v3044_v20 = vlaneseq  ;;  %v2608_v27 = vadd.f32 %v11327_v60, %v1305_v42 }
 0x356   : > { %v11440_v29 = vpop.f32.mrf.mxu1  ;;  %v3038_v58 = vpack.c.bf16 %v2957_v47, %v2953_v25  ;;  %v2614_v11 = vadd.f32 %v11347_v28, %v1308_v55  ;;  %v1312_v55 = vunpack.c.h.bf16 %v1056_v3  ;;  %v2951_v25 = vadd.f32 %v16282_v23, %v2598_v37 }
 0x357   : > { %v11445_v1 = vpop.f32.mrf.mxu0  ;;  %v11508_v37 = vshrl.u32 %v3044_v20, 7  ;;  %v2961_v20 = vadd.f32 %v11329_v59, %v2608_v27 }
 0x358   : > { %v11447_v4 = vpop.f32.mrf.mxu1  ;;  %v2967_v47 = vadd.f32 %v11349_v14, %v2614_v11  ;;  %v2624_v11 = vadd.f32 %v11373_v44, %v1312_v55 }
 0x359   : > { %v11451_v16 = vpop.f32.mrf.mxu0  ;;  %16283 = vst [vmem:[#allocation40_spill] sm:$0xff] %v11508_v37  ;;  %v11549_v27 = vsub.s32 0, %v11508_v37 }
 0x35a   : > { %v11453_v52 = vpop.f32.mrf.mxu1  ;;  %v2977_v55 = vadd.f32 %v11375_v13, %v2624_v11 }
 0x35b   : > { %v11457_v51 = vpop.f32.mrf.mxu0  ;;  %3687 = vmatmul.mubr.bf16.gmra.mxu0 %v3033_v62  ;;  %16285 = vst [vmem:[#allocation42_spill] sm:$0xff] %v11549_v27 }
 0x35c   : > { %v11459_v21 = vpop.f32.mrf.mxu1  ;;  %4040 = vmatmul.mubr.bf16.gmra.mxu1 %v3033_v62  ;;  %3696 = vmatprep.mubr.bf16.mxu0 %v3036_v31  ;;  %v2602_v62 = vadd.f32 %v11315_v7, %v1303_v53 }
 0x35d   : > { %16278 = vst [vmem:[#allocation48_spill] sm:$0xff] %v11459_v21  ;;  %4049 = vmatprep.mubr.bf16.mxu1 %v3036_v31  ;;  %v11464_v33 = vpop.f32.mrf.mxu0 }
 0x35e   : > { %v11466_v57 = vpop.f32.mrf.mxu1  ;;  %v2955_v7 = vadd.f32 %v11317_v30, %v2602_v62  ;;  %v2963_v30 = vadd.f32 %v11336_v17, %v2610_v18  ;;  %v2612_v62 = vadd.f32 %v11341_v34, %v1307_v63  ;;  %v11517_v18 = vsub.s32 1, %v11508_v37 }
 0x35f   : > { %v11471_v9 = vpop.f32.mrf.mxu0  ;;  %v1311_v63 = vunpack.c.l.bf16 %v1056_v3 }
 0x360   : > { %v11473_v39 = vpop.f32.mrf.mxu1  ;;  %v3037_v10 = vpack.c.bf16 %v2955_v7, %v2951_v25  ;;  %v3040_v14 = vpack.c.bf16 %v2967_v47, %v2963_v30  ;;  %16284 = vst [vmem:[#allocation38_spill] sm:$0xff] %v11517_v18  ;;  %v3058_v7 = vsub.s32 3, %v11508_v37  ;;  %v2965_v44 = vadd.f32 %v11343_v15, %v2612_v62 }
 0x361   : > { %v11477_v26 = vpop.f32.mrf.mxu0  ;;  %v2622_v62 = vadd.f32 %v11367_v12, %v1311_v63 }
 0x362   : > { %v11479_v31 = vpop.f32.mrf.mxu1  ;;  %v3039_v3 = vpack.c.bf16 %v2965_v44, %v2961_v20 }
 0x363   : > { %v11483_v2 = vpop.f32.mrf.mxu0  ;;  %3697 = vmatmul.mubr.bf16.gmra.mxu0 %v3035_v19 }
 0x364   : > { %16280 = vst [vmem:[#allocation41_spill] sm:$0xff] %v11483_v2  ;;  %v11485_v21 = vpop.f32.mrf.mxu1  ;;  %4050 = vmatmul.mubr.bf16.gmra.mxu1 %v3035_v19  ;;  %3706 = vmatprep.mubr.bf16.mxu0 %v3038_v58  ;;  %v1055_v19 = vld [vmem:[%s10420_s2 + $0x1f0] sm:$0xff] }
 0x365   : > { %16281 = vst [vmem:[#allocation39_spill] sm:$0xff] %v11485_v21  ;;  %4059 = vmatprep.mubr.bf16.mxu1 %v3038_v58  ;;  %v11490_v53 = vpop.f32.mrf.mxu0  ;;  %v1310_v38 = vunpack.c.h.bf16 %v1055_v19  ;;  %v1309_v25 = vunpack.c.l.bf16 %v1055_v19 }
 0x366   : > { %v11492_v28 = vpop.f32.mrf.mxu1 }
 0x367   : > { %v11497_v21 = vpop.f32.mrf.mxu0  ;;  %v2620_v34 = vadd.f32 %v11360_v45, %v1310_v38  ;;  %v796_v45 = vld [vmem:[%s10430_s17] ss:$2 sm:$0xf] }
 0x368   : > { %v11499_v36 = vpop.f32.mrf.mxu1  ;;  %v11536_v15 = vrot.slane %v796_v45, %v3058_v7 }
 0x369   : > { %v11503_v58 = vpop.f32.mrf.mxu0  ;;  %v2973_v38 = vadd.f32 %v11362_v46, %v2620_v34  ;;  %v2618_v46 = vadd.f32 %v11353_v49, %v1309_v25  ;;  %v3054_v34 = vsub.s32 2, %v11508_v37  ;;  %v2975_v49 = vadd.f32 %v11369_v24, %v2622_v62 }
 0x36a   : > { %v11505_v2 = vpop.f32.mrf.mxu1  ;;  %v3778_v11 = vadd.f32 %v11401_v43, %v11536_v15 }
 0x36b   : > { %v11511_v23 = vpop.f32.mrf.mxu0  ;;  %3707 = vmatmul.mubr.bf16.gmra.mxu0 %v3037_v10  ;;  %v3042_v59 = vpack.c.bf16 %v2977_v55, %v2973_v38  ;;  %v2971_v25 = vadd.f32 %v11355_v22, %v2618_v46  ;;  %v11567_v38 = vrot.slane %v796_v45, %v11549_v27  ;;  %v3788_v46 = vadd.f32 %v11427_v41, %v11536_v15 }
 0x36c   : > { %v11513_v17 = vpop.f32.mrf.mxu1  ;;  %4060 = vmatmul.mubr.bf16.gmra.mxu1 %v3037_v10  ;;  %3716 = vmatprep.mubr.bf16.mxu0 %v3040_v14  ;;  %v11534_v10 = vrot.slane %v796_v45, %v11517_v18  ;;  %v4097_v20 = vmax.f32 %v3778_v11, 0.0  ;;  %v3784_v41 = vadd.f32 %v11414_v35, %v11536_v15 }
 0x36d   : > { %4069 = vmatprep.mubr.bf16.mxu1 %v3040_v14  ;;  %v11521_v60 = vpop.f32.mrf.mxu0  ;;  %v3041_v24 = vpack.c.bf16 %v2975_v49, %v2971_v25  ;;  %v3423_v62 = vadd.f32 %v11393_v56, %v11567_v38  ;;  %v16287_v56 = vld [vmem:[#allocation47_spill] sm:$0xff] }
 0x36e   : > { %v11523_v47 = vpop.f32.mrf.mxu1  ;;  %v3425_v19 = vadd.f32 %v11399_v5, %v11534_v10  ;;  %v3421_v44 = vadd.f32 %v11386_v32, %v11534_v10  ;;  %v3774_v5 = vadd.f32 %v11388_v6, %v11536_v15 }
 0x36f   : > { %v11528_v42 = vpop.f32.mrf.mxu0 }
 0x370   : > { %v11530_v30 = vpop.f32.mrf.mxu1  ;;  %v4095_v55 = vmax.f32 %v3425_v19, 0.0  ;;  %v4093_v37 = vmax.f32 %v3774_v5, 0.0  ;;  %v3419_v5 = vadd.f32 %v11379_v61, %v11567_v38 }
 0x371   : > { %v11539_v14 = vpop.f32.mrf.mxu0 }
 0x372   : > { %v11541_v13 = vpop.f32.mrf.mxu1  ;;  %v4090_v18 = vmax.f32 %v3419_v5, 0.0  ;;  %v3798_v5 = vadd.f32 %v11453_v52, %v11536_v15  ;;  %v3794_v52 = vadd.f32 %v11440_v29, %v11536_v15 }
 0x373   : > { %v11552_v7 = vpop.f32.mrf.mxu0  ;;  %3717 = vmatmul.mubr.bf16.gmra.mxu0 %v3039_v3 }
 0x374   : > { %v11554_v12 = vpop.f32.mrf.mxu1  ;;  %4070 = vmatmul.mubr.bf16.gmra.mxu1 %v3039_v3  ;;  %3726 = vmatprep.mubr.bf16.mxu0 %v3042_v59  ;;  %v11569_v3 = vrot.slane %v796_v45, %v3054_v34  ;;  %v3435_v45 = vadd.f32 %v11425_v40, %v11534_v10  ;;  %v3431_v40 = vadd.f32 %v11412_v48, %v11534_v10 }
 0x375   : > { %16286 = vst [vmem:[#allocation44_spill] sm:$0xff] %v11554_v12  ;;  %4079 = vmatprep.mubr.bf16.mxu1 %v3042_v59  ;;  %v11561_v43 = vpop.f32.mrf.mxu0  ;;  %v4091_v59 = vmax.f32 %v3421_v44, 0.0  ;;  %v4349_v44 = vpack.c.bf16 %v4097_v20, %v4093_v37  ;;  %v4094_v37 = vmax.f32 %v3423_v62, 0.0  ;;  %v3433_v62 = vadd.f32 %v11419_v50, %v11567_v38  ;;  %v16293_v50 = vld [vmem:[#allocation37_spill] sm:$0xff] }
 0x376   : > { %v11563_v63 = vpop.f32.mrf.mxu1  ;;  %v3776_v19 = vadd.f32 %v11395_v54, %v11569_v3  ;;  %v3772_v49 = vadd.f32 %v16287_v56, %v11569_v3  ;;  %v4105_v56 = vmax.f32 %v3788_v46, 0.0  ;;  %v4099_v48 = vmax.f32 %v3431_v40, 0.0 }
 0x377   : > { %v11571_v32 = vpop.f32.mrf.mxu0  ;;  %v4347_v34 = vpack.c.bf16 %v4095_v55, %v4091_v59  ;;  %v4103_v59 = vmax.f32 %v3435_v45, 0.0  ;;  %v4346_v12 = vpack.c.bf16 %v4094_v37, %v4090_v18  ;;  %v3445_v46 = vadd.f32 %v11451_v16, %v11534_v10  ;;  %v16292_v18 = vld [vmem:[#allocation43_spill] sm:$0xff] }
 0x378   : > { %v11573_v6 = vpop.f32.mrf.mxu1  ;;  %v4096_v55 = vmax.f32 %v3776_v19, 0.0  ;;  %v4092_v27 = vmax.f32 %v3772_v49, 0.0  ;;  %v16291_v19 = vld [vmem:[#allocation45_spill] sm:$0xff]  ;;  %v3441_v16 = vadd.f32 %v11438_v0, %v11534_v10 }
 0x379   : > { %v11579_v11 = vpop.f32.mrf.mxu0  ;;  %v4351_v49 = vpack.c.bf16 %v4103_v59, %v4099_v48 }
 0x37a   : > { %v11581_v22 = vpop.f32.mrf.mxu1  ;;  %v4348_v35 = vpack.c.bf16 %v4096_v55, %v4092_v27  ;;  %v3429_v27 = vadd.f32 %v16292_v18, %v11567_v38  ;;  %v4113_v18 = vmax.f32 %v3798_v5, 0.0  ;;  %v4107_v0 = vmax.f32 %v3441_v16, 0.0 }
 0x37b   : > { %v11591_v25 = vpop.f32.mrf.mxu0  ;;  %3727 = vmatmul.mubr.bf16.gmra.mxu0 %v3041_v24  ;;  %v3455_v5 = vadd.f32 %v11477_v26, %v11534_v10  ;;  %v3451_v26 = vadd.f32 %v11464_v33, %v11534_v10 }
 0x37c   : > { %16288 = vst [vmem:[#allocation46_spill] sm:$0xff] %v11591_v25  ;;  %v11593_v54 = vpop.f32.mrf.mxu1  ;;  %4080 = vmatmul.mubr.bf16.gmra.mxu1 %v3041_v24  ;;  %4826 = vmatprep.mubr.bf16.mxu0 %v4347_v34  ;;  %v4101_v25 = vmax.f32 %v3784_v41, 0.0  ;;  %v3786_v34 = vadd.f32 %v16291_v19, %v11569_v3  ;;  %v3782_v41 = vadd.f32 %v16293_v50, %v11569_v3  ;;  %v4111_v19 = vmax.f32 %v3445_v46, 0.0 }
 0x37d   : > { %16289 = vst [vmem:[#allocation47_spill] sm:$0xff] %v11593_v54  ;;  %5179 = vmatprep.mubr.bf16.mxu1 %v4349_v44  ;;  %v11599_v61 = vpop.f32.mrf.mxu0  ;;  %v4098_v50 = vmax.f32 %v3429_v27, 0.0  ;;  %v4115_v33 = vmax.f32 %v3451_v26, 0.0  ;;  %v3449_v26 = vadd.f32 %v11457_v51, %v11567_v38 }
 0x37e   : > { %v11601_v20 = vpop.f32.mrf.mxu1  ;;  %v4353_v40 = vpack.c.bf16 %v4105_v56, %v4101_v25  ;;  %v4102_v25 = vmax.f32 %v3433_v62, 0.0  ;;  %v4104_v59 = vmax.f32 %v3786_v34, 0.0  ;;  %v3443_v62 = vadd.f32 %v11445_v1, %v11567_v38  ;;  %v16296_v1 = vld [vmem:[#allocation36_spill] sm:$0xff] }
 0x37f   : > { %v11603_v54 = vpop.f32.mrf.mxu0  ;;  %v3796_v34 = vadd.f32 %v11447_v4, %v11569_v3  ;;  %v4355_v27 = vpack.c.bf16 %v4111_v19, %v4107_v0  ;;  %v3792_v16 = vadd.f32 %v16296_v1, %v11569_v3  ;;  %v4119_v19 = vmax.f32 %v3455_v5, 0.0 }
 0x380   : > { %v11605_v24 = vpop.f32.mrf.mxu1 }
 0x381   : > { %16290 = vst [vmem:[#allocation49_spill] sm:$0xff] %v11605_v24  ;;  %v11611_v44 = vpop.f32.mrf.mxu0  ;;  %v4350_v24 = vpack.c.bf16 %v4102_v25, %v4098_v50  ;;  %v4112_v25 = vmax.f32 %v3796_v34, 0.0  ;;  %v4108_v0 = vmax.f32 %v3792_v16, 0.0  ;;  %v3806_v34 = vadd.f32 %v11473_v39, %v11569_v3 }
 0x382   : > { %v11613_v45 = vpop.f32.mrf.mxu1 }
 0x383   : > { %v11623_v37 = vpop.f32.mrf.mxu0  ;;  %4827 = vmatmul.mubr.bf16.vlgmr.msra.gmra.mxu0 %v4346_v12 }
 0x384   : > { %16294 = vst [vmem:[#allocation45_spill] sm:$0xff] %v11623_v37  ;;  %v11625_v55 = vpop.f32.mrf.mxu1  ;;  %5180 = vmatmul.mubr.bf16.vlgmr.msra.gmra.mxu1 %v4348_v35  ;;  %4836 = vmatprep.mubr.bf16.mxu0 %v4351_v49  ;;  %v4109_v37 = vmax.f32 %v3794_v52, 0.0 }
 0x385   : > { %16295 = vst [vmem:[#allocation43_spill] sm:$0xff] %v11625_v55  ;;  %5189 = vmatprep.mubr.bf16.mxu1 %v4353_v40  ;;  %v11631_v56 = vpop.f32.mrf.mxu0  ;;  %v4100_v55 = vmax.f32 %v3782_v41, 0.0  ;;  %v3808_v40 = vadd.f32 %v11479_v31, %v11536_v15  ;;  %v3804_v31 = vadd.f32 %v11466_v57, %v11536_v15  ;;  %v4356_v57 = vpack.c.bf16 %v4112_v25, %v4108_v0 }
 0x386   : > { %v11633_v48 = vpop.f32.mrf.mxu1  ;;  %v4357_v41 = vpack.c.bf16 %v4113_v18, %v4109_v37  ;;  %v4110_v37 = vmax.f32 %v3443_v62, 0.0  ;;  %v3453_v62 = vadd.f32 %v11471_v9, %v11567_v38  ;;  %v16298_v9 = vld [vmem:[#allocation48_spill] sm:$0xff] }
 0x387   : > { %v11635_v12 = vpop.f32.mrf.mxu0  ;;  %v4352_v29 = vpack.c.bf16 %v4104_v59, %v4100_v55  ;;  %v3439_v55 = vadd.f32 %v11431_v8, %v11567_v38  ;;  %v4121_v18 = vmax.f32 %v3808_v40, 0.0  ;;  %v4117_v1 = vmax.f32 %v3804_v31, 0.0 }
 0x388   : > { %v11637_v35 = vpop.f32.mrf.mxu1  ;;  %v3465_v40 = vadd.f32 %v11503_v58, %v11534_v10  ;;  %v3802_v31 = vadd.f32 %v16298_v9, %v11569_v3  ;;  %v3461_v58 = vadd.f32 %v11490_v53, %v11534_v10  ;;  %v4118_v25 = vmax.f32 %v3453_v62, 0.0 }
 0x389   : > { %v11643_v49 = vpop.f32.mrf.mxu0  ;;  %v4106_v50 = vmax.f32 %v3439_v55, 0.0  ;;  %v4359_v55 = vpack.c.bf16 %v4119_v19, %v4115_v33  ;;  %v4361_v16 = vpack.c.bf16 %v4121_v18, %v4117_v1  ;;  %v4120_v19 = vmax.f32 %v3806_v34, 0.0 }
 0x38a   : > { %v11645_v46 = vpop.f32.mrf.mxu1  ;;  %v4114_v33 = vmax.f32 %v3449_v26, 0.0  ;;  %v4116_v1 = vmax.f32 %v3802_v31, 0.0  ;;  %v4123_v53 = vmax.f32 %v3461_v58, 0.0  ;;  %v3463_v62 = vadd.f32 %v11497_v21, %v11567_v38  ;;  %v16300_v58 = vld [vmem:[#allocation41_spill] sm:$0xff]  ;;  %v16301_v21 = vld [vmem:[#allocation39_spill] sm:$0xff] }
 0x38b   : > { %v11655_v52 = vpop.f32.mrf.mxu0  ;;  %4837 = vmatmul.mubr.bf16.gmra.mxu0 %v4350_v24  ;;  %v3816_v34 = vadd.f32 %v11499_v36, %v11569_v3 }
 0x38c   : > { %v11657_v4 = vpop.f32.mrf.mxu1  ;;  %5190 = vmatmul.mubr.bf16.gmra.mxu1 %v4352_v29  ;;  %4846 = vmatprep.mubr.bf16.mxu0 %v4355_v27 }
 0x38d   : > { %16297 = vst [vmem:[#allocation37_spill] sm:$0xff] %v11657_v4  ;;  %5199 = vmatprep.mubr.bf16.mxu1 %v4357_v41  ;;  %v11663_v8 = vpop.f32.mrf.mxu0  ;;  %v4354_v4 = vpack.c.bf16 %v4110_v37, %v4106_v50  ;;  %v3818_v41 = vadd.f32 %v11505_v2, %v11536_v15  ;;  %v3814_v2 = vadd.f32 %v11492_v28, %v11536_v15  ;;  %v4127_v50 = vmax.f32 %v3465_v40, 0.0 }
 0x38e   : > { %v11665_v59 = vpop.f32.mrf.mxu1  ;;  %v4360_v28 = vpack.c.bf16 %v4120_v19, %v4116_v1 }
 0x38f   : > { %v11667_v24 = vpop.f32.mrf.mxu0  ;;  %v4129_v0 = vmax.f32 %v3818_v41, 0.0  ;;  %v4125_v9 = vmax.f32 %v3814_v2, 0.0  ;;  %v3475_v41 = vadd.f32 %v11539_v14, %v11534_v10  ;;  %v4363_v26 = vpack.c.bf16 %v4127_v50, %v4123_v53 }
 0x390   : > { %v11669_v29 = vpop.f32.mrf.mxu1  ;;  %v3459_v2 = vadd.f32 %v16300_v58, %v11567_v38  ;;  %v3471_v14 = vadd.f32 %v11521_v60, %v11534_v10  ;;  %v4126_v50 = vmax.f32 %v3463_v62, 0.0  ;;  %v3473_v62 = vadd.f32 %v11528_v42, %v11567_v38 }
 0x391   : > { %v11675_v27 = vpop.f32.mrf.mxu0  ;;  %v4365_v31 = vpack.c.bf16 %v4129_v0, %v4125_v9  ;;  %v4128_v0 = vmax.f32 %v3816_v34, 0.0  ;;  %v4135_v53 = vmax.f32 %v3475_v41, 0.0  ;;  %v3826_v34 = vadd.f32 %v11530_v30, %v11569_v3 }
 0x392   : > { %v11677_v5 = vpop.f32.mrf.mxu1  ;;  %v4122_v58 = vmax.f32 %v3459_v2, 0.0  ;;  %v4131_v60 = vmax.f32 %v3471_v14, 0.0  ;;  %v3469_v14 = vadd.f32 %v11511_v23, %v11567_v38  ;;  %v3822_v42 = vadd.f32 %v11513_v17, %v11569_v3 }
 0x393   : > { %v11687_v37 = vpop.f32.mrf.mxu0  ;;  %4847 = vmatmul.mubr.bf16.gmra.mxu0 %v4354_v4 }
 0x394   : > { %v11689_v39 = vpop.f32.mrf.mxu1  ;;  %5200 = vmatmul.mubr.bf16.gmra.mxu1 %v4356_v57  ;;  %4856 = vmatprep.mubr.bf16.mxu0 %v4359_v55  ;;  %v4367_v2 = vpack.c.bf16 %v4135_v53, %v4131_v60 }
 0x395   : > { %16299 = vst [vmem:[#allocation36_spill] sm:$0xff] %v11689_v39  ;;  %5209 = vmatprep.mubr.bf16.mxu1 %v4361_v16  ;;  %v11695_v51 = vpop.f32.mrf.mxu0  ;;  %v4358_v39 = vpack.c.bf16 %v4118_v25, %v4114_v33  ;;  %v3828_v16 = vadd.f32 %v11541_v13, %v11536_v15  ;;  %v3812_v25 = vadd.f32 %v16301_v21, %v11569_v3 }
 0x396   : > { %v11697_v18 = vpop.f32.mrf.mxu1  ;;  %v3824_v13 = vadd.f32 %v11523_v47, %v11536_v15 }
 0x397   : > { %v11699_v4 = vpop.f32.mrf.mxu0  ;;  %v4137_v9 = vmax.f32 %v3828_v16, 0.0  ;;  %v4124_v21 = vmax.f32 %v3812_v25, 0.0  ;;  %v3485_v16 = vadd.f32 %v11579_v11, %v11534_v10  ;;  %v3481_v11 = vadd.f32 %v11561_v43, %v11534_v10 }
 0x398   : > { %v11701_v57 = vpop.f32.mrf.mxu1 }
 0x399   : > { %v11707_v55 = vpop.f32.mrf.mxu0  ;;  %v4364_v47 = vpack.c.bf16 %v4128_v0, %v4124_v21  ;;  %v4143_v17 = vmax.f32 %v3485_v16, 0.0  ;;  %v4139_v43 = vmax.f32 %v3481_v11, 0.0  ;;  %v3479_v11 = vadd.f32 %v11552_v7, %v11567_v38 }
 0x39a   : > { %v11709_v40 = vpop.f32.mrf.mxu1 }
 0x39b   : > { %v11719_v19 = vpop.f32.mrf.mxu0  ;;  %4857 = vmatmul.mubr.bf16.gmra.mxu0 %v4358_v39 }
 0x39c   : > { %16302 = vst [vmem:[#allocation48_spill] sm:$0xff] %v11719_v19  ;;  %v11721_v36 = vpop.f32.mrf.mxu1  ;;  %5210 = vmatmul.mubr.bf16.gmra.mxu1 %v4360_v28  ;;  %4866 = vmatprep.mubr.bf16.mxu0 %v4363_v26  ;;  %v4362_v19 = vpack.c.bf16 %v4126_v50, %v4122_v58  ;;  %v4136_v50 = vmax.f32 %v3826_v34, 0.0  ;;  %v4132_v58 = vmax.f32 %v3822_v42, 0.0  ;;  %v3836_v34 = vadd.f32 %v11573_v6, %v11569_v3 }
 0x39d   : > { %16303 = vst [vmem:[#allocation41_spill] sm:$0xff] %v11721_v36  ;;  %5219 = vmatprep.mubr.bf16.mxu1 %v4365_v31  ;;  %v11727_v33 = vpop.f32.mrf.mxu0  ;;  %v4133_v36 = vmax.f32 %v3824_v13, 0.0  ;;  %v3838_v31 = vadd.f32 %v11581_v22, %v11536_v15  ;;  %v3834_v22 = vadd.f32 %v11563_v63, %v11536_v15 }
 0x39e   : > { %v11729_v1 = vpop.f32.mrf.mxu1  ;;  %v4368_v63 = vpack.c.bf16 %v4136_v50, %v4132_v58 }
 0x39f   : > { %v11731_v39 = vpop.f32.mrf.mxu0  ;;  %v4369_v25 = vpack.c.bf16 %v4137_v9, %v4133_v36  ;;  %v4134_v36 = vmax.f32 %v3473_v62, 0.0  ;;  %v4145_v53 = vmax.f32 %v3838_v31, 0.0  ;;  %v4130_v9 = vmax.f32 %v3469_v14, 0.0 }
 0x3a0   : > { %v11733_v28 = vpop.f32.mrf.mxu1  ;;  %v4141_v60 = vmax.f32 %v3834_v22, 0.0  ;;  %v3483_v62 = vadd.f32 %v11571_v32, %v11567_v38  ;;  %v3495_v31 = vadd.f32 %v11611_v44, %v11534_v10  ;;  %v4371_v14 = vpack.c.bf16 %v4143_v17, %v4139_v43  ;;  %v16304_v32 = vld [vmem:[#allocation44_spill] sm:$0xff] }
 0x3a1   : > { %v11739_v26 = vpop.f32.mrf.mxu0  ;;  %v3832_v22 = vadd.f32 %v16304_v32, %v11569_v3  ;;  %v3491_v44 = vadd.f32 %v11599_v61, %v11534_v10  ;;  %v4144_v17 = vmax.f32 %v3836_v34, 0.0  ;;  %v4138_v43 = vmax.f32 %v3479_v11, 0.0  ;;  %v16307_v34 = vld [vmem:[#allocation49_spill] sm:$0xff] }
 0x3a2   : > { %v11741_v41 = vpop.f32.mrf.mxu1  ;;  %v4373_v42 = vpack.c.bf16 %v4145_v53, %v4141_v60  ;;  %v4142_v50 = vmax.f32 %v3483_v62, 0.0  ;;  %v3493_v62 = vadd.f32 %v11603_v54, %v11567_v38  ;;  %v3858_v11 = vadd.f32 %v11645_v46, %v11536_v15  ;;  %v16309_v54 = vld [vmem:[#allocation47_spill] sm:$0xff] }
 0x3a3   : > { %v11751_v13 = vpop.f32.mrf.mxu0  ;;  %4867 = vmatmul.mubr.bf16.gmra.mxu0 %v4362_v19  ;;  %v4140_v60 = vmax.f32 %v3832_v22, 0.0  ;;  %v4147_v61 = vmax.f32 %v3491_v44, 0.0  ;;  %v3854_v46 = vadd.f32 %v11633_v48, %v11536_v15 }
 0x3a4   : > { %v11753_v30 = vpop.f32.mrf.mxu1  ;;  %5220 = vmatmul.mubr.bf16.gmra.mxu1 %v4364_v47  ;;  %4876 = vmatprep.mubr.bf16.mxu0 %v4367_v2  ;;  %v4366_v47 = vpack.c.bf16 %v4134_v36, %v4130_v9  ;;  %v4151_v9 = vmax.f32 %v3495_v31, 0.0 }
 0x3a5   : > { %5229 = vmatprep.mubr.bf16.mxu1 %v4369_v25  ;;  %v11759_v23 = vpop.f32.mrf.mxu0  ;;  %v3848_v25 = vadd.f32 %v11613_v45, %v11536_v15  ;;  %v3844_v45 = vadd.f32 %v11601_v20, %v11536_v15  ;;  %v4372_v20 = vpack.c.bf16 %v4144_v17, %v4140_v60  ;;  %v3842_v17 = vadd.f32 %v16309_v54, %v11569_v3 }
 0x3a6   : > { %v11761_v0 = vpop.f32.mrf.mxu1  ;;  %v4375_v22 = vpack.c.bf16 %v4151_v9, %v4147_v61  ;;  %v4150_v9 = vmax.f32 %v3493_v62, 0.0  ;;  %v3503_v62 = vadd.f32 %v11635_v12, %v11567_v38  ;;  %v16313_v12 = vld [vmem:[#allocation43_spill] sm:$0xff] }
 0x3a7   : > { %v11763_v19 = vpop.f32.mrf.mxu0  ;;  %v4153_v58 = vmax.f32 %v3848_v25, 0.0  ;;  %v4149_v32 = vmax.f32 %v3844_v45, 0.0  ;;  %v3505_v25 = vadd.f32 %v11643_v49, %v11534_v10  ;;  %v16308_v45 = vld [vmem:[#allocation46_spill] sm:$0xff]  ;;  %v3501_v49 = vadd.f32 %v11631_v56, %v11534_v10 }
 0x3a8   : > { %v11765_v21 = vpop.f32.mrf.mxu1 }
 0x3a9   : > { %v11771_v2 = vpop.f32.mrf.mxu0  ;;  %v4377_v44 = vpack.c.bf16 %v4153_v58, %v4149_v32  ;;  %v4155_v56 = vmax.f32 %v3501_v49, 0.0 }
 0x3aa   : > { %v11773_v16 = vpop.f32.mrf.mxu1 }
 0x3ab   : > { %v11783_v36 = vpop.f32.mrf.mxu0  ;;  %4877 = vmatmul.mubr.bf16.gmra.mxu0 %v4366_v47 }
 0x3ac   : > { %16305 = vst [vmem:[#allocation39_spill] sm:$0xff] %v11783_v36  ;;  %v11785_v6 = vpop.f32.mrf.mxu1  ;;  %5230 = vmatmul.mubr.bf16.gmra.mxu1 %v4368_v63  ;;  %4886 = vmatprep.mubr.bf16.mxu0 %v4371_v14  ;;  %v3846_v14 = vadd.f32 %v16307_v34, %v11569_v3  ;;  %v4159_v34 = vmax.f32 %v3505_v25, 0.0 }
 0x3ad   : > { %16306 = vst [vmem:[#allocation44_spill] sm:$0xff] %v11785_v6  ;;  %5239 = vmatprep.mubr.bf16.mxu1 %v4373_v42  ;;  %v11791_v7 = vpop.f32.mrf.mxu0  ;;  %v4370_v6 = vpack.c.bf16 %v4142_v50, %v4138_v43  ;;  %v3489_v50 = vadd.f32 %v16308_v45, %v11567_v38  ;;  %v4161_v45 = vmax.f32 %v3858_v11, 0.0  ;;  %v3515_v11 = vadd.f32 %v11675_v27, %v11534_v10 }
 0x3ae   : > { %v11793_v53 = vpop.f32.mrf.mxu1  ;;  %v4152_v58 = vmax.f32 %v3846_v14, 0.0  ;;  %v3856_v14 = vadd.f32 %v11637_v35, %v11569_v3  ;;  %v3511_v27 = vadd.f32 %v11663_v8, %v11534_v10 }
 0x3af   : > { %v11795_v47 = vpop.f32.mrf.mxu0  ;;  %v4146_v54 = vmax.f32 %v3489_v50, 0.0  ;;  %v4379_v50 = vpack.c.bf16 %v4159_v34, %v4155_v56 }
 0x3b0   : > { %v11797_v63 = vpop.f32.mrf.mxu1  ;;  %v4163_v8 = vmax.f32 %v3511_v27, 0.0  ;;  %v3509_v27 = vadd.f32 %v11655_v52, %v11567_v38 }
 0x3b1   : > { %v11803_v42 = vpop.f32.mrf.mxu0  ;;  %v4374_v36 = vpack.c.bf16 %v4150_v9, %v4146_v54  ;;  %v4167_v54 = vmax.f32 %v3515_v11, 0.0 }
 0x3b2   : > { %v11805_v31 = vpop.f32.mrf.mxu1 }
 0x3b3   : > { %v11815_v43 = vpop.f32.mrf.mxu0  ;;  %4887 = vmatmul.mubr.bf16.gmra.mxu0 %v4370_v6 }
 0x3b4   : > { %16310 = vst [vmem:[#allocation49_spill] sm:$0xff] %v11815_v43  ;;  %v11817_v60 = vpop.f32.mrf.mxu1  ;;  %5240 = vmatmul.mubr.bf16.gmra.mxu1 %v4372_v20  ;;  %4896 = vmatprep.mubr.bf16.mxu0 %v4375_v22  ;;  %v4157_v43 = vmax.f32 %v3854_v46, 0.0  ;;  %v3852_v46 = vadd.f32 %v16313_v12, %v11569_v3 }
 0x3b5   : > { %16311 = vst [vmem:[#allocation46_spill] sm:$0xff] %v11817_v60  ;;  %5249 = vmatprep.mubr.bf16.mxu1 %v4377_v44  ;;  %v11823_v61 = vpop.f32.mrf.mxu0  ;;  %v4148_v60 = vmax.f32 %v3842_v17, 0.0  ;;  %v3868_v44 = vadd.f32 %v11677_v5, %v11536_v15  ;;  %v3864_v5 = vadd.f32 %v11665_v59, %v11536_v15 }
 0x3b6   : > { %v11825_v32 = vpop.f32.mrf.mxu1  ;;  %v4381_v17 = vpack.c.bf16 %v4161_v45, %v4157_v43  ;;  %v4158_v43 = vmax.f32 %v3503_v62, 0.0  ;;  %v4156_v12 = vmax.f32 %v3852_v46, 0.0  ;;  %v3513_v62 = vadd.f32 %v11667_v24, %v11567_v38  ;;  %v16316_v24 = vld [vmem:[#allocation37_spill] sm:$0xff] }
 0x3b7   : > { %v11827_v6 = vpop.f32.mrf.mxu0  ;;  %v4376_v48 = vpack.c.bf16 %v4152_v58, %v4148_v60  ;;  %v16312_v60 = vld [vmem:[#allocation45_spill] sm:$0xff]  ;;  %v4160_v58 = vmax.f32 %v3856_v14, 0.0  ;;  %v4169_v56 = vmax.f32 %v3868_v44, 0.0  ;;  %v3866_v14 = vadd.f32 %v11669_v29, %v11569_v3 }
 0x3b8   : > { %v11829_v20 = vpop.f32.mrf.mxu1  ;;  %v3499_v49 = vadd.f32 %v16312_v60, %v11567_v38  ;;  %v3525_v44 = vadd.f32 %v11707_v55, %v11534_v10  ;;  %v3521_v55 = vadd.f32 %v11695_v51, %v11534_v10 }
 0x3b9   : > { %v11835_v22 = vpop.f32.mrf.mxu0  ;;  %v4380_v59 = vpack.c.bf16 %v4160_v58, %v4156_v12  ;;  %v4168_v58 = vmax.f32 %v3866_v14, 0.0  ;;  %v4162_v12 = vmax.f32 %v3509_v27, 0.0  ;;  %v3876_v14 = vadd.f32 %v11701_v57, %v11569_v3 }
 0x3ba   : > { %v11837_v25 = vpop.f32.mrf.mxu1  ;;  %v4154_v60 = vmax.f32 %v3499_v49, 0.0  ;;  %v4383_v49 = vpack.c.bf16 %v4167_v54, %v4163_v8  ;;  %v4171_v51 = vmax.f32 %v3521_v55, 0.0  ;;  %v3519_v55 = vadd.f32 %v11687_v37, %v11567_v38 }
 0x3bb   : > { %v11847_v9 = vpop.f32.mrf.mxu0  ;;  %4897 = vmatmul.mubr.bf16.gmra.mxu0 %v4374_v36 }
 0x3bc   : > { %16314 = vst [vmem:[#allocation47_spill] sm:$0xff] %v11847_v9  ;;  %v11849_v35 = vpop.f32.mrf.mxu1  ;;  %5250 = vmatmul.mubr.bf16.gmra.mxu1 %v4376_v48  ;;  %4906 = vmatprep.mubr.bf16.mxu0 %v4379_v50  ;;  %v4378_v9 = vpack.c.bf16 %v4158_v43, %v4154_v60 }
 0x3bd   : > { %16315 = vst [vmem:[#allocation45_spill] sm:$0xff] %v11849_v35  ;;  %5259 = vmatprep.mubr.bf16.mxu1 %v4381_v17  ;;  %v11855_v34 = vpop.f32.mrf.mxu0  ;;  %v4165_v35 = vmax.f32 %v3864_v5, 0.0  ;;  %v3878_v17 = vadd.f32 %v11709_v40, %v11536_v15  ;;  %v3862_v5 = vadd.f32 %v16316_v24, %v11569_v3  ;;  %v3874_v40 = vadd.f32 %v11697_v18, %v11536_v15 }
 0x3be   : > { %v11857_v45 = vpop.f32.mrf.mxu1 }
 0x3bf   : > { %v11859_v36 = vpop.f32.mrf.mxu0  ;;  %v4385_v46 = vpack.c.bf16 %v4169_v56, %v4165_v35  ;;  %v4166_v35 = vmax.f32 %v3513_v62, 0.0  ;;  %v4175_v56 = vmax.f32 %v3525_v44, 0.0  ;;  %v4177_v60 = vmax.f32 %v3878_v17, 0.0 }
 0x3c0   : > { %v11861_v48 = vpop.f32.mrf.mxu1  ;;  %v4164_v8 = vmax.f32 %v3862_v5, 0.0  ;;  %v4173_v24 = vmax.f32 %v3874_v40, 0.0  ;;  %v3523_v62 = vadd.f32 %v11699_v4, %v11567_v38  ;;  %v3535_v17 = vadd.f32 %v11739_v26, %v11534_v10  ;;  %v16318_v4 = vld [vmem:[#allocation36_spill] sm:$0xff] }
 0x3c1   : > { %v11867_v50 = vpop.f32.mrf.mxu0  ;;  %v4387_v27 = vpack.c.bf16 %v4175_v56, %v4171_v51  ;;  %v3872_v40 = vadd.f32 %v16318_v4, %v11569_v3  ;;  %v3531_v26 = vadd.f32 %v11727_v33, %v11534_v10  ;;  %v4176_v56 = vmax.f32 %v3876_v14, 0.0 }
 0x3c2   : > { %v11869_v11 = vpop.f32.mrf.mxu1  ;;  %v4384_v18 = vpack.c.bf16 %v4168_v58, %v4164_v8  ;;  %v4389_v5 = vpack.c.bf16 %v4177_v60, %v4173_v24  ;;  %v4174_v58 = vmax.f32 %v3523_v62, 0.0  ;;  %v4170_v51 = vmax.f32 %v3519_v55, 0.0 }
 0x3c3   : > { %v11879_v43 = vpop.f32.mrf.mxu0  ;;  %4907 = vmatmul.mubr.bf16.gmra.mxu0 %v4378_v9  ;;  %v4172_v24 = vmax.f32 %v3872_v40, 0.0  ;;  %v4179_v33 = vmax.f32 %v3531_v26, 0.0  ;;  %v3533_v62 = vadd.f32 %v11731_v39, %v11567_v38  ;;  %v3886_v14 = vadd.f32 %v11733_v28, %v11569_v3  ;;  %v16320_v26 = vld [vmem:[#allocation48_spill] sm:$0xff]  ;;  %v16321_v39 = vld [vmem:[#allocation41_spill] sm:$0xff] }
 0x3c4   : > { %v11881_v29 = vpop.f32.mrf.mxu1  ;;  %5260 = vmatmul.mubr.bf16.gmra.mxu1 %v4380_v59  ;;  %4916 = vmatprep.mubr.bf16.mxu0 %v4383_v49 }
 0x3c5   : > { %16317 = vst [vmem:[#allocation43_spill] sm:$0xff] %v11881_v29  ;;  %5269 = vmatprep.mubr.bf16.mxu1 %v4385_v46  ;;  %v11887_v52 = vpop.f32.mrf.mxu0  ;;  %v4382_v29 = vpack.c.bf16 %v4166_v35, %v4162_v12  ;;  %v3888_v46 = vadd.f32 %v11741_v41, %v11536_v15  ;;  %v3884_v41 = vadd.f32 %v11729_v1, %v11536_v15  ;;  %v4183_v12 = vmax.f32 %v3535_v17, 0.0 }
 0x3c6   : > { %v11889_v54 = vpop.f32.mrf.mxu1  ;;  %v4388_v1 = vpack.c.bf16 %v4176_v56, %v4172_v24 }
 0x3c7   : > { %v11891_v9 = vpop.f32.mrf.mxu0  ;;  %v4185_v8 = vmax.f32 %v3888_v46, 0.0  ;;  %v4181_v4 = vmax.f32 %v3884_v41, 0.0  ;;  %v3545_v46 = vadd.f32 %v11771_v2, %v11534_v10  ;;  %v4391_v55 = vpack.c.bf16 %v4183_v12, %v4179_v33 }
 0x3c8   : > { %v11893_v59 = vpop.f32.mrf.mxu1  ;;  %v3529_v41 = vadd.f32 %v16320_v26, %v11567_v38  ;;  %v3541_v2 = vadd.f32 %v11759_v23, %v11534_v10  ;;  %v4182_v12 = vmax.f32 %v3533_v62, 0.0  ;;  %v3543_v62 = vadd.f32 %v11763_v19, %v11567_v38 }
 0x3c9   : > { %v11899_v49 = vpop.f32.mrf.mxu0  ;;  %v4393_v40 = vpack.c.bf16 %v4185_v8, %v4181_v4  ;;  %v4184_v8 = vmax.f32 %v3886_v14, 0.0  ;;  %v4191_v33 = vmax.f32 %v3545_v46, 0.0  ;;  %v3896_v14 = vadd.f32 %v11765_v21, %v11569_v3 }
 0x3ca   : > { %v11901_v44 = vpop.f32.mrf.mxu1  ;;  %v4178_v26 = vmax.f32 %v3529_v41, 0.0  ;;  %v4187_v23 = vmax.f32 %v3541_v2, 0.0  ;;  %v3539_v2 = vadd.f32 %v11751_v13, %v11567_v38  ;;  %v3892_v19 = vadd.f32 %v11753_v30, %v11569_v3 }
 0x3cb   : > { %v11911_v35 = vpop.f32.mrf.mxu0  ;;  %4917 = vmatmul.mubr.bf16.gmra.mxu0 %v4382_v29 }
 0x3cc   : > { %v11913_v57 = vpop.f32.mrf.mxu1  ;;  %5270 = vmatmul.mubr.bf16.gmra.mxu1 %v4384_v18  ;;  %4926 = vmatprep.mubr.bf16.mxu0 %v4387_v27  ;;  %v4395_v41 = vpack.c.bf16 %v4191_v33, %v4187_v23 }
 0x3cd   : > { %16319 = vst [vmem:[#allocation37_spill] sm:$0xff] %v11913_v57  ;;  %5279 = vmatprep.mubr.bf16.mxu1 %v4389_v5  ;;  %v11919_v37 = vpop.f32.mrf.mxu0  ;;  %v4386_v57 = vpack.c.bf16 %v4174_v58, %v4170_v51  ;;  %v3898_v5 = vadd.f32 %v11773_v16, %v11536_v15  ;;  %v3882_v58 = vadd.f32 %v16321_v39, %v11569_v3 }
 0x3ce   : > { %v11921_v60 = vpop.f32.mrf.mxu1  ;;  %v3894_v16 = vadd.f32 %v11761_v0, %v11536_v15 }
 0x3cf   : > { %v11923_v29 = vpop.f32.mrf.mxu0  ;;  %v4193_v4 = vmax.f32 %v3898_v5, 0.0  ;;  %v4180_v39 = vmax.f32 %v3882_v58, 0.0  ;;  %v3555_v5 = vadd.f32 %v11803_v42, %v11534_v10  ;;  %v3551_v42 = vadd.f32 %v11791_v7, %v11534_v10 }
 0x3d0   : > { %v11925_v18 = vpop.f32.mrf.mxu1 }
 0x3d1   : > { %v11931_v27 = vpop.f32.mrf.mxu0  ;;  %v4392_v0 = vpack.c.bf16 %v4184_v8, %v4180_v39  ;;  %v4199_v30 = vmax.f32 %v3555_v5, 0.0  ;;  %v4195_v7 = vmax.f32 %v3551_v42, 0.0  ;;  %v16324_v42 = vld [vmem:[#allocation39_spill] sm:$0xff] }
 0x3d2   : > { %v11933_v17 = vpop.f32.mrf.mxu1 }
 0x3d3   : > { %v11943_v56 = vpop.f32.mrf.mxu0  ;;  %4927 = vmatmul.mubr.bf16.gmra.mxu0 %v4386_v57 }
 0x3d4   : > { %16322 = vst [vmem:[#allocation36_spill] sm:$0xff] %v11943_v56  ;;  %v11945_v28 = vpop.f32.mrf.mxu1  ;;  %5280 = vmatmul.mubr.bf16.gmra.mxu1 %v4388_v1  ;;  %4936 = vmatprep.mubr.bf16.mxu0 %v4391_v55  ;;  %v4390_v56 = vpack.c.bf16 %v4182_v12, %v4178_v26  ;;  %v4192_v12 = vmax.f32 %v3896_v14, 0.0  ;;  %v4188_v26 = vmax.f32 %v3892_v19, 0.0  ;;  %v3906_v14 = vadd.f32 %v11797_v63, %v11569_v3 }
 0x3d5   : > { %16323 = vst [vmem:[#allocation48_spill] sm:$0xff] %v11945_v28  ;;  %5289 = vmatprep.mubr.bf16.mxu1 %v4393_v40  ;;  %v11951_v51 = vpop.f32.mrf.mxu0  ;;  %v4189_v28 = vmax.f32 %v3894_v16, 0.0  ;;  %v3908_v40 = vadd.f32 %v11805_v31, %v11536_v15  ;;  %v3904_v31 = vadd.f32 %v11793_v53, %v11536_v15 }
 0x3d6   : > { %v11953_v24 = vpop.f32.mrf.mxu1  ;;  %v4396_v53 = vpack.c.bf16 %v4192_v12, %v4188_v26 }
 0x3d7   : > { %v11955_v57 = vpop.f32.mrf.mxu0  ;;  %v4397_v58 = vpack.c.bf16 %v4193_v4, %v4189_v28  ;;  %v4190_v28 = vmax.f32 %v3543_v62, 0.0  ;;  %v4201_v33 = vmax.f32 %v3908_v40, 0.0  ;;  %v4186_v4 = vmax.f32 %v3539_v2, 0.0 }
 0x3d8   : > { %v11957_v1 = vpop.f32.mrf.mxu1  ;;  %v4197_v23 = vmax.f32 %v3904_v31, 0.0  ;;  %v3553_v62 = vadd.f32 %v11795_v47, %v11567_v38  ;;  %v3565_v40 = vadd.f32 %v11835_v22, %v11534_v10  ;;  %v4399_v2 = vpack.c.bf16 %v4199_v30, %v4195_v7  ;;  %v16325_v47 = vld [vmem:[#allocation44_spill] sm:$0xff] }
 0x3d9   : > { %v11963_v55 = vpop.f32.mrf.mxu0  ;;  %v3549_v31 = vadd.f32 %v16324_v42, %v11567_v38  ;;  %v3561_v22 = vadd.f32 %v11823_v61, %v11534_v10 }
 0x3da   : > { %v11965_v46 = vpop.f32.mrf.mxu1  ;;  %v4401_v19 = vpack.c.bf16 %v4201_v33, %v4197_v23  ;;  %v4198_v30 = vmax.f32 %v3553_v62, 0.0  ;;  %v4200_v33 = vmax.f32 %v3906_v14, 0.0  ;;  %v4207_v7 = vmax.f32 %v3565_v40, 0.0 }
 0x3db   : > { %v11975_v16 = vpop.f32.mrf.mxu0  ;;  %4937 = vmatmul.mubr.bf16.gmra.mxu0 %v4390_v56  ;;  %v4194_v42 = vmax.f32 %v3549_v31, 0.0  ;;  %v4203_v61 = vmax.f32 %v3561_v22, 0.0  ;;  %v3563_v62 = vadd.f32 %v11827_v6, %v11567_v38  ;;  %v3916_v14 = vadd.f32 %v11829_v20, %v11569_v3  ;;  %v16328_v22 = vld [vmem:[#allocation49_spill] sm:$0xff]  ;;  %v16329_v6 = vld [vmem:[#allocation46_spill] sm:$0xff] }
 0x3dc   : > { %v11977_v21 = vpop.f32.mrf.mxu1  ;;  %5290 = vmatmul.mubr.bf16.gmra.mxu1 %v4392_v0  ;;  %4946 = vmatprep.mubr.bf16.mxu0 %v4395_v41  ;;  %v4394_v0 = vpack.c.bf16 %v4190_v28, %v4186_v4  ;;  %v3902_v28 = vadd.f32 %v16325_v47, %v11569_v3 }
 0x3dd   : > { %5299 = vmatprep.mubr.bf16.mxu1 %v4397_v58  ;;  %v11983_v13 = vpop.f32.mrf.mxu0  ;;  %v3918_v58 = vadd.f32 %v11837_v25, %v11536_v15  ;;  %v3914_v25 = vadd.f32 %v11825_v32, %v11536_v15  ;;  %v4403_v31 = vpack.c.bf16 %v4207_v7, %v4203_v61  ;;  %v4208_v7 = vmax.f32 %v3916_v14, 0.0 }
 0x3de   : > { %v11985_v8 = vpop.f32.mrf.mxu1  ;;  %v4196_v47 = vmax.f32 %v3902_v28, 0.0  ;;  %v3926_v14 = vadd.f32 %v11861_v48, %v11569_v3 }
 0x3df   : > { %v11987_v56 = vpop.f32.mrf.mxu0  ;;  %v4209_v23 = vmax.f32 %v3918_v58, 0.0  ;;  %v3575_v58 = vadd.f32 %v11867_v50, %v11534_v10  ;;  %v3571_v50 = vadd.f32 %v11855_v34, %v11534_v10 }
 0x3e0   : > { %v11989_v39 = vpop.f32.mrf.mxu1  ;;  %v4400_v32 = vpack.c.bf16 %v4200_v33, %v4196_v47 }
 0x3e1   : > { %v11995_v41 = vpop.f32.mrf.mxu0  ;;  %v4215_v47 = vmax.f32 %v3575_v58, 0.0  ;;  %v4211_v34 = vmax.f32 %v3571_v50, 0.0  ;;  %v16332_v50 = vld [vmem:[#allocation47_spill] sm:$0xff] }
 0x3e2   : > { %v11997_v5 = vpop.f32.mrf.mxu1 }
 0x3e3   : > { %v12007_v12 = vpop.f32.mrf.mxu0  ;;  %4947 = vmatmul.mubr.bf16.gmra.mxu0 %v4394_v0 }
 0x3e4   : > { %16326 = vst [vmem:[#allocation41_spill] sm:$0xff] %v12007_v12  ;;  %v12009_v63 = vpop.f32.mrf.mxu1  ;;  %5300 = vmatmul.mubr.bf16.gmra.mxu1 %v4396_v53  ;;  %4956 = vmatprep.mubr.bf16.mxu0 %v4399_v2  ;;  %v4398_v12 = vpack.c.bf16 %v4198_v30, %v4194_v42  ;;  %v3912_v30 = vadd.f32 %v16329_v6, %v11569_v3 }
 0x3e5   : > { %16327 = vst [vmem:[#allocation39_spill] sm:$0xff] %v12009_v63  ;;  %5309 = vmatprep.mubr.bf16.mxu1 %v4401_v19  ;;  %v12015_v4 = vpop.f32.mrf.mxu0  ;;  %v4205_v63 = vmax.f32 %v3914_v25, 0.0  ;;  %v3928_v19 = vadd.f32 %v11869_v11, %v11536_v15  ;;  %v3559_v25 = vadd.f32 %v16328_v22, %v11567_v38  ;;  %v3924_v11 = vadd.f32 %v11857_v45, %v11536_v15 }
 0x3e6   : > { %v12017_v26 = vpop.f32.mrf.mxu1  ;;  %v4204_v6 = vmax.f32 %v3912_v30, 0.0 }
 0x3e7   : > { %v12019_v0 = vpop.f32.mrf.mxu0  ;;  %v4405_v28 = vpack.c.bf16 %v4209_v23, %v4205_v63  ;;  %v4206_v63 = vmax.f32 %v3563_v62, 0.0  ;;  %v4217_v61 = vmax.f32 %v3928_v19, 0.0  ;;  %v4202_v22 = vmax.f32 %v3559_v25, 0.0 }
 0x3e8   : > { %v12021_v53 = vpop.f32.mrf.mxu1  ;;  %v4404_v45 = vpack.c.bf16 %v4208_v7, %v4204_v6  ;;  %v3573_v62 = vadd.f32 %v11859_v36, %v11567_v38  ;;  %v3585_v19 = vadd.f32 %v11899_v49, %v11534_v10  ;;  %v4407_v25 = vpack.c.bf16 %v4215_v47, %v4211_v34  ;;  %v16333_v36 = vld [vmem:[#allocation45_spill] sm:$0xff] }
 0x3e9   : > { %v12027_v2 = vpop.f32.mrf.mxu0  ;;  %v3581_v49 = vadd.f32 %v11887_v52, %v11534_v10  ;;  %v4216_v47 = vmax.f32 %v3926_v14, 0.0  ;;  %v3936_v14 = vadd.f32 %v11893_v59, %v11569_v3 }
 0x3ea   : > { %v12029_v40 = vpop.f32.mrf.mxu1  ;;  %v4223_v6 = vmax.f32 %v3585_v19, 0.0 }
 0x3eb   : > { %v12039_v33 = vpop.f32.mrf.mxu0  ;;  %4957 = vmatmul.mubr.bf16.gmra.mxu0 %v4398_v12  ;;  %v4219_v52 = vmax.f32 %v3581_v49, 0.0  ;;  %v3579_v49 = vadd.f32 %v11879_v43, %v11567_v38 }
 0x3ec   : > { %16330 = vst [vmem:[#allocation44_spill] sm:$0xff] %v12039_v33  ;;  %v12041_v20 = vpop.f32.mrf.mxu1  ;;  %5310 = vmatmul.mubr.bf16.gmra.mxu1 %v4400_v32  ;;  %4966 = vmatprep.mubr.bf16.mxu0 %v4403_v31  ;;  %v4402_v33 = vpack.c.bf16 %v4206_v63, %v4202_v22  ;;  %v3922_v63 = vadd.f32 %v16333_v36, %v11569_v3 }
 0x3ed   : > { %16331 = vst [vmem:[#allocation49_spill] sm:$0xff] %v12041_v20  ;;  %5319 = vmatprep.mubr.bf16.mxu1 %v4405_v28  ;;  %v12047_v23 = vpop.f32.mrf.mxu0  ;;  %v4213_v20 = vmax.f32 %v3924_v11, 0.0  ;;  %v3938_v28 = vadd.f32 %v11901_v44, %v11536_v15  ;;  %v3569_v11 = vadd.f32 %v16332_v50, %v11567_v38  ;;  %v3934_v44 = vadd.f32 %v11889_v54, %v11536_v15 }
 0x3ee   : > { %v12049_v42 = vpop.f32.mrf.mxu1  ;;  %v4212_v36 = vmax.f32 %v3922_v63, 0.0 }
 0x3ef   : > { %v12051_v12 = vpop.f32.mrf.mxu0  ;;  %v4409_v30 = vpack.c.bf16 %v4217_v61, %v4213_v20  ;;  %v4214_v20 = vmax.f32 %v3573_v62, 0.0  ;;  %v4225_v34 = vmax.f32 %v3938_v28, 0.0  ;;  %v4210_v50 = vmax.f32 %v3569_v11, 0.0 }
 0x3f0   : > { %v12053_v32 = vpop.f32.mrf.mxu1  ;;  %v4408_v54 = vpack.c.bf16 %v4216_v47, %v4212_v36  ;;  %v3583_v62 = vadd.f32 %v11891_v9, %v11567_v38  ;;  %v3595_v28 = vadd.f32 %v11931_v27, %v11534_v10  ;;  %v4411_v11 = vpack.c.bf16 %v4223_v6, %v4219_v52  ;;  %v16336_v9 = vld [vmem:[#allocation43_spill] sm:$0xff] }
 0x3f1   : > { %v12059_v31 = vpop.f32.mrf.mxu0  ;;  %v3591_v27 = vadd.f32 %v11919_v37, %v11534_v10  ;;  %v4224_v47 = vmax.f32 %v3936_v14, 0.0  ;;  %v4218_v36 = vmax.f32 %v3579_v49, 0.0  ;;  %v3946_v14 = vadd.f32 %v11925_v18, %v11569_v3 }
 0x3f2   : > { %v12061_v58 = vpop.f32.mrf.mxu1 }
 0x3f3   : > { %v12071_v7 = vpop.f32.mrf.mxu0  ;;  %4967 = vmatmul.mubr.bf16.gmra.mxu0 %v4402_v33  ;;  %v4227_v37 = vmax.f32 %v3591_v27, 0.0  ;;  %v3589_v27 = vadd.f32 %v11911_v35, %v11567_v38 }
 0x3f4   : > { %16334 = vst [vmem:[#allocation46_spill] sm:$0xff] %v12071_v7  ;;  %v12073_v48 = vpop.f32.mrf.mxu1  ;;  %5320 = vmatmul.mubr.bf16.gmra.mxu1 %v4404_v45  ;;  %4976 = vmatprep.mubr.bf16.mxu0 %v4407_v25  ;;  %v4406_v7 = vpack.c.bf16 %v4214_v20, %v4210_v50 }
 0x3f5   : > { %16335 = vst [vmem:[#allocation47_spill] sm:$0xff] %v12073_v48  ;;  %5329 = vmatprep.mubr.bf16.mxu1 %v4409_v30  ;;  %v12079_v61 = vpop.f32.mrf.mxu0  ;;  %v4221_v48 = vmax.f32 %v3934_v44, 0.0  ;;  %v3948_v30 = vadd.f32 %v11933_v17, %v11536_v15  ;;  %v3932_v44 = vadd.f32 %v16336_v9, %v11569_v3  ;;  %v3944_v17 = vadd.f32 %v11921_v60, %v11536_v15 }
 0x3f6   : > { %v12081_v22 = vpop.f32.mrf.mxu1 }
 0x3f7   : > { %v12083_v33 = vpop.f32.mrf.mxu0  ;;  %v4413_v63 = vpack.c.bf16 %v4225_v34, %v4221_v48  ;;  %v4222_v48 = vmax.f32 %v3583_v62, 0.0  ;;  %v4231_v34 = vmax.f32 %v3595_v28, 0.0  ;;  %v4233_v50 = vmax.f32 %v3948_v30, 0.0 }
 0x3f8   : > { %v12085_v45 = vpop.f32.mrf.mxu1  ;;  %v4220_v52 = vmax.f32 %v3932_v44, 0.0  ;;  %v4229_v9 = vmax.f32 %v3944_v17, 0.0  ;;  %v3593_v62 = vadd.f32 %v11923_v29, %v11567_v38  ;;  %v3605_v30 = vadd.f32 %v11963_v55, %v11534_v10  ;;  %v16338_v29 = vld [vmem:[#allocation37_spill] sm:$0xff] }
 0x3f9   : > { %v12091_v25 = vpop.f32.mrf.mxu0  ;;  %v4415_v49 = vpack.c.bf16 %v4231_v34, %v4227_v37  ;;  %v3942_v17 = vadd.f32 %v16338_v29, %v11569_v3  ;;  %v3601_v55 = vadd.f32 %v11951_v51, %v11534_v10  ;;  %v4232_v34 = vmax.f32 %v3946_v14, 0.0 }
 0x3fa   : > { %v12093_v19 = vpop.f32.mrf.mxu1  ;;  %v4412_v60 = vpack.c.bf16 %v4224_v47, %v4220_v52  ;;  %v4417_v44 = vpack.c.bf16 %v4233_v50, %v4229_v9  ;;  %v4230_v47 = vmax.f32 %v3593_v62, 0.0  ;;  %v4226_v37 = vmax.f32 %v3589_v27, 0.0 }
 0x3fb   : > { %v12103_v20 = vpop.f32.mrf.mxu0  ;;  %4977 = vmatmul.mubr.bf16.gmra.mxu0 %v4406_v7  ;;  %v4228_v9 = vmax.f32 %v3942_v17, 0.0  ;;  %v4235_v51 = vmax.f32 %v3601_v55, 0.0  ;;  %v3603_v62 = vadd.f32 %v11955_v57, %v11567_v38  ;;  %v3956_v14 = vadd.f32 %v11957_v1, %v11569_v3  ;;  %v16340_v55 = vld [vmem:[#allocation36_spill] sm:$0xff] }
 0x3fc   : > { %v12105_v59 = vpop.f32.mrf.mxu1  ;;  %5330 = vmatmul.mubr.bf16.gmra.mxu1 %v4408_v54  ;;  %4986 = vmatprep.mubr.bf16.mxu0 %v4411_v11  ;;  %v16341_v57 = vld [vmem:[#allocation48_spill] sm:$0xff] }
 0x3fd   : > { %16337 = vst [vmem:[#allocation45_spill] sm:$0xff] %v12105_v59  ;;  %5339 = vmatprep.mubr.bf16.mxu1 %v4413_v63  ;;  %v12111_v43 = vpop.f32.mrf.mxu0  ;;  %v4410_v59 = vpack.c.bf16 %v4222_v48, %v4218_v36  ;;  %v3958_v63 = vadd.f32 %v11965_v46, %v11536_v15  ;;  %v3954_v46 = vadd.f32 %v11953_v24, %v11536_v15  ;;  %v4239_v36 = vmax.f32 %v3605_v30, 0.0 }
 0x3fe   : > { %v12113_v6 = vpop.f32.mrf.mxu1  ;;  %v4416_v24 = vpack.c.bf16 %v4232_v34, %v4228_v9 }
 0x3ff   : > { %v12115_v7 = vpop.f32.mrf.mxu0  ;;  %v4241_v52 = vmax.f32 %v3958_v63, 0.0  ;;  %v4237_v29 = vmax.f32 %v3954_v46, 0.0  ;;  %v3615_v63 = vadd.f32 %v11995_v41, %v11534_v10  ;;  %v4419_v27 = vpack.c.bf16 %v4239_v36, %v4235_v51 }
 0x400   : > { %v12117_v54 = vpop.f32.mrf.mxu1  ;;  %v3599_v46 = vadd.f32 %v16340_v55, %v11567_v38  ;;  %v3611_v41 = vadd.f32 %v11983_v13, %v11534_v10  ;;  %v4238_v36 = vmax.f32 %v3603_v62, 0.0  ;;  %v3613_v62 = vadd.f32 %v11987_v56, %v11567_v38 }
 0x401   : > { %v12123_v11 = vpop.f32.mrf.mxu0  ;;  %v4421_v17 = vpack.c.bf16 %v4241_v52, %v4237_v29  ;;  %v4240_v52 = vmax.f32 %v3956_v14, 0.0  ;;  %v4247_v51 = vmax.f32 %v3615_v63, 0.0  ;;  %v3966_v14 = vadd.f32 %v11989_v39, %v11569_v3 }
 0x402   : > { %v12125_v28 = vpop.f32.mrf.mxu1  ;;  %v4234_v55 = vmax.f32 %v3599_v46, 0.0  ;;  %v4243_v13 = vmax.f32 %v3611_v41, 0.0  ;;  %v3609_v41 = vadd.f32 %v11975_v16, %v11567_v38  ;;  %v3962_v56 = vadd.f32 %v11977_v21, %v11569_v3 }
 0x403   : > { %v12135_v48 = vpop.f32.mrf.mxu0  ;;  %4987 = vmatmul.mubr.bf16.gmra.mxu0 %v4410_v59 }
 0x404   : > { %v12137_v18 = vpop.f32.mrf.mxu1  ;;  %5340 = vmatmul.mubr.bf16.gmra.mxu1 %v4412_v60  ;;  %4996 = vmatprep.mubr.bf16.mxu0 %v4415_v49  ;;  %v4423_v46 = vpack.c.bf16 %v4247_v51, %v4243_v13 }
 0x405   : > { %16339 = vst [vmem:[#allocation43_spill] sm:$0xff] %v12137_v18  ;;  %5349 = vmatprep.mubr.bf16.mxu1 %v4417_v44  ;;  %v12143_v35 = vpop.f32.mrf.mxu0  ;;  %v4414_v18 = vpack.c.bf16 %v4230_v47, %v4226_v37  ;;  %v3968_v44 = vadd.f32 %v11997_v5, %v11536_v15  ;;  %v3952_v47 = vadd.f32 %v16341_v57, %v11569_v3 }
 0x406   : > { %v12145_v50 = vpop.f32.mrf.mxu1  ;;  %v3964_v5 = vadd.f32 %v11985_v8, %v11536_v15 }
 0x407   : > { %v12147_v59 = vpop.f32.mrf.mxu0  ;;  %v4249_v29 = vmax.f32 %v3968_v44, 0.0  ;;  %v4236_v57 = vmax.f32 %v3952_v47, 0.0  ;;  %v3625_v44 = vadd.f32 %v12027_v2, %v11534_v10  ;;  %v3621_v2 = vadd.f32 %v12015_v4, %v11534_v10 }
 0x408   : > { %v12149_v60 = vpop.f32.mrf.mxu1 }
 0x409   : > { %v12155_v49 = vpop.f32.mrf.mxu0  ;;  %v4420_v8 = vpack.c.bf16 %v4240_v52, %v4236_v57  ;;  %v4255_v21 = vmax.f32 %v3625_v44, 0.0  ;;  %v4251_v4 = vmax.f32 %v3621_v2, 0.0  ;;  %v16344_v2 = vld [vmem:[#allocation41_spill] sm:$0xff] }
 0x40a   : > { %v12157_v30 = vpop.f32.mrf.mxu1 }
 0x40b   : > { %v12167_v34 = vpop.f32.mrf.mxu0  ;;  %4997 = vmatmul.mubr.bf16.gmra.mxu0 %v4414_v18 }
 0x40c   : > { %16342 = vst [vmem:[#allocation37_spill] sm:$0xff] %v12167_v34  ;;  %v12169_v1 = vpop.f32.mrf.mxu1  ;;  %5350 = vmatmul.mubr.bf16.gmra.mxu1 %v4416_v24  ;;  %5006 = vmatprep.mubr.bf16.mxu0 %v4419_v27  ;;  %v4418_v34 = vpack.c.bf16 %v4238_v36, %v4234_v55  ;;  %v4248_v36 = vmax.f32 %v3966_v14, 0.0  ;;  %v4244_v55 = vmax.f32 %v3962_v56, 0.0  ;;  %v3976_v14 = vadd.f32 %v12021_v53, %v11569_v3 }
 0x40d   : > { %16343 = vst [vmem:[#allocation36_spill] sm:$0xff] %v12169_v1  ;;  %5359 = vmatprep.mubr.bf16.mxu1 %v4421_v17  ;;  %v12175_v37 = vpop.f32.mrf.mxu0  ;;  %v4245_v1 = vmax.f32 %v3964_v5, 0.0  ;;  %v3978_v17 = vadd.f32 %v12029_v40, %v11536_v15  ;;  %v3974_v40 = vadd.f32 %v12017_v26, %v11536_v15 }
 0x40e   : > { %v12177_v9 = vpop.f32.mrf.mxu1  ;;  %v4424_v26 = vpack.c.bf16 %v4248_v36, %v4244_v55 }
 0x40f   : > { %v12179_v18 = vpop.f32.mrf.mxu0  ;;  %v4425_v47 = vpack.c.bf16 %v4249_v29, %v4245_v1  ;;  %v4246_v1 = vmax.f32 %v3613_v62, 0.0  ;;  %v4257_v51 = vmax.f32 %v3978_v17, 0.0  ;;  %v4242_v29 = vmax.f32 %v3609_v41, 0.0 }
 0x410   : > { %v12181_v24 = vpop.f32.mrf.mxu1  ;;  %v4253_v13 = vmax.f32 %v3974_v40, 0.0  ;;  %v3623_v62 = vadd.f32 %v12019_v0, %v11567_v38  ;;  %v3635_v17 = vadd.f32 %v12059_v31, %v11534_v10  ;;  %v4427_v41 = vpack.c.bf16 %v4255_v21, %v4251_v4  ;;  %v16345_v0 = vld [vmem:[#allocation39_spill] sm:$0xff] }
 0x411   : > { %v12187_v27 = vpop.f32.mrf.mxu0  ;;  %v3619_v40 = vadd.f32 %v16344_v2, %v11567_v38  ;;  %v3631_v31 = vadd.f32 %v12047_v23, %v11534_v10 }
 0x412   : > { %v12189_v63 = vpop.f32.mrf.mxu1  ;;  %v4429_v56 = vpack.c.bf16 %v4257_v51, %v4253_v13  ;;  %v4254_v21 = vmax.f32 %v3623_v62, 0.0  ;;  %v4256_v51 = vmax.f32 %v3976_v14, 0.0  ;;  %v4263_v4 = vmax.f32 %v3635_v17, 0.0 }
 0x413   : > { %v12199_v5 = vpop.f32.mrf.mxu0  ;;  %5007 = vmatmul.mubr.bf16.gmra.mxu0 %v4418_v34  ;;  %v4250_v2 = vmax.f32 %v3619_v40, 0.0  ;;  %v4259_v23 = vmax.f32 %v3631_v31, 0.0  ;;  %v3633_v62 = vadd.f32 %v12051_v12, %v11567_v38  ;;  %v3986_v14 = vadd.f32 %v12053_v32, %v11569_v3  ;;  %v16348_v31 = vld [vmem:[#allocation44_spill] sm:$0xff]  ;;  %v16349_v12 = vld [vmem:[#allocation49_spill] sm:$0xff] }
 0x414   : > { %v12201_v39 = vpop.f32.mrf.mxu1  ;;  %5360 = vmatmul.mubr.bf16.gmra.mxu1 %v4420_v8  ;;  %5016 = vmatprep.mubr.bf16.mxu0 %v4423_v46  ;;  %v4422_v8 = vpack.c.bf16 %v4246_v1, %v4242_v29  ;;  %v3972_v1 = vadd.f32 %v16345_v0, %v11569_v3 }
 0x415   : > { %5369 = vmatprep.mubr.bf16.mxu1 %v4425_v47  ;;  %v12207_v16 = vpop.f32.mrf.mxu0  ;;  %v3988_v47 = vadd.f32 %v12061_v58, %v11536_v15  ;;  %v3984_v58 = vadd.f32 %v12049_v42, %v11536_v15  ;;  %v4431_v40 = vpack.c.bf16 %v4263_v4, %v4259_v23  ;;  %v4264_v4 = vmax.f32 %v3986_v14, 0.0 }
 0x416   : > { %v12209_v52 = vpop.f32.mrf.mxu1  ;;  %v4252_v0 = vmax.f32 %v3972_v1, 0.0  ;;  %v3996_v14 = vadd.f32 %v12085_v45, %v11569_v3 }
 0x417   : > { %v12211_v34 = vpop.f32.mrf.mxu0  ;;  %v4265_v13 = vmax.f32 %v3988_v47, 0.0  ;;  %v3645_v47 = vadd.f32 %v12091_v25, %v11534_v10  ;;  %v3641_v25 = vadd.f32 %v12079_v61, %v11534_v10 }
 0x418   : > { %v12213_v57 = vpop.f32.mrf.mxu1  ;;  %v4428_v42 = vpack.c.bf16 %v4256_v51, %v4252_v0 }
 0x419   : > { %v12219_v46 = vpop.f32.mrf.mxu0  ;;  %v4271_v0 = vmax.f32 %v3645_v47, 0.0  ;;  %v4267_v61 = vmax.f32 %v3641_v25, 0.0  ;;  %v16352_v25 = vld [vmem:[#allocation46_spill] sm:$0xff] }
 0x41a   : > { %v12221_v44 = vpop.f32.mrf.mxu1 }
 0x41b   : > { %v12231_v36 = vpop.f32.mrf.mxu0  ;;  %5017 = vmatmul.mubr.bf16.gmra.mxu0 %v4422_v8 }
 0x41c   : > { %16346 = vst [vmem:[#allocation48_spill] sm:$0xff] %v12231_v36  ;;  %v12233_v53 = vpop.f32.mrf.mxu1  ;;  %5370 = vmatmul.mubr.bf16.gmra.mxu1 %v4424_v26  ;;  %5026 = vmatprep.mubr.bf16.mxu0 %v4427_v41  ;;  %v4426_v36 = vpack.c.bf16 %v4254_v21, %v4250_v2  ;;  %v3982_v21 = vadd.f32 %v16349_v12, %v11569_v3 }
 0x41d   : > { %16347 = vst [vmem:[#allocation41_spill] sm:$0xff] %v12233_v53  ;;  %5379 = vmatprep.mubr.bf16.mxu1 %v4429_v56  ;;  %v12239_v29 = vpop.f32.mrf.mxu0  ;;  %v4261_v53 = vmax.f32 %v3984_v58, 0.0  ;;  %v3998_v56 = vadd.f32 %v12093_v19, %v11536_v15  ;;  %v3629_v58 = vadd.f32 %v16348_v31, %v11567_v38  ;;  %v3994_v19 = vadd.f32 %v12081_v22, %v11536_v15 }
 0x41e   : > { %v12241_v55 = vpop.f32.mrf.mxu1  ;;  %v4260_v12 = vmax.f32 %v3982_v21, 0.0 }
 0x41f   : > { %v12243_v8 = vpop.f32.mrf.mxu0  ;;  %v4433_v1 = vpack.c.bf16 %v4265_v13, %v4261_v53  ;;  %v4262_v53 = vmax.f32 %v3633_v62, 0.0  ;;  %v4273_v23 = vmax.f32 %v3998_v56, 0.0  ;;  %v4258_v31 = vmax.f32 %v3629_v58, 0.0 }
 0x420   : > { %v12245_v26 = vpop.f32.mrf.mxu1  ;;  %v4432_v22 = vpack.c.bf16 %v4264_v4, %v4260_v12  ;;  %v3643_v62 = vadd.f32 %v12083_v33, %v11567_v38  ;;  %v3655_v56 = vadd.f32 %v12123_v11, %v11534_v10  ;;  %v4435_v58 = vpack.c.bf16 %v4271_v0, %v4267_v61  ;;  %v16353_v33 = vld [vmem:[#allocation47_spill] sm:$0xff] }
 0x421   : > { %v12251_v41 = vpop.f32.mrf.mxu0  ;;  %v3651_v11 = vadd.f32 %v12111_v43, %v11534_v10  ;;  %v4272_v0 = vmax.f32 %v3996_v14, 0.0  ;;  %v4006_v14 = vadd.f32 %v12117_v54, %v11569_v3 }
 0x422   : > { %v12253_v17 = vpop.f32.mrf.mxu1  ;;  %v4279_v12 = vmax.f32 %v3655_v56, 0.0 }
 0x423   : > { %v12263_v51 = vpop.f32.mrf.mxu0  ;;  %5027 = vmatmul.mubr.bf16.gmra.mxu0 %v4426_v36  ;;  %v4275_v43 = vmax.f32 %v3651_v11, 0.0  ;;  %v3649_v11 = vadd.f32 %v12103_v20, %v11567_v38 }
 0x424   : > { %16350 = vst [vmem:[#allocation39_spill] sm:$0xff] %v12263_v51  ;;  %v12265_v32 = vpop.f32.mrf.mxu1  ;;  %5380 = vmatmul.mubr.bf16.gmra.mxu1 %v4428_v42  ;;  %5036 = vmatprep.mubr.bf16.mxu0 %v4431_v40  ;;  %v4430_v51 = vpack.c.bf16 %v4262_v53, %v4258_v31  ;;  %v3992_v53 = vadd.f32 %v16353_v33, %v11569_v3 }
 0x425   : > { %16351 = vst [vmem:[#allocation44_spill] sm:$0xff] %v12265_v32  ;;  %5389 = vmatprep.mubr.bf16.mxu1 %v4433_v1  ;;  %v12271_v13 = vpop.f32.mrf.mxu0  ;;  %v4269_v32 = vmax.f32 %v3994_v19, 0.0  ;;  %v4008_v1 = vadd.f32 %v12125_v28, %v11536_v15  ;;  %v3639_v19 = vadd.f32 %v16352_v25, %v11567_v38  ;;  %v4004_v28 = vadd.f32 %v12113_v6, %v11536_v15 }
 0x426   : > { %v12273_v2 = vpop.f32.mrf.mxu1  ;;  %v4268_v33 = vmax.f32 %v3992_v53, 0.0 }
 0x427   : > { %v12275_v36 = vpop.f32.mrf.mxu0  ;;  %v4437_v21 = vpack.c.bf16 %v4273_v23, %v4269_v32  ;;  %v4270_v32 = vmax.f32 %v3643_v62, 0.0  ;;  %v4281_v61 = vmax.f32 %v4008_v1, 0.0  ;;  %v4266_v25 = vmax.f32 %v3639_v19, 0.0 }
 0x428   : > { %v12277_v42 = vpop.f32.mrf.mxu1  ;;  %v4436_v6 = vpack.c.bf16 %v4272_v0, %v4268_v33  ;;  %v3653_v62 = vadd.f32 %v12115_v7, %v11567_v38  ;;  %v3665_v1 = vadd.f32 %v12155_v49, %v11534_v10  ;;  %v4439_v19 = vpack.c.bf16 %v4279_v12, %v4275_v43  ;;  %v16356_v7 = vld [vmem:[#allocation45_spill] sm:$0xff] }
 0x429   : > { %v12283_v40 = vpop.f32.mrf.mxu0  ;;  %v3661_v49 = vadd.f32 %v12143_v35, %v11534_v10  ;;  %v4280_v0 = vmax.f32 %v4006_v14, 0.0  ;;  %v4274_v33 = vmax.f32 %v3649_v11, 0.0  ;;  %v4016_v14 = vadd.f32 %v12149_v60, %v11569_v3 }
 0x42a   : > { %v12285_v47 = vpop.f32.mrf.mxu1 }
 0x42b   : > { %v12295_v4 = vpop.f32.mrf.mxu0  ;;  %5037 = vmatmul.mubr.bf16.gmra.mxu0 %v4430_v51  ;;  %v4283_v35 = vmax.f32 %v3661_v49, 0.0  ;;  %v3659_v49 = vadd.f32 %v12135_v48, %v11567_v38 }
 0x42c   : > { %16354 = vst [vmem:[#allocation49_spill] sm:$0xff] %v12295_v4  ;;  %v12297_v45 = vpop.f32.mrf.mxu1  ;;  %5390 = vmatmul.mubr.bf16.gmra.mxu1 %v4432_v22  ;;  %5046 = vmatprep.mubr.bf16.mxu0 %v4435_v58  ;;  %v4434_v4 = vpack.c.bf16 %v4270_v32, %v4266_v25 }
 0x42d   : > { %16355 = vst [vmem:[#allocation46_spill] sm:$0xff] %v12297_v45  ;;  %5399 = vmatprep.mubr.bf16.mxu1 %v4437_v21  ;;  %v12303_v23 = vpop.f32.mrf.mxu0  ;;  %v4277_v45 = vmax.f32 %v4004_v28, 0.0  ;;  %v4018_v21 = vadd.f32 %v12157_v30, %v11536_v15  ;;  %v4002_v28 = vadd.f32 %v16356_v7, %v11569_v3  ;;  %v4014_v30 = vadd.f32 %v12145_v50, %v11536_v15 }
 0x42e   : > { %v12305_v31 = vpop.f32.mrf.mxu1 }
 0x42f   : > { %v12307_v51 = vpop.f32.mrf.mxu0  ;;  %v4441_v53 = vpack.c.bf16 %v4281_v61, %v4277_v45  ;;  %v4278_v45 = vmax.f32 %v3653_v62, 0.0  ;;  %v4287_v61 = vmax.f32 %v3665_v1, 0.0  ;;  %v4289_v25 = vmax.f32 %v4018_v21, 0.0 }
 0x430   : > { %v12309_v22 = vpop.f32.mrf.mxu1  ;;  %v4276_v43 = vmax.f32 %v4002_v28, 0.0  ;;  %v4285_v7 = vmax.f32 %v4014_v30, 0.0  ;;  %v3663_v62 = vadd.f32 %v12147_v59, %v11567_v38  ;;  %v3675_v21 = vadd.f32 %v12187_v27, %v11534_v10  ;;  %v16358_v59 = vld [vmem:[#allocation43_spill] sm:$0xff] }
 0x431   : > { %v12315_v58 = vpop.f32.mrf.mxu0  ;;  %v4443_v11 = vpack.c.bf16 %v4287_v61, %v4283_v35  ;;  %v4012_v30 = vadd.f32 %v16358_v59, %v11569_v3  ;;  %v3671_v27 = vadd.f32 %v12175_v37, %v11534_v10  ;;  %v4288_v61 = vmax.f32 %v4016_v14, 0.0 }
 0x432   : > { %v12317_v56 = vpop.f32.mrf.mxu1  ;;  %v4440_v50 = vpack.c.bf16 %v4280_v0, %v4276_v43  ;;  %v4445_v28 = vpack.c.bf16 %v4289_v25, %v4285_v7  ;;  %v4286_v0 = vmax.f32 %v3663_v62, 0.0  ;;  %v4282_v35 = vmax.f32 %v3659_v49, 0.0  ;;  %v16362_v49 = vld [vmem:[#allocation37_spill] sm:$0xff] }
 0x433   : > { %v12327_v32 = vpop.f32.mrf.mxu0  ;;  %5047 = vmatmul.mubr.bf16.gmra.mxu0 %v4434_v4  ;;  %v4284_v7 = vmax.f32 %v4012_v30, 0.0  ;;  %v4291_v37 = vmax.f32 %v3671_v27, 0.0  ;;  %v4026_v14 = vadd.f32 %v12181_v24, %v11569_v3  ;;  %v3669_v30 = vadd.f32 %v16362_v49, %v11567_v38 }
 0x434   : > { %v12329_v54 = vpop.f32.mrf.mxu1  ;;  %5400 = vmatmul.mubr.bf16.gmra.mxu1 %v4436_v6  ;;  %5056 = vmatprep.mubr.bf16.mxu0 %v4439_v19  ;;  %v4038_v27 = vadd.f32 %v12221_v44, %v11536_v15  ;;  %v3681_v24 = vadd.f32 %v12207_v16, %v11534_v10 }
 0x435   : > { %16357 = vst [vmem:[#allocation47_spill] sm:$0xff] %v12329_v54  ;;  %5409 = vmatprep.mubr.bf16.mxu1 %v4441_v53  ;;  %v12335_v20 = vpop.f32.mrf.mxu0  ;;  %v4438_v54 = vpack.c.bf16 %v4278_v45, %v4274_v33  ;;  %v4028_v53 = vadd.f32 %v12189_v63, %v11536_v15  ;;  %v4024_v63 = vadd.f32 %v12177_v9, %v11536_v15  ;;  %v4295_v33 = vmax.f32 %v3675_v21, 0.0 }
 0x436   : > { %v12337_v12 = vpop.f32.mrf.mxu1  ;;  %v3673_v9 = vadd.f32 %v12179_v18, %v11567_v38  ;;  %v4444_v62 = vpack.c.bf16 %v4288_v61, %v4284_v7  ;;  %v3685_v21 = vadd.f32 %v12219_v46, %v11534_v10  ;;  %v4296_v49 = vmax.f32 %v4026_v14, 0.0 }
 0x437   : > { %v12339_v4 = vpop.f32.mrf.mxu0  ;;  %v4297_v43 = vmax.f32 %v4028_v53, 0.0  ;;  %v4293_v59 = vmax.f32 %v4024_v63, 0.0  ;;  %v4447_v63 = vpack.c.bf16 %v4295_v33, %v4291_v37 }
 0x438   : > { %v12341_v6 = vpop.f32.mrf.mxu1  ;;  %v4294_v7 = vmax.f32 %v3673_v9, 0.0  ;;  %v4303_v44 = vmax.f32 %v3685_v21, 0.0  ;;  %v3683_v9 = vadd.f32 %v12211_v34, %v11567_v38  ;;  %v3679_v21 = vadd.f32 %v12199_v5, %v11567_v38 }
 0x439   : > { %v12347_v19 = vpop.f32.mrf.mxu0  ;;  %v4449_v18 = vpack.c.bf16 %v4297_v43, %v4293_v59  ;;  %v4290_v59 = vmax.f32 %v3669_v30, 0.0  ;;  %v4036_v30 = vadd.f32 %v12213_v57, %v11569_v3  ;;  %v4048_v34 = vadd.f32 %v12253_v17, %v11536_v15 }
 0x43a   : > { %v12349_v1 = vpop.f32.mrf.mxu1  ;;  %v3691_v57 = vadd.f32 %v12239_v29, %v11534_v10  ;;  %v4298_v17 = vmax.f32 %v3679_v21, 0.0  ;;  %v16371_v21 = vld [vmem:[#allocation48_spill] sm:$0xff] }
 0x43b   : > { %v12359_v45 = vpop.f32.mrf.mxu0  ;;  %5057 = vmatmul.mubr.bf16.gmra.mxu0 %v4438_v54 }
 0x43c   : > { %16359 = vst [vmem:[#allocation45_spill] sm:$0xff] %v12359_v45  ;;  %v12361_v60 = vpop.f32.mrf.mxu1  ;;  %5410 = vmatmul.mubr.bf16.gmra.mxu1 %v4440_v50  ;;  %5066 = vmatprep.mubr.bf16.mxu0 %v4443_v11  ;;  %v4442_v11 = vpack.c.bf16 %v4286_v0, %v4282_v35  ;;  %v16363_v0 = vld [vmem:[#allocation36_spill] sm:$0xff]  ;;  %v4307_v29 = vmax.f32 %v3691_v57, 0.0  ;;  %v3701_v57 = vadd.f32 %v12271_v13, %v11534_v10 }
 0x43d   : > { %16360 = vst [vmem:[#allocation43_spill] sm:$0xff] %v12361_v60  ;;  %5419 = vmatprep.mubr.bf16.mxu1 %v4445_v28  ;;  %v12367_v48 = vpop.f32.mrf.mxu0  ;;  %v4022_v61 = vadd.f32 %v16363_v0, %v11569_v3  ;;  %v4034_v60 = vadd.f32 %v12209_v52, %v11536_v15  ;;  %v4305_v0 = vmax.f32 %v4038_v27, 0.0  ;;  %v4446_v52 = vpack.c.bf16 %v4294_v7, %v4290_v59 }
 0x43e   : > { %v12369_v25 = vpop.f32.mrf.mxu1  ;;  %v4302_v7 = vmax.f32 %v3683_v9, 0.0 }
 0x43f   : > { %v12371_v54 = vpop.f32.mrf.mxu0  ;;  %v4292_v16 = vmax.f32 %v4022_v61, 0.0 }
 0x440   : > { %v12373_v50 = vpop.f32.mrf.mxu1  ;;  %v4450_v9 = vpack.c.bf16 %v4302_v7, %v4298_v17  ;;  %v4054_v17 = vadd.f32 %v12273_v2, %v11536_v15 }
 0x441   : > { %16361 = vst [vmem:[#allocation50_spill] sm:$0xff] %v12373_v50  ;;  %v12381_v53 = vpop.f32.mrf.mxu0  ;;  %v4448_v14 = vpack.c.bf16 %v4296_v49, %v4292_v16 }
 0x442   : > { %v12383_v28 = vpop.f32.mrf.mxu1 }
 0x443   : > { %v4828_v35 = vpop.f32.mrf.mxu0  ;;  %5067 = vmatmul.mubr.bf16.gmra.mxu0 %v4442_v11  ;;  %v4299_v11 = vmax.f32 %v3681_v24, 0.0  ;;  %v3695_v24 = vadd.f32 %v12251_v41, %v11534_v10  ;;  %v4044_v41 = vadd.f32 %v12241_v55, %v11536_v15  ;;  %v3693_v55 = vadd.f32 %v12243_v8, %v11567_v38 }
 0x444   : > { %v5181_v46 = vpop.f32.mrf.mxu1  ;;  %5420 = vmatmul.mubr.bf16.gmra.mxu1 %v4444_v62  ;;  %5076 = vmatprep.mubr.bf16.mxu0 %v4447_v63  ;;  %v4301_v63 = vmax.f32 %v4034_v60, 0.0 }
 0x445   : > { %5429 = vmatprep.mubr.bf16.mxu1 %v4449_v18  ;;  %v12395_v33 = vadd.f32 %v5181_v46, %v4828_v35  ;;  %v4830_v43 = vpop.f32.mrf.mxu0  ;;  %v4451_v61 = vpack.c.bf16 %v4303_v44, %v4299_v11 }
 0x446   : > { %v5183_v37 = vpop.f32.mrf.mxu1  ;;  %v4453_v60 = vpack.c.bf16 %v4305_v0, %v4301_v63  ;;  %v4313_v0 = vmax.f32 %v4048_v34, 0.0  ;;  %v4309_v63 = vmax.f32 %v4044_v41, 0.0 }
 0x447   : > { %16364 = vst [vmem:[#allocation37_spill] sm:$0xff] %v12395_v33  ;;  %v12397_v45 = vadd.f32 %v5183_v37, %v4830_v43  ;;  %v4832_v62 = vpop.f32.mrf.mxu0  ;;  %v4304_v43 = vmax.f32 %v4036_v30, 0.0  ;;  %v3689_v30 = vadd.f32 %v16371_v21, %v11567_v38 }
 0x448   : > { %v5185_v50 = vpop.f32.mrf.mxu1  ;;  %v4457_v7 = vpack.c.bf16 %v4313_v0, %v4309_v63 }
 0x449   : > { %16365 = vst [vmem:[#allocation36_spill] sm:$0xff] %v12397_v45  ;;  %v12401_v18 = vadd.f32 %v5185_v50, %v4832_v62  ;;  %v4834_v27 = vpop.f32.mrf.mxu0  ;;  %v4032_v50 = vadd.f32 %v12201_v39, %v11569_v3  ;;  %v4311_v39 = vmax.f32 %v3695_v24, 0.0  ;;  %v4306_v0 = vmax.f32 %v3689_v30, 0.0 }
 0x44a   : > { %v5187_v35 = vpop.f32.mrf.mxu1  ;;  %v4056_v30 = vadd.f32 %v12277_v42, %v11569_v3  ;;  %v3711_v42 = vadd.f32 %v12303_v23, %v11534_v10 }
 0x44b   : > { %16366 = vst [vmem:[#allocation51_spill] sm:$0xff] %v12401_v18  ;;  %v12411_v46 = vadd.f32 %v5187_v35, %v4834_v27  ;;  %v4838_v5 = vpop.f32.mrf.mxu0  ;;  %5077 = vmatmul.mubr.bf16.gmra.mxu0 %v4446_v52  ;;  %v4300_v11 = vmax.f32 %v4032_v50, 0.0  ;;  %v4046_v35 = vadd.f32 %v12245_v26, %v11569_v3  ;;  %v4455_v8 = vpack.c.bf16 %v4311_v39, %v4307_v29 }
 0x44c   : > { %v5191_v49 = vpop.f32.mrf.mxu1  ;;  %5430 = vmatmul.mubr.bf16.gmra.mxu1 %v4448_v14  ;;  %5086 = vmatprep.mubr.bf16.mxu0 %v4451_v61  ;;  %v3705_v61 = vadd.f32 %v12283_v40, %v11534_v10  ;;  %v4310_v40 = vmax.f32 %v3693_v55, 0.0  ;;  %v4317_v55 = vmax.f32 %v4054_v17, 0.0  ;;  %v4323_v23 = vmax.f32 %v3711_v42, 0.0 }
 0x44d   : > { %16367 = vst [vmem:[#allocation52_spill] sm:$0xff] %v12411_v46  ;;  %v12419_v44 = vadd.f32 %v5191_v49, %v4838_v5  ;;  %5439 = vmatprep.mubr.bf16.mxu1 %v4453_v60  ;;  %v4840_v37 = vpop.f32.mrf.mxu0  ;;  %v4452_v27 = vpack.c.bf16 %v4304_v43, %v4300_v11  ;;  %v4058_v60 = vadd.f32 %v12285_v47, %v11536_v15  ;;  %v16373_v5 = vld [vmem:[#allocation41_spill] sm:$0xff]  ;;  %v4312_v47 = vmax.f32 %v4046_v35, 0.0  ;;  %v16377_v35 = vld [vmem:[#allocation39_spill] sm:$0xff] }
 0x44e   : > { %v5193_v59 = vpop.f32.mrf.mxu1  ;;  %v4042_v49 = vadd.f32 %v16373_v5, %v11569_v3  ;;  %v4454_v2 = vpack.c.bf16 %v4310_v40, %v4306_v0 }
 0x44f   : > { %16368 = vst [vmem:[#allocation53_spill] sm:$0xff] %v12419_v44  ;;  %v12421_v16 = vadd.f32 %v5193_v59, %v4840_v37  ;;  %v4842_v62 = vpop.f32.mrf.mxu0  ;;  %v4319_v37 = vmax.f32 %v3705_v61, 0.0  ;;  %v4321_v11 = vmax.f32 %v4058_v60, 0.0  ;;  %v3699_v61 = vadd.f32 %v16377_v35, %v11567_v38 }
 0x450   : > { %v5195_v52 = vpop.f32.mrf.mxu1  ;;  %v4308_v13 = vmax.f32 %v4042_v49, 0.0  ;;  %v16379_v49 = vld [vmem:[#allocation44_spill] sm:$0xff] }
 0x451   : > { %16369 = vst [vmem:[#allocation54_spill] sm:$0xff] %v12421_v16  ;;  %v12425_v14 = vadd.f32 %v5195_v52, %v4842_v62  ;;  %v4844_v24 = vpop.f32.mrf.mxu0  ;;  %v3703_v52 = vadd.f32 %v12275_v36, %v11567_v38  ;;  %v4068_v36 = vadd.f32 %v12317_v56, %v11536_v15  ;;  %v4461_v5 = vpack.c.bf16 %v4321_v11, %v4317_v55 }
 0x452   : > { %v5197_v34 = vpop.f32.mrf.mxu1  ;;  %v4456_v21 = vpack.c.bf16 %v4312_v47, %v4308_v13  ;;  %v4314_v56 = vmax.f32 %v3699_v61, 0.0  ;;  %v4320_v47 = vmax.f32 %v4056_v30, 0.0  ;;  %v4066_v61 = vadd.f32 %v12309_v22, %v11569_v3 }
 0x453   : > { %16370 = vst [vmem:[#allocation55_spill] sm:$0xff] %v12425_v14  ;;  %v12435_v50 = vadd.f32 %v5197_v34, %v4844_v24  ;;  %v4848_v41 = vpop.f32.mrf.mxu0  ;;  %5087 = vmatmul.mubr.bf16.gmra.mxu0 %v4450_v9  ;;  %v4315_v9 = vmax.f32 %v3701_v57, 0.0  ;;  %v4052_v57 = vadd.f32 %v16379_v49, %v11569_v3  ;;  %v4329_v0 = vmax.f32 %v4068_v36, 0.0 }
 0x454   : > { %v5201_v26 = vpop.f32.mrf.mxu1  ;;  %5440 = vmatmul.mubr.bf16.gmra.mxu1 %v4452_v27  ;;  %5096 = vmatprep.mubr.bf16.mxu0 %v4455_v8  ;;  %v3715_v8 = vadd.f32 %v12315_v58, %v11534_v10  ;;  %v4064_v58 = vadd.f32 %v12305_v31, %v11536_v15  ;;  %v3713_v31 = vadd.f32 %v12307_v51, %v11567_v38 }
 0x455   : > { %16372 = vst [vmem:[#allocation48_spill] sm:$0xff] %v12435_v50  ;;  %v12443_v43 = vadd.f32 %v5201_v26, %v4848_v41  ;;  %5449 = vmatprep.mubr.bf16.mxu1 %v4457_v7  ;;  %v4850_v59 = vpop.f32.mrf.mxu0  ;;  %v4459_v60 = vpack.c.bf16 %v4319_v37, %v4315_v9  ;;  %v4318_v41 = vmax.f32 %v3703_v52, 0.0  ;;  %v4316_v13 = vmax.f32 %v4052_v57, 0.0 }
 0x456   : > { %v5203_v39 = vpop.f32.mrf.mxu1  ;;  %v3725_v30 = vadd.f32 %v12347_v19, %v11534_v10  ;;  %v3721_v57 = vadd.f32 %v12335_v20, %v11534_v10  ;;  %v4326_v19 = vmax.f32 %v3713_v31, 0.0 }
 0x457   : > { %16374 = vst [vmem:[#allocation41_spill] sm:$0xff] %v12443_v43  ;;  %v12445_v62 = vadd.f32 %v5203_v39, %v4850_v59  ;;  %v4852_v29 = vpop.f32.mrf.mxu0  ;;  %v4327_v39 = vmax.f32 %v3715_v8, 0.0  ;;  %v4458_v9 = vpack.c.bf16 %v4318_v41, %v4314_v56  ;;  %v4460_v55 = vpack.c.bf16 %v4320_v47, %v4316_v13 }
 0x458   : > { %v5205_v63 = vpop.f32.mrf.mxu1  ;;  %v4335_v42 = vmax.f32 %v3725_v30, 0.0 }
 0x459   : > { %16375 = vst [vmem:[#allocation56_spill] sm:$0xff] %v12445_v62  ;;  %v12449_v27 = vadd.f32 %v5205_v63, %v4852_v29  ;;  %v4854_v24 = vpop.f32.mrf.mxu0  ;;  %v4325_v63 = vmax.f32 %v4064_v58, 0.0  ;;  %v4463_v51 = vpack.c.bf16 %v4327_v39, %v4323_v23  ;;  %v4331_v39 = vmax.f32 %v3721_v57, 0.0 }
 0x45a   : > { %v5207_v34 = vpop.f32.mrf.mxu1  ;;  %v3723_v23 = vadd.f32 %v12339_v4, %v11567_v38  ;;  %v16390_v4 = vld [vmem:[#allocation47_spill] sm:$0xff] }
 0x45b   : > { %16376 = vst [vmem:[#allocation57_spill] sm:$0xff] %v12449_v27  ;;  %v12459_v7 = vadd.f32 %v5207_v34, %v4854_v24  ;;  %v4858_v26 = vpop.f32.mrf.mxu0  ;;  %5097 = vmatmul.mubr.bf16.gmra.mxu0 %v4454_v2  ;;  %v4465_v36 = vpack.c.bf16 %v4329_v0, %v4325_v63  ;;  %v4076_v63 = vadd.f32 %v12341_v6, %v11569_v3 }
 0x45c   : > { %v5211_v40 = vpop.f32.mrf.mxu1  ;;  %5450 = vmatmul.mubr.bf16.gmra.mxu1 %v4456_v21  ;;  %5106 = vmatprep.mubr.bf16.mxu0 %v4459_v60  ;;  %v16383_v21 = vld [vmem:[#allocation49_spill] sm:$0xff]  ;;  %v4078_v60 = vadd.f32 %v12349_v1, %v11536_v15  ;;  %v4328_v1 = vmax.f32 %v4066_v61, 0.0  ;;  %v4088_v61 = vadd.f32 %v12383_v28, %v11536_v15 }
 0x45d   : > { %16378 = vst [vmem:[#allocation39_spill] sm:$0xff] %v12459_v7  ;;  %v12467_v17 = vadd.f32 %v5211_v40, %v4858_v26  ;;  %5459 = vmatprep.mubr.bf16.mxu1 %v4461_v5  ;;  %v4860_v37 = vpop.f32.mrf.mxu0  ;;  %v3709_v35 = vadd.f32 %v16383_v21, %v11567_v38  ;;  %v16385_v5 = vld [vmem:[#allocation46_spill] sm:$0xff]  ;;  %v4074_v26 = vadd.f32 %v12337_v12, %v11536_v15 }
 0x45e   : > { %v5213_v59 = vpop.f32.mrf.mxu1  ;;  %v4062_v49 = vadd.f32 %v16385_v5, %v11569_v3  ;;  %v4467_v21 = vpack.c.bf16 %v4335_v42, %v4331_v39  ;;  %v4334_v5 = vmax.f32 %v3723_v23, 0.0 }
 0x45f   : > { %16380 = vst [vmem:[#allocation44_spill] sm:$0xff] %v12467_v17  ;;  %v12469_v11 = vadd.f32 %v5213_v59, %v4860_v37  ;;  %v4862_v52 = vpop.f32.mrf.mxu0  ;;  %v4322_v47 = vmax.f32 %v3709_v35, 0.0  ;;  %v4337_v37 = vmax.f32 %v4078_v60, 0.0  ;;  %v3735_v35 = vadd.f32 %v12381_v53, %v11534_v10 }
 0x460   : > { %v5215_v29 = vpop.f32.mrf.mxu1  ;;  %v4324_v20 = vmax.f32 %v4062_v49, 0.0  ;;  %v4072_v60 = vadd.f32 %v16390_v4, %v11569_v3  ;;  %v4084_v53 = vadd.f32 %v12369_v25, %v11536_v15  ;;  %v4336_v49 = vmax.f32 %v4076_v63, 0.0  ;;  %v16397_v63 = vld [vmem:[#allocation43_spill] sm:$0xff] }
 0x461   : > { %16381 = vst [vmem:[#allocation58_spill] sm:$0xff] %v12469_v11  ;;  %v12473_v2 = vadd.f32 %v5215_v29, %v4862_v52  ;;  %v4864_v24 = vpop.f32.mrf.mxu0  ;;  %v4333_v52 = vmax.f32 %v4074_v26, 0.0 }
 0x462   : > { %v5217_v34 = vpop.f32.mrf.mxu1  ;;  %v4464_v12 = vpack.c.bf16 %v4328_v1, %v4324_v20  ;;  %v4332_v1 = vmax.f32 %v4072_v60, 0.0 }
 0x463   : > { %16382 = vst [vmem:[#allocation59_spill] sm:$0xff] %v12473_v2  ;;  %v12483_v8 = vadd.f32 %v5217_v34, %v4864_v24  ;;  %v4868_v41 = vpop.f32.mrf.mxu0  ;;  %5107 = vmatmul.mubr.bf16.gmra.mxu0 %v4458_v9  ;;  %v4462_v9 = vpack.c.bf16 %v4326_v19, %v4322_v47  ;;  %v4469_v24 = vpack.c.bf16 %v4337_v37, %v4333_v52  ;;  %v16394_v37 = vld [vmem:[#allocation50_spill] sm:$0xff] }
 0x464   : > { %v5221_v22 = vpop.f32.mrf.mxu1  ;;  %5460 = vmatmul.mubr.bf16.gmra.mxu1 %v4460_v55  ;;  %5116 = vmatprep.mubr.bf16.mxu0 %v4463_v51  ;;  %v3719_v34 = vadd.f32 %v12327_v32, %v11567_v38  ;;  %v4468_v25 = vpack.c.bf16 %v4336_v49, %v4332_v1  ;;  %v3733_v47 = vadd.f32 %v12371_v54, %v11567_v38 }
 0x465   : > { %16384 = vst [vmem:[#allocation49_spill] sm:$0xff] %v12483_v8  ;;  %v12491_v40 = vadd.f32 %v5221_v22, %v4868_v41  ;;  %5469 = vmatprep.mubr.bf16.mxu1 %v4465_v36  ;;  %v4870_v58 = vpop.f32.mrf.mxu0  ;;  %v3731_v36 = vadd.f32 %v12367_v48, %v11534_v10  ;;  %v4343_v41 = vmax.f32 %v3735_v35, 0.0  ;;  %v4345_v22 = vmax.f32 %v4088_v61, 0.0 }
 0x466   : > { %v5223_v56 = vpop.f32.mrf.mxu1  ;;  %v4330_v26 = vmax.f32 %v3719_v34, 0.0  ;;  %v4341_v48 = vmax.f32 %v4084_v53, 0.0  ;;  %v4086_v20 = vadd.f32 %v16394_v37, %v11569_v3  ;;  %v4342_v35 = vmax.f32 %v3733_v47, 0.0 }
 0x467   : > { %16386 = vst [vmem:[#allocation46_spill] sm:$0xff] %v12491_v40  ;;  %v12493_v59 = vadd.f32 %v5223_v56, %v4870_v58  ;;  %v4872_v0 = vpop.f32.mrf.mxu0  ;;  %v4339_v10 = vmax.f32 %v3731_v36, 0.0 }
 0x468   : > { %v5225_v13 = vpop.f32.mrf.mxu1  ;;  %v4466_v15 = vpack.c.bf16 %v4334_v5, %v4330_v26  ;;  %v4473_v52 = vpack.c.bf16 %v4345_v22, %v4341_v48  ;;  %v4344_v61 = vmax.f32 %v4086_v20, 0.0 }
 0x469   : > { %16387 = vst [vmem:[#allocation60_spill] sm:$0xff] %v12493_v59  ;;  %v12495_v29 = vadd.f32 %v5225_v13, %v4872_v0  ;;  %v4874_v31 = vpop.f32.mrf.mxu0 }
 0x46a   : > { %v5227_v55 = vpop.f32.mrf.mxu1 }
 0x46b   : > { %16388 = vst [vmem:[#allocation61_spill] sm:$0xff] %v12495_v29  ;;  %v12505_v30 = vadd.f32 %v5227_v55, %v4874_v31  ;;  %v4878_v51 = vpop.f32.mrf.mxu0  ;;  %5117 = vmatmul.mubr.bf16.gmra.mxu0 %v4462_v9  ;;  %v4471_v9 = vpack.c.bf16 %v4343_v41, %v4339_v10  ;;  %v4082_v31 = vadd.f32 %v16397_v63, %v11569_v3 }
 0x46c   : > { %v5231_v6 = vpop.f32.mrf.mxu1  ;;  %5470 = vmatmul.mubr.bf16.gmra.mxu1 %v4464_v12  ;;  %5126 = vmatprep.mubr.bf16.mxu0 %v4467_v21  ;;  %v16396_v12 = vld [vmem:[#allocation45_spill] sm:$0xff] }
 0x46d   : > { %16389 = vst [vmem:[#allocation62_spill] sm:$0xff] %v12505_v30  ;;  %v12515_v28 = vadd.f32 %v5231_v6, %v4878_v51  ;;  %5479 = vmatprep.mubr.bf16.mxu1 %v4469_v24  ;;  %v4880_v32 = vpop.f32.mrf.mxu0  ;;  %v3729_v23 = vadd.f32 %v16396_v12, %v11567_v38  ;;  %v4340_v51 = vmax.f32 %v4082_v31, 0.0 }
 0x46e   : > { %v5233_v57 = vpop.f32.mrf.mxu1 }
 0x46f   : > { %16391 = vst [vmem:[#allocation47_spill] sm:$0xff] %v12515_v28  ;;  %v12517_v19 = vadd.f32 %v5233_v57, %v4880_v32  ;;  %v4882_v42 = vpop.f32.mrf.mxu0  ;;  %v4338_v60 = vmax.f32 %v3729_v23, 0.0  ;;  %v4472_v53 = vpack.c.bf16 %v4344_v61, %v4340_v51 }
 0x470   : > { %v5235_v58 = vpop.f32.mrf.mxu1 }
 0x471   : > { %16392 = vst [vmem:[#allocation63_spill] sm:$0xff] %v12517_v19  ;;  %v12519_v56 = vadd.f32 %v5235_v58, %v4882_v42  ;;  %v4884_v39 = vpop.f32.mrf.mxu0  ;;  %v4470_v3 = vpack.c.bf16 %v4342_v35, %v4338_v60 }
 0x472   : > { %v5237_v0 = vpop.f32.mrf.mxu1 }
 0x473   : > { %16393 = vst [vmem:[#allocation64_spill] sm:$0xff] %v12519_v56  ;;  %v12525_v13 = vadd.f32 %v5237_v0, %v4884_v39  ;;  %v4888_v55 = vpop.f32.mrf.mxu0  ;;  %5127 = vmatmul.mubr.bf16.gmra.mxu0 %v4466_v15 }
 0x474   : > { %v5241_v21 = vpop.f32.mrf.mxu1  ;;  %5480 = vmatmul.mubr.bf16.gmra.mxu1 %v4468_v25  ;;  %5136 = vmatprep.mubr.bf16.mxu0 %v4471_v9 }
 0x475   : > { %16395 = vst [vmem:[#allocation50_spill] sm:$0xff] %v12525_v13  ;;  %v12531_v54 = vadd.f32 %v5241_v21, %v4888_v55  ;;  %5489 = vmatprep.mubr.bf16.mxu1 %v4473_v52  ;;  %v4890_v24 = vpop.f32.mrf.mxu0 }
 0x476   : > { %v5243_v34 = vpop.f32.mrf.mxu1 }
 0x477   : > { %16398 = vst [vmem:[#allocation45_spill] sm:$0xff] %v12531_v54  ;;  %v12533_v4 = vadd.f32 %v5243_v34, %v4890_v24  ;;  %v4892_v38 = vpop.f32.mrf.mxu0 }
 0x478   : > { %v5245_v6 = vpop.f32.mrf.mxu1 }
 0x479   : > { %16399 = vst [vmem:[#allocation43_spill] sm:$0xff] %v12533_v4  ;;  %v12535_v36 = vadd.f32 %v5245_v6, %v4892_v38  ;;  %v4894_v5 = vpop.f32.mrf.mxu0 }
 0x47a   : > { %v5247_v49 = vpop.f32.mrf.mxu1 }
 0x47b   : > { %16400 = vst [vmem:[#allocation65_spill] sm:$0xff] %v12535_v36  ;;  %v12537_v32 = vadd.f32 %v5247_v49, %v4894_v5  ;;  %v4898_v57 = vpop.f32.mrf.mxu0  ;;  %5137 = vmatmul.mubr.bf16.gmra.mxu0 %v4470_v3 }
 0x47c   : > { %v5251_v41 = vpop.f32.mrf.mxu1  ;;  %5490 = vmatmul.mubr.bf16.gmra.mxu1 %v4472_v53 }
 0x47d   : > { %16401 = vst [vmem:[#allocation66_spill] sm:$0xff] %v12537_v32  ;;  %v12539_v22 = vadd.f32 %v5251_v41, %v4898_v57  ;;  %v4900_v26 = vpop.f32.mrf.mxu0 }
 0x47e   : > { %v5253_v1 = vpop.f32.mrf.mxu1 }
 0x47f   : > { %16402 = vst [vmem:[#allocation67_spill] sm:$0xff] %v12539_v22  ;;  %v12541_v42 = vadd.f32 %v5253_v1, %v4900_v26  ;;  %v4902_v58 = vpop.f32.mrf.mxu0 }
 0x480   : > { %v5255_v10 = vpop.f32.mrf.mxu1 }
 0x481   : > { %16403 = vst [vmem:[#allocation68_spill] sm:$0xff] %v12541_v42  ;;  %v12543_v48 = vadd.f32 %v5255_v10, %v4902_v58  ;;  %v4904_v15 = vpop.f32.mrf.mxu0 }
 0x482   : > { %v5257_v25 = vpop.f32.mrf.mxu1 }
 0x483   : > { %16404 = vst [vmem:[#allocation69_spill] sm:$0xff] %v12543_v48  ;;  %v12545_v47 = vadd.f32 %v5257_v25, %v4904_v15  ;;  %v4908_v37 = vpop.f32.mrf.mxu0 }
 0x484   : > { %v5261_v20 = vpop.f32.mrf.mxu1 }
 0x485   : > { %16405 = vst [vmem:[#allocation70_spill] sm:$0xff] %v12545_v47  ;;  %v12547_v39 = vadd.f32 %v5261_v20, %v4908_v37  ;;  %v4910_v0 = vpop.f32.mrf.mxu0 }
 0x486   : > { %v5263_v9 = vpop.f32.mrf.mxu1 }
 0x487   : > { %16406 = vst [vmem:[#allocation71_spill] sm:$0xff] %v12547_v39  ;;  %v12549_v52 = vadd.f32 %v5263_v9, %v4910_v0  ;;  %v4912_v12 = vpop.f32.mrf.mxu0 }
 0x488   : > { %v5265_v23 = vpop.f32.mrf.mxu1 }
 0x489   : > { %16407 = vst [vmem:[#allocation72_spill] sm:$0xff] %v12549_v52  ;;  %v12551_v63 = vadd.f32 %v5265_v23, %v4912_v12  ;;  %v4914_v31 = vpop.f32.mrf.mxu0 }
 0x48a   : > { %v5267_v55 = vpop.f32.mrf.mxu1 }
 0x48b   : > { %16408 = vst [vmem:[#allocation73_spill] sm:$0xff] %v12551_v63  ;;  %v12553_v21 = vadd.f32 %v5267_v55, %v4914_v31  ;;  %v4918_v35 = vpop.f32.mrf.mxu0 }
 0x48c   : > { %v5271_v61 = vpop.f32.mrf.mxu1 }
 0x48d   : > { %16409 = vst [vmem:[#allocation74_spill] sm:$0xff] %v12553_v21  ;;  %v12555_v24 = vadd.f32 %v5271_v61, %v4918_v35  ;;  %v4920_v34 = vpop.f32.mrf.mxu0 }
 0x48e   : > { %v5273_v60 = vpop.f32.mrf.mxu1 }
 0x48f   : > { %16410 = vst [vmem:[#allocation75_spill] sm:$0xff] %v12555_v24  ;;  %v12557_v51 = vadd.f32 %v5273_v60, %v4920_v34  ;;  %v4922_v38 = vpop.f32.mrf.mxu0 }
 0x490   : > { %v5275_v6 = vpop.f32.mrf.mxu1 }
 0x491   : > { %16411 = vst [vmem:[#allocation76_spill] sm:$0xff] %v12557_v51  ;;  %v12559_v3 = vadd.f32 %v5275_v6, %v4922_v38  ;;  %v4924_v53 = vpop.f32.mrf.mxu0 }
 0x492   : > { %v5277_v5 = vpop.f32.mrf.mxu1 }
 0x493   : > { %16412 = vst [vmem:[#allocation77_spill] sm:$0xff] %v12559_v3  ;;  %v12561_v49 = vadd.f32 %v5277_v5, %v4924_v53  ;;  %v4928_v57 = vpop.f32.mrf.mxu0 }
 0x494   : > { %v5281_v41 = vpop.f32.mrf.mxu1 }
 0x495   : > { %16413 = vst [vmem:[#allocation78_spill] sm:$0xff] %v12561_v49  ;;  %v12563_v26 = vadd.f32 %v5281_v41, %v4928_v57  ;;  %v4930_v1 = vpop.f32.mrf.mxu0 }
 0x496   : > { %v5283_v58 = vpop.f32.mrf.mxu1 }
 0x497   : > { %16414 = vst [vmem:[#allocation79_spill] sm:$0xff] %v12563_v26  ;;  %v12565_v10 = vadd.f32 %v5283_v58, %v4930_v1  ;;  %v4932_v15 = vpop.f32.mrf.mxu0 }
 0x498   : > { %v5285_v25 = vpop.f32.mrf.mxu1 }
 0x499   : > { %16415 = vst [vmem:[#allocation80_spill] sm:$0xff] %v12565_v10  ;;  %v12567_v37 = vadd.f32 %v5285_v25, %v4932_v15  ;;  %v4934_v20 = vpop.f32.mrf.mxu0 }
 0x49a   : > { %v5287_v0 = vpop.f32.mrf.mxu1 }
 0x49b   : > { %16416 = vst [vmem:[#allocation81_spill] sm:$0xff] %v12567_v37  ;;  %v12569_v9 = vadd.f32 %v5287_v0, %v4934_v20  ;;  %v4938_v12 = vpop.f32.mrf.mxu0 }
 0x49c   : > { %v5291_v23 = vpop.f32.mrf.mxu1 }
 0x49d   : > { %16417 = vst [vmem:[#allocation82_spill] sm:$0xff] %v12569_v9  ;;  %v12571_v31 = vadd.f32 %v5291_v23, %v4938_v12  ;;  %v4940_v55 = vpop.f32.mrf.mxu0 }
 0x49e   : > { %v5293_v35 = vpop.f32.mrf.mxu1 }
 0x49f   : > { %16418 = vst [vmem:[#allocation83_spill] sm:$0xff] %v12571_v31  ;;  %v12573_v61 = vadd.f32 %v5293_v35, %v4940_v55  ;;  %v4942_v34 = vpop.f32.mrf.mxu0 }
 0x4a0   : > { %v5295_v60 = vpop.f32.mrf.mxu1 }
 0x4a1   : > { %16419 = vst [vmem:[#allocation84_spill] sm:$0xff] %v12573_v61  ;;  %v12575_v38 = vadd.f32 %v5295_v60, %v4942_v34  ;;  %v4944_v6 = vpop.f32.mrf.mxu0 }
 0x4a2   : > { %v5297_v53 = vpop.f32.mrf.mxu1 }
 0x4a3   : > { %16420 = vst [vmem:[#allocation85_spill] sm:$0xff] %v12575_v38  ;;  %v12577_v5 = vadd.f32 %v5297_v53, %v4944_v6  ;;  %v4948_v57 = vpop.f32.mrf.mxu0 }
 0x4a4   : > { %v5301_v41 = vpop.f32.mrf.mxu1 }
 0x4a5   : > { %16421 = vst [vmem:[#allocation86_spill] sm:$0xff] %v12577_v5  ;;  %v12579_v1 = vadd.f32 %v5301_v41, %v4948_v57  ;;  %v4950_v58 = vpop.f32.mrf.mxu0 }
 0x4a6   : > { %v5303_v15 = vpop.f32.mrf.mxu1 }
 0x4a7   : > { %16422 = vst [vmem:[#allocation87_spill] sm:$0xff] %v12579_v1  ;;  %v12581_v25 = vadd.f32 %v5303_v15, %v4950_v58  ;;  %v4952_v20 = vpop.f32.mrf.mxu0 }
 0x4a8   : > { %v5305_v0 = vpop.f32.mrf.mxu1 }
 0x4a9   : > { %16423 = vst [vmem:[#allocation88_spill] sm:$0xff] %v12581_v25  ;;  %v12583_v12 = vadd.f32 %v5305_v0, %v4952_v20  ;;  %v4954_v23 = vpop.f32.mrf.mxu0 }
 0x4aa   : > { %v5307_v55 = vpop.f32.mrf.mxu1 }
 0x4ab   : > { %16424 = vst [vmem:[#allocation89_spill] sm:$0xff] %v12583_v12  ;;  %v12585_v35 = vadd.f32 %v5307_v55, %v4954_v23  ;;  %v4958_v34 = vpop.f32.mrf.mxu0 }
 0x4ac   : > { %v5311_v60 = vpop.f32.mrf.mxu1 }
 0x4ad   : > { %16425 = vst [vmem:[#allocation90_spill] sm:$0xff] %v12585_v35  ;;  %v12587_v6 = vadd.f32 %v5311_v60, %v4958_v34  ;;  %v4960_v53 = vpop.f32.mrf.mxu0 }
 0x4ae   : > { %v5313_v5 = vpop.f32.mrf.mxu1 }
 0x4af   : > { %16426 = vst [vmem:[#allocation91_spill] sm:$0xff] %v12587_v6  ;;  %v12589_v57 = vadd.f32 %v5313_v5, %v4960_v53  ;;  %v4962_v41 = vpop.f32.mrf.mxu0 }
 0x4b0   : > { %v5315_v61 = vpop.f32.mrf.mxu1 }
 0x4b1   : > { %16427 = vst [vmem:[#allocation92_spill] sm:$0xff] %v12589_v57  ;;  %v12591_v58 = vadd.f32 %v5315_v61, %v4962_v41  ;;  %v4964_v15 = vpop.f32.mrf.mxu0 }
 0x4b2   : > { %v5317_v25 = vpop.f32.mrf.mxu1 }
 0x4b3   : > { %16428 = vst [vmem:[#allocation93_spill] sm:$0xff] %v12591_v58  ;;  %v12593_v20 = vadd.f32 %v5317_v25, %v4964_v15  ;;  %v4968_v0 = vpop.f32.mrf.mxu0 }
 0x4b4   : > { %v5321_v9 = vpop.f32.mrf.mxu1 }
 0x4b5   : > { %16429 = vst [vmem:[#allocation94_spill] sm:$0xff] %v12593_v20  ;;  %v12595_v23 = vadd.f32 %v5321_v9, %v4968_v0  ;;  %v4970_v55 = vpop.f32.mrf.mxu0 }
 0x4b6   : > { %v5323_v35 = vpop.f32.mrf.mxu1 }
 0x4b7   : > { %16430 = vst [vmem:[#allocation95_spill] sm:$0xff] %v12595_v23  ;;  %v12597_v34 = vadd.f32 %v5323_v35, %v4970_v55  ;;  %v4972_v60 = vpop.f32.mrf.mxu0 }
 0x4b8   : > { %v5325_v10 = vpop.f32.mrf.mxu1 }
 0x4b9   : > { %16431 = vst [vmem:[#allocation96_spill] sm:$0xff] %v12597_v34  ;;  %v12599_v5 = vadd.f32 %v5325_v10, %v4972_v60  ;;  %v4974_v53 = vpop.f32.mrf.mxu0 }
 0x4ba   : > { %v5327_v57 = vpop.f32.mrf.mxu1 }
 0x4bb   : > { %16432 = vst [vmem:[#allocation97_spill] sm:$0xff] %v12599_v5  ;;  %v12601_v61 = vadd.f32 %v5327_v57, %v4974_v53  ;;  %v4978_v41 = vpop.f32.mrf.mxu0 }
 0x4bc   : > { %v5331_v49 = vpop.f32.mrf.mxu1 }
 0x4bd   : > { %16433 = vst [vmem:[#allocation98_spill] sm:$0xff] %v12601_v61  ;;  %v12603_v25 = vadd.f32 %v5331_v49, %v4978_v41  ;;  %v4980_v15 = vpop.f32.mrf.mxu0 }
 0x4be   : > { %v5333_v20 = vpop.f32.mrf.mxu1 }
 0x4bf   : > { %16434 = vst [vmem:[#allocation99_spill] sm:$0xff] %v12603_v25  ;;  %v12605_v9 = vadd.f32 %v5333_v20, %v4980_v15  ;;  %v4982_v0 = vpop.f32.mrf.mxu0  ;;  %v5500_v20 = vadd.f32 %v12401_v18, %v12395_v33 }
 0x4c0   : > { %v5335_v51 = vpop.f32.mrf.mxu1 }
 0x4c1   : > { %16435 = vst [vmem:[#allocation100_spill] sm:$0xff] %v12605_v9  ;;  %v12607_v35 = vadd.f32 %v5335_v51, %v4982_v0  ;;  %v4984_v55 = vpop.f32.mrf.mxu0  ;;  %v5501_v51 = vadd.f32 %v5500_v20, %v12419_v44 }
 0x4c2   : > { %v5337_v34 = vpop.f32.mrf.mxu1 }
 0x4c3   : > { %16436 = vst [vmem:[#allocation101_spill] sm:$0xff] %v12607_v35  ;;  %v12609_v10 = vadd.f32 %v5337_v34, %v4984_v55  ;;  %v4988_v60 = vpop.f32.mrf.mxu0 }
 0x4c4   : > { %v5341_v21 = vpop.f32.mrf.mxu1 }
 0x4c5   : > { %16437 = vst [vmem:[#allocation102_spill] sm:$0xff] %v12609_v10  ;;  %v12611_v57 = vadd.f32 %v5341_v21, %v4988_v60  ;;  %v12613_v53 = vpop.f32.mrf.mxu0  ;;  %v5502_v21 = vadd.f32 %v5501_v51, %v12425_v14 }
 0x4c6   : > { %16439 = vst [vmem:[#allocation104_spill] sm:$0xff] %v12613_v53  ;;  %v12615_v49 = vpop.f32.mrf.mxu1 }
 0x4c7   : > { %16438 = vst [vmem:[#allocation103_spill] sm:$0xff] %v12611_v57  ;;  %16440 = vst [vmem:[#allocation105_spill] sm:$0xff] %v12615_v49  ;;  %v12619_v41 = vpop.f32.mrf.mxu0  ;;  %v5503_v10 = vadd.f32 %v5502_v21, %v12443_v43 }
 0x4c8   : > { %v12621_v15 = vpop.f32.mrf.mxu1 }
 0x4c9   : > { %v12624_v0 = vpop.f32.mrf.mxu0  ;;  %v5504_v33 = vadd.f32 %v5503_v10, %v12449_v27 }
 0x4ca   : > { %16441 = vst [vmem:[#allocation106_spill] sm:$0xff] %v12624_v0  ;;  %v12626_v34 = vpop.f32.mrf.mxu1 }
 0x4cb   : > { %16442 = vst [vmem:[#allocation107_spill] sm:$0xff] %v12626_v34  ;;  %v12629_v55 = vpop.f32.mrf.mxu0  ;;  %v5505_v44 = vadd.f32 %v5504_v33, %v12467_v17 }
 0x4cc   : > { %v12631_v60 = vpop.f32.mrf.mxu1 }
 0x4cd   : > { %v12634_v49 = vpop.f32.mrf.mxu0  ;;  %v5506_v14 = vadd.f32 %v5505_v44, %v12473_v2 }
 0x4ce   : > { %16443 = vst [vmem:[#allocation108_spill] sm:$0xff] %v12634_v49  ;;  %v12636_v18 = vpop.f32.mrf.mxu1 }
 0x4cf   : > { %16444 = vst [vmem:[#allocation109_spill] sm:$0xff] %v12636_v18  ;;  %v12639_v53 = vpop.f32.mrf.mxu0  ;;  %v5507_v43 = vadd.f32 %v5506_v14, %v12491_v40 }
 0x4d0   : > { %v12641_v20 = vpop.f32.mrf.mxu1 }
 0x4d1   : > { %v12644_v34 = vpop.f32.mrf.mxu0  ;;  %v5508_v27 = vadd.f32 %v5507_v43, %v12495_v29 }
 0x4d2   : > { %16445 = vst [vmem:[#allocation110_spill] sm:$0xff] %v12644_v34  ;;  %v12646_v51 = vpop.f32.mrf.mxu1 }
 0x4d3   : > { %16446 = vst [vmem:[#allocation111_spill] sm:$0xff] %v12646_v51  ;;  %v12649_v0 = vpop.f32.mrf.mxu0  ;;  %v5509_v17 = vadd.f32 %v5508_v27, %v12515_v28 }
 0x4d4   : > { %v12651_v21 = vpop.f32.mrf.mxu1 }
 0x4d5   : > { %v12654_v18 = vpop.f32.mrf.mxu0  ;;  %v5510_v2 = vadd.f32 %v5509_v17, %v12519_v56 }
 0x4d6   : > { %16447 = vst [vmem:[#allocation112_spill] sm:$0xff] %v12654_v18  ;;  %v12656_v10 = vpop.f32.mrf.mxu1 }
 0x4d7   : > { %16448 = vst [vmem:[#allocation113_spill] sm:$0xff] %v12656_v10  ;;  %v12659_v49 = vpop.f32.mrf.mxu0  ;;  %v5511_v40 = vadd.f32 %v5510_v2, %v12531_v54 }
 0x4d8   : > { %v12661_v33 = vpop.f32.mrf.mxu1 }
 0x4d9   : > { %v12664_v51 = vpop.f32.mrf.mxu0  ;;  %v5512_v29 = vadd.f32 %v5511_v40, %v12535_v36 }
 0x4da   : > { %16449 = vst [vmem:[#allocation114_spill] sm:$0xff] %v12664_v51  ;;  %v12666_v44 = vpop.f32.mrf.mxu1 }
 0x4db   : > { %16450 = vst [vmem:[#allocation115_spill] sm:$0xff] %v12666_v44  ;;  %v12669_v34 = vpop.f32.mrf.mxu0  ;;  %v5513_v28 = vadd.f32 %v5512_v29, %v12539_v22 }
 0x4dc   : > { %v12671_v14 = vpop.f32.mrf.mxu1 }
 0x4dd   : > { %v12674_v10 = vpop.f32.mrf.mxu0  ;;  %v5514_v56 = vadd.f32 %v5513_v28, %v12543_v48 }
 0x4de   : > { %16451 = vst [vmem:[#allocation116_spill] sm:$0xff] %v12674_v10  ;;  %v12676_v43 = vpop.f32.mrf.mxu1 }
 0x4df   : > { %16452 = vst [vmem:[#allocation117_spill] sm:$0xff] %v12676_v43  ;;  %v12679_v18 = vpop.f32.mrf.mxu0  ;;  %v5515_v54 = vadd.f32 %v5514_v56, %v12547_v39 }
 0x4e0   : > { %v12681_v27 = vpop.f32.mrf.mxu1 }
 0x4e1   : > { %v12684_v44 = vpop.f32.mrf.mxu0  ;;  %v5516_v36 = vadd.f32 %v5515_v54, %v12551_v63 }
 0x4e2   : > { %16453 = vst [vmem:[#allocation118_spill] sm:$0xff] %v12684_v44  ;;  %v12686_v17 = vpop.f32.mrf.mxu1 }
 0x4e3   : > { %16454 = vst [vmem:[#allocation119_spill] sm:$0xff] %v12686_v17  ;;  %v12689_v51 = vpop.f32.mrf.mxu0  ;;  %v5517_v22 = vadd.f32 %v5516_v36, %v12555_v24 }
 0x4e4   : > { %v12691_v2 = vpop.f32.mrf.mxu1 }
 0x4e5   : > { %v12694_v43 = vpop.f32.mrf.mxu0  ;;  %v5518_v48 = vadd.f32 %v5517_v22, %v12559_v3 }
 0x4e6   : > { %16455 = vst [vmem:[#allocation120_spill] sm:$0xff] %v12694_v43  ;;  %v12696_v40 = vpop.f32.mrf.mxu1 }
 0x4e7   : > { %16456 = vst [vmem:[#allocation121_spill] sm:$0xff] %v12696_v40  ;;  %v12699_v10 = vpop.f32.mrf.mxu0  ;;  %v5519_v39 = vadd.f32 %v5518_v48, %v12563_v26  ;;  %v5569_v48 = vadd.f32 %v12411_v46, %v12397_v45 }
 0x4e8   : > { %v12701_v29 = vpop.f32.mrf.mxu1 }
 0x4e9   : > { %v12704_v17 = vpop.f32.mrf.mxu0  ;;  %v5520_v63 = vadd.f32 %v5519_v39, %v12567_v37  ;;  %v5570_v37 = vadd.f32 %v5569_v48, %v12421_v16 }
 0x4ea   : > { %v12706_v28 = vpop.f32.mrf.mxu1 }
 0x4eb   : > { %16457 = vst [vmem:[#allocation122_spill] sm:$0xff] %v12706_v28  ;;  %v12709_v44 = vpop.f32.mrf.mxu0  ;;  %v5521_v24 = vadd.f32 %v5520_v63, %v12571_v31 }
 0x4ec   : > { %v12711_v56 = vpop.f32.mrf.mxu1 }
 0x4ed   : > { %v12714_v40 = vpop.f32.mrf.mxu0  ;;  %v5522_v3 = vadd.f32 %v5521_v24, %v12575_v38 }
 0x4ee   : > { %16458 = vst [vmem:[#allocation123_spill] sm:$0xff] %v12714_v40  ;;  %v12716_v54 = vpop.f32.mrf.mxu1 }
 0x4ef   : > { %16459 = vst [vmem:[#allocation124_spill] sm:$0xff] %v12716_v54  ;;  %v12719_v43 = vpop.f32.mrf.mxu0  ;;  %v5523_v39 = vadd.f32 %v5522_v3, %v12579_v1 }
 0x4f0   : > { %v12721_v36 = vpop.f32.mrf.mxu1 }
 0x4f1   : > { %v12724_v28 = vpop.f32.mrf.mxu0  ;;  %v5524_v31 = vadd.f32 %v5523_v39, %v12583_v12 }
 0x4f2   : > { %16460 = vst [vmem:[#allocation125_spill] sm:$0xff] %v12724_v28  ;;  %v12726_v22 = vpop.f32.mrf.mxu1 }
 0x4f3   : > { %16461 = vst [vmem:[#allocation126_spill] sm:$0xff] %v12726_v22  ;;  %v12731_v26 = vpop.f32.mrf.mxu0  ;;  %v5571_v22 = vadd.f32 %v5570_v37, %v12435_v50  ;;  %v5525_v46 = vadd.f32 %v5524_v31, %v12587_v6 }
 0x4f4   : > { %v12733_v54 = vpop.f32.mrf.mxu1 }
 0x4f5   : > { %v12737_v40 = vpop.f32.mrf.mxu0  ;;  %v5572_v45 = vadd.f32 %v5571_v22, %v12445_v62  ;;  %v5526_v48 = vadd.f32 %v5525_v46, %v12591_v58 }
 0x4f6   : > { %v12739_v63 = vpop.f32.mrf.mxu1 }
 0x4f7   : > { %v12743_v24 = vpop.f32.mrf.mxu0  ;;  %v5573_v1 = vadd.f32 %v5572_v45, %v12459_v7  ;;  %v5527_v37 = vadd.f32 %v5526_v48, %v12595_v23  ;;  %v12780_v23 = vadd.f32 %v12621_v15, %v12619_v41 }
 0x4f8   : > { %v12745_v38 = vpop.f32.mrf.mxu1 }
 0x4f9   : > { %v12749_v28 = vpop.f32.mrf.mxu0  ;;  %v5574_v12 = vadd.f32 %v5573_v1, %v12469_v11  ;;  %v5528_v22 = vadd.f32 %v5527_v37, %v12599_v5  ;;  %16462 = vst [vmem:[#allocation127_spill] sm:$0xff] %v12780_v23 }
 0x4fa   : > { %v12751_v3 = vpop.f32.mrf.mxu1 }
 0x4fb   : > { %v12755_v16 = vpop.f32.mrf.mxu0  ;;  %v5575_v6 = vadd.f32 %v5574_v12, %v12483_v8  ;;  %v5529_v45 = vadd.f32 %v5528_v22, %v12603_v25 }
 0x4fc   : > { %v12757_v39 = vpop.f32.mrf.mxu1 }
 0x4fd   : > { %v12761_v50 = vpop.f32.mrf.mxu0  ;;  %v5576_v58 = vadd.f32 %v5575_v6, %v12493_v59  ;;  %v5530_v1 = vadd.f32 %v5529_v45, %v12607_v35  ;;  %v12790_v6 = vadd.f32 %v12631_v60, %v12629_v55  ;;  %v12810_v60 = vadd.f32 %v12651_v21, %v12649_v0 }
 0x4fe   : > { %v12763_v31 = vpop.f32.mrf.mxu1  ;;  %v12828_v21 = vadd.f32 %v12671_v14, %v12669_v34  ;;  %v12844_v34 = vadd.f32 %v12691_v2, %v12689_v51  ;;  %v12860_v51 = vadd.f32 %v12711_v56, %v12709_v44  ;;  %v16473_v2 = vld [vmem:[#allocation76_spill] sm:$0xff]  ;;  %v12876_v44 = vadd.f32 %v12733_v54, %v12731_v26 }
 0x4ff   : > { %v12767_v62 = vpop.f32.mrf.mxu0  ;;  %v5577_v12 = vadd.f32 %v5576_v58, %v12505_v30  ;;  %v5531_v22 = vadd.f32 %v5530_v1, %v12611_v57  ;;  %16463 = vst [vmem:[#allocation128_spill] sm:$0xff] %v12790_v6  ;;  %v12800_v58 = vadd.f32 %v12641_v20, %v12639_v53  ;;  %16465 = vst [vmem:[#allocation130_spill] sm:$0xff] %v12810_v60  ;;  %v16477_v56 = vld [vmem:[#allocation80_spill] sm:$0xff]  ;;  %v16522_v30 = vld [vmem:[#allocation121_spill] sm:$0xff] }
 0x500   : > { %v12769_v46 = vpop.f32.mrf.mxu1  ;;  %16467 = vst [vmem:[#allocation132_spill] sm:$0xff] %v12828_v21  ;;  %16469 = vst [vmem:[#allocation134_spill] sm:$0xff] %v12844_v34  ;;  %v12892_v26 = vadd.f32 %v12757_v39, %v12755_v16  ;;  %v16481_v54 = vld [vmem:[#allocation84_spill] sm:$0xff] }
 0x501   : > { %v12773_v7 = vpop.f32.mrf.mxu0  ;;  %v5578_v25 = vadd.f32 %v5577_v12, %v12517_v19  ;;  %v5532_v41 = vadd.f32 %v5531_v22, %v12780_v23  ;;  %16464 = vst [vmem:[#allocation129_spill] sm:$0xff] %v12800_v58  ;;  %16472 = vst [vmem:[#allocation136_spill] sm:$0xff] %v12860_v51  ;;  %v16485_v39 = vld [vmem:[#allocation88_spill] sm:$0xff] }
 0x502   : > { %v12775_v48 = vpop.f32.mrf.mxu1  ;;  %16476 = vst [vmem:[#allocation138_spill] sm:$0xff] %v12876_v44  ;;  %16480 = vst [vmem:[#allocation140_spill] sm:$0xff] %v12892_v26 }
 0x503   : > { %v12783_v37 = vpop.f32.mrf.mxu0  ;;  %v5579_v15 = vadd.f32 %v5578_v25, %v12525_v13  ;;  %v5533_v55 = vadd.f32 %v5532_v41, %v12790_v6  ;;  %v12820_v25 = vadd.f32 %v12661_v33, %v12659_v49  ;;  %v12838_v33 = vadd.f32 %v12681_v27, %v12679_v18  ;;  %v16471_v27 = vld [vmem:[#allocation74_spill] sm:$0xff]  ;;  %v16516_v13 = vld [vmem:[#allocation117_spill] sm:$0xff] }
 0x504   : > { %v12785_v5 = vpop.f32.mrf.mxu1  ;;  %v12854_v18 = vadd.f32 %v12701_v29, %v12699_v10  ;;  %v12870_v10 = vadd.f32 %v12721_v36, %v12719_v43  ;;  %v16475_v29 = vld [vmem:[#allocation78_spill] sm:$0xff]  ;;  %v12886_v43 = vadd.f32 %v12745_v38, %v12743_v24  ;;  %v12902_v38 = vadd.f32 %v12769_v46, %v12767_v62 }
 0x505   : > { %v12793_v59 = vpop.f32.mrf.mxu0  ;;  %v5580_v12 = vadd.f32 %v5579_v15, %v12533_v4  ;;  %v5534_v53 = vadd.f32 %v5533_v55, %v12800_v58  ;;  %16466 = vst [vmem:[#allocation131_spill] sm:$0xff] %v12820_v25  ;;  %16468 = vst [vmem:[#allocation133_spill] sm:$0xff] %v12838_v33  ;;  %v16479_v36 = vld [vmem:[#allocation82_spill] sm:$0xff]  ;;  %v12908_v16 = vadd.f32 %v12785_v5, %v12783_v37  ;;  %v16489_v37 = vld [vmem:[#allocation92_spill] sm:$0xff] }
 0x506   : > { %v12795_v45 = vpop.f32.mrf.mxu1  ;;  %16470 = vst [vmem:[#allocation135_spill] sm:$0xff] %v12854_v18  ;;  %16474 = vst [vmem:[#allocation137_spill] sm:$0xff] %v12870_v10  ;;  %v16483_v24 = vld [vmem:[#allocation86_spill] sm:$0xff] }
 0x507   : > { %v12803_v35 = vpop.f32.mrf.mxu0  ;;  %v5581_v20 = vadd.f32 %v5580_v12, %v12537_v32  ;;  %v5535_v0 = vadd.f32 %v5534_v53, %v12810_v60  ;;  %16478 = vst [vmem:[#allocation139_spill] sm:$0xff] %v12886_v43  ;;  %16482 = vst [vmem:[#allocation141_spill] sm:$0xff] %v12902_v38  ;;  %v16487_v46 = vld [vmem:[#allocation90_spill] sm:$0xff] }
 0x508   : > { %v12805_v1 = vpop.f32.mrf.mxu1  ;;  %16484 = vst [vmem:[#allocation142_spill] sm:$0xff] %v12908_v16 }
 0x509   : > { %v12813_v57 = vpop.f32.mrf.mxu0  ;;  %v5582_v15 = vadd.f32 %v5581_v20, %v12541_v42  ;;  %v5536_v49 = vadd.f32 %v5535_v0, %v12820_v25  ;;  %v12918_v62 = vadd.f32 %v12805_v1, %v12803_v35  ;;  %v16491_v35 = vld [vmem:[#allocation94_spill] sm:$0xff] }
 0x50a   : > { %v12815_v22 = vpop.f32.mrf.mxu1 }
 0x50b   : > { %v12823_v23 = vpop.f32.mrf.mxu0  ;;  %v5583_v12 = vadd.f32 %v5582_v15, %v12545_v47  ;;  %v5537_v60 = vadd.f32 %v5536_v49, %v12828_v21  ;;  %16486 = vst [vmem:[#allocation143_spill] sm:$0xff] %v12918_v62 }
 0x50c   : > { %v5431_v41 = vpop.f32.mrf.mxu1 }
 0x50d   : > { %v12831_v6 = vpop.f32.mrf.mxu0  ;;  %v5584_v14 = vadd.f32 %v5583_v12, %v12549_v52  ;;  %v5538_v0 = vadd.f32 %v5537_v60, %v12838_v33  ;;  %v12923_v5 = vadd.f32 %v5431_v41, %v12823_v23  ;;  %v16493_v23 = vld [vmem:[#allocation96_spill] sm:$0xff] }
 0x50e   : > { %v12833_v55 = vpop.f32.mrf.mxu1 }
 0x50f   : > { %v5082_v58 = vpop.f32.mrf.mxu0  ;;  %v5585_v15 = vadd.f32 %v5584_v14, %v16471_v27  ;;  %v5539_v21 = vadd.f32 %v5538_v0, %v12844_v34  ;;  %16488 = vst [vmem:[#allocation144_spill] sm:$0xff] %v12923_v5 }
 0x510   : > { %v5435_v53 = vpop.f32.mrf.mxu1 }
 0x511   : > { %v12847_v20 = vpop.f32.mrf.mxu0  ;;  %v5586_v12 = vadd.f32 %v5585_v15, %v16473_v2  ;;  %v5540_v60 = vadd.f32 %v5539_v21, %v12854_v18 }
 0x512   : > { %v12849_v42 = vpop.f32.mrf.mxu1 }
 0x513   : > { %v5088_v25 = vpop.f32.mrf.mxu0  ;;  %v5587_v14 = vadd.f32 %v5586_v12, %v16475_v29  ;;  %v5541_v34 = vadd.f32 %v5540_v60, %v12860_v51 }
 0x514   : > { %v5441_v49 = vpop.f32.mrf.mxu1 }
 0x515   : > { %v12863_v52 = vpop.f32.mrf.mxu0  ;;  %v5588_v15 = vadd.f32 %v5587_v14, %v16477_v56  ;;  %v5542_v21 = vadd.f32 %v5541_v34, %v12870_v10 }
 0x516   : > { %v12865_v47 = vpop.f32.mrf.mxu1 }
 0x517   : > { %v5092_v33 = vpop.f32.mrf.mxu0  ;;  %v5589_v12 = vadd.f32 %v5588_v15, %v16479_v36  ;;  %v5543_v51 = vadd.f32 %v5542_v21, %v12876_v44 }
 0x518   : > { %v5445_v0 = vpop.f32.mrf.mxu1 }
 0x519   : > { %v12879_v2 = vpop.f32.mrf.mxu0  ;;  %v5590_v14 = vadd.f32 %v5589_v12, %v16481_v54  ;;  %v5544_v34 = vadd.f32 %v5543_v51, %v12886_v43  ;;  %v12943_v4 = vadd.f32 %v5445_v0, %v5092_v33  ;;  %v16499_v0 = vld [vmem:[#allocation102_spill] sm:$0xff] }
 0x51a   : > { %v12881_v27 = vpop.f32.mrf.mxu1 }
 0x51b   : > { %v5098_v18 = vpop.f32.mrf.mxu0  ;;  %v5591_v15 = vadd.f32 %v5590_v14, %v16483_v24  ;;  %v5545_v44 = vadd.f32 %v5544_v34, %v12892_v26  ;;  %16494 = vst [vmem:[#allocation147_spill] sm:$0xff] %v12943_v4 }
 0x51c   : > { %v5451_v60 = vpop.f32.mrf.mxu1 }
 0x51d   : > { %v12895_v56 = vpop.f32.mrf.mxu0  ;;  %v5592_v12 = vadd.f32 %v5591_v15, %v16485_v39  ;;  %v5546_v51 = vadd.f32 %v5545_v44, %v12902_v38  ;;  %v12931_v38 = vadd.f32 %v5435_v53, %v5082_v58 }
 0x51e   : > { %v12897_v29 = vpop.f32.mrf.mxu1 }
 0x51f   : > { %v5102_v10 = vpop.f32.mrf.mxu0  ;;  %v5593_v14 = vadd.f32 %v5592_v12, %v16487_v46  ;;  %v5547_v26 = vadd.f32 %v5546_v51, %v12908_v16  ;;  %16490 = vst [vmem:[#allocation145_spill] sm:$0xff] %v12931_v38  ;;  %v12935_v51 = vadd.f32 %v5441_v49, %v5088_v25  ;;  %v16496_v49 = vld [vmem:[#allocation104_spill] sm:$0xff] }
 0x520   : > { %v5455_v21 = vpop.f32.mrf.mxu1 }
 0x521   : > { %v12911_v54 = vpop.f32.mrf.mxu0  ;;  %v5594_v15 = vadd.f32 %v5593_v14, %v16489_v37  ;;  %v5548_v44 = vadd.f32 %v5547_v26, %v12918_v62  ;;  %16492 = vst [vmem:[#allocation146_spill] sm:$0xff] %v12935_v51  ;;  %v12947_v62 = vadd.f32 %v5451_v60, %v5098_v18  ;;  %v12959_v33 = vadd.f32 %v5455_v21, %v5102_v10 }
 0x522   : > { %v12913_v36 = vpop.f32.mrf.mxu1 }
 0x523   : > { %v5108_v43 = vpop.f32.mrf.mxu0  ;;  %v5595_v1 = vadd.f32 %v5594_v15, %v16491_v35  ;;  %v5549_v32 = vadd.f32 %v5548_v44, %v12923_v5  ;;  %16495 = vst [vmem:[#allocation148_spill] sm:$0xff] %v12947_v62  ;;  %v16497_v44 = vld [vmem:[#allocation105_spill] sm:$0xff] }
 0x524   : > { %v5461_v34 = vpop.f32.mrf.mxu1 }
 0x525   : > { %v12926_v39 = vpop.f32.mrf.mxu0  ;;  %v5596_v41 = vadd.f32 %v5595_v1, %v16493_v23  ;;  %v5550_v37 = vadd.f32 %v5549_v32, %v12931_v38  ;;  %v12952_v1 = vadd.f32 %v16497_v44, %v16496_v49  ;;  %v16500_v38 = vld [vmem:[#allocation106_spill] sm:$0xff]  ;;  %v12967_v49 = vadd.f32 %v5461_v34, %v5108_v43 }
 0x526   : > { %v12928_v24 = vpop.f32.mrf.mxu1 }
 0x527   : > { %v5112_v12 = vpop.f32.mrf.mxu0  ;;  %v5597_v58 = vadd.f32 %v5596_v41, %v12601_v61  ;;  %v5551_v15 = vadd.f32 %v5550_v37, %v12935_v51  ;;  %16498 = vst [vmem:[#allocation104_spill] sm:$0xff] %v12952_v1  ;;  %v16501_v37 = vld [vmem:[#allocation107_spill] sm:$0xff]  ;;  %v16504_v61 = vld [vmem:[#allocation109_spill] sm:$0xff] }
 0x528   : > { %v5465_v46 = vpop.f32.mrf.mxu1  ;;  %v12964_v18 = vadd.f32 %v16501_v37, %v16500_v38  ;;  %v16506_v37 = vld [vmem:[#allocation110_spill] sm:$0xff] }
 0x529   : > { %v12938_v16 = vpop.f32.mrf.mxu0  ;;  %v5598_v25 = vadd.f32 %v5597_v58, %v12605_v9  ;;  %v5552_v32 = vadd.f32 %v5551_v15, %v12943_v4  ;;  %v16503_v9 = vld [vmem:[#allocation108_spill] sm:$0xff]  ;;  %v12979_v38 = vadd.f32 %v5465_v46, %v5112_v12 }
 0x52a   : > { %v12940_v14 = vpop.f32.mrf.mxu1  ;;  %16502 = vst [vmem:[#allocation105_spill] sm:$0xff] %v12964_v18  ;;  %v12972_v35 = vadd.f32 %v16504_v61, %v16503_v9  ;;  %v16509_v4 = vld [vmem:[#allocation112_spill] sm:$0xff] }
 0x52b   : > { %v5118_v53 = vpop.f32.mrf.mxu0  ;;  %v5599_v41 = vadd.f32 %v5598_v25, %v16499_v0  ;;  %v5553_v51 = vadd.f32 %v5552_v32, %v12947_v62  ;;  %v16507_v32 = vld [vmem:[#allocation111_spill] sm:$0xff] }
 0x52c   : > { %v5471_v26 = vpop.f32.mrf.mxu1  ;;  %16505 = vst [vmem:[#allocation106_spill] sm:$0xff] %v12972_v35  ;;  %v12984_v43 = vadd.f32 %v16507_v32, %v16506_v37  ;;  %v16512_v32 = vld [vmem:[#allocation114_spill] sm:$0xff] }
 0x52d   : > { %v12954_v5 = vpop.f32.mrf.mxu0  ;;  %v5600_v44 = vadd.f32 %v5599_v41, %v12952_v1  ;;  %v5554_v15 = vadd.f32 %v5553_v51, %v12959_v33  ;;  %v12987_v61 = vadd.f32 %v5471_v26, %v5118_v53  ;;  %v16510_v1 = vld [vmem:[#allocation113_spill] sm:$0xff] }
 0x52e   : > { %v12956_v23 = vpop.f32.mrf.mxu1  ;;  %16508 = vst [vmem:[#allocation107_spill] sm:$0xff] %v12984_v43  ;;  %v12992_v0 = vadd.f32 %v16510_v1, %v16509_v4 }
 0x52f   : > { %v5122_v60 = vpop.f32.mrf.mxu0  ;;  %v5601_v25 = vadd.f32 %v5600_v44, %v12964_v18  ;;  %v5555_v62 = vadd.f32 %v5554_v15, %v12967_v49  ;;  %v16513_v15 = vld [vmem:[#allocation115_spill] sm:$0xff]  ;;  %v16515_v18 = vld [vmem:[#allocation116_spill] sm:$0xff] }
 0x530   : > { %v5475_v58 = vpop.f32.mrf.mxu1  ;;  %16511 = vst [vmem:[#allocation108_spill] sm:$0xff] %v12992_v0  ;;  %v13004_v53 = vadd.f32 %v16513_v15, %v16512_v32  ;;  %v13012_v19 = vadd.f32 %v16516_v13, %v16515_v18  ;;  %v16518_v15 = vld [vmem:[#allocation118_spill] sm:$0xff] }
 0x531   : > { %v12974_v10 = vpop.f32.mrf.mxu0  ;;  %v5602_v9 = vadd.f32 %v5601_v25, %v12972_v35  ;;  %v5556_v51 = vadd.f32 %v5555_v62, %v12979_v38  ;;  %v12999_v44 = vadd.f32 %v5475_v58, %v5122_v60 }
 0x532   : > { %v12976_v21 = vpop.f32.mrf.mxu1  ;;  %16514 = vst [vmem:[#allocation109_spill] sm:$0xff] %v13004_v53  ;;  %16517 = vst [vmem:[#allocation110_spill] sm:$0xff] %v13012_v19 }
 0x533   : > { %v5128_v34 = vpop.f32.mrf.mxu0  ;;  %v5603_v37 = vadd.f32 %v5602_v9, %v12984_v43  ;;  %v5557_v35 = vadd.f32 %v5556_v51, %v12987_v61  ;;  %v16519_v51 = vld [vmem:[#allocation119_spill] sm:$0xff]  ;;  %v16521_v43 = vld [vmem:[#allocation120_spill] sm:$0xff] }
 0x534   : > { %v5481_v41 = vpop.f32.mrf.mxu1  ;;  %v13030_v8 = vadd.f32 %v16522_v30, %v16521_v43  ;;  %v16526_v30 = vld [vmem:[#allocation123_spill] sm:$0xff]  ;;  %v16527_v43 = vld [vmem:[#allocation124_spill] sm:$0xff] }
 0x535   : > { %v12994_v46 = vpop.f32.mrf.mxu0  ;;  %v13007_v4 = vadd.f32 %v5481_v41, %v5128_v34  ;;  %v5604_v1 = vadd.f32 %v5603_v37, %v12992_v0  ;;  %v5558_v58 = vadd.f32 %v5557_v35, %v12999_v44  ;;  %v13024_v34 = vadd.f32 %v16519_v51, %v16518_v15  ;;  %v16525_v15 = vld [vmem:[#allocation122_spill] sm:$0xff] }
 0x536   : > { %v12996_v12 = vpop.f32.mrf.mxu1  ;;  %v13040_v51 = vadd.f32 %v16525_v15, %v12704_v17  ;;  %v13060_v15 = vadd.f32 %v12751_v3, %v12749_v28  ;;  %v13075_v28 = vadd.f32 %v12795_v45, %v12793_v59  ;;  %v13080_v3 = vadd.f32 %v12815_v22, %v12813_v57 }
 0x537   : > { %v5132_v26 = vpop.f32.mrf.mxu0  ;;  %v5605_v32 = vadd.f32 %v5604_v1, %v13004_v53  ;;  %16520 = vst [vmem:[#allocation111_spill] sm:$0xff] %v13024_v34  ;;  %v5559_v0 = vadd.f32 %v5558_v58, %v13007_v4  ;;  %v13045_v53 = vadd.f32 %v16527_v43, %v16526_v30  ;;  %v13095_v57 = vadd.f32 %v12865_v47, %v12863_v52 }
 0x538   : > { %v5485_v25 = vpop.f32.mrf.mxu1  ;;  %v13110_v30 = vadd.f32 %v12913_v36, %v12911_v54 }
 0x539   : > { %v13014_v62 = vpop.f32.mrf.mxu0  ;;  %v13019_v9 = vadd.f32 %v5485_v25, %v5132_v26  ;;  %v5606_v18 = vadd.f32 %v5605_v32, %v13012_v19 }
 0x53a   : > { %v13016_v60 = vpop.f32.mrf.mxu1 }
 0x53b   : > { %v5138_v41 = vpop.f32.mrf.mxu0  ;;  %v5560_v25 = vadd.f32 %v5559_v0, %v13019_v9  ;;  %v5607_v1 = vadd.f32 %v5606_v18, %v13024_v34  ;;  %v16528_v0 = vld [vmem:[#allocation125_spill] sm:$0xff]  ;;  %v13176_v43 = vadd.f32 %v13016_v60, %v13014_v62 }
 0x53c   : > { %v5491_v37 = vpop.f32.mrf.mxu1 }
 0x53d   : > { %v5492_v13 = vadd.f32 %v5491_v37, %v5138_v41  ;;  %v13032_v35 = vpop.f32.mrf.mxu0  ;;  %v5608_v19 = vadd.f32 %v5607_v1, %v13030_v8 }
 0x53e   : > { %16523 = vst [vmem:[#allocation112_spill] sm:$0xff] %v13032_v35  ;;  %v13034_v26 = vpop.f32.mrf.mxu1  ;;  %v16529_v35 = vld [vmem:[#allocation126_spill] sm:$0xff] }
 0x53f   : > { %16524 = vst [vmem:[#allocation113_spill] sm:$0xff] %v13034_v26  ;;  %v5142_v58 = vpop.f32.mrf.mxu0  ;;  %v5561_v37 = vadd.f32 %v5560_v25, %v5492_v13  ;;  %v5609_v26 = vadd.f32 %v5608_v19, %v13040_v51  ;;  %v13050_v18 = vadd.f32 %v16529_v35, %v16528_v0  ;;  %v13055_v25 = vadd.f32 %v12739_v63, %v12737_v40 }
 0x540   : > { %v5495_v41 = vpop.f32.mrf.mxu1  ;;  %v13065_v35 = vadd.f32 %v12763_v31, %v12761_v50 }
 0x541   : > { %v5496_v32 = vadd.f32 %v5495_v41, %v5142_v58  ;;  %v5610_v17 = vadd.f32 %v5609_v26, %v13045_v53  ;;  %v13070_v26 = vadd.f32 %v12775_v48, %v12773_v7  ;;  %v13085_v7 = vadd.f32 %v12833_v55, %v12831_v6 }
 0x543   : > { %v5562_v11 = vadd.f32 %v5561_v37, %v5496_v32  ;;  %v5611_v1 = vadd.f32 %v5610_v17, %v13050_v18  ;;  %v13100_v37 = vadd.f32 %v12881_v27, %v12879_v2  ;;  %v13117_v27 = vadd.f32 %v12928_v24, %v12926_v39 }
 0x545   : > { %v5563_v34 = vrot.slane %v5562_v11, 4  ;;  %v5612_v19 = vadd.f32 %v5611_v1, %v13055_v25  ;;  %v16530_v17 = vld [vmem:[#allocation112_spill] sm:$0xff] }
 0x546   : > { %v16531_v1 = vld [vmem:[#allocation113_spill] sm:$0xff] }
 0x547   : > { %v5564_v58 = vadd.f32 %v5563_v34, %v5562_v11  ;;  %v5613_v41 = vadd.f32 %v5612_v19, %v13060_v15  ;;  %v13090_v34 = vadd.f32 %v12849_v42, %v12847_v20  ;;  %v13105_v42 = vadd.f32 %v12897_v29, %v12895_v56 }
 0x548   : > { %v13122_v29 = vadd.f32 %v12940_v14, %v12938_v16 }
 0x549   : > { %v5565_v40 = vrot.slane %v5564_v58, 2  ;;  %v5614_v63 = vadd.f32 %v5613_v41, %v13065_v35  ;;  %v16534_v41 = vld [vmem:[#allocation53_spill] sm:$0xff] }
 0x54b   : > { %v5615_v11 = vadd.f32 %v5614_v63, %v13070_v26  ;;  %v5566_v50 = vadd.f32 %v5565_v40, %v5564_v58 }
 0x54d   : > { %v5616_v31 = vadd.f32 %v5615_v11, %v13075_v28  ;;  %v5567_v59 = vrot.slane %v5566_v50, 1 }
 0x54f   : > { %v5617_v48 = vadd.f32 %v5616_v31, %v13080_v3  ;;  %v5568_v6 = vadd.f32 %v5567_v59, %v5566_v50  ;;  %v16535_v50 = vld [vmem:[#allocation55_spill] sm:$0xff]  ;;  %v16536_v59 = vld [vmem:[#allocation41_spill] sm:$0xff] }
 0x551   : > { %v5618_v45 = vadd.f32 %v5617_v48, %v13085_v7  ;;  %v13112_v47 = vmul.f32 0.001953125, %v5568_v6 }
 0x553   : > { %v5619_v22 = vadd.f32 %v5618_v45, %v13090_v34  ;;  %v13126_v56 = vsub.f32 %v12959_v33, %v13112_v47  ;;  %v13130_v36 = vsub.f32 %v12967_v49, %v13112_v47  ;;  %v13134_v54 = vsub.f32 %v12979_v38, %v13112_v47 }
 0x554   : > { %v13138_v24 = vsub.f32 %v12987_v61, %v13112_v47  ;;  %v13142_v16 = vsub.f32 %v12999_v44, %v13112_v47  ;;  %v13146_v39 = vsub.f32 %v13007_v4, %v13112_v47  ;;  %v13150_v14 = vsub.f32 %v13019_v9, %v13112_v47 }
 0x555   : > { %v5620_v55 = vadd.f32 %v5619_v22, %v13095_v57  ;;  %v13153_v33 = vsub.f32 %v5492_v13, %v13112_v47  ;;  %v13156_v49 = vsub.f32 %v5496_v32, %v13112_v47  ;;  %v13161_v61 = vadd.f32 %v12956_v23, %v12954_v5  ;;  %v5144_v5 = vpop.f32.mrf.mxu0  ;;  %v5497_v23 = vpop.f32.mrf.mxu1 }
 0x556   : > { %v13166_v4 = vadd.f32 %v12976_v21, %v12974_v10  ;;  %v13171_v13 = vadd.f32 %v12996_v12, %v12994_v46  ;;  %v13181_v10 = vadd.f32 %v16531_v1, %v16530_v17  ;;  %v16532_v21 = vld [vmem:[#allocation37_spill] sm:$0xff]  ;;  %v16533_v46 = vld [vmem:[#allocation51_spill] sm:$0xff]  ;;  %v13192_v62 = vadd.f32 %v5497_v23, %v5144_v5 }
 0x557   : > { %v5621_v20 = vadd.f32 %v5620_v55, %v13100_v37  ;;  %v13185_v58 = vsub.f32 %v16532_v21, %v13112_v47  ;;  %v13189_v12 = vsub.f32 %v16533_v46, %v13112_v47  ;;  %v13197_v40 = vsub.f32 %v16534_v41, %v13112_v47  ;;  %v16537_v55 = vld [vmem:[#allocation57_spill] sm:$0xff]  ;;  %v16539_v23 = vld [vmem:[#allocation59_spill] sm:$0xff]  ;;  %v16540_v46 = vld [vmem:[#allocation46_spill] sm:$0xff] }
 0x558   : > { %v13205_v31 = vsub.f32 %v16535_v50, %v13112_v47  ;;  %v13210_v45 = vsub.f32 %v16536_v59, %v13112_v47 }
 0x559   : > { %v5622_v52 = vadd.f32 %v5621_v20, %v13105_v42  ;;  %v5769_v63 = vmul.f32 %v13185_v58, %v13185_v58  ;;  %v5771_v11 = vmul.f32 %v13189_v12, %v13189_v12  ;;  %v5773_v22 = vmul.f32 %v13197_v40, %v13197_v40 }
 0x55a   : > { %v13216_v20 = vsub.f32 %v16537_v55, %v13112_v47 }
 0x55b   : > { %v5623_v2 = vadd.f32 %v5622_v52, %v13110_v30  ;;  %v5897_v6 = vadd.f32 %v5771_v11, %v5769_v63  ;;  %v5775_v52 = vmul.f32 %v13205_v31, %v13205_v31  ;;  %v16541_v63 = vld [vmem:[#allocation61_spill] sm:$0xff] }
 0x55c   : > { %v5779_v17 = vmul.f32 %v13216_v20, %v13216_v20  ;;  %v13240_v11 = vsub.f32 %v16541_v63, %v13112_v47 }
 0x55d   : > { %v5624_v38 = vadd.f32 %v5623_v2, %v13117_v27  ;;  %v5898_v2 = vadd.f32 %v5897_v6, %v5773_v22  ;;  %v16543_v6 = vld [vmem:[#allocation47_spill] sm:$0xff] }
 0x55e   : > { %16542 = vst [vmem:[#allocation114_spill] sm:$0xff] %v13240_v11 }
 0x55f   : > { %v5625_v44 = vadd.f32 %v5624_v38, %v13122_v29  ;;  %v5899_v5 = vadd.f32 %v5898_v2, %v5775_v52  ;;  %v16545_v2 = vld [vmem:[#allocation64_spill] sm:$0xff] }
 0x561   : > { %v5626_v9 = vadd.f32 %v5625_v44, %v13161_v61  ;;  %v16538_v44 = vld [vmem:[#allocation44_spill] sm:$0xff] }
 0x563   : > { %v5627_v32 = vadd.f32 %v5626_v9, %v13166_v4  ;;  %v13222_v9 = vsub.f32 %v16538_v44, %v13112_v47  ;;  %v5787_v44 = vmul.f32 %v13240_v11, %v13240_v11  ;;  %v16583_v11 = vld [vmem:[#allocation39_spill] sm:$0xff] }
 0x565   : > { %v5628_v0 = vadd.f32 %v5627_v32, %v13171_v13  ;;  %v5777_v32 = vmul.f32 %v13210_v45, %v13210_v45 }
 0x567   : > { %v5629_v19 = vadd.f32 %v5628_v0, %v13176_v43  ;;  %v13228_v0 = vsub.f32 %v16539_v23, %v13112_v47  ;;  %v5900_v1 = vadd.f32 %v5899_v5, %v5777_v32  ;;  %v16547_v23 = vld [vmem:[#allocation45_spill] sm:$0xff] }
 0x569   : > { %v5630_v60 = vadd.f32 %v5629_v19, %v13181_v10  ;;  %v13234_v19 = vsub.f32 %v16540_v46, %v13112_v47  ;;  %v5901_v41 = vadd.f32 %v5900_v1, %v5779_v17  ;;  %v5783_v50 = vmul.f32 %v13228_v0, %v13228_v0 }
 0x56a   : > { %v13258_v17 = vsub.f32 %v16547_v23, %v13112_v47 }
 0x56b   : > { %v5631_v48 = vadd.f32 %v5630_v60, %v13192_v62  ;;  %v5781_v60 = vmul.f32 %v13222_v9, %v13222_v9  ;;  %v5785_v55 = vmul.f32 %v13234_v19, %v13234_v19 }
 0x56c   : > { %16548 = vst [vmem:[#allocation117_spill] sm:$0xff] %v13258_v17 }
 0x56d   : > { %v5632_v38 = vrot.slane %v5631_v48, 4  ;;  %v5902_v59 = vadd.f32 %v5901_v41, %v5781_v60  ;;  %v16549_v60 = vld [vmem:[#allocation65_spill] sm:$0xff] }
 0x56e   : > { %v13264_v41 = vsub.f32 %v16549_v60, %v13112_v47 }
 0x56f   : > { %v5633_v21 = vadd.f32 %v5632_v38, %v5631_v48  ;;  %v13246_v48 = vsub.f32 %v16543_v6, %v13112_v47  ;;  %v5903_v52 = vadd.f32 %v5902_v59, %v5783_v50  ;;  %v13252_v38 = vsub.f32 %v16545_v2, %v13112_v47  ;;  %v16551_v6 = vld [vmem:[#allocation67_spill] sm:$0xff] }
 0x570   : > { %16550 = vst [vmem:[#allocation118_spill] sm:$0xff] %v13264_v41 }
 0x571   : > { %v5634_v22 = vrot.slane %v5633_v21, 2  ;;  %16544 = vst [vmem:[#allocation115_spill] sm:$0xff] %v13246_v48  ;;  %16546 = vst [vmem:[#allocation116_spill] sm:$0xff] %v13252_v38  ;;  %v5904_v32 = vadd.f32 %v5903_v52, %v5785_v55  ;;  %v5789_v1 = vmul.f32 %v13246_v48, %v13246_v48  ;;  %v5791_v63 = vmul.f32 %v13252_v38, %v13252_v38  ;;  %v16553_v52 = vld [vmem:[#allocation69_spill] sm:$0xff] }
 0x572   : > { %v13276_v2 = vsub.f32 %v16553_v52, %v13112_v47 }
 0x573   : > { %v5635_v5 = vadd.f32 %v5634_v22, %v5633_v21  ;;  %v5905_v46 = vadd.f32 %v5904_v32, %v5787_v44  ;;  %v13270_v21 = vsub.f32 %v16551_v6, %v13112_v47  ;;  %v5793_v22 = vmul.f32 %v13258_v17, %v13258_v17  ;;  %v16557_v17 = vld [vmem:[#allocation73_spill] sm:$0xff] }
 0x574   : > { %16554 = vst [vmem:[#allocation120_spill] sm:$0xff] %v13276_v2  ;;  %v5795_v44 = vmul.f32 %v13264_v41, %v13264_v41  ;;  %v16579_v41 = vld [vmem:[#allocation56_spill] sm:$0xff] }
 0x575   : > { %v5906_v50 = vadd.f32 %v5905_v46, %v5789_v1  ;;  %v5636_v59 = vrot.slane %v5635_v5, 1  ;;  %16552 = vst [vmem:[#allocation119_spill] sm:$0xff] %v13270_v21  ;;  %v16555_v1 = vld [vmem:[#allocation71_spill] sm:$0xff]  ;;  %v5797_v60 = vmul.f32 %v13270_v21, %v13270_v21 }
 0x576   : > { %v13282_v46 = vsub.f32 %v16555_v1, %v13112_v47 }
 0x577   : > { %v5907_v55 = vadd.f32 %v5906_v50, %v5791_v63  ;;  %v5637_v23 = vadd.f32 %v5636_v59, %v5635_v5  ;;  %v13288_v63 = vsub.f32 %v16557_v17, %v13112_v47  ;;  %v5799_v50 = vmul.f32 %v13276_v2, %v13276_v2  ;;  %v16559_v5 = vld [vmem:[#allocation75_spill] sm:$0xff] }
 0x578   : > { %16556 = vst [vmem:[#allocation121_spill] sm:$0xff] %v13282_v46  ;;  %v13296_v59 = vsub.f32 %v16559_v5, %v13112_v47  ;;  %v16567_v2 = vld [vmem:[#allocation79_spill] sm:$0xff] }
 0x579   : > { %v5908_v32 = vadd.f32 %v5907_v55, %v5793_v22  ;;  %16558 = vst [vmem:[#allocation122_spill] sm:$0xff] %v13288_v63  ;;  %v13292_v38 = vmul.f32 0.001953125, %v5637_v23  ;;  %v5801_v22 = vmul.f32 %v13282_v46, %v13282_v46  ;;  %v5803_v17 = vmul.f32 %v13288_v63, %v13288_v63 }
 0x57a   : > { %16560 = vst [vmem:[#allocation123_spill] sm:$0xff] %v13296_v59  ;;  %v13316_v46 = vsub.f32 %v16567_v2, %v13112_v47 }
 0x57b   : > { %v5909_v6 = vadd.f32 %v5908_v32, %v5795_v44  ;;  %v16561_v44 = vld [vmem:[#allocation77_spill] sm:$0xff] }
 0x57c   : > { %v13302_v32 = vsub.f32 %v16561_v44, %v13112_v47  ;;  %16568 = vst [vmem:[#allocation112_spill] sm:$0xff] %v13316_v46  ;;  %v16569_v44 = vld [vmem:[#allocation81_spill] sm:$0xff] }
 0x57d   : > { %v5910_v52 = vadd.f32 %v5909_v6, %v5797_v60  ;;  %v16563_v60 = vld [vmem:[#allocation36_spill] sm:$0xff]  ;;  %v13322_v63 = vsub.f32 %v16569_v44, %v13112_v47  ;;  %v5809_v44 = vmul.f32 %v13316_v46, %v13316_v46 }
 0x57e   : > { %16562 = vst [vmem:[#allocation124_spill] sm:$0xff] %v13302_v32  ;;  %v13308_v23 = vsub.f32 %v16563_v60, %v13292_v38  ;;  %v16565_v6 = vld [vmem:[#allocation52_spill] sm:$0xff]  ;;  %v16571_v60 = vld [vmem:[#allocation54_spill] sm:$0xff] }
 0x57f   : > { %v5911_v55 = vadd.f32 %v5910_v52, %v5799_v50  ;;  %v13312_v5 = vsub.f32 %v16565_v6, %v13292_v38  ;;  %v5805_v50 = vmul.f32 %v13296_v59, %v13296_v59  ;;  %16570 = vst [vmem:[#allocation113_spill] sm:$0xff] %v13322_v63  ;;  %v13328_v6 = vsub.f32 %v16571_v60, %v13292_v38  ;;  %v16577_v60 = vld [vmem:[#allocation85_spill] sm:$0xff] }
 0x580   : > { %16564 = vst [vmem:[#allocation125_spill] sm:$0xff] %v13308_v23  ;;  %v5770_v2 = vmul.f32 %v13308_v23, %v13308_v23  ;;  %v5811_v23 = vmul.f32 %v13322_v63, %v13322_v63  ;;  %v13364_v63 = vsub.f32 %v16583_v11, %v13292_v38 }
 0x581   : > { %v5912_v1 = vadd.f32 %v5911_v55, %v5801_v22  ;;  %16566 = vst [vmem:[#allocation126_spill] sm:$0xff] %v13312_v5  ;;  %v5807_v22 = vmul.f32 %v13302_v32, %v13302_v32  ;;  %16572 = vst [vmem:[#allocation37_spill] sm:$0xff] %v13328_v6  ;;  %v5772_v21 = vmul.f32 %v13312_v5, %v13312_v5 }
 0x582   : > { %v13346_v32 = vsub.f32 %v16577_v60, %v13112_v47  ;;  %v5774_v46 = vmul.f32 %v13328_v6, %v13328_v6  ;;  %16584 = vst [vmem:[#allocation44_spill] sm:$0xff] %v13364_v63 }
 0x583   : > { %v5913_v52 = vadd.f32 %v5912_v1, %v5803_v17  ;;  %v16573_v17 = vld [vmem:[#allocation83_spill] sm:$0xff] }
 0x584   : > { %v13336_v1 = vsub.f32 %v16573_v17, %v13112_v47  ;;  %16578 = vst [vmem:[#allocation55_spill] sm:$0xff] %v13346_v32  ;;  %v13352_v17 = vsub.f32 %v16579_v41, %v13292_v38 }
 0x585   : > { %v5914_v55 = vadd.f32 %v5913_v52, %v5805_v50  ;;  %v16575_v50 = vld [vmem:[#allocation48_spill] sm:$0xff] }
 0x586   : > { %16574 = vst [vmem:[#allocation51_spill] sm:$0xff] %v13336_v1  ;;  %v13342_v52 = vsub.f32 %v16575_v50, %v13292_v38  ;;  %16580 = vst [vmem:[#allocation41_spill] sm:$0xff] %v13352_v17  ;;  %v5813_v60 = vmul.f32 %v13336_v1, %v13336_v1  ;;  %v5778_v11 = vmul.f32 %v13352_v17, %v13352_v17 }
 0x587   : > { %v5915_v59 = vadd.f32 %v5914_v55, %v5807_v22  ;;  %v5966_v22 = vadd.f32 %v5772_v21, %v5770_v2  ;;  %v16581_v55 = vld [vmem:[#allocation87_spill] sm:$0xff]  ;;  %v5815_v21 = vmul.f32 %v13346_v32, %v13346_v32 }
 0x588   : > { %16576 = vst [vmem:[#allocation53_spill] sm:$0xff] %v13342_v52  ;;  %v13358_v50 = vsub.f32 %v16581_v55, %v13112_v47  ;;  %v5776_v41 = vmul.f32 %v13342_v52, %v13342_v52  ;;  %v16587_v55 = vld [vmem:[#allocation58_spill] sm:$0xff] }
 0x589   : > { %v5916_v5 = vadd.f32 %v5915_v59, %v5809_v44  ;;  %v5967_v59 = vadd.f32 %v5966_v22, %v5774_v46  ;;  %v16585_v44 = vld [vmem:[#allocation89_spill] sm:$0xff]  ;;  %v13376_v1 = vsub.f32 %v16587_v55, %v13292_v38 }
 0x58a   : > { %16582 = vst [vmem:[#allocation57_spill] sm:$0xff] %v13358_v50  ;;  %v13370_v6 = vsub.f32 %v16585_v44, %v13112_v47  ;;  %v5817_v46 = vmul.f32 %v13358_v50, %v13358_v50  ;;  %v16591_v44 = vld [vmem:[#allocation49_spill] sm:$0xff] }
 0x58b   : > { %v5917_v48 = vadd.f32 %v5916_v5, %v5811_v23  ;;  %16588 = vst [vmem:[#allocation46_spill] sm:$0xff] %v13376_v1  ;;  %v5968_v23 = vadd.f32 %v5967_v59, %v5776_v41  ;;  %v16589_v5 = vld [vmem:[#allocation91_spill] sm:$0xff]  ;;  %v13388_v32 = vsub.f32 %v16591_v44, %v13292_v38  ;;  %v16593_v55 = vld [vmem:[#allocation93_spill] sm:$0xff] }
 0x58c   : > { %16586 = vst [vmem:[#allocation59_spill] sm:$0xff] %v13370_v6  ;;  %v13382_v52 = vsub.f32 %v16589_v5, %v13112_v47  ;;  %v13394_v17 = vsub.f32 %v16593_v55, %v13112_v47  ;;  %v5819_v41 = vmul.f32 %v13370_v6, %v13370_v6  ;;  %v16595_v5 = vld [vmem:[#allocation60_spill] sm:$0xff]  ;;  %v16597_v44 = vld [vmem:[#allocation95_spill] sm:$0xff]  ;;  %v16599_v55 = vld [vmem:[#allocation62_spill] sm:$0xff] }
 0x58d   : > { %v5918_v2 = vadd.f32 %v5917_v48, %v5813_v60  ;;  %16592 = vst [vmem:[#allocation47_spill] sm:$0xff] %v13388_v32  ;;  %v5780_v48 = vmul.f32 %v13364_v63, %v13364_v63  ;;  %v5969_v60 = vadd.f32 %v5968_v23, %v5778_v11  ;;  %v13400_v50 = vsub.f32 %v16595_v5, %v13292_v38  ;;  %v16601_v5 = vld [vmem:[#allocation97_spill] sm:$0xff] }
 0x58e   : > { %16590 = vst [vmem:[#allocation61_spill] sm:$0xff] %v13382_v52  ;;  %16594 = vst [vmem:[#allocation64_spill] sm:$0xff] %v13394_v17  ;;  %v13406_v63 = vsub.f32 %v16597_v44, %v13112_v47  ;;  %v5821_v11 = vmul.f32 %v13382_v52, %v13382_v52  ;;  %v13412_v6 = vsub.f32 %v16599_v55, %v13292_v38  ;;  %v16603_v44 = vld [vmem:[#allocation63_spill] sm:$0xff] }
 0x58f   : > { %v5919_v22 = vadd.f32 %v5918_v2, %v5815_v21  ;;  %16596 = vst [vmem:[#allocation45_spill] sm:$0xff] %v13400_v50  ;;  %v5782_v21 = vmul.f32 %v13376_v1, %v13376_v1  ;;  %v5970_v2 = vadd.f32 %v5969_v60, %v5780_v48  ;;  %v13418_v1 = vsub.f32 %v16601_v5, %v13112_v47  ;;  %v16605_v55 = vld [vmem:[#allocation99_spill] sm:$0xff]  ;;  %v16607_v5 = vld [vmem:[#allocation50_spill] sm:$0xff] }
 0x590   : > { %16598 = vst [vmem:[#allocation65_spill] sm:$0xff] %v13406_v63  ;;  %16600 = vst [vmem:[#allocation67_spill] sm:$0xff] %v13412_v6  ;;  %v5823_v48 = vmul.f32 %v13394_v17, %v13394_v17  ;;  %v13424_v52 = vsub.f32 %v16603_v44, %v13292_v38  ;;  %v13436_v17 = vsub.f32 %v16607_v5, %v13292_v38  ;;  %v16609_v44 = vld [vmem:[#allocation101_spill] sm:$0xff]  ;;  %v16613_v5 = vld [vmem:[#allocation103_spill] sm:$0xff] }
 0x591   : > { %v5920_v59 = vadd.f32 %v5919_v22, %v5817_v46  ;;  %v5784_v46 = vmul.f32 %v13388_v32, %v13388_v32  ;;  %v5971_v22 = vadd.f32 %v5970_v2, %v5782_v21  ;;  %16602 = vst [vmem:[#allocation69_spill] sm:$0xff] %v13418_v1  ;;  %v13430_v32 = vsub.f32 %v16605_v55, %v13112_v47  ;;  %v16611_v55 = vld [vmem:[#allocation43_spill] sm:$0xff] }
 0x592   : > { %16604 = vst [vmem:[#allocation71_spill] sm:$0xff] %v13424_v52  ;;  %v5825_v21 = vmul.f32 %v13406_v63, %v13406_v63  ;;  %16608 = vst [vmem:[#allocation75_spill] sm:$0xff] %v13436_v17  ;;  %v13448_v63 = vsub.f32 %v16611_v55, %v13292_v38  ;;  %v16617_v55 = vld [vmem:[#allocation127_spill] sm:$0xff] }
 0x593   : > { %v5921_v23 = vadd.f32 %v5920_v59, %v5819_v41  ;;  %v5786_v41 = vmul.f32 %v13400_v50, %v13400_v50  ;;  %v5972_v59 = vadd.f32 %v5971_v22, %v5784_v46  ;;  %16606 = vst [vmem:[#allocation73_spill] sm:$0xff] %v13430_v32  ;;  %v13442_v50 = vsub.f32 %v16609_v44, %v13112_v47  ;;  %v16615_v44 = vld [vmem:[#allocation66_spill] sm:$0xff] }
 0x594   : > { %v5827_v46 = vmul.f32 %v13418_v1, %v13418_v1  ;;  %16612 = vst [vmem:[#allocation36_spill] sm:$0xff] %v13448_v63  ;;  %v13460_v1 = vsub.f32 %v16615_v44, %v13292_v38  ;;  %v16621_v44 = vld [vmem:[#allocation128_spill] sm:$0xff] }
 0x595   : > { %v5922_v60 = vadd.f32 %v5921_v23, %v5821_v11  ;;  %v5788_v11 = vmul.f32 %v13412_v6, %v13412_v6  ;;  %v5973_v23 = vadd.f32 %v5972_v59, %v5786_v41  ;;  %16610 = vst [vmem:[#allocation77_spill] sm:$0xff] %v13442_v50  ;;  %v13454_v6 = vsub.f32 %v16613_v5, %v13112_v47  ;;  %v16619_v5 = vld [vmem:[#allocation68_spill] sm:$0xff] }
 0x596   : > { %v5829_v41 = vmul.f32 %v13430_v32, %v13430_v32  ;;  %16616 = vst [vmem:[#allocation79_spill] sm:$0xff] %v13460_v1  ;;  %v13472_v32 = vsub.f32 %v16619_v5, %v13292_v38  ;;  %v16625_v5 = vld [vmem:[#allocation129_spill] sm:$0xff] }
 0x597   : > { %v5923_v2 = vadd.f32 %v5922_v60, %v5823_v48  ;;  %v5790_v48 = vmul.f32 %v13424_v52, %v13424_v52  ;;  %v5974_v60 = vadd.f32 %v5973_v23, %v5788_v11  ;;  %16614 = vst [vmem:[#allocation52_spill] sm:$0xff] %v13454_v6  ;;  %v13466_v52 = vsub.f32 %v16617_v55, %v13112_v47  ;;  %v16623_v55 = vld [vmem:[#allocation70_spill] sm:$0xff] }
 0x598   : > { %v5831_v11 = vmul.f32 %v13442_v50, %v13442_v50  ;;  %16620 = vst [vmem:[#allocation54_spill] sm:$0xff] %v13472_v32  ;;  %v13484_v50 = vsub.f32 %v16623_v55, %v13292_v38  ;;  %v16629_v55 = vld [vmem:[#allocation130_spill] sm:$0xff] }
 0x599   : > { %v5924_v22 = vadd.f32 %v5923_v2, %v5825_v21  ;;  %v5792_v21 = vmul.f32 %v13436_v17, %v13436_v17  ;;  %v5975_v2 = vadd.f32 %v5974_v60, %v5790_v48  ;;  %16618 = vst [vmem:[#allocation81_spill] sm:$0xff] %v13466_v52  ;;  %v13478_v17 = vsub.f32 %v16621_v44, %v13112_v47  ;;  %v16627_v44 = vld [vmem:[#allocation72_spill] sm:$0xff] }
 0x59a   : > { %v5833_v48 = vmul.f32 %v13454_v6, %v13454_v6  ;;  %16624 = vst [vmem:[#allocation48_spill] sm:$0xff] %v13484_v50  ;;  %v13496_v6 = vsub.f32 %v16627_v44, %v13292_v38  ;;  %v16633_v44 = vld [vmem:[#allocation131_spill] sm:$0xff] }
 0x59b   : > { %v5925_v59 = vadd.f32 %v5924_v22, %v5827_v46  ;;  %v5794_v46 = vmul.f32 %v13448_v63, %v13448_v63  ;;  %v5976_v22 = vadd.f32 %v5975_v2, %v5792_v21  ;;  %16622 = vst [vmem:[#allocation83_spill] sm:$0xff] %v13478_v17  ;;  %v13490_v63 = vsub.f32 %v16625_v5, %v13112_v47  ;;  %v16631_v5 = vld [vmem:[#allocation74_spill] sm:$0xff] }
 0x59c   : > { %v5835_v21 = vmul.f32 %v13466_v52, %v13466_v52  ;;  %16628 = vst [vmem:[#allocation56_spill] sm:$0xff] %v13496_v6  ;;  %v13508_v52 = vsub.f32 %v16631_v5, %v13292_v38  ;;  %v16637_v5 = vld [vmem:[#allocation132_spill] sm:$0xff] }
 0x59d   : > { %v5926_v23 = vadd.f32 %v5925_v59, %v5829_v41  ;;  %v5796_v41 = vmul.f32 %v13460_v1, %v13460_v1  ;;  %v5977_v59 = vadd.f32 %v5976_v22, %v5794_v46  ;;  %16626 = vst [vmem:[#allocation85_spill] sm:$0xff] %v13490_v63  ;;  %v13502_v1 = vsub.f32 %v16629_v55, %v13112_v47  ;;  %v16635_v55 = vld [vmem:[#allocation76_spill] sm:$0xff] }
 0x59e   : > { %v5837_v46 = vmul.f32 %v13478_v17, %v13478_v17  ;;  %16632 = vst [vmem:[#allocation39_spill] sm:$0xff] %v13508_v52  ;;  %v13520_v17 = vsub.f32 %v16635_v55, %v13292_v38  ;;  %v16641_v55 = vld [vmem:[#allocation133_spill] sm:$0xff] }
 0x59f   : > { %v5927_v60 = vadd.f32 %v5926_v23, %v5831_v11  ;;  %v5798_v11 = vmul.f32 %v13472_v32, %v13472_v32  ;;  %v5978_v23 = vadd.f32 %v5977_v59, %v5796_v41  ;;  %16630 = vst [vmem:[#allocation87_spill] sm:$0xff] %v13502_v1  ;;  %v13514_v32 = vsub.f32 %v16633_v44, %v13112_v47  ;;  %v16639_v44 = vld [vmem:[#allocation78_spill] sm:$0xff] }
 0x5a0   : > { %v5839_v41 = vmul.f32 %v13490_v63, %v13490_v63  ;;  %16636 = vst [vmem:[#allocation58_spill] sm:$0xff] %v13520_v17  ;;  %v13532_v63 = vsub.f32 %v16639_v44, %v13292_v38  ;;  %v16645_v44 = vld [vmem:[#allocation134_spill] sm:$0xff] }
 0x5a1   : > { %v5928_v2 = vadd.f32 %v5927_v60, %v5833_v48  ;;  %v5800_v48 = vmul.f32 %v13484_v50, %v13484_v50  ;;  %v5979_v60 = vadd.f32 %v5978_v23, %v5798_v11  ;;  %16634 = vst [vmem:[#allocation89_spill] sm:$0xff] %v13514_v32  ;;  %v13526_v50 = vsub.f32 %v16637_v5, %v13112_v47  ;;  %v16643_v5 = vld [vmem:[#allocation80_spill] sm:$0xff] }
 0x5a2   : > { %v5841_v11 = vmul.f32 %v13502_v1, %v13502_v1  ;;  %16640 = vst [vmem:[#allocation49_spill] sm:$0xff] %v13532_v63  ;;  %v13544_v1 = vsub.f32 %v16643_v5, %v13292_v38  ;;  %v16649_v5 = vld [vmem:[#allocation135_spill] sm:$0xff] }
 0x5a3   : > { %v5929_v22 = vadd.f32 %v5928_v2, %v5835_v21  ;;  %v5802_v21 = vmul.f32 %v13496_v6, %v13496_v6  ;;  %v5980_v2 = vadd.f32 %v5979_v60, %v5800_v48  ;;  %16638 = vst [vmem:[#allocation91_spill] sm:$0xff] %v13526_v50  ;;  %v13538_v6 = vsub.f32 %v16641_v55, %v13112_v47  ;;  %v16647_v55 = vld [vmem:[#allocation82_spill] sm:$0xff] }
 0x5a4   : > { %v5843_v48 = vmul.f32 %v13514_v32, %v13514_v32  ;;  %16644 = vst [vmem:[#allocation60_spill] sm:$0xff] %v13544_v1  ;;  %v13556_v32 = vsub.f32 %v16647_v55, %v13292_v38  ;;  %v16653_v55 = vld [vmem:[#allocation136_spill] sm:$0xff] }
 0x5a5   : > { %v5930_v59 = vadd.f32 %v5929_v22, %v5837_v46  ;;  %v5804_v46 = vmul.f32 %v13508_v52, %v13508_v52  ;;  %v5981_v22 = vadd.f32 %v5980_v2, %v5802_v21  ;;  %16642 = vst [vmem:[#allocation93_spill] sm:$0xff] %v13538_v6  ;;  %v13550_v52 = vsub.f32 %v16645_v44, %v13112_v47  ;;  %v16651_v44 = vld [vmem:[#allocation84_spill] sm:$0xff] }
 0x5a6   : > { %v5845_v21 = vmul.f32 %v13526_v50, %v13526_v50  ;;  %16648 = vst [vmem:[#allocation62_spill] sm:$0xff] %v13556_v32  ;;  %v13568_v50 = vsub.f32 %v16651_v44, %v13292_v38  ;;  %v16657_v44 = vld [vmem:[#allocation137_spill] sm:$0xff] }
 0x5a7   : > { %v5931_v23 = vadd.f32 %v5930_v59, %v5839_v41  ;;  %v5806_v41 = vmul.f32 %v13520_v17, %v13520_v17  ;;  %v5982_v59 = vadd.f32 %v5981_v22, %v5804_v46  ;;  %16646 = vst [vmem:[#allocation95_spill] sm:$0xff] %v13550_v52  ;;  %v13562_v17 = vsub.f32 %v16649_v5, %v13112_v47  ;;  %v16655_v5 = vld [vmem:[#allocation86_spill] sm:$0xff] }
 0x5a8   : > { %v5847_v46 = vmul.f32 %v13538_v6, %v13538_v6  ;;  %16652 = vst [vmem:[#allocation63_spill] sm:$0xff] %v13568_v50  ;;  %v13580_v6 = vsub.f32 %v16655_v5, %v13292_v38  ;;  %v16661_v5 = vld [vmem:[#allocation138_spill] sm:$0xff] }
 0x5a9   : > { %v5932_v60 = vadd.f32 %v5931_v23, %v5841_v11  ;;  %v5808_v11 = vmul.f32 %v13532_v63, %v13532_v63  ;;  %v5983_v23 = vadd.f32 %v5982_v59, %v5806_v41  ;;  %16650 = vst [vmem:[#allocation97_spill] sm:$0xff] %v13562_v17  ;;  %v13574_v63 = vsub.f32 %v16653_v55, %v13112_v47  ;;  %v16659_v55 = vld [vmem:[#allocation88_spill] sm:$0xff] }
 0x5aa   : > { %v5849_v41 = vmul.f32 %v13550_v52, %v13550_v52  ;;  %16656 = vst [vmem:[#allocation50_spill] sm:$0xff] %v13580_v6  ;;  %v13592_v52 = vsub.f32 %v16659_v55, %v13292_v38  ;;  %v16665_v55 = vld [vmem:[#allocation139_spill] sm:$0xff] }
 0x5ab   : > { %v5933_v2 = vadd.f32 %v5932_v60, %v5843_v48  ;;  %v5810_v48 = vmul.f32 %v13544_v1, %v13544_v1  ;;  %v5984_v60 = vadd.f32 %v5983_v23, %v5808_v11  ;;  %16654 = vst [vmem:[#allocation99_spill] sm:$0xff] %v13574_v63  ;;  %v13586_v1 = vsub.f32 %v16657_v44, %v13112_v47  ;;  %v16663_v44 = vld [vmem:[#allocation90_spill] sm:$0xff] }
 0x5ac   : > { %v5851_v11 = vmul.f32 %v13562_v17, %v13562_v17  ;;  %16660 = vst [vmem:[#allocation43_spill] sm:$0xff] %v13592_v52  ;;  %v13604_v17 = vsub.f32 %v16663_v44, %v13292_v38  ;;  %v16669_v44 = vld [vmem:[#allocation140_spill] sm:$0xff] }
 0x5ad   : > { %v5934_v22 = vadd.f32 %v5933_v2, %v5845_v21  ;;  %v5812_v21 = vmul.f32 %v13556_v32, %v13556_v32  ;;  %v5985_v2 = vadd.f32 %v5984_v60, %v5810_v48  ;;  %16658 = vst [vmem:[#allocation101_spill] sm:$0xff] %v13586_v1  ;;  %v13598_v32 = vsub.f32 %v16661_v5, %v13112_v47  ;;  %v16667_v5 = vld [vmem:[#allocation92_spill] sm:$0xff] }
 0x5ae   : > { %v5853_v48 = vmul.f32 %v13574_v63, %v13574_v63  ;;  %16664 = vst [vmem:[#allocation66_spill] sm:$0xff] %v13604_v17  ;;  %v13616_v63 = vsub.f32 %v16667_v5, %v13292_v38  ;;  %v16673_v5 = vld [vmem:[#allocation141_spill] sm:$0xff] }
 0x5af   : > { %v5935_v59 = vadd.f32 %v5934_v22, %v5847_v46  ;;  %v5814_v46 = vmul.f32 %v13568_v50, %v13568_v50  ;;  %v5986_v22 = vadd.f32 %v5985_v2, %v5812_v21  ;;  %16662 = vst [vmem:[#allocation103_spill] sm:$0xff] %v13598_v32  ;;  %v13610_v50 = vsub.f32 %v16665_v55, %v13112_v47  ;;  %v16671_v55 = vld [vmem:[#allocation94_spill] sm:$0xff] }
 0x5b0   : > { %v5855_v21 = vmul.f32 %v13586_v1, %v13586_v1  ;;  %16668 = vst [vmem:[#allocation68_spill] sm:$0xff] %v13616_v63  ;;  %v13628_v1 = vsub.f32 %v16671_v55, %v13292_v38  ;;  %v16677_v55 = vld [vmem:[#allocation142_spill] sm:$0xff] }
 0x5b1   : > { %v5936_v23 = vadd.f32 %v5935_v59, %v5849_v41  ;;  %v5816_v41 = vmul.f32 %v13580_v6, %v13580_v6  ;;  %v5987_v59 = vadd.f32 %v5986_v22, %v5814_v46  ;;  %16666 = vst [vmem:[#allocation127_spill] sm:$0xff] %v13610_v50  ;;  %v13622_v6 = vsub.f32 %v16669_v44, %v13112_v47  ;;  %v16675_v44 = vld [vmem:[#allocation96_spill] sm:$0xff] }
 0x5b2   : > { %v5857_v46 = vmul.f32 %v13598_v32, %v13598_v32  ;;  %16672 = vst [vmem:[#allocation70_spill] sm:$0xff] %v13628_v1  ;;  %v13640_v32 = vsub.f32 %v16675_v44, %v13292_v38  ;;  %v16681_v44 = vld [vmem:[#allocation143_spill] sm:$0xff] }
 0x5b3   : > { %v5937_v60 = vadd.f32 %v5936_v23, %v5851_v11  ;;  %v5818_v11 = vmul.f32 %v13592_v52, %v13592_v52  ;;  %v5988_v23 = vadd.f32 %v5987_v59, %v5816_v41  ;;  %16670 = vst [vmem:[#allocation128_spill] sm:$0xff] %v13622_v6  ;;  %v13634_v52 = vsub.f32 %v16673_v5, %v13112_v47  ;;  %v16679_v5 = vld [vmem:[#allocation98_spill] sm:$0xff] }
 0x5b4   : > { %v5859_v41 = vmul.f32 %v13610_v50, %v13610_v50  ;;  %16676 = vst [vmem:[#allocation72_spill] sm:$0xff] %v13640_v32  ;;  %v13652_v50 = vsub.f32 %v16679_v5, %v13292_v38  ;;  %v16685_v5 = vld [vmem:[#allocation144_spill] sm:$0xff] }
 0x5b5   : > { %v5938_v2 = vadd.f32 %v5937_v60, %v5853_v48  ;;  %v5820_v48 = vmul.f32 %v13604_v17, %v13604_v17  ;;  %v5989_v60 = vadd.f32 %v5988_v23, %v5818_v11  ;;  %16674 = vst [vmem:[#allocation129_spill] sm:$0xff] %v13634_v52  ;;  %v13646_v17 = vsub.f32 %v16677_v55, %v13112_v47  ;;  %v16683_v55 = vld [vmem:[#allocation100_spill] sm:$0xff] }
 0x5b6   : > { %v5861_v11 = vmul.f32 %v13622_v6, %v13622_v6  ;;  %16680 = vst [vmem:[#allocation74_spill] sm:$0xff] %v13652_v50  ;;  %v13664_v6 = vsub.f32 %v16683_v55, %v13292_v38  ;;  %v16689_v55 = vld [vmem:[#allocation145_spill] sm:$0xff] }
 0x5b7   : > { %v5939_v22 = vadd.f32 %v5938_v2, %v5855_v21  ;;  %v5822_v21 = vmul.f32 %v13616_v63, %v13616_v63  ;;  %v5990_v2 = vadd.f32 %v5989_v60, %v5820_v48  ;;  %16678 = vst [vmem:[#allocation130_spill] sm:$0xff] %v13646_v17  ;;  %v13658_v63 = vsub.f32 %v16681_v44, %v13112_v47  ;;  %v16687_v44 = vld [vmem:[#allocation102_spill] sm:$0xff] }
 0x5b8   : > { %v5863_v48 = vmul.f32 %v13634_v52, %v13634_v52  ;;  %16684 = vst [vmem:[#allocation76_spill] sm:$0xff] %v13664_v6  ;;  %v13676_v52 = vsub.f32 %v16687_v44, %v13292_v38  ;;  %v16693_v44 = vld [vmem:[#allocation146_spill] sm:$0xff] }
 0x5b9   : > { %v5940_v59 = vadd.f32 %v5939_v22, %v5857_v46  ;;  %v5824_v46 = vmul.f32 %v13628_v1, %v13628_v1  ;;  %v5991_v22 = vadd.f32 %v5990_v2, %v5822_v21  ;;  %16682 = vst [vmem:[#allocation131_spill] sm:$0xff] %v13658_v63  ;;  %v13670_v1 = vsub.f32 %v16685_v5, %v13112_v47  ;;  %v16691_v5 = vld [vmem:[#allocation104_spill] sm:$0xff] }
 0x5ba   : > { %v5865_v21 = vmul.f32 %v13646_v17, %v13646_v17  ;;  %16688 = vst [vmem:[#allocation78_spill] sm:$0xff] %v13676_v52  ;;  %v13688_v17 = vsub.f32 %v16691_v5, %v13292_v38  ;;  %v16696_v5 = vld [vmem:[#allocation147_spill] sm:$0xff] }
 0x5bb   : > { %v5941_v23 = vadd.f32 %v5940_v59, %v5859_v41  ;;  %v5826_v41 = vmul.f32 %v13640_v32, %v13640_v32  ;;  %v5992_v59 = vadd.f32 %v5991_v22, %v5824_v46  ;;  %16686 = vst [vmem:[#allocation132_spill] sm:$0xff] %v13670_v1  ;;  %v13682_v32 = vsub.f32 %v16689_v55, %v13112_v47  ;;  %v16694_v55 = vld [vmem:[#allocation105_spill] sm:$0xff] }
 0x5bc   : > { %v5867_v46 = vmul.f32 %v13658_v63, %v13658_v63  ;;  %16692 = vst [vmem:[#allocation80_spill] sm:$0xff] %v13688_v17  ;;  %v13700_v63 = vsub.f32 %v16694_v55, %v13292_v38  ;;  %v16699_v55 = vld [vmem:[#allocation148_spill] sm:$0xff] }
 0x5bd   : > { %v5942_v60 = vadd.f32 %v5941_v23, %v5861_v11  ;;  %v5828_v11 = vmul.f32 %v13652_v50, %v13652_v50  ;;  %v5993_v23 = vadd.f32 %v5992_v59, %v5826_v41  ;;  %16690 = vst [vmem:[#allocation133_spill] sm:$0xff] %v13682_v32  ;;  %v13694_v50 = vsub.f32 %v16693_v44, %v13112_v47  ;;  %v16697_v44 = vld [vmem:[#allocation106_spill] sm:$0xff] }
 0x5be   : > { %v5869_v41 = vmul.f32 %v13670_v1, %v13670_v1  ;;  %16695 = vst [vmem:[#allocation134_spill] sm:$0xff] %v13700_v63  ;;  %v13712_v1 = vsub.f32 %v16697_v44, %v13292_v38 }
 0x5bf   : > { %v5943_v2 = vadd.f32 %v5942_v60, %v5863_v48  ;;  %v5830_v48 = vmul.f32 %v13664_v6, %v13664_v6  ;;  %v5994_v60 = vadd.f32 %v5993_v23, %v5828_v11  ;;  %v13706_v6 = vsub.f32 %v16696_v5, %v13112_v47  ;;  %v16700_v5 = vld [vmem:[#allocation107_spill] sm:$0xff] }
 0x5c0   : > { %v5871_v11 = vmul.f32 %v13682_v32, %v13682_v32  ;;  %16698 = vst [vmem:[#allocation82_spill] sm:$0xff] %v13712_v1  ;;  %v13724_v32 = vsub.f32 %v16700_v5, %v13292_v38 }
 0x5c1   : > { %v5944_v22 = vadd.f32 %v5943_v2, %v5865_v21  ;;  %v5832_v21 = vmul.f32 %v13676_v52, %v13676_v52  ;;  %v5995_v2 = vadd.f32 %v5994_v60, %v5830_v48  ;;  %v13718_v52 = vsub.f32 %v16699_v55, %v13112_v47 }
 0x5c2   : > { %v5873_v48 = vmul.f32 %v13694_v50, %v13694_v50  ;;  %16701 = vst [vmem:[#allocation135_spill] sm:$0xff] %v13724_v32  ;;  %v5875_v44 = vmul.f32 %v13706_v6, %v13706_v6  ;;  %v5838_v55 = vmul.f32 %v13712_v1, %v13712_v1 }
 0x5c3   : > { %v5945_v59 = vadd.f32 %v5944_v22, %v5867_v46  ;;  %v5834_v46 = vmul.f32 %v13688_v17, %v13688_v17  ;;  %v5996_v22 = vadd.f32 %v5995_v2, %v5832_v21  ;;  %v16702_v2 = vld [vmem:[#allocation108_spill] sm:$0xff]  ;;  %v16704_v17 = vld [vmem:[#allocation109_spill] sm:$0xff] }
 0x5c4   : > { %v13732_v47 = vsub.f32 %v16702_v2, %v13292_v38  ;;  %v16706_v2 = vld [vmem:[#allocation110_spill] sm:$0xff] }
 0x5c5   : > { %v5946_v23 = vadd.f32 %v5945_v59, %v5869_v41  ;;  %v5836_v41 = vmul.f32 %v13700_v63, %v13700_v63  ;;  %v5997_v59 = vadd.f32 %v5996_v22, %v5834_v46  ;;  %v13740_v63 = vsub.f32 %v16704_v17, %v13292_v38 }
 0x5c6   : > { %16703 = vst [vmem:[#allocation84_spill] sm:$0xff] %v13732_v47  ;;  %v5840_v46 = vmul.f32 %v13724_v32, %v13724_v32  ;;  %v13748_v1 = vsub.f32 %v16706_v2, %v13292_v38  ;;  %v5881_v17 = vmul.f32 %v13130_v36, %v13130_v36  ;;  %v13764_v2 = vsub.f32 %v13030_v8, %v13292_v38 }
 0x5c7   : > { %v5947_v60 = vadd.f32 %v5946_v23, %v5871_v11  ;;  %v5998_v11 = vadd.f32 %v5997_v59, %v5836_v41  ;;  %v5877_v23 = vmul.f32 %v13718_v52, %v13718_v52  ;;  %16705 = vst [vmem:[#allocation136_spill] sm:$0xff] %v13740_v63  ;;  %v5842_v41 = vmul.f32 %v13732_v47, %v13732_v47  ;;  %v16778_v47 = vld [vmem:[#allocation83_spill] sm:$0xff] }
 0x5c8   : > { %16707 = vst [vmem:[#allocation86_spill] sm:$0xff] %v13748_v1  ;;  %16710 = vst [vmem:[#allocation88_spill] sm:$0xff] %v13764_v2  ;;  %v13776_v8 = vsub.f32 %v13040_v51, %v13292_v38 }
 0x5c9   : > { %v5948_v21 = vadd.f32 %v5947_v60, %v5873_v48  ;;  %v5999_v22 = vadd.f32 %v5998_v11, %v5838_v55  ;;  %v5879_v48 = vmul.f32 %v13126_v56, %v13126_v56  ;;  %v5844_v55 = vmul.f32 %v13740_v63, %v13740_v63  ;;  %v16777_v63 = vld [vmem:[#allocation81_spill] sm:$0xff] }
 0x5ca   : > { %16711 = vst [vmem:[#allocation138_spill] sm:$0xff] %v13776_v8  ;;  %v5852_v51 = vmul.f32 %v13776_v8, %v13776_v8  ;;  %v13802_v8 = vsub.f32 %v13055_v25, %v13292_v38 }
 0x5cb   : > { %v5949_v5 = vadd.f32 %v5948_v21, %v5875_v44  ;;  %v6000_v59 = vadd.f32 %v5999_v22, %v5840_v46  ;;  %v16708_v21 = vld [vmem:[#allocation111_spill] sm:$0xff]  ;;  %v5846_v46 = vmul.f32 %v13748_v1, %v13748_v1  ;;  %v16776_v1 = vld [vmem:[#allocation52_spill] sm:$0xff] }
 0x5cc   : > { %v13756_v32 = vsub.f32 %v16708_v21, %v13292_v38  ;;  %16714 = vst [vmem:[#allocation92_spill] sm:$0xff] %v13802_v8 }
 0x5cd   : > { %v5950_v60 = vadd.f32 %v5949_v5, %v5877_v23  ;;  %v6001_v11 = vadd.f32 %v6000_v59, %v5842_v41  ;;  %v5883_v23 = vmul.f32 %v13134_v54, %v13134_v54  ;;  %v5887_v59 = vmul.f32 %v13142_v16, %v13142_v16 }
 0x5ce   : > { %16709 = vst [vmem:[#allocation137_spill] sm:$0xff] %v13756_v32  ;;  %v5848_v21 = vmul.f32 %v13756_v32, %v13756_v32  ;;  %v16775_v32 = vld [vmem:[#allocation77_spill] sm:$0xff] }
 0x5cf   : > { %v5951_v44 = vadd.f32 %v5950_v60, %v5879_v48  ;;  %v6002_v22 = vadd.f32 %v6001_v11, %v5844_v55  ;;  %v5885_v48 = vmul.f32 %v13138_v24, %v13138_v24  ;;  %v5889_v11 = vmul.f32 %v13146_v39, %v13146_v39 }
 0x5d1   : > { %v5952_v5 = vadd.f32 %v5951_v44, %v5881_v17  ;;  %v6003_v41 = vadd.f32 %v6002_v22, %v5846_v46  ;;  %v5850_v44 = vmul.f32 %v13764_v2, %v13764_v2  ;;  %v5891_v46 = vmul.f32 %v13150_v14, %v13150_v14  ;;  %v16774_v2 = vld [vmem:[#allocation73_spill] sm:$0xff] }
 0x5d3   : > { %v5953_v60 = vadd.f32 %v5952_v5, %v5883_v23  ;;  %v6004_v55 = vadd.f32 %v6003_v41, %v5848_v21 }
 0x5d5   : > { %v5954_v17 = vadd.f32 %v5953_v60, %v5885_v48  ;;  %v6005_v5 = vadd.f32 %v6004_v55, %v5850_v44  ;;  %v13786_v48 = vsub.f32 %v13045_v53, %v13292_v38  ;;  %v5893_v60 = vmul.f32 %v13153_v33, %v13153_v33 }
 0x5d6   : > { %v13796_v44 = vsub.f32 %v13050_v18, %v13292_v38  ;;  %v13808_v18 = vsub.f32 %v13060_v15, %v13292_v38 }
 0x5d7   : > { %v5955_v23 = vadd.f32 %v5954_v17, %v5887_v59  ;;  %16712 = vst [vmem:[#allocation90_spill] sm:$0xff] %v13786_v48  ;;  %v6006_v41 = vadd.f32 %v6005_v5, %v5852_v51  ;;  %v5895_v59 = vmul.f32 %v13156_v49, %v13156_v49  ;;  %v5854_v53 = vmul.f32 %v13786_v48, %v13786_v48  ;;  %v16773_v48 = vld [vmem:[#allocation69_spill] sm:$0xff] }
 0x5d8   : > { %16713 = vst [vmem:[#allocation139_spill] sm:$0xff] %v13796_v44  ;;  %v5856_v5 = vmul.f32 %v13796_v44, %v13796_v44  ;;  %16715 = vst [vmem:[#allocation140_spill] sm:$0xff] %v13808_v18  ;;  %v5860_v25 = vmul.f32 %v13808_v18, %v13808_v18  ;;  %v16770_v18 = vld [vmem:[#allocation61_spill] sm:$0xff] }
 0x5d9   : > { %v5956_v22 = vadd.f32 %v5955_v23, %v5889_v11  ;;  %v6007_v11 = vadd.f32 %v6006_v41, %v5854_v53  ;;  %v16772_v44 = vld [vmem:[#allocation65_spill] sm:$0xff] }
 0x5db   : > { %v5957_v21 = vadd.f32 %v5956_v22, %v5891_v46  ;;  %v6008_v22 = vadd.f32 %v6007_v11, %v5856_v5  ;;  %v13826_v5 = vsub.f32 %v13075_v28, %v13292_v38 }
 0x5dd   : > { %v5958_v17 = vadd.f32 %v5957_v21, %v5893_v60  ;;  %v5858_v60 = vmul.f32 %v13802_v8, %v13802_v8  ;;  %16718 = vst [vmem:[#allocation96_spill] sm:$0xff] %v13826_v5  ;;  %v16771_v8 = vld [vmem:[#allocation64_spill] sm:$0xff] }
 0x5df   : > { %v5959_v55 = vadd.f32 %v5958_v17, %v5895_v59  ;;  %v6009_v21 = vadd.f32 %v6008_v22, %v5858_v60  ;;  %v13814_v59 = vsub.f32 %v13065_v35, %v13292_v38 }
 0x5e1   : > { %v5960_v23 = vrot.slane %v5959_v55, 4  ;;  %16716 = vst [vmem:[#allocation94_spill] sm:$0xff] %v13814_v59  ;;  %v6010_v17 = vadd.f32 %v6009_v21, %v5860_v25  ;;  %v5862_v15 = vmul.f32 %v13814_v59, %v13814_v59  ;;  %v16769_v59 = vld [vmem:[#allocation59_spill] sm:$0xff] }
 0x5e3   : > { %v5961_v46 = vadd.f32 %v5960_v23, %v5959_v55  ;;  %v13820_v55 = vsub.f32 %v13070_v26, %v13292_v38  ;;  %v6011_v11 = vadd.f32 %v6010_v17, %v5862_v15  ;;  %v5866_v26 = vmul.f32 %v13826_v5, %v13826_v5  ;;  %v16767_v5 = vld [vmem:[#allocation55_spill] sm:$0xff] }
 0x5e4   : > { %v13844_v17 = vsub.f32 %v13090_v34, %v13292_v38  ;;  %v13850_v15 = vsub.f32 %v13095_v57, %v13292_v38 }
 0x5e5   : > { %v5962_v51 = vrot.slane %v5961_v46, 2  ;;  %16717 = vst [vmem:[#allocation141_spill] sm:$0xff] %v13820_v55  ;;  %v5864_v35 = vmul.f32 %v13820_v55, %v13820_v55  ;;  %v16768_v55 = vld [vmem:[#allocation57_spill] sm:$0xff] }
 0x5e6   : > { %16721 = vst [vmem:[#allocation143_spill] sm:$0xff] %v13844_v17  ;;  %16722 = vst [vmem:[#allocation100_spill] sm:$0xff] %v13850_v15  ;;  %v5874_v34 = vmul.f32 %v13850_v15, %v13850_v15  ;;  %v16763_v15 = vld [vmem:[#allocation124_spill] sm:$0xff] }
 0x5e7   : > { %v5963_v41 = vadd.f32 %v5962_v51, %v5961_v46  ;;  %v6012_v46 = vadd.f32 %v6011_v11, %v5864_v35  ;;  %v13832_v51 = vsub.f32 %v13080_v3, %v13292_v38 }
 0x5e9   : > { %v5964_v53 = vrot.slane %v5963_v41, 1  ;;  %16719 = vst [vmem:[#allocation142_spill] sm:$0xff] %v13832_v51  ;;  %v6013_v60 = vadd.f32 %v6012_v46, %v5866_v26  ;;  %v5868_v28 = vmul.f32 %v13832_v51, %v13832_v51  ;;  %v13862_v46 = vsub.f32 %v13105_v42, %v13292_v38  ;;  %v16766_v51 = vld [vmem:[#allocation51_spill] sm:$0xff] }
 0x5eb   : > { %v5965_v23 = vadd.f32 %v5964_v53, %v5963_v41  ;;  %v13838_v41 = vsub.f32 %v13085_v7, %v13292_v38  ;;  %v6014_v25 = vadd.f32 %v6013_v60, %v5868_v28  ;;  %v5872_v7 = vmul.f32 %v13844_v17, %v13844_v17  ;;  %16724 = vst [vmem:[#allocation102_spill] sm:$0xff] %v13862_v46  ;;  %v16764_v17 = vld [vmem:[#allocation112_spill] sm:$0xff] }
 0x5ed   : > { %v6035_v22 = vmul.f32 0.001953125, %v5965_v23  ;;  %16720 = vst [vmem:[#allocation98_spill] sm:$0xff] %v13838_v41  ;;  %v5870_v3 = vmul.f32 %v13838_v41, %v13838_v41  ;;  %v13856_v23 = vsub.f32 %v13100_v37, %v13292_v38  ;;  %v13874_v37 = vsub.f32 %v13110_v30, %v13292_v38  ;;  %v16765_v41 = vld [vmem:[#allocation113_spill] sm:$0xff] }
 0x5ef   : > { %v6037_v21 = vadd.f32 1e-05, %v6035_v22  ;;  %v6015_v53 = vadd.f32 %v6014_v25, %v5870_v3  ;;  %16723 = vst [vmem:[#allocation144_spill] sm:$0xff] %v13856_v23  ;;  %v5876_v57 = vmul.f32 %v13856_v23, %v13856_v23  ;;  %16726 = vst [vmem:[#allocation104_spill] sm:$0xff] %v13874_v37  ;;  %v16762_v23 = vld [vmem:[#allocation123_spill] sm:$0xff] }
 0x5f1   : > { %9617 = vrsqrt.f32 %v6037_v21  ;;  %v6016_v11 = vadd.f32 %v6015_v53, %v5872_v7  ;;  %v5878_v21 = vmul.f32 %v13862_v46, %v13862_v46  ;;  %v13918_v53 = vsub.f32 %v13122_v29, %v13292_v38  ;;  %v16761_v46 = vld [vmem:[#allocation122_spill] sm:$0xff] }
 0x5f2   : > { %v13924_v7 = vsub.f32 %v13161_v61, %v13292_v38  ;;  %v13934_v29 = vsub.f32 %v13171_v13, %v13292_v38  ;;  %v13944_v61 = vsub.f32 %v13181_v10, %v13292_v38 }
 0x5f3   : > { %v6017_v35 = vadd.f32 %v6016_v11, %v5874_v34  ;;  %16736 = vst [vmem:[#allocation111_spill] sm:$0xff] %v13918_v53  ;;  %v13930_v34 = vsub.f32 %v13166_v4, %v13292_v38  ;;  %v8462_v4 = vld [vmem:[%s10430_s17 + $0x1] ss:$2 sm:$0x3] }
 0x5f4   : > { %16737 = vst [vmem:[#allocation149_spill] sm:$0xff] %v13924_v7  ;;  %16739 = vst [vmem:[#allocation151_spill] sm:$0xff] %v13934_v29 }
 0x5f5   : > { %v6018_v26 = vadd.f32 %v6017_v35, %v5876_v57  ;;  %16738 = vst [vmem:[#allocation150_spill] sm:$0xff] %v13930_v34  ;;  %v5886_v35 = vmul.f32 %v13924_v7, %v13924_v7  ;;  %v13940_v57 = vsub.f32 %v13176_v43, %v13292_v38  ;;  %16741 = vst [vmem:[#allocation153_spill] sm:$0xff] %v13944_v61  ;;  %v16745_v43 = vld [vmem:[#allocation42_spill] sm:$0xff] }
 0x5f6   : > { %v5888_v13 = vmul.f32 %v13930_v34, %v13930_v34  ;;  %v16756_v34 = vld [vmem:[#allocation117_spill] sm:$0xff]  ;;  %v16757_v7 = vld [vmem:[#allocation118_spill] sm:$0xff] }
 0x5f7   : > { %v6019_v3 = vadd.f32 %v6018_v26, %v5878_v21  ;;  %16740 = vst [vmem:[#allocation152_spill] sm:$0xff] %v13940_v57  ;;  %v13948_v26 = vsub.f32 %v13192_v62, %v13292_v38  ;;  %v13965_v10 = vmul.f32 %v13940_v57, %v13940_v57  ;;  %v13969_v62 = vmul.f32 %v13944_v61, %v13944_v61 }
 0x5f9   : > { %16742 = vst [vmem:[#allocation154_spill] sm:$0xff] %v13948_v26  ;;  %16746 = vst [vmem:[#allocation157_spill] sm:$0xff] %v13965_v10  ;;  %v16784_v10 = vld [vmem:[#allocation95_spill] sm:$0xff] }
 0x5fa   : > { %16747 = vst [vmem:[#allocation158_spill] sm:$0xff] %v13969_v62  ;;  %v16782_v62 = vld [vmem:[#allocation91_spill] sm:$0xff] }
 0x5fe   : > { %v13864_v22 = vpop.eup %9617 }
 0x5ff   : > { %v13870_v60 = vmul.f32 %v13864_v22, %v13126_v56  ;;  %v13880_v42 = vmul.f32 %v13864_v22, %v13130_v36  ;;  %v13884_v28 = vmul.f32 %v13864_v22, %v13134_v54  ;;  %v13888_v25 = vmul.f32 %v13864_v22, %v13138_v24 }
 0x600   : > { %v13892_v56 = vmul.f32 %v13864_v22, %v13142_v16  ;;  %v13896_v30 = vmul.f32 %v13864_v22, %v13146_v39  ;;  %v13900_v36 = vmul.f32 %v13864_v22, %v13150_v14  ;;  %v13904_v54 = vmul.f32 %v13864_v22, %v13153_v33 }
 0x601   : > { %16725 = vst [vmem:[#allocation145_spill] sm:$0xff] %v13870_v60  ;;  %16727 = vst [vmem:[#allocation146_spill] sm:$0xff] %v13880_v42  ;;  %v13908_v24 = vmul.f32 %v13864_v22, %v13156_v49  ;;  %v13912_v16 = vsub.f32 %v13117_v27, %v13292_v38  ;;  %v5880_v39 = vmul.f32 %v13874_v37, %v13874_v37  ;;  %v16760_v37 = vld [vmem:[#allocation121_spill] sm:$0xff]  ;;  %v16794_v42 = vld [vmem:[#allocation132_spill] sm:$0xff] }
 0x602   : > { %16728 = vst [vmem:[#allocation105_spill] sm:$0xff] %v13884_v28  ;;  %16729 = vst [vmem:[#allocation147_spill] sm:$0xff] %v13888_v25  ;;  %v5884_v27 = vmul.f32 %v13918_v53, %v13918_v53  ;;  %v13973_v38 = vmul.f32 %v13948_v26, %v13948_v26  ;;  %v6043_v61 = vmul.f32 %v13864_v22, %v13189_v12  ;;  %v16758_v53 = vld [vmem:[#allocation119_spill] sm:$0xff]  ;;  %v16790_v25 = vld [vmem:[#allocation128_spill] sm:$0xff] }
 0x603   : > { %16730 = vst [vmem:[#allocation106_spill] sm:$0xff] %v13892_v56  ;;  %16731 = vst [vmem:[#allocation148_spill] sm:$0xff] %v13896_v30  ;;  %v6020_v14 = vadd.f32 %v6019_v3, %v5880_v39  ;;  %v5882_v33 = vmul.f32 %v13912_v16, %v13912_v16  ;;  %v13952_v3 = vld [vmem:[%s10430_s17 + $0x5] ss:$2 sm:$0x3]  ;;  %v13958_v39 = vmul.f32 %v13934_v29, %v13934_v29  ;;  %v16791_v28 = vld [vmem:[#allocation129_spill] sm:$0xff] }
 0x604   : > { %16732 = vst [vmem:[#allocation107_spill] sm:$0xff] %v13900_v36  ;;  %16733 = vst [vmem:[#allocation108_spill] sm:$0xff] %v13904_v54  ;;  %v6045_v57 = vmul.f32 %v13864_v22, %v13197_v40  ;;  %v6047_v26 = vmul.f32 %v13864_v22, %v13205_v31  ;;  %v6057_v12 = vmul.f32 %v13864_v22, %v13234_v19  ;;  %v16755_v29 = vld [vmem:[#allocation116_spill] sm:$0xff]  ;;  %v16786_v54 = vld [vmem:[#allocation99_spill] sm:$0xff] }
 0x605   : > { %16734 = vst [vmem:[#allocation109_spill] sm:$0xff] %v13908_v24  ;;  %16735 = vst [vmem:[#allocation110_spill] sm:$0xff] %v13912_v16  ;;  %v6021_v49 = vadd.f32 %v6020_v14, %v5882_v33  ;;  %v13961_v14 = vrot.slane %v8462_v4, %v16745_v43  ;;  %v6041_v33 = vmul.f32 %v13864_v22, %v13185_v58  ;;  %v16759_v16 = vld [vmem:[#allocation120_spill] sm:$0xff]  ;;  %v16785_v24 = vld [vmem:[#allocation97_spill] sm:$0xff] }
 0x606   : > { %16743 = vst [vmem:[#allocation155_spill] sm:$0xff] %v13952_v3  ;;  %16744 = vst [vmem:[#allocation156_spill] sm:$0xff] %v13958_v39  ;;  %v6049_v58 = vmul.f32 %v13864_v22, %v13210_v45  ;;  %v6063_v45 = vmul.f32 %v13864_v22, %v16755_v29  ;;  %v6071_v19 = vmul.f32 %v13864_v22, %v16759_v16  ;;  %v16787_v36 = vld [vmem:[#allocation101_spill] sm:$0xff]  ;;  %v16788_v30 = vld [vmem:[#allocation103_spill] sm:$0xff] }
 0x607   : > { %v6022_v11 = vadd.f32 %v6021_v49, %v5884_v27  ;;  %16748 = vst [vmem:[#allocation159_spill] sm:$0xff] %v13973_v38  ;;  %v13979_v49 = vrot.slane %v13952_v3, %v16745_v43  ;;  %v6051_v43 = vmul.f32 %v13864_v22, %v13216_v20  ;;  %v6065_v20 = vmul.f32 %v13864_v22, %v16756_v34  ;;  %v16779_v3 = vld [vmem:[#allocation85_spill] sm:$0xff]  ;;  %v16789_v56 = vld [vmem:[#allocation127_spill] sm:$0xff] }
 0x608   : > { %v6077_v29 = vmul.f32 %v13864_v22, %v16762_v23  ;;  %v6079_v34 = vmul.f32 %v13864_v22, %v16763_v15  ;;  %v6085_v16 = vmul.f32 %v13864_v22, %v16766_v51  ;;  %v6091_v23 = vmul.f32 %v13864_v22, %v16769_v59  ;;  %v16781_v38 = vld [vmem:[#allocation89_spill] sm:$0xff]  ;;  %v16793_v39 = vld [vmem:[#allocation131_spill] sm:$0xff] }
 0x609   : > { %v6023_v21 = vadd.f32 %v6022_v11, %v5886_v35  ;;  %16749 = vst [vmem:[#allocation160_spill] sm:$0xff] %v13979_v49  ;;  %v16751_v11 = vld [vmem:[#allocation38_spill] sm:$0xff]  ;;  %v6093_v15 = vmul.f32 %v13864_v22, %v16770_v18  ;;  %v6099_v51 = vmul.f32 %v13864_v22, %v16773_v48  ;;  %v6105_v59 = vmul.f32 %v13864_v22, %v16776_v1  ;;  %v16783_v49 = vld [vmem:[#allocation93_spill] sm:$0xff] }
 0x60a   : > { %v13984_v35 = vrot.slane %v8462_v4, %v16751_v11  ;;  %v6055_v4 = vmul.f32 %v13864_v22, %v13228_v0  ;;  %v6069_v0 = vmul.f32 %v13864_v22, %v16758_v53  ;;  %v6083_v53 = vmul.f32 %v13864_v22, %v16765_v41  ;;  %v16780_v11 = vld [vmem:[#allocation87_spill] sm:$0xff]  ;;  %v16795_v60 = vld [vmem:[#allocation133_spill] sm:$0xff] }
 0x60b   : > { %v13981_v27 = vadd.f32 %v6023_v21, %v5888_v13  ;;  %v6053_v21 = vmul.f32 %v13864_v22, %v13222_v9  ;;  %v16753_v13 = vld [vmem:[#allocation114_spill] sm:$0xff]  ;;  %v6067_v9 = vmul.f32 %v13864_v22, %v16757_v7  ;;  %v6081_v7 = vmul.f32 %v13864_v22, %v16764_v17 }
 0x60c   : > { %16752 = vst [vmem:[#allocation162_spill] sm:$0xff] %v13984_v35  ;;  %v6059_v40 = vmul.f32 %v13864_v22, %v16753_v13  ;;  %v16754_v35 = vld [vmem:[#allocation115_spill] sm:$0xff]  ;;  %v6073_v13 = vmul.f32 %v13864_v22, %v16760_v37  ;;  %v6087_v37 = vmul.f32 %v13864_v22, %v16767_v5  ;;  %v6095_v17 = vmul.f32 %v13864_v22, %v16771_v8 }
 0x60d   : > { %16750 = vst [vmem:[#allocation161_spill] sm:$0xff] %v13981_v27  ;;  %v6061_v31 = vmul.f32 %v13864_v22, %v16754_v35  ;;  %v6075_v35 = vmul.f32 %v13864_v22, %v16761_v46  ;;  %v6089_v46 = vmul.f32 %v13864_v22, %v16768_v55  ;;  %v6097_v41 = vmul.f32 %v13864_v22, %v16772_v44  ;;  %v16792_v27 = vld [vmem:[#allocation130_spill] sm:$0xff] }
 0x60e   : > { %v6101_v5 = vmul.f32 %v13864_v22, %v16774_v2  ;;  %v6103_v55 = vmul.f32 %v13864_v22, %v16775_v32  ;;  %v6107_v18 = vmul.f32 %v13864_v22, %v16777_v63  ;;  %v6109_v8 = vmul.f32 %v13864_v22, %v16778_v47 }
 0x60f   : > { %v6111_v44 = vmul.f32 %v13864_v22, %v16779_v3  ;;  %v6113_v48 = vmul.f32 %v13864_v22, %v16780_v11  ;;  %v6115_v2 = vmul.f32 %v13864_v22, %v16781_v38  ;;  %v6117_v32 = vmul.f32 %v13864_v22, %v16782_v62 }
 0x610   : > { %v6119_v1 = vmul.f32 %v13864_v22, %v16783_v49  ;;  %v6121_v63 = vmul.f32 %v13864_v22, %v16784_v10  ;;  %v6123_v47 = vmul.f32 %v13864_v22, %v16785_v24  ;;  %v6125_v3 = vmul.f32 %v13864_v22, %v16786_v54 }
 0x611   : > { %v6127_v11 = vmul.f32 %v13864_v22, %v16787_v36  ;;  %v6129_v38 = vmul.f32 %v13864_v22, %v16788_v30  ;;  %v6131_v62 = vmul.f32 %v13864_v22, %v16789_v56  ;;  %v6133_v49 = vmul.f32 %v13864_v22, %v16790_v25 }
 0x612   : > { %v6135_v10 = vmul.f32 %v13864_v22, %v16791_v28  ;;  %v6137_v24 = vmul.f32 %v13864_v22, %v16792_v27  ;;  %v6139_v54 = vmul.f32 %v13864_v22, %v16793_v39  ;;  %v6141_v36 = vmul.f32 %v13864_v22, %v16794_v42 }
 0x613   : > { %v6143_v30 = vmul.f32 %v13864_v22, %v16795_v60  ;;  %v6145_v56 = vmul.f32 %v13864_v22, %v13694_v50  ;;  %v6147_v25 = vmul.f32 %v13864_v22, %v13706_v6  ;;  %v6149_v28 = vmul.f32 %v13864_v22, %v13718_v52 }
 0x614   : > { %v14095_v27 = vmul.f32 %v13961_v14, %v6041_v33  ;;  %v14098_v39 = vmul.f32 %v13961_v14, %v6043_v61  ;;  %v14101_v42 = vmul.f32 %v13961_v14, %v6045_v57  ;;  %v14104_v60 = vmul.f32 %v13961_v14, %v6047_v26 }
 0x615   : > { %v14107_v50 = vmul.f32 %v13961_v14, %v6049_v58  ;;  %v14110_v6 = vmul.f32 %v13961_v14, %v6051_v43  ;;  %v14113_v52 = vmul.f32 %v13961_v14, %v6053_v21  ;;  %v14116_v22 = vmul.f32 %v13961_v14, %v6055_v4 }
 0x616   : > { %v14119_v61 = vmul.f32 %v13961_v14, %v6057_v12  ;;  %v14122_v57 = vmul.f32 %v13961_v14, %v6059_v40  ;;  %v14125_v26 = vmul.f32 %v13961_v14, %v6061_v31  ;;  %v14128_v33 = vmul.f32 %v13961_v14, %v6063_v45 }
 0x617   : > { %v14131_v58 = vmul.f32 %v13961_v14, %v6065_v20  ;;  %v14134_v43 = vmul.f32 %v13961_v14, %v6067_v9  ;;  %v14137_v21 = vmul.f32 %v13961_v14, %v6069_v0  ;;  %v14140_v4 = vmul.f32 %v13961_v14, %v6071_v19 }
 0x618   : > { %v14143_v12 = vmul.f32 %v13961_v14, %v6073_v13  ;;  %v14146_v40 = vmul.f32 %v13961_v14, %v6075_v35  ;;  %v14149_v31 = vmul.f32 %v13961_v14, %v6077_v29  ;;  %v14152_v45 = vmul.f32 %v13961_v14, %v6079_v34 }
 0x619   : > { %v14155_v20 = vmul.f32 %v13961_v14, %v6081_v7  ;;  %v14158_v9 = vmul.f32 %v13961_v14, %v6083_v53  ;;  %v14161_v0 = vmul.f32 %v13961_v14, %v6085_v16  ;;  %v14164_v19 = vmul.f32 %v13961_v14, %v6087_v37 }
 0x61a   : > { %v14167_v13 = vmul.f32 %v13961_v14, %v6089_v46  ;;  %v14170_v35 = vmul.f32 %v13961_v14, %v6091_v23  ;;  %v14173_v29 = vmul.f32 %v13961_v14, %v6093_v15  ;;  %v14176_v34 = vmul.f32 %v13961_v14, %v6095_v17 }
 0x61b   : > { %v14179_v7 = vmul.f32 %v13961_v14, %v6097_v41  ;;  %v14182_v53 = vmul.f32 %v13961_v14, %v6099_v51  ;;  %v14185_v16 = vmul.f32 %v13961_v14, %v6101_v5  ;;  %v14188_v37 = vmul.f32 %v13961_v14, %v6103_v55 }
 0x61c   : > { %v14191_v46 = vmul.f32 %v13961_v14, %v6105_v59  ;;  %v14194_v23 = vmul.f32 %v13961_v14, %v6107_v18  ;;  %v14197_v15 = vmul.f32 %v13961_v14, %v6109_v8  ;;  %v14200_v17 = vmul.f32 %v13961_v14, %v6111_v44 }
 0x61d   : > { %v14203_v41 = vmul.f32 %v13961_v14, %v6113_v48  ;;  %v14206_v51 = vmul.f32 %v13961_v14, %v6115_v2  ;;  %v14209_v5 = vmul.f32 %v13961_v14, %v6117_v32  ;;  %v14212_v55 = vmul.f32 %v13961_v14, %v6119_v1 }
 0x61e   : > { %v14215_v59 = vmul.f32 %v13961_v14, %v6121_v63  ;;  %v14218_v18 = vmul.f32 %v13961_v14, %v6123_v47  ;;  %v14221_v8 = vmul.f32 %v13961_v14, %v6125_v3  ;;  %v14224_v44 = vmul.f32 %v13961_v14, %v6127_v11 }
 0x61f   : > { %v14227_v48 = vmul.f32 %v13961_v14, %v6129_v38  ;;  %v14230_v2 = vmul.f32 %v13961_v14, %v6131_v62  ;;  %v14233_v32 = vmul.f32 %v13961_v14, %v6133_v49  ;;  %v14236_v1 = vmul.f32 %v13961_v14, %v6135_v10  ;;  %v16801_v10 = vld [vmem:[#allocation145_spill] sm:$0xff] }
 0x620   : > { %v14239_v63 = vmul.f32 %v13961_v14, %v6137_v24  ;;  %v14242_v47 = vmul.f32 %v13961_v14, %v6139_v54  ;;  %v14245_v3 = vmul.f32 %v13961_v14, %v6141_v36  ;;  %v14248_v11 = vmul.f32 %v13961_v14, %v6143_v30  ;;  %v16803_v54 = vld [vmem:[#allocation146_spill] sm:$0xff]  ;;  %v16806_v30 = vld [vmem:[#allocation161_spill] sm:$0xff] }
 0x621   : > { %v14251_v38 = vmul.f32 %v13961_v14, %v6145_v56  ;;  %v14254_v62 = vmul.f32 %v13961_v14, %v6147_v25  ;;  %v14257_v49 = vmul.f32 %v13961_v14, %v6149_v28  ;;  %v14261_v24 = vmul.f32 %v13961_v14, %v16801_v10  ;;  %v16809_v25 = vld [vmem:[#allocation147_spill] sm:$0xff]  ;;  %v16811_v28 = vld [vmem:[#allocation106_spill] sm:$0xff]  ;;  %v16813_v10 = vld [vmem:[#allocation148_spill] sm:$0xff] }
 0x622   : > { %16796 = vst [vmem:[#allocation114_spill] sm:$0xff] %v14242_v47  ;;  %16797 = vst [vmem:[#allocation115_spill] sm:$0xff] %v14245_v3  ;;  %v14265_v36 = vmul.f32 %v13961_v14, %v16803_v54  ;;  %v16805_v3 = vld [vmem:[#allocation156_spill] sm:$0xff]  ;;  %v16807_v47 = vld [vmem:[#allocation105_spill] sm:$0xff] }
 0x623   : > { %16798 = vst [vmem:[#allocation116_spill] sm:$0xff] %v14248_v11  ;;  %16799 = vst [vmem:[#allocation117_spill] sm:$0xff] %v14254_v62  ;;  %v6025_v11 = vadd.f32 %v16806_v30, %v16805_v3  ;;  %v14271_v56 = vmul.f32 %v13961_v14, %v16807_v47  ;;  %v14275_v62 = vmul.f32 %v13961_v14, %v16809_v25  ;;  %v16814_v54 = vld [vmem:[#allocation107_spill] sm:$0xff]  ;;  %v16815_v3 = vld [vmem:[#allocation108_spill] sm:$0xff] }
 0x624   : > { %16800 = vst [vmem:[#allocation118_spill] sm:$0xff] %v14257_v49  ;;  %16802 = vst [vmem:[#allocation119_spill] sm:$0xff] %v14261_v24  ;;  %v14279_v49 = vmul.f32 %v13961_v14, %v16811_v28  ;;  %v14283_v24 = vmul.f32 %v13961_v14, %v16813_v10  ;;  %v14291_v47 = vmul.f32 %v13961_v14, %v16815_v3  ;;  %v16816_v30 = vld [vmem:[#allocation109_spill] sm:$0xff]  ;;  %v16818_v28 = vld [vmem:[#allocation160_spill] sm:$0xff] }
 0x625   : > { %16804 = vst [vmem:[#allocation120_spill] sm:$0xff] %v14265_v36  ;;  %16808 = vst [vmem:[#allocation121_spill] sm:$0xff] %v14271_v56  ;;  %v14287_v36 = vmul.f32 %v13961_v14, %v16814_v54  ;;  %v14295_v25 = vmul.f32 %v13961_v14, %v16816_v30  ;;  %v14304_v10 = vadd.f32 %v16818_v28, %v14098_v39 }
 0x626   : > { %16810 = vst [vmem:[#allocation122_spill] sm:$0xff] %v14275_v62  ;;  %16812 = vst [vmem:[#allocation123_spill] sm:$0xff] %v14279_v49  ;;  %v16817_v62 = vld [vmem:[#allocation157_spill] sm:$0xff]  ;;  %v14300_v49 = vadd.f32 %v16818_v28, %v14095_v27  ;;  %v14308_v54 = vadd.f32 %v16818_v28, %v14101_v42  ;;  %v14312_v3 = vadd.f32 %v16818_v28, %v14104_v60 }
 0x627   : > { %v6026_v56 = vadd.f32 %v6025_v11, %v16817_v62  ;;  %16820 = vst [vmem:[#allocation112_spill] sm:$0xff] %v14304_v10  ;;  %v14316_v14 = vadd.f32 %v16818_v28, %v14107_v50  ;;  %v14320_v27 = vadd.f32 %v16818_v28, %v14110_v6  ;;  %v14324_v39 = vadd.f32 %v16818_v28, %v14113_v52  ;;  %v16826_v11 = vld [vmem:[#allocation158_spill] sm:$0xff]  ;;  %v16968_v10 = vld [vmem:[#allocation104_spill] sm:$0xff] }
 0x628   : > { %16819 = vst [vmem:[#allocation124_spill] sm:$0xff] %v14300_v49  ;;  %16821 = vst [vmem:[#allocation113_spill] sm:$0xff] %v14308_v54  ;;  %v14329_v42 = vadd.f32 %v16818_v28, %v14116_v22  ;;  %v14333_v60 = vadd.f32 %v16818_v28, %v14119_v61  ;;  %v14337_v50 = vadd.f32 %v16818_v28, %v14122_v57  ;;  %v16966_v54 = vld [vmem:[#allocation102_spill] sm:$0xff] }
 0x629   : > { %16822 = vst [vmem:[#allocation51_spill] sm:$0xff] %v14312_v3  ;;  %16823 = vst [vmem:[#allocation55_spill] sm:$0xff] %v14316_v14  ;;  %v6027_v62 = vadd.f32 %v6026_v56, %v16826_v11  ;;  %v14341_v6 = vadd.f32 %v16818_v28, %v14125_v26  ;;  %v14345_v52 = vadd.f32 %v16818_v28, %v14128_v33  ;;  %v16834_v56 = vld [vmem:[#allocation159_spill] sm:$0xff]  ;;  %v16962_v14 = vld [vmem:[#allocation100_spill] sm:$0xff] }
 0x62a   : > { %16824 = vst [vmem:[#allocation57_spill] sm:$0xff] %v14320_v27  ;;  %16825 = vst [vmem:[#allocation59_spill] sm:$0xff] %v14324_v39  ;;  %v14349_v22 = vadd.f32 %v16818_v28, %v14131_v58  ;;  %v14353_v61 = vadd.f32 %v16818_v28, %v14134_v43  ;;  %v14358_v57 = vadd.f32 %v16818_v28, %v14137_v21  ;;  %v16960_v39 = vld [vmem:[#allocation98_spill] sm:$0xff]  ;;  %v16961_v27 = vld [vmem:[#allocation143_spill] sm:$0xff] }
 0x62b   : > { %16827 = vst [vmem:[#allocation61_spill] sm:$0xff] %v14329_v42  ;;  %16828 = vst [vmem:[#allocation64_spill] sm:$0xff] %v14333_v60  ;;  %v6028_v30 = vadd.f32 %v6027_v62, %v16834_v56  ;;  %v14362_v26 = vadd.f32 %v16818_v28, %v14140_v4  ;;  %v14366_v33 = vadd.f32 %v16818_v28, %v14143_v12  ;;  %v16958_v60 = vld [vmem:[#allocation96_spill] sm:$0xff]  ;;  %v16959_v42 = vld [vmem:[#allocation142_spill] sm:$0xff] }
 0x62c   : > { %16829 = vst [vmem:[#allocation65_spill] sm:$0xff] %v14337_v50  ;;  %16830 = vst [vmem:[#allocation69_spill] sm:$0xff] %v14341_v6  ;;  %v14370_v58 = vadd.f32 %v16818_v28, %v14146_v40  ;;  %v14374_v43 = vadd.f32 %v16818_v28, %v14149_v31  ;;  %v14378_v21 = vadd.f32 %v16818_v28, %v14152_v45  ;;  %v16956_v6 = vld [vmem:[#allocation94_spill] sm:$0xff]  ;;  %v16957_v50 = vld [vmem:[#allocation141_spill] sm:$0xff] }
 0x62d   : > { %16831 = vst [vmem:[#allocation73_spill] sm:$0xff] %v14345_v52  ;;  %16832 = vst [vmem:[#allocation77_spill] sm:$0xff] %v14349_v22  ;;  %v14382_v4 = vadd.f32 %v16818_v28, %v14155_v20  ;;  %v6029_v11 = vrot.slane %v6028_v30, 4  ;;  %v14386_v12 = vadd.f32 %v16818_v28, %v14158_v9  ;;  %v14390_v40 = vadd.f32 %v16818_v28, %v14161_v0  ;;  %v16954_v22 = vld [vmem:[#allocation92_spill] sm:$0xff]  ;;  %v16970_v49 = vld [vmem:[#allocation110_spill] sm:$0xff] }
 0x62e   : > { %16833 = vst [vmem:[#allocation52_spill] sm:$0xff] %v14353_v61  ;;  %16835 = vst [vmem:[#allocation81_spill] sm:$0xff] %v14358_v57  ;;  %v14394_v31 = vadd.f32 %v16818_v28, %v14164_v19  ;;  %v14398_v45 = vadd.f32 %v16818_v28, %v14167_v13  ;;  %v14402_v20 = vadd.f32 %v16818_v28, %v14170_v35  ;;  %v16952_v57 = vld [vmem:[#allocation90_spill] sm:$0xff]  ;;  %v16953_v61 = vld [vmem:[#allocation139_spill] sm:$0xff] }
 0x62f   : > { %16836 = vst [vmem:[#allocation83_spill] sm:$0xff] %v14362_v26  ;;  %16837 = vst [vmem:[#allocation85_spill] sm:$0xff] %v14366_v33  ;;  %v14406_v9 = vadd.f32 %v16818_v28, %v14173_v29  ;;  %v14410_v0 = vadd.f32 %v16818_v28, %v14176_v34  ;;  %v6030_v62 = vadd.f32 %v6029_v11, %v6028_v30  ;;  %v16950_v33 = vld [vmem:[#allocation88_spill] sm:$0xff]  ;;  %v16951_v26 = vld [vmem:[#allocation138_spill] sm:$0xff] }
 0x630   : > { %16838 = vst [vmem:[#allocation87_spill] sm:$0xff] %v14370_v58  ;;  %16839 = vst [vmem:[#allocation89_spill] sm:$0xff] %v14374_v43  ;;  %v14414_v19 = vadd.f32 %v16818_v28, %v14179_v7  ;;  %v14418_v13 = vadd.f32 %v16818_v28, %v14182_v53  ;;  %v14422_v35 = vadd.f32 %v16818_v28, %v14185_v16  ;;  %v16948_v43 = vld [vmem:[#allocation86_spill] sm:$0xff]  ;;  %v16949_v58 = vld [vmem:[#allocation137_spill] sm:$0xff] }
 0x631   : > { %16840 = vst [vmem:[#allocation91_spill] sm:$0xff] %v14378_v21  ;;  %16841 = vst [vmem:[#allocation93_spill] sm:$0xff] %v14382_v4  ;;  %v14426_v29 = vadd.f32 %v16818_v28, %v14188_v37  ;;  %v14430_v34 = vadd.f32 %v16818_v28, %v14191_v46  ;;  %v14434_v7 = vadd.f32 %v16818_v28, %v14194_v23  ;;  %v6031_v56 = vrot.slane %v6030_v62, 2  ;;  %v16946_v4 = vld [vmem:[#allocation84_spill] sm:$0xff] }
 0x632   : > { %16842 = vst [vmem:[#allocation95_spill] sm:$0xff] %v14386_v12  ;;  %16843 = vst [vmem:[#allocation97_spill] sm:$0xff] %v14390_v40  ;;  %v14438_v53 = vadd.f32 %v16818_v28, %v14197_v15  ;;  %v14442_v16 = vadd.f32 %v16818_v28, %v14200_v17  ;;  %v14446_v37 = vadd.f32 %v16818_v28, %v14203_v41  ;;  %v16944_v40 = vld [vmem:[#allocation82_spill] sm:$0xff]  ;;  %v16945_v12 = vld [vmem:[#allocation135_spill] sm:$0xff] }
 0x633   : > { %16844 = vst [vmem:[#allocation99_spill] sm:$0xff] %v14394_v31  ;;  %16845 = vst [vmem:[#allocation101_spill] sm:$0xff] %v14398_v45  ;;  %v14450_v46 = vadd.f32 %v16818_v28, %v14206_v51  ;;  %v14454_v23 = vadd.f32 %v16818_v28, %v14209_v5  ;;  %v14458_v15 = vadd.f32 %v16818_v28, %v14212_v55  ;;  %v16942_v45 = vld [vmem:[#allocation80_spill] sm:$0xff]  ;;  %v16943_v31 = vld [vmem:[#allocation134_spill] sm:$0xff] }
 0x634   : > { %16846 = vst [vmem:[#allocation103_spill] sm:$0xff] %v14402_v20  ;;  %16847 = vst [vmem:[#allocation127_spill] sm:$0xff] %v14406_v9  ;;  %v14462_v17 = vadd.f32 %v16818_v28, %v14215_v59  ;;  %v14466_v41 = vadd.f32 %v16818_v28, %v14218_v18  ;;  %v6032_v30 = vadd.f32 %v6031_v56, %v6030_v62  ;;  %v16870_v62 = vld [vmem:[#allocation114_spill] sm:$0xff]  ;;  %v16872_v56 = vld [vmem:[#allocation115_spill] sm:$0xff] }
 0x635   : > { %16848 = vst [vmem:[#allocation128_spill] sm:$0xff] %v14410_v0  ;;  %16849 = vst [vmem:[#allocation129_spill] sm:$0xff] %v14414_v19  ;;  %v14470_v51 = vadd.f32 %v16818_v28, %v14221_v8  ;;  %v14474_v5 = vadd.f32 %v16818_v28, %v14224_v44  ;;  %v14478_v55 = vadd.f32 %v16818_v28, %v14227_v48  ;;  %v16938_v19 = vld [vmem:[#allocation72_spill] sm:$0xff]  ;;  %v16939_v0 = vld [vmem:[#allocation74_spill] sm:$0xff] }
 0x636   : > { %16850 = vst [vmem:[#allocation130_spill] sm:$0xff] %v14418_v13  ;;  %16851 = vst [vmem:[#allocation131_spill] sm:$0xff] %v14422_v35  ;;  %v14482_v59 = vadd.f32 %v16818_v28, %v14230_v2  ;;  %v14486_v18 = vadd.f32 %v16818_v28, %v14233_v32  ;;  %v14490_v8 = vadd.f32 %v16818_v28, %v14236_v1  ;;  %v6033_v11 = vrot.slane %v6032_v30, 1  ;;  %v16936_v35 = vld [vmem:[#allocation68_spill] sm:$0xff]  ;;  %v16937_v13 = vld [vmem:[#allocation70_spill] sm:$0xff] }
 0x637   : > { %16852 = vst [vmem:[#allocation132_spill] sm:$0xff] %v14426_v29  ;;  %16853 = vst [vmem:[#allocation133_spill] sm:$0xff] %v14430_v34  ;;  %v14494_v44 = vadd.f32 %v16818_v28, %v14239_v63  ;;  %v14498_v48 = vadd.f32 %v16818_v28, %v16870_v62  ;;  %v14502_v2 = vadd.f32 %v16818_v28, %v16872_v56  ;;  %v16934_v34 = vld [vmem:[#allocation43_spill] sm:$0xff]  ;;  %v16935_v29 = vld [vmem:[#allocation66_spill] sm:$0xff] }
 0x638   : > { %16854 = vst [vmem:[#allocation145_spill] sm:$0xff] %v14434_v7  ;;  %16855 = vst [vmem:[#allocation146_spill] sm:$0xff] %v14438_v53  ;;  %v14510_v1 = vadd.f32 %v16818_v28, %v14251_v38  ;;  %v16932_v53 = vld [vmem:[#allocation63_spill] sm:$0xff]  ;;  %v16933_v7 = vld [vmem:[#allocation50_spill] sm:$0xff] }
 0x639   : > { %16856 = vst [vmem:[#allocation156_spill] sm:$0xff] %v14442_v16  ;;  %16857 = vst [vmem:[#allocation161_spill] sm:$0xff] %v14446_v37  ;;  %v16926_v37 = vld [vmem:[#allocation56_spill] sm:$0xff]  ;;  %v16931_v16 = vld [vmem:[#allocation62_spill] sm:$0xff] }
 0x63a   : > { %16858 = vst [vmem:[#allocation105_spill] sm:$0xff] %v14450_v46  ;;  %16859 = vst [vmem:[#allocation147_spill] sm:$0xff] %v14454_v23  ;;  %v16919_v46 = vld [vmem:[#allocation67_spill] sm:$0xff]  ;;  %v16940_v9 = vld [vmem:[#allocation76_spill] sm:$0xff] }
 0x63b   : > { %16860 = vst [vmem:[#allocation106_spill] sm:$0xff] %v14458_v15  ;;  %16861 = vst [vmem:[#allocation148_spill] sm:$0xff] %v14462_v17  ;;  %v16925_v17 = vld [vmem:[#allocation48_spill] sm:$0xff]  ;;  %v16941_v20 = vld [vmem:[#allocation78_spill] sm:$0xff] }
 0x63c   : > { %16862 = vst [vmem:[#allocation107_spill] sm:$0xff] %v14466_v41  ;;  %16863 = vst [vmem:[#allocation108_spill] sm:$0xff] %v14470_v51  ;;  %v16923_v51 = vld [vmem:[#allocation79_spill] sm:$0xff]  ;;  %v16924_v41 = vld [vmem:[#allocation54_spill] sm:$0xff] }
 0x63d   : > { %16864 = vst [vmem:[#allocation109_spill] sm:$0xff] %v14474_v5  ;;  %16865 = vst [vmem:[#allocation157_spill] sm:$0xff] %v14478_v55  ;;  %v16929_v55 = vld [vmem:[#allocation49_spill] sm:$0xff]  ;;  %v16930_v5 = vld [vmem:[#allocation60_spill] sm:$0xff] }
 0x63e   : > { %16866 = vst [vmem:[#allocation160_spill] sm:$0xff] %v14482_v59  ;;  %16867 = vst [vmem:[#allocation158_spill] sm:$0xff] %v14486_v18  ;;  %v16874_v59 = vld [vmem:[#allocation116_spill] sm:$0xff] }
 0x63f   : > { %16868 = vst [vmem:[#allocation159_spill] sm:$0xff] %v14490_v8  ;;  %16869 = vst [vmem:[#allocation163_spill] sm:$0xff] %v14494_v44  ;;  %v14506_v32 = vadd.f32 %v16818_v28, %v16874_v59  ;;  %v16877_v8 = vld [vmem:[#allocation117_spill] sm:$0xff]  ;;  %v16879_v44 = vld [vmem:[#allocation118_spill] sm:$0xff] }
 0x640   : > { %16871 = vst [vmem:[#allocation114_spill] sm:$0xff] %v14498_v48  ;;  %16873 = vst [vmem:[#allocation115_spill] sm:$0xff] %v14502_v2  ;;  %v14514_v63 = vadd.f32 %v16818_v28, %v16877_v8  ;;  %v14518_v62 = vadd.f32 %v16818_v28, %v16879_v44  ;;  %v16881_v48 = vld [vmem:[#allocation119_spill] sm:$0xff]  ;;  %v6034_v2 = vadd.f32 %v6033_v11, %v6032_v30  ;;  %v16883_v18 = vld [vmem:[#allocation120_spill] sm:$0xff] }
 0x641   : > { %16875 = vst [vmem:[#allocation116_spill] sm:$0xff] %v14506_v32  ;;  %16876 = vst [vmem:[#allocation164_spill] sm:$0xff] %v14510_v1  ;;  %v14522_v56 = vadd.f32 %v16818_v28, %v16881_v48  ;;  %v14526_v59 = vadd.f32 %v16818_v28, %v16883_v18  ;;  %v16885_v32 = vld [vmem:[#allocation121_spill] sm:$0xff]  ;;  %v16887_v1 = vld [vmem:[#allocation122_spill] sm:$0xff]  ;;  %v14542_v48 = vadd.f32 %v16818_v28, %v14283_v24 }
 0x642   : > { %16878 = vst [vmem:[#allocation117_spill] sm:$0xff] %v14514_v63  ;;  %16880 = vst [vmem:[#allocation118_spill] sm:$0xff] %v14518_v62  ;;  %v14530_v38 = vadd.f32 %v16818_v28, %v16885_v32  ;;  %v14534_v8 = vadd.f32 %v16818_v28, %v16887_v1  ;;  %v16889_v63 = vld [vmem:[#allocation123_spill] sm:$0xff]  ;;  %v14546_v30 = vadd.f32 %v16818_v28, %v14287_v36  ;;  %v6036_v11 = vmul.f32 0.001953125, %v6034_v2  ;;  %v16907_v62 = vld [vmem:[#allocation38_spill] sm:$0xff] }
 0x643   : > { %16882 = vst [vmem:[#allocation119_spill] sm:$0xff] %v14522_v56  ;;  %16884 = vst [vmem:[#allocation120_spill] sm:$0xff] %v14526_v59  ;;  %v14538_v44 = vadd.f32 %v16818_v28, %v16889_v63  ;;  %v14550_v18 = vadd.f32 %v16818_v28, %v14291_v47  ;;  %v14554_v32 = vadd.f32 %v16818_v28, %v14295_v25  ;;  %v16910_v47 = vld [vmem:[#allocation125_spill] sm:$0xff]  ;;  %v16911_v25 = vld [vmem:[#allocation126_spill] sm:$0xff] }
 0x644   : > { %16886 = vst [vmem:[#allocation121_spill] sm:$0xff] %v14530_v38  ;;  %16888 = vst [vmem:[#allocation122_spill] sm:$0xff] %v14534_v8  ;;  %v16912_v1 = vld [vmem:[#allocation37_spill] sm:$0xff]  ;;  %v16920_v8 = vld [vmem:[#allocation71_spill] sm:$0xff] }
 0x645   : > { %16890 = vst [vmem:[#allocation123_spill] sm:$0xff] %v14538_v44  ;;  %16891 = vst [vmem:[#allocation165_spill] sm:$0xff] %v14542_v48  ;;  %v6038_v44 = vadd.f32 1e-05, %v6036_v11  ;;  %v16908_v11 = vld [vmem:[#allocation155_spill] sm:$0xff]  ;;  %v16918_v63 = vld [vmem:[#allocation45_spill] sm:$0xff] }
 0x646   : > { %16892 = vst [vmem:[#allocation166_spill] sm:$0xff] %v14546_v30  ;;  %16893 = vst [vmem:[#allocation167_spill] sm:$0xff] %v14550_v18  ;;  %v14624_v56 = vrot.slane %v16908_v11, %v16907_v62  ;;  %v16914_v30 = vld [vmem:[#allocation41_spill] sm:$0xff]  ;;  %v16915_v11 = vld [vmem:[#allocation44_spill] sm:$0xff] }
 0x647   : > { %16894 = vst [vmem:[#allocation168_spill] sm:$0xff] %v14554_v32  ;;  %9619 = vrsqrt.f32 %v6038_v44  ;;  %v16913_v44 = vld [vmem:[#allocation53_spill] sm:$0xff]  ;;  %v16916_v32 = vld [vmem:[#allocation46_spill] sm:$0xff]  ;;  %v16917_v18 = vld [vmem:[#allocation47_spill] sm:$0xff] }
 0x648   : > { %16909 = vst [vmem:[#allocation155_spill] sm:$0xff] %v14624_v56  ;;  %v16921_v38 = vld [vmem:[#allocation75_spill] sm:$0xff]  ;;  %v16922_v59 = vld [vmem:[#allocation36_spill] sm:$0xff]  ;;  %v16928_v24 = vld [vmem:[#allocation58_spill] sm:$0xff] }
 0x649   : > { %v16927_v48 = vld [vmem:[#allocation39_spill] sm:$0xff]  ;;  %v16947_v21 = vld [vmem:[#allocation136_spill] sm:$0xff] }
 0x64a   : > { %v16955_v52 = vld [vmem:[#allocation140_spill] sm:$0xff]  ;;  %v16972_v56 = vld [vmem:[#allocation111_spill] sm:$0xff] }
 0x64b   : > { %v16964_v3 = vld [vmem:[#allocation144_spill] sm:$0xff] }
 0x654   : > { %v14617_v15 = vpop.eup %9619 }
 0x655   : > { %v14628_v2 = vmul.f32 %v14617_v15, %v16910_v47  ;;  %v14632_v28 = vmul.f32 %v14617_v15, %v16911_v25  ;;  %v14636_v23 = vmul.f32 %v14617_v15, %v16912_v1  ;;  %v14640_v36 = vmul.f32 %v14617_v15, %v16913_v44 }
 0x656   : > { %v14644_v62 = vmul.f32 %v14617_v15, %v16914_v30  ;;  %v14648_v47 = vmul.f32 %v14617_v15, %v16915_v11  ;;  %v14652_v25 = vmul.f32 %v14617_v15, %v16916_v32  ;;  %v14656_v1 = vmul.f32 %v14617_v15, %v16917_v18 }
 0x657   : > { %v14660_v44 = vmul.f32 %v14617_v15, %v16918_v63  ;;  %v14664_v30 = vmul.f32 %v14617_v15, %v16919_v46  ;;  %v14668_v11 = vmul.f32 %v14617_v15, %v16920_v8  ;;  %v14672_v32 = vmul.f32 %v14617_v15, %v16921_v38 }
 0x658   : > { %v14676_v18 = vmul.f32 %v14617_v15, %v16922_v59  ;;  %v14680_v63 = vmul.f32 %v14617_v15, %v16923_v51  ;;  %v14684_v46 = vmul.f32 %v14617_v15, %v16924_v41  ;;  %v14688_v8 = vmul.f32 %v14617_v15, %v16925_v17 }
 0x659   : > { %v14692_v38 = vmul.f32 %v14617_v15, %v16926_v37  ;;  %v14696_v59 = vmul.f32 %v14617_v15, %v16927_v48  ;;  %v14700_v51 = vmul.f32 %v14617_v15, %v16928_v24  ;;  %v14704_v41 = vmul.f32 %v14617_v15, %v16929_v55 }
 0x65a   : > { %v14708_v17 = vmul.f32 %v14617_v15, %v16930_v5  ;;  %v14712_v37 = vmul.f32 %v14617_v15, %v16931_v16  ;;  %v14716_v48 = vmul.f32 %v14617_v15, %v16932_v53  ;;  %v14720_v24 = vmul.f32 %v14617_v15, %v16933_v7 }
 0x65b   : > { %v14724_v55 = vmul.f32 %v14617_v15, %v16934_v34  ;;  %v14728_v5 = vmul.f32 %v14617_v15, %v16935_v29  ;;  %v14732_v16 = vmul.f32 %v14617_v15, %v16936_v35  ;;  %v14736_v53 = vmul.f32 %v14617_v15, %v16937_v13 }
 0x65c   : > { %v14740_v7 = vmul.f32 %v14617_v15, %v16938_v19  ;;  %v14744_v34 = vmul.f32 %v14617_v15, %v16939_v0  ;;  %v14748_v29 = vmul.f32 %v14617_v15, %v16940_v9  ;;  %v14752_v35 = vmul.f32 %v14617_v15, %v16941_v20 }
 0x65d   : > { %v14756_v13 = vmul.f32 %v14617_v15, %v16942_v45  ;;  %v14760_v19 = vmul.f32 %v14617_v15, %v16943_v31  ;;  %v14764_v0 = vmul.f32 %v14617_v15, %v16944_v40  ;;  %v14768_v9 = vmul.f32 %v14617_v15, %v16945_v12 }
 0x65e   : > { %v14772_v20 = vmul.f32 %v14617_v15, %v16946_v4  ;;  %v14776_v45 = vmul.f32 %v14617_v15, %v16947_v21  ;;  %v14780_v31 = vmul.f32 %v14617_v15, %v16948_v43  ;;  %v14784_v40 = vmul.f32 %v14617_v15, %v16949_v58 }
 0x65f   : > { %v14788_v12 = vmul.f32 %v14617_v15, %v16950_v33  ;;  %v14792_v4 = vmul.f32 %v14617_v15, %v16951_v26  ;;  %v14796_v21 = vmul.f32 %v14617_v15, %v16952_v57  ;;  %v14800_v43 = vmul.f32 %v14617_v15, %v16953_v61 }
 0x660   : > { %v14804_v58 = vmul.f32 %v14617_v15, %v16954_v22  ;;  %v14808_v33 = vmul.f32 %v14617_v15, %v16955_v52  ;;  %v14812_v26 = vmul.f32 %v14617_v15, %v16956_v6  ;;  %v14816_v57 = vmul.f32 %v14617_v15, %v16957_v50 }
 0x661   : > { %v14820_v61 = vmul.f32 %v14617_v15, %v16958_v60  ;;  %v14824_v22 = vmul.f32 %v14617_v15, %v16959_v42  ;;  %v14828_v52 = vmul.f32 %v14617_v15, %v16960_v39  ;;  %v14832_v6 = vmul.f32 %v14617_v15, %v16961_v27 }
 0x662   : > { %v14836_v50 = vmul.f32 %v14617_v15, %v16962_v14  ;;  %v14840_v60 = vmul.f32 %v14617_v15, %v16964_v3  ;;  %v14844_v42 = vmul.f32 %v14617_v15, %v16966_v54  ;;  %v14848_v39 = vmul.f32 %v14617_v15, %v16968_v10 }
 0x663   : > { %v14852_v27 = vmul.f32 %v14617_v15, %v16970_v49  ;;  %v14856_v14 = vmul.f32 %v14617_v15, %v16972_v56 }
 0x664   : > { %16963 = vst [vmem:[#allocation125_spill] sm:$0xff] %v14836_v50  ;;  %16965 = vst [vmem:[#allocation126_spill] sm:$0xff] %v14840_v60  ;;  %v16974_v50 = vld [vmem:[#allocation149_spill] sm:$0xff]  ;;  %v16976_v60 = vld [vmem:[#allocation150_spill] sm:$0xff] }
 0x665   : > { %16967 = vst [vmem:[#allocation37_spill] sm:$0xff] %v14844_v42  ;;  %16969 = vst [vmem:[#allocation53_spill] sm:$0xff] %v14848_v39  ;;  %v14860_v3 = vmul.f32 %v14617_v15, %v16974_v50  ;;  %v14864_v54 = vmul.f32 %v14617_v15, %v16976_v60  ;;  %v16977_v42 = vld [vmem:[#allocation151_spill] sm:$0xff]  ;;  %v16978_v39 = vld [vmem:[#allocation152_spill] sm:$0xff] }
 0x666   : > { %16971 = vst [vmem:[#allocation41_spill] sm:$0xff] %v14852_v27  ;;  %16973 = vst [vmem:[#allocation44_spill] sm:$0xff] %v14856_v14  ;;  %v14868_v10 = vmul.f32 %v14617_v15, %v16977_v42  ;;  %v14872_v49 = vmul.f32 %v14617_v15, %v16978_v39  ;;  %v16979_v27 = vld [vmem:[#allocation153_spill] sm:$0xff]  ;;  %v16980_v14 = vld [vmem:[#allocation154_spill] sm:$0xff] }
 0x667   : > { %16975 = vst [vmem:[#allocation46_spill] sm:$0xff] %v14860_v3  ;;  %v14876_v56 = vmul.f32 %v14617_v15, %v16979_v27  ;;  %v14880_v50 = vmul.f32 %v14617_v15, %v16980_v14  ;;  %v16981_v3 = vld [vmem:[#allocation162_spill] sm:$0xff] }
 0x668   : > { %v14884_v60 = vmul.f32 %v16981_v3, %v14628_v2  ;;  %v14888_v42 = vmul.f32 %v16981_v3, %v14632_v28  ;;  %v14892_v39 = vmul.f32 %v16981_v3, %v14636_v23  ;;  %v14896_v27 = vmul.f32 %v16981_v3, %v14640_v36 }
 0x669   : > { %v14900_v15 = vmul.f32 %v16981_v3, %v14644_v62  ;;  %v14904_v2 = vmul.f32 %v16981_v3, %v14648_v47  ;;  %v14908_v28 = vmul.f32 %v16981_v3, %v14652_v25  ;;  %v14912_v23 = vmul.f32 %v16981_v3, %v14656_v1 }
 0x66a   : > { %v14916_v36 = vmul.f32 %v16981_v3, %v14660_v44  ;;  %v14920_v62 = vmul.f32 %v16981_v3, %v14664_v30  ;;  %v14924_v47 = vmul.f32 %v16981_v3, %v14668_v11  ;;  %v14928_v25 = vmul.f32 %v16981_v3, %v14672_v32 }
 0x66b   : > { %v14932_v1 = vmul.f32 %v16981_v3, %v14676_v18  ;;  %v14936_v44 = vmul.f32 %v16981_v3, %v14680_v63  ;;  %v14940_v30 = vmul.f32 %v16981_v3, %v14684_v46  ;;  %v14944_v11 = vmul.f32 %v16981_v3, %v14688_v8  ;;  %v16987_v14 = vld [vmem:[#allocation125_spill] sm:$0xff] }
 0x66c   : > { %v14948_v32 = vmul.f32 %v16981_v3, %v14692_v38  ;;  %v14952_v18 = vmul.f32 %v16981_v3, %v14696_v59  ;;  %v14956_v63 = vmul.f32 %v16981_v3, %v14700_v51  ;;  %v14960_v46 = vmul.f32 %v16981_v3, %v14704_v41 }
 0x66d   : > { %v14964_v8 = vmul.f32 %v16981_v3, %v14708_v17  ;;  %v14968_v38 = vmul.f32 %v16981_v3, %v14712_v37  ;;  %v14972_v59 = vmul.f32 %v16981_v3, %v14716_v48  ;;  %v14976_v51 = vmul.f32 %v16981_v3, %v14720_v24 }
 0x66e   : > { %v14980_v41 = vmul.f32 %v16981_v3, %v14724_v55  ;;  %v14984_v17 = vmul.f32 %v16981_v3, %v14728_v5  ;;  %v14988_v37 = vmul.f32 %v16981_v3, %v14732_v16  ;;  %v14992_v48 = vmul.f32 %v16981_v3, %v14736_v53 }
 0x66f   : > { %v14996_v24 = vmul.f32 %v16981_v3, %v14740_v7  ;;  %v15000_v55 = vmul.f32 %v16981_v3, %v14744_v34  ;;  %v15004_v5 = vmul.f32 %v16981_v3, %v14748_v29  ;;  %v15008_v16 = vmul.f32 %v16981_v3, %v14752_v35 }
 0x670   : > { %v15012_v53 = vmul.f32 %v16981_v3, %v14756_v13  ;;  %v15016_v7 = vmul.f32 %v16981_v3, %v14760_v19  ;;  %v15020_v34 = vmul.f32 %v16981_v3, %v14764_v0  ;;  %v15024_v29 = vmul.f32 %v16981_v3, %v14768_v9 }
 0x671   : > { %v15028_v35 = vmul.f32 %v16981_v3, %v14772_v20  ;;  %v15032_v13 = vmul.f32 %v16981_v3, %v14776_v45  ;;  %v15036_v19 = vmul.f32 %v16981_v3, %v14780_v31  ;;  %v15040_v0 = vmul.f32 %v16981_v3, %v14784_v40 }
 0x672   : > { %v15044_v9 = vmul.f32 %v16981_v3, %v14788_v12  ;;  %v15048_v20 = vmul.f32 %v16981_v3, %v14792_v4  ;;  %v15052_v45 = vmul.f32 %v16981_v3, %v14796_v21  ;;  %v15056_v31 = vmul.f32 %v16981_v3, %v14800_v43 }
 0x673   : > { %v15060_v40 = vmul.f32 %v16981_v3, %v14804_v58  ;;  %v15064_v12 = vmul.f32 %v16981_v3, %v14808_v33  ;;  %v15068_v4 = vmul.f32 %v16981_v3, %v14812_v26  ;;  %v15072_v21 = vmul.f32 %v16981_v3, %v14816_v57 }
 0x674   : > { %v15076_v43 = vmul.f32 %v16981_v3, %v14820_v61  ;;  %v15080_v58 = vmul.f32 %v16981_v3, %v14824_v22  ;;  %v15084_v33 = vmul.f32 %v16981_v3, %v14828_v52  ;;  %v15088_v26 = vmul.f32 %v16981_v3, %v14832_v6 }
 0x675   : > { %16982 = vst [vmem:[#allocation47_spill] sm:$0xff] %v15072_v21  ;;  %v15092_v57 = vmul.f32 %v16981_v3, %v16987_v14  ;;  %v16989_v21 = vld [vmem:[#allocation126_spill] sm:$0xff] }
 0x676   : > { %16983 = vst [vmem:[#allocation45_spill] sm:$0xff] %v15076_v43  ;;  %16984 = vst [vmem:[#allocation67_spill] sm:$0xff] %v15080_v58  ;;  %v15096_v61 = vmul.f32 %v16981_v3, %v16989_v21  ;;  %v16990_v43 = vld [vmem:[#allocation37_spill] sm:$0xff] }
 0x677   : > { %16985 = vst [vmem:[#allocation71_spill] sm:$0xff] %v15084_v33  ;;  %16986 = vst [vmem:[#allocation75_spill] sm:$0xff] %v15088_v26  ;;  %v15100_v22 = vmul.f32 %v16981_v3, %v16990_v43  ;;  %v16991_v58 = vld [vmem:[#allocation53_spill] sm:$0xff]  ;;  %v16993_v26 = vld [vmem:[#allocation44_spill] sm:$0xff]  ;;  %v15120_v43 = vmul.f32 %v16981_v3, %v14864_v54 }
 0x678   : > { %16988 = vst [vmem:[#allocation36_spill] sm:$0xff] %v15092_v57  ;;  %v15104_v52 = vmul.f32 %v16981_v3, %v16991_v58  ;;  %v16992_v33 = vld [vmem:[#allocation41_spill] sm:$0xff]  ;;  %v15112_v14 = vmul.f32 %v16981_v3, %v16993_v26  ;;  %v16994_v57 = vld [vmem:[#allocation46_spill] sm:$0xff]  ;;  %v15124_v58 = vmul.f32 %v16981_v3, %v14868_v10  ;;  %v15132_v26 = vmul.f32 %v16981_v3, %v14876_v56 }
 0x679   : > { %v15108_v6 = vmul.f32 %v16981_v3, %v16992_v33  ;;  %v15116_v21 = vmul.f32 %v16981_v3, %v16994_v57  ;;  %v15128_v33 = vmul.f32 %v16981_v3, %v14872_v49  ;;  %v15136_v57 = vmul.f32 %v16981_v3, %v14880_v50 }
 0x67b   : > { %16995 = vst [vmem:[#allocation79_spill] sm:$0xff] %v15116_v21  ;;  %v16996_v21 = vld [vmem:[#allocation155_spill] sm:$0xff] }
 0x67c   : > { %v15140_v54 = vadd.f32 %v16996_v21, %v14884_v60  ;;  %v15144_v10 = vadd.f32 %v16996_v21, %v14888_v42  ;;  %v15148_v49 = vadd.f32 %v16996_v21, %v14892_v39  ;;  %v15152_v56 = vadd.f32 %v16996_v21, %v14896_v27 }
 0x67d   : > { %v15156_v3 = vadd.f32 %v16996_v21, %v14900_v15  ;;  %v15160_v50 = vadd.f32 %v16996_v21, %v14904_v2  ;;  %v15164_v60 = vadd.f32 %v16996_v21, %v14908_v28  ;;  %v15168_v42 = vadd.f32 %v16996_v21, %v14912_v23 }
 0x67e   : > { %v15172_v39 = vadd.f32 %v16996_v21, %v14916_v36  ;;  %v15176_v27 = vadd.f32 %v16996_v21, %v14920_v62  ;;  %v15180_v15 = vadd.f32 %v16996_v21, %v14924_v47  ;;  %v15184_v2 = vadd.f32 %v16996_v21, %v14928_v25 }
 0x67f   : > { %v15188_v28 = vadd.f32 %v16996_v21, %v14932_v1  ;;  %v15192_v23 = vadd.f32 %v16996_v21, %v14936_v44  ;;  %v15196_v36 = vadd.f32 %v16996_v21, %v14940_v30  ;;  %v15200_v62 = vadd.f32 %v16996_v21, %v14944_v11 }
 0x680   : > { %v15204_v47 = vadd.f32 %v16996_v21, %v14948_v32  ;;  %v15208_v25 = vadd.f32 %v16996_v21, %v14952_v18  ;;  %v15212_v1 = vadd.f32 %v16996_v21, %v14956_v63  ;;  %v15216_v44 = vadd.f32 %v16996_v21, %v14960_v46 }
 0x681   : > { %v15220_v30 = vadd.f32 %v16996_v21, %v14964_v8  ;;  %v15224_v11 = vadd.f32 %v16996_v21, %v14968_v38  ;;  %v15228_v32 = vadd.f32 %v16996_v21, %v14972_v59  ;;  %v15232_v18 = vadd.f32 %v16996_v21, %v14976_v51 }
 0x682   : > { %v15236_v63 = vadd.f32 %v16996_v21, %v14980_v41  ;;  %v15240_v46 = vadd.f32 %v16996_v21, %v14984_v17  ;;  %v15244_v8 = vadd.f32 %v16996_v21, %v14988_v37  ;;  %v15248_v38 = vadd.f32 %v16996_v21, %v14992_v48 }
 0x683   : > { %v15252_v59 = vadd.f32 %v16996_v21, %v14996_v24  ;;  %v15256_v51 = vadd.f32 %v16996_v21, %v15000_v55  ;;  %v15260_v41 = vadd.f32 %v16996_v21, %v15004_v5  ;;  %v15264_v17 = vadd.f32 %v16996_v21, %v15008_v16 }
 0x684   : > { %v15268_v37 = vadd.f32 %v16996_v21, %v15012_v53  ;;  %v15272_v48 = vadd.f32 %v16996_v21, %v15016_v7  ;;  %v15276_v24 = vadd.f32 %v16996_v21, %v15020_v34  ;;  %v15280_v55 = vadd.f32 %v16996_v21, %v15024_v29 }
 0x685   : > { %v15284_v5 = vadd.f32 %v16996_v21, %v15028_v35  ;;  %v15288_v16 = vadd.f32 %v16996_v21, %v15032_v13  ;;  %v15292_v53 = vadd.f32 %v16996_v21, %v15036_v19  ;;  %v15296_v7 = vadd.f32 %v16996_v21, %v15040_v0 }
 0x686   : > { %16997 = vst [vmem:[#allocation54_spill] sm:$0xff] %v15268_v37  ;;  %16998 = vst [vmem:[#allocation48_spill] sm:$0xff] %v15272_v48  ;;  %v15300_v34 = vadd.f32 %v16996_v21, %v15044_v9  ;;  %v15304_v29 = vadd.f32 %v16996_v21, %v15048_v20  ;;  %v15308_v35 = vadd.f32 %v16996_v21, %v15052_v45  ;;  %v17007_v20 = vld [vmem:[#allocation47_spill] sm:$0xff] }
 0x687   : > { %16999 = vst [vmem:[#allocation56_spill] sm:$0xff] %v15276_v24  ;;  %17000 = vst [vmem:[#allocation39_spill] sm:$0xff] %v15280_v55  ;;  %v15312_v13 = vadd.f32 %v16996_v21, %v15056_v31  ;;  %v15316_v19 = vadd.f32 %v16996_v21, %v15060_v40  ;;  %v15320_v0 = vadd.f32 %v16996_v21, %v15064_v12 }
 0x688   : > { %17001 = vst [vmem:[#allocation58_spill] sm:$0xff] %v15304_v29  ;;  %17002 = vst [vmem:[#allocation49_spill] sm:$0xff] %v15308_v35  ;;  %v15324_v9 = vadd.f32 %v16996_v21, %v15068_v4  ;;  %v15328_v45 = vadd.f32 %v16996_v21, %v17007_v20  ;;  %v17009_v35 = vld [vmem:[#allocation45_spill] sm:$0xff] }
 0x689   : > { %17003 = vst [vmem:[#allocation60_spill] sm:$0xff] %v15312_v13  ;;  %17004 = vst [vmem:[#allocation62_spill] sm:$0xff] %v15316_v19  ;;  %v15332_v31 = vadd.f32 %v16996_v21, %v17009_v35  ;;  %v17011_v13 = vld [vmem:[#allocation67_spill] sm:$0xff]  ;;  %v15352_v35 = vadd.f32 %v16996_v21, %v15096_v61 }
 0x68a   : > { %17005 = vst [vmem:[#allocation63_spill] sm:$0xff] %v15320_v0  ;;  %17006 = vst [vmem:[#allocation50_spill] sm:$0xff] %v15324_v9  ;;  %v15336_v40 = vadd.f32 %v16996_v21, %v17011_v13  ;;  %v17013_v19 = vld [vmem:[#allocation71_spill] sm:$0xff]  ;;  %v17017_v9 = vld [vmem:[#allocation36_spill] sm:$0xff]  ;;  %v15356_v13 = vadd.f32 %v16996_v21, %v15100_v22  ;;  %v15376_v22 = vadd.f32 %v16996_v21, %v15120_v43 }
 0x68b   : > { %17008 = vst [vmem:[#allocation43_spill] sm:$0xff] %v15328_v45  ;;  %17010 = vst [vmem:[#allocation66_spill] sm:$0xff] %v15332_v31  ;;  %v15340_v12 = vadd.f32 %v16996_v21, %v17013_v19  ;;  %v17015_v0 = vld [vmem:[#allocation75_spill] sm:$0xff]  ;;  %v15348_v20 = vadd.f32 %v16996_v21, %v17017_v9  ;;  %v15360_v19 = vadd.f32 %v16996_v21, %v15104_v52  ;;  %v17046_v45 = vld [vmem:[#allocation113_spill] sm:$0xff] }
 0x68c   : > { %17012 = vst [vmem:[#allocation68_spill] sm:$0xff] %v15336_v40  ;;  %v15344_v4 = vadd.f32 %v16996_v21, %v17015_v0  ;;  %17019 = vst [vmem:[#allocation76_spill] sm:$0xff] %v15352_v35  ;;  %v15364_v0 = vadd.f32 %v16996_v21, %v15108_v6  ;;  %v15368_v9 = vadd.f32 %v16996_v21, %v15112_v14  ;;  %v17036_v31 = vmov %v15376_v22  ;;  %v17040_v35 = vld [vmem:[#allocation124_spill] sm:$0xff]  ;;  %v17049_v43 = vld [vmem:[#allocation51_spill] sm:$0xff] }
 0x68d   : > { %17014 = vst [vmem:[#allocation70_spill] sm:$0xff] %v15340_v12  ;;  %17018 = vst [vmem:[#allocation74_spill] sm:$0xff] %v15348_v20  ;;  %v17022_v20 = vld [vmem:[#allocation79_spill] sm:$0xff]  ;;  %v15380_v52 = vadd.f32 %v16996_v21, %v15124_v58  ;;  %v15384_v6 = vadd.f32 %v16996_v21, %v15128_v33  ;;  %v15388_v14 = vadd.f32 %v16996_v21, %v15132_v26  ;;  %v17042_v33 = vmax.f32 %v15140_v54, 0.0 }
 0x68e   : > { %17016 = vst [vmem:[#allocation72_spill] sm:$0xff] %v15344_v4  ;;  %17020 = vst [vmem:[#allocation78_spill] sm:$0xff] %v15360_v19  ;;  %v15372_v61 = vadd.f32 %v16996_v21, %v17022_v20  ;;  %v15392_v20 = vadd.f32 %v16996_v21, %v15136_v57  ;;  %v17045_v26 = vmax.f32 %v15144_v10, 0.0  ;;  %v17047_v21 = vmax.f32 %v17046_v45, 0.0 }
 0x68f   : > { %17021 = vst [vmem:[#allocation80_spill] sm:$0xff] %v15364_v0  ;;  %17024 = vst [vmem:[#allocation82_spill] sm:$0xff] %v15376_v22  ;;  %v17039_v4 = vmov %v15388_v14  ;;  %v17048_v57 = vmax.f32 %v15148_v49, 0.0  ;;  %v17050_v12 = vmax.f32 %v17049_v43, 0.0  ;;  %v17051_v22 = vmax.f32 %v15152_v56, 0.0 }
 0x690   : > { %17023 = vst [vmem:[#allocation134_spill] sm:$0xff] %v15372_v61  ;;  %17025 = vst [vmem:[#allocation135_spill] sm:$0xff] %v15380_v52  ;;  %v17029_v61 = vld [vmem:[#allocation49_spill] sm:$0xff]  ;;  %v17030_v37 = vld [vmem:[#allocation60_spill] sm:$0xff]  ;;  %v17041_v52 = vmax.f32 %v17040_v35, 0.0  ;;  %v17054_v54 = vmax.f32 %v15156_v3, 0.0 }
 0x691   : > { %17026 = vst [vmem:[#allocation84_spill] sm:$0xff] %v15384_v6  ;;  %17027 = vst [vmem:[#allocation136_spill] sm:$0xff] %v15388_v14  ;;  %v17031_v48 = vld [vmem:[#allocation62_spill] sm:$0xff]  ;;  %v17032_v24 = vld [vmem:[#allocation63_spill] sm:$0xff]  ;;  %v8861_v40 = vpack.c.bf16 %v17048_v57, %v17047_v21  ;;  %v8862_v58 = vpack.c.bf16 %v17051_v22, %v17050_v12  ;;  %v17057_v10 = vmax.f32 %v15160_v50, 0.0  ;;  %v17060_v49 = vmax.f32 %v15164_v60, 0.0 }
 0x692   : > { %17028 = vst [vmem:[#allocation86_spill] sm:$0xff] %v15392_v20  ;;  %v17033_v55 = vld [vmem:[#allocation50_spill] sm:$0xff]  ;;  %v8859_v19 = vpack.c.bf16 %v17042_v33, %v17041_v52  ;;  %v17043_v6 = vld [vmem:[#allocation112_spill] sm:$0xff]  ;;  %v17052_v20 = vld [vmem:[#allocation55_spill] sm:$0xff]  ;;  %v17063_v56 = vmax.f32 %v15168_v42, 0.0  ;;  %v17066_v3 = vmax.f32 %v15172_v39, 0.0 }
 0x693   : > { %v17044_v0 = vmax.f32 %v17043_v6, 0.0  ;;  %v17053_v35 = vmax.f32 %v17052_v20, 0.0  ;;  %v17055_v33 = vld [vmem:[#allocation57_spill] sm:$0xff]  ;;  %v17064_v22 = vld [vmem:[#allocation64_spill] sm:$0xff]  ;;  %v17069_v50 = vmax.f32 %v15176_v27, 0.0  ;;  %v17072_v60 = vmax.f32 %v15180_v15, 0.0 }
 0x694   : > { %v17034_v29 = vld [vmem:[#allocation74_spill] sm:$0xff]  ;;  %v17056_v6 = vmax.f32 %v17055_v33, 0.0  ;;  %v17061_v57 = vld [vmem:[#allocation61_spill] sm:$0xff]  ;;  %v17065_v20 = vmax.f32 %v17064_v22, 0.0  ;;  %v17075_v42 = vmax.f32 %v15184_v2, 0.0  ;;  %6959 = vst [vmem:[#allocation2 + $0xb0] sm:$0xff] %v8859_v19 }
 0x695   : > { %v8860_v14 = vpack.c.bf16 %v17045_v26, %v17044_v0  ;;  %v8863_v52 = vpack.c.bf16 %v17054_v54, %v17053_v35  ;;  %v17058_v26 = vld [vmem:[#allocation59_spill] sm:$0xff]  ;;  %v17062_v43 = vmax.f32 %v17061_v57, 0.0  ;;  %v17067_v54 = vld [vmem:[#allocation65_spill] sm:$0xff]  ;;  %6961 = vst [vmem:[#allocation2 + $0xd8] sm:$0xff] %v8861_v40  ;;  %6962 = vst [vmem:[#allocation2 + $0x18] sm:$0xff] %v8862_v58  ;;  %v17078_v22 = vmax.f32 %v15188_v28, 0.0 }
 0x696   : > { %v8864_v0 = vpack.c.bf16 %v17057_v10, %v17056_v6  ;;  %v17059_v45 = vmax.f32 %v17058_v26, 0.0  ;;  %v8867_v35 = vpack.c.bf16 %v17066_v3, %v17065_v20  ;;  %v17068_v33 = vmax.f32 %v17067_v54, 0.0  ;;  %v17070_v10 = vld [vmem:[#allocation69_spill] sm:$0xff]  ;;  %v17079_v20 = vld [vmem:[#allocation52_spill] sm:$0xff] }
 0x697   : > { %v8866_v12 = vpack.c.bf16 %v17063_v56, %v17062_v43  ;;  %v17071_v26 = vmax.f32 %v17070_v10, 0.0  ;;  %6960 = vst [vmem:[#allocation2 + $0x1b0] sm:$0xff] %v8860_v14  ;;  %v17076_v39 = vld [vmem:[#allocation77_spill] sm:$0xff]  ;;  %v17080_v3 = vmax.f32 %v17079_v20, 0.0  ;;  %v17081_v54 = vmax.f32 %v15192_v23, 0.0  ;;  %6963 = vst [vmem:[#allocation2 + $0x50] sm:$0xff] %v8863_v52 }
 0x698   : > { %v8865_v21 = vpack.c.bf16 %v17060_v49, %v17059_v45  ;;  %v8868_v6 = vpack.c.bf16 %v17069_v50, %v17068_v33  ;;  %v17073_v49 = vld [vmem:[#allocation73_spill] sm:$0xff]  ;;  %v17077_v56 = vmax.f32 %v17076_v39, 0.0  ;;  %v17084_v10 = vmax.f32 %v15196_v36, 0.0  ;;  %6964 = vst [vmem:[#allocation2 + $0x168] sm:$0xff] %v8864_v0  ;;  %v17097_v20 = vld [vmem:[#allocation91_spill] sm:$0xff]  ;;  %6967 = vst [vmem:[#allocation2 + $0x180] sm:$0xff] %v8867_v35 }
 0x699   : > { %v8869_v45 = vpack.c.bf16 %v17072_v60, %v17071_v26  ;;  %v17074_v57 = vmax.f32 %v17073_v49, 0.0  ;;  %v8872_v15 = vpack.c.bf16 %v17081_v54, %v17080_v3  ;;  %v17082_v33 = vld [vmem:[#allocation81_spill] sm:$0xff]  ;;  %v17085_v26 = vld [vmem:[#allocation83_spill] sm:$0xff]  ;;  %v17087_v40 = vmax.f32 %v15200_v62, 0.0  ;;  %6966 = vst [vmem:[#allocation2 + $0x48] sm:$0xff] %v8866_v12 }
 0x69a   : > { %v8871_v27 = vpack.c.bf16 %v17078_v22, %v17077_v56  ;;  %v17083_v50 = vmax.f32 %v17082_v33, 0.0  ;;  %v17086_v19 = vmax.f32 %v17085_v26, 0.0  ;;  %6965 = vst [vmem:[#allocation2 + $0x130] sm:$0xff] %v8865_v21  ;;  %v17088_v28 = vld [vmem:[#allocation85_spill] sm:$0xff]  ;;  %v17090_v60 = vmax.f32 %v15204_v47, 0.0  ;;  %v17091_v49 = vld [vmem:[#allocation87_spill] sm:$0xff] }
 0x69b   : > { %v8870_v43 = vpack.c.bf16 %v17075_v42, %v17074_v57  ;;  %v17089_v58 = vmax.f32 %v17088_v28, 0.0  ;;  %v17092_v57 = vmax.f32 %v17091_v49, 0.0  ;;  %v17093_v42 = vmax.f32 %v15208_v25, 0.0  ;;  %v17094_v39 = vld [vmem:[#allocation89_spill] sm:$0xff]  ;;  %6968 = vst [vmem:[#allocation2 + $0x110] sm:$0xff] %v8868_v6  ;;  %6969 = vst [vmem:[#allocation2 + $0x118] sm:$0xff] %v8869_v45 }
 0x69c   : > { %v8873_v2 = vpack.c.bf16 %v17084_v10, %v17083_v50  ;;  %v8874_v14 = vpack.c.bf16 %v17087_v40, %v17086_v19  ;;  %v17095_v56 = vmax.f32 %v17094_v39, 0.0  ;;  %v17096_v22 = vmax.f32 %v15212_v1, 0.0  ;;  %v17100_v47 = vld [vmem:[#allocation93_spill] sm:$0xff]  ;;  %v17103_v54 = vld [vmem:[#allocation95_spill] sm:$0xff]  ;;  %6971 = vst [vmem:[#allocation2 + $0x120] sm:$0xff] %v8871_v27  ;;  %6972 = vst [vmem:[#allocation2 + $0x150] sm:$0xff] %v8872_v15 }
 0x69d   : > { %v8875_v23 = vpack.c.bf16 %v17090_v60, %v17089_v58  ;;  %v8876_v36 = vpack.c.bf16 %v17093_v42, %v17092_v57  ;;  %v17098_v52 = vmax.f32 %v17097_v20, 0.0  ;;  %v17099_v0 = vmax.f32 %v15216_v44, 0.0  ;;  %6970 = vst [vmem:[#allocation2 + $0x98] sm:$0xff] %v8870_v43  ;;  %v17106_v10 = vld [vmem:[#allocation97_spill] sm:$0xff]  ;;  %v17109_v40 = vld [vmem:[#allocation99_spill] sm:$0xff]  ;;  %v17127_v20 = vld [vmem:[#allocation130_spill] sm:$0xff] }
 0x69e   : > { %v8877_v62 = vpack.c.bf16 %v17096_v22, %v17095_v56  ;;  %v17101_v12 = vmax.f32 %v17100_v47, 0.0  ;;  %v17102_v3 = vmax.f32 %v15220_v30, 0.0  ;;  %v17104_v33 = vmax.f32 %v17103_v54, 0.0  ;;  %6973 = vst [vmem:[#allocation2 + $0x108] sm:$0xff] %v8873_v2  ;;  %6974 = vst [vmem:[#allocation2 + $0x60] sm:$0xff] %v8874_v14  ;;  %v17112_v30 = vld [vmem:[#allocation101_spill] sm:$0xff] }
 0x69f   : > { %v8878_v21 = vpack.c.bf16 %v17099_v0, %v17098_v52  ;;  %v17105_v50 = vmax.f32 %v15224_v11, 0.0  ;;  %v17107_v26 = vmax.f32 %v17106_v10, 0.0  ;;  %v17108_v19 = vmax.f32 %v15228_v32, 0.0  ;;  %v17115_v58 = vld [vmem:[#allocation103_spill] sm:$0xff]  ;;  %v17121_v56 = vld [vmem:[#allocation128_spill] sm:$0xff]  ;;  %6975 = vst [vmem:[#allocation2 + $0xe0] sm:$0xff] %v8875_v23 }
 0x6a0   : > { %v8879_v25 = vpack.c.bf16 %v17102_v3, %v17101_v12  ;;  %v17110_v35 = vmax.f32 %v17109_v40, 0.0  ;;  %v17111_v6 = vmax.f32 %v15232_v18, 0.0  ;;  %v17113_v43 = vmax.f32 %v17112_v30, 0.0  ;;  %v17118_v57 = vld [vmem:[#allocation127_spill] sm:$0xff]  ;;  %6976 = vst [vmem:[#allocation2 + $0x188] sm:$0xff] %v8876_v36  ;;  %6977 = vst [vmem:[#allocation2 + $0x138] sm:$0xff] %v8877_v62 }
 0x6a1   : > { %v8880_v1 = vpack.c.bf16 %v17105_v50, %v17104_v33  ;;  %v8881_v44 = vpack.c.bf16 %v17108_v19, %v17107_v26  ;;  %v17114_v28 = vmax.f32 %v15236_v63, 0.0  ;;  %v17116_v60 = vmax.f32 %v17115_v58, 0.0  ;;  %6978 = vst [vmem:[#allocation2 + $0x140] sm:$0xff] %v8878_v21  ;;  %v17124_v63 = vld [vmem:[#allocation129_spill] sm:$0xff]  ;;  %v17130_v47 = vld [vmem:[#allocation131_spill] sm:$0xff]  ;;  %v17133_v54 = vld [vmem:[#allocation132_spill] sm:$0xff] }
 0x6a2   : > { %v8882_v45 = vpack.c.bf16 %v17111_v6, %v17110_v35  ;;  %v17117_v49 = vmax.f32 %v15240_v46, 0.0  ;;  %v17119_v42 = vmax.f32 %v17118_v57, 0.0  ;;  %v17120_v39 = vmax.f32 %v15244_v8, 0.0  ;;  %6979 = vst [vmem:[#allocation2 + $0x80] sm:$0xff] %v8879_v25  ;;  %v17138_v33 = vld [vmem:[#allocation54_spill] sm:$0xff]  ;;  %v17140_v10 = vld [vmem:[#allocation145_spill] sm:$0xff] }
 0x6a3   : > { %v8883_v11 = vpack.c.bf16 %v17114_v28, %v17113_v43  ;;  %v17122_v27 = vmax.f32 %v17121_v56, 0.0  ;;  %v17123_v15 = vmax.f32 %v15248_v38, 0.0  ;;  %v17125_v14 = vmax.f32 %v17124_v63, 0.0  ;;  %6980 = vst [vmem:[#allocation2 + $0x1a8] sm:$0xff] %v8880_v1  ;;  %6981 = vst [vmem:[#allocation2 + $0x1b8] sm:$0xff] %v8881_v44  ;;  %v17142_v19 = vld [vmem:[#allocation48_spill] sm:$0xff] }
 0x6a4   : > { %v8884_v32 = vpack.c.bf16 %v17117_v49, %v17116_v60  ;;  %v8885_v18 = vpack.c.bf16 %v17120_v39, %v17119_v42  ;;  %v17126_v22 = vmax.f32 %v15252_v59, 0.0  ;;  %v17128_v52 = vmax.f32 %v17127_v20, 0.0  ;;  %6982 = vst [vmem:[#allocation2 + $0x28] sm:$0xff] %v8882_v45  ;;  %v17136_v59 = vld [vmem:[#allocation133_spill] sm:$0xff]  ;;  %v17144_v35 = vld [vmem:[#allocation146_spill] sm:$0xff]  ;;  %v17146_v30 = vld [vmem:[#allocation56_spill] sm:$0xff] }
 0x6a5   : > { %v8886_v2 = vpack.c.bf16 %v17123_v15, %v17122_v27  ;;  %v17129_v0 = vmax.f32 %v15256_v51, 0.0  ;;  %v17131_v12 = vmax.f32 %v17130_v47, 0.0  ;;  %v17132_v3 = vmax.f32 %v15260_v41, 0.0  ;;  %v17148_v28 = vld [vmem:[#allocation156_spill] sm:$0xff]  ;;  %v17150_v1 = vld [vmem:[#allocation39_spill] sm:$0xff]  ;;  %6983 = vst [vmem:[#allocation2 + $0x1e8] sm:$0xff] %v8883_v11 }
 0x6a6   : > { %v8887_v46 = vpack.c.bf16 %v17126_v22, %v17125_v14  ;;  %v17134_v23 = vmax.f32 %v17133_v54, 0.0  ;;  %v17135_v36 = vmax.f32 %v15264_v17, 0.0  ;;  %v17137_v21 = vmax.f32 %v17136_v59, 0.0  ;;  %6984 = vst [vmem:[#allocation2 + $0xf8] sm:$0xff] %v8884_v32  ;;  %6985 = vst [vmem:[#allocation2 + $0x160] sm:$0xff] %v8885_v18  ;;  %v17152_v58 = vld [vmem:[#allocation161_spill] sm:$0xff] }
 0x6a7   : > { %v8888_v8 = vpack.c.bf16 %v17129_v0, %v17128_v52  ;;  %v8889_v38 = vpack.c.bf16 %v17132_v3, %v17131_v12  ;;  %v17139_v50 = vmax.f32 %v17138_v33, 0.0  ;;  %v17141_v26 = vmax.f32 %v17140_v10, 0.0  ;;  %6986 = vst [vmem:[#allocation2 + $0x30] sm:$0xff] %v8886_v2  ;;  %v17155_v42 = vld [vmem:[#allocation105_spill] sm:$0xff]  ;;  %v17158_v15 = vld [vmem:[#allocation147_spill] sm:$0xff]  ;;  %v17161_v20 = vld [vmem:[#allocation106_spill] sm:$0xff] }
 0x6a8   : > { %v8890_v62 = vpack.c.bf16 %v17135_v36, %v17134_v23  ;;  %v17143_v40 = vmax.f32 %v17142_v19, 0.0  ;;  %v17145_v6 = vmax.f32 %v17144_v35, 0.0  ;;  %v17147_v43 = vmax.f32 %v17146_v30, 0.0  ;;  %6987 = vst [vmem:[#allocation2 + $0x1e0] sm:$0xff] %v8887_v46  ;;  %v17167_v0 = vld [vmem:[#allocation107_spill] sm:$0xff]  ;;  %v17169_v12 = vld [vmem:[#allocation58_spill] sm:$0xff] }
 0x6a9   : > { %v8891_v51 = vpack.c.bf16 %v17139_v50, %v17137_v21  ;;  %v17149_v25 = vmax.f32 %v17148_v28, 0.0  ;;  %v17151_v44 = vmax.f32 %v17150_v1, 0.0  ;;  %v17153_v60 = vmax.f32 %v17152_v58, 0.0  ;;  %6988 = vst [vmem:[#allocation2] sm:$0xff] %v8888_v8  ;;  %6989 = vst [vmem:[#allocation2 + $0xf0] sm:$0xff] %v8889_v38  ;;  %v17171_v54 = vld [vmem:[#allocation108_spill] sm:$0xff] }
 0x6aa   : > { %v8892_v41 = vpack.c.bf16 %v17143_v40, %v17141_v26  ;;  %v8893_v17 = vpack.c.bf16 %v17147_v43, %v17145_v6  ;;  %v17154_v49 = vmax.f32 %v15284_v5, 0.0  ;;  %v17156_v39 = vmax.f32 %v17155_v42, 0.0  ;;  %6990 = vst [vmem:[#allocation2 + $0x8] sm:$0xff] %v8890_v62  ;;  %v17164_v5 = vld [vmem:[#allocation148_spill] sm:$0xff]  ;;  %v17174_v59 = vld [vmem:[#allocation109_spill] sm:$0xff]  ;;  %v17183_v19 = vld [vmem:[#allocation158_spill] sm:$0xff] }
 0x6ab   : > { %v8894_v45 = vpack.c.bf16 %v17151_v44, %v17149_v25  ;;  %v17157_v56 = vmax.f32 %v15288_v16, 0.0  ;;  %v17159_v63 = vmax.f32 %v17158_v15, 0.0  ;;  %v17160_v14 = vmax.f32 %v15292_v53, 0.0  ;;  %6991 = vst [vmem:[#allocation2 + $0x148] sm:$0xff] %v8891_v51  ;;  %v17180_v50 = vld [vmem:[#allocation160_spill] sm:$0xff]  ;;  %v17186_v6 = vld [vmem:[#allocation159_spill] sm:$0xff] }
 0x6ac   : > { %v8895_v57 = vpack.c.bf16 %v17154_v49, %v17153_v60  ;;  %v17162_v11 = vmax.f32 %v17161_v20, 0.0  ;;  %v17163_v32 = vmax.f32 %v15296_v7, 0.0  ;;  %v17165_v2 = vmax.f32 %v17164_v5, 0.0  ;;  %6992 = vst [vmem:[#allocation2 + $0x1d0] sm:$0xff] %v8892_v41  ;;  %6993 = vst [vmem:[#allocation2 + $0x100] sm:$0xff] %v8893_v17  ;;  %v17188_v41 = vld [vmem:[#allocation43_spill] sm:$0xff] }
 0x6ad   : > { %v8896_v27 = vpack.c.bf16 %v17157_v56, %v17156_v39  ;;  %v8897_v22 = vpack.c.bf16 %v17160_v14, %v17159_v63  ;;  %v17166_v52 = vmax.f32 %v15300_v34, 0.0  ;;  %v17168_v47 = vmax.f32 %v17167_v0, 0.0  ;;  %6994 = vst [vmem:[#allocation2 + $0xc8] sm:$0xff] %v8894_v45  ;;  %v17177_v34 = vld [vmem:[#allocation157_spill] sm:$0xff]  ;;  %v17192_v28 = vld [vmem:[#allocation66_spill] sm:$0xff]  ;;  %v17196_v45 = vld [vmem:[#allocation68_spill] sm:$0xff] }
 0x6ae   : > { %v8898_v18 = vpack.c.bf16 %v17163_v32, %v17162_v11  ;;  %v17170_v3 = vmax.f32 %v17169_v12, 0.0  ;;  %v17172_v23 = vmax.f32 %v17171_v54, 0.0  ;;  %v17173_v36 = vmax.f32 %v17029_v61, 0.0  ;;  %6995 = vst [vmem:[#allocation2 + $0x40] sm:$0xff] %v8895_v57  ;;  %v17194_v1 = vld [vmem:[#allocation114_spill] sm:$0xff]  ;;  %v17198_v60 = vld [vmem:[#allocation115_spill] sm:$0xff] }
 0x6af   : > { %v8899_v16 = vpack.c.bf16 %v17166_v52, %v17165_v2  ;;  %v17175_v46 = vmax.f32 %v17174_v59, 0.0  ;;  %v17176_v8 = vmax.f32 %v17030_v37, 0.0  ;;  %v17178_v62 = vmax.f32 %v17177_v34, 0.0  ;;  %6996 = vst [vmem:[#allocation2 + $0x1f8] sm:$0xff] %v8896_v27  ;;  %6997 = vst [vmem:[#allocation2 + $0x20] sm:$0xff] %v8897_v22  ;;  %v17200_v42 = vld [vmem:[#allocation70_spill] sm:$0xff] }
 0x6b0   : > { %v8900_v53 = vpack.c.bf16 %v17170_v3, %v17168_v47  ;;  %v8901_v7 = vpack.c.bf16 %v17173_v36, %v17172_v23  ;;  %v17179_v21 = vmax.f32 %v17031_v48, 0.0  ;;  %v17181_v10 = vmax.f32 %v17180_v50, 0.0  ;;  %6998 = vst [vmem:[#allocation2 + $0x128] sm:$0xff] %v8898_v18  ;;  %v17190_v48 = vld [vmem:[#allocation163_spill] sm:$0xff]  ;;  %v17202_v15 = vld [vmem:[#allocation116_spill] sm:$0xff]  ;;  %v17209_v18 = vld [vmem:[#allocation117_spill] sm:$0xff] }
 0x6b1   : > { %v8902_v38 = vpack.c.bf16 %v17176_v8, %v17175_v46  ;;  %v17182_v26 = vmax.f32 %v17032_v24, 0.0  ;;  %v17184_v40 = vmax.f32 %v17183_v19, 0.0  ;;  %v17185_v35 = vmax.f32 %v17033_v55, 0.0  ;;  %v17204_v27 = vld [vmem:[#allocation72_spill] sm:$0xff]  ;;  %6999 = vst [vmem:[#allocation2 + $0x1a0] sm:$0xff] %v8899_v16  ;;  %v17213_v47 = vld [vmem:[#allocation118_spill] sm:$0xff] }
 0x6b2   : > { %v8903_v33 = vpack.c.bf16 %v17179_v21, %v17178_v62  ;;  %v17187_v51 = vmax.f32 %v17186_v6, 0.0  ;;  %v17189_v30 = vmax.f32 %v17188_v41, 0.0  ;;  %v17191_v17 = vmax.f32 %v17190_v48, 0.0  ;;  %7000 = vst [vmem:[#allocation2 + $0x1f0] sm:$0xff] %v8900_v53  ;;  %7001 = vst [vmem:[#allocation2 + $0xe8] sm:$0xff] %v8901_v7  ;;  %v17206_v22 = vld [vmem:[#allocation164_spill] sm:$0xff] }
 0x6b3   : > { %v8904_v61 = vpack.c.bf16 %v17182_v26, %v17181_v10  ;;  %v8905_v37 = vpack.c.bf16 %v17185_v35, %v17184_v40  ;;  %v17193_v25 = vmax.f32 %v17192_v28, 0.0  ;;  %v17195_v44 = vmax.f32 %v17194_v1, 0.0  ;;  %7002 = vst [vmem:[#allocation2 + $0x78] sm:$0xff] %v8902_v38  ;;  %v17211_v2 = vld [vmem:[#allocation76_spill] sm:$0xff]  ;;  %v17216_v23 = vld [vmem:[#allocation119_spill] sm:$0xff]  ;;  %v17218_v53 = vld [vmem:[#allocation78_spill] sm:$0xff] }
 0x6b4   : > { %v8906_v43 = vpack.c.bf16 %v17189_v30, %v17187_v51  ;;  %v17197_v58 = vmax.f32 %v17196_v45, 0.0  ;;  %v17199_v49 = vmax.f32 %v17198_v60, 0.0  ;;  %v17201_v39 = vmax.f32 %v17200_v42, 0.0  ;;  %7003 = vst [vmem:[#allocation2 + $0x70] sm:$0xff] %v8903_v33  ;;  %v17222_v46 = vld [vmem:[#allocation80_spill] sm:$0xff]  ;;  %v17224_v34 = vld [vmem:[#allocation121_spill] sm:$0xff] }
 0x6b5   : > { %v8907_v24 = vpack.c.bf16 %v17193_v25, %v17191_v17  ;;  %v17203_v57 = vmax.f32 %v17202_v15, 0.0  ;;  %v17205_v63 = vmax.f32 %v17204_v27, 0.0  ;;  %v17207_v20 = vmax.f32 %v17206_v22, 0.0  ;;  %7004 = vst [vmem:[#allocation2 + $0x90] sm:$0xff] %v8904_v61  ;;  %7005 = vst [vmem:[#allocation2 + $0x1d8] sm:$0xff] %v8905_v37  ;;  %v17227_v50 = vld [vmem:[#allocation122_spill] sm:$0xff] }
 0x6b6   : > { %v8908_v55 = vpack.c.bf16 %v17197_v58, %v17195_v44  ;;  %v8909_v56 = vpack.c.bf16 %v17201_v39, %v17199_v49  ;;  %v17208_v11 = vmax.f32 %v17034_v29, 0.0  ;;  %v17210_v5 = vmax.f32 %v17209_v18, 0.0  ;;  %7006 = vst [vmem:[#allocation2 + $0xd0] sm:$0xff] %v8906_v43  ;;  %v17220_v29 = vld [vmem:[#allocation120_spill] sm:$0xff]  ;;  %v17229_v26 = vld [vmem:[#allocation134_spill] sm:$0xff]  ;;  %v17231_v35 = vld [vmem:[#allocation123_spill] sm:$0xff] }
 0x6b7   : > { %v8910_v14 = vpack.c.bf16 %v17205_v63, %v17203_v57  ;;  %v17212_v52 = vmax.f32 %v17211_v2, 0.0  ;;  %v17214_v12 = vmax.f32 %v17213_v47, 0.0  ;;  %v17215_v3 = vmax.f32 %v15356_v13, 0.0  ;;  %7007 = vst [vmem:[#allocation2 + $0xb8] sm:$0xff] %v8907_v24  ;;  %v17234_v6 = vld [vmem:[#allocation165_spill] sm:$0xff]  ;;  %v17236_v41 = vld [vmem:[#allocation135_spill] sm:$0xff] }
 0x6b8   : > { %v8911_v32 = vpack.c.bf16 %v17208_v11, %v17207_v20  ;;  %v17217_v16 = vmax.f32 %v17216_v23, 0.0  ;;  %v17219_v36 = vmax.f32 %v17218_v53, 0.0  ;;  %v17221_v59 = vmax.f32 %v17220_v29, 0.0  ;;  %7008 = vst [vmem:[#allocation2 + $0x88] sm:$0xff] %v8908_v55  ;;  %7009 = vst [vmem:[#allocation2 + $0xa8] sm:$0xff] %v8909_v56  ;;  %v17238_v43 = vld [vmem:[#allocation166_spill] sm:$0xff] }
 0x6b9   : > { %v8912_v0 = vpack.c.bf16 %v17212_v52, %v17210_v5  ;;  %v8913_v54 = vpack.c.bf16 %v17215_v3, %v17214_v12  ;;  %v17223_v8 = vmax.f32 %v17222_v46, 0.0  ;;  %v17225_v62 = vmax.f32 %v17224_v34, 0.0  ;;  %7010 = vst [vmem:[#allocation2 + $0x1c8] sm:$0xff] %v8910_v14  ;;  %v17240_v17 = vld [vmem:[#allocation84_spill] sm:$0xff]  ;;  %v17242_v1 = vld [vmem:[#allocation167_spill] sm:$0xff]  ;;  %v17247_v55 = vld [vmem:[#allocation86_spill] sm:$0xff] }
 0x6ba   : > { %v8914_v7 = vpack.c.bf16 %v17219_v36, %v17217_v16  ;;  %v17226_v21 = vmax.f32 %v15368_v9, 0.0  ;;  %v17228_v10 = vmax.f32 %v17227_v50, 0.0  ;;  %v17230_v19 = vmax.f32 %v17229_v26, 0.0  ;;  %v17245_v58 = vld [vmem:[#allocation168_spill] sm:$0xff]  ;;  %7011 = vst [vmem:[#allocation2 + $0x170] sm:$0xff] %v8911_v32 }
 0x6bb   : > { %v8915_v38 = vpack.c.bf16 %v17223_v8, %v17221_v59  ;;  %v17232_v33 = vmax.f32 %v17231_v35, 0.0  ;;  %v17233_v61 = vmax.f32 %v17036_v31, 0.0  ;;  %v17235_v51 = vmax.f32 %v17234_v6, 0.0  ;;  %7012 = vst [vmem:[#allocation2 + $0x178] sm:$0xff] %v8912_v0  ;;  %7013 = vst [vmem:[#allocation2 + $0x68] sm:$0xff] %v8913_v54 }
 0x6bc   : > { %v8916_v13 = vpack.c.bf16 %v17226_v21, %v17225_v62  ;;  %v8917_v40 = vpack.c.bf16 %v17230_v19, %v17228_v10  ;;  %v17237_v30 = vmax.f32 %v17236_v41, 0.0  ;;  %v17239_v48 = vmax.f32 %v17238_v43, 0.0  ;;  %7014 = vst [vmem:[#allocation2 + $0x190] sm:$0xff] %v8914_v7 }
 0x6bd   : > { %v8918_v37 = vpack.c.bf16 %v17233_v61, %v17232_v33  ;;  %v17241_v28 = vmax.f32 %v17240_v17, 0.0  ;;  %v17243_v44 = vmax.f32 %v17242_v1, 0.0  ;;  %v17244_v45 = vmax.f32 %v17039_v4, 0.0  ;;  %7015 = vst [vmem:[#allocation2 + $0x198] sm:$0xff] %v8915_v38 }
 0x6be   : > { %v8919_v9 = vpack.c.bf16 %v17237_v30, %v17235_v51  ;;  %v17246_v24 = vmax.f32 %v17245_v58, 0.0  ;;  %v17248_v60 = vmax.f32 %v17247_v55, 0.0  ;;  %7016 = vst [vmem:[#allocation2 + $0x38] sm:$0xff] %v8916_v13  ;;  %7017 = vst [vmem:[#allocation2 + $0xc0] sm:$0xff] %v8917_v40  ;;  %7026 = sbr.rel (%p8848_p3) target bundleno = 3190 (0xc76), region = 128 }
 0x6bf   : > { %v8920_v25 = vpack.c.bf16 %v17241_v28, %v17239_v48  ;;  %v8921_v31 = vpack.c.bf16 %v17244_v45, %v17243_v44  ;;  %7018 = vst [vmem:[#allocation2 + $0x1c0] sm:$0xff] %v8918_v37 }
 0x6c0   : > { %v8922_v49 = vpack.c.bf16 %v17248_v60, %v17246_v24  ;;  %7019 = vst [vmem:[#allocation2 + $0x158] sm:$0xff] %v8919_v9 }
 0x6c1   : > { %7020 = vst [vmem:[#allocation2 + $0x10] sm:$0xff] %v8920_v25  ;;  %7021 = vst [vmem:[#allocation2 + $0x58] sm:$0xff] %v8921_v31 }
 0x6c2   : > { %7022 = vst [vmem:[#allocation2 + $0xa0] sm:$0xff] %v8922_v49 }
 0x6c3   : > { %v7042_v4 = vld [vmem:[#allocation2 + $0x60] sm:$0xff]  ;;  %v7074_v42 = vld [vmem:[#allocation2 + $0xd0] sm:$0xff]  ;;  %v7041_v39 = vld [vmem:[#allocation2 + $0x108] sm:$0xff]  ;;  %vm7572_vm0 = vcmask 1041408   ;;  %vm10066_vm1 = vmmov 0   ;;  %vm8228_vm4 = vcmask 9216  }
 0x6c4   : > { %v7173_v56 = vunpack.c.h.bf16 %v7042_v4  ;;  %v7237_v15 = vunpack.c.h.bf16 %v7074_v42  ;;  %v7172_v57 = vunpack.c.l.bf16 %v7042_v4  ;;  %v7236_v27 = vunpack.c.l.bf16 %v7074_v42  ;;  %v7073_v63 = vld [vmem:[#allocation2 + $0x1d8] sm:$0xff]  ;;  %v7040_v14 = vld [vmem:[#allocation2 + $0x150] sm:$0xff]  ;;  %v7039_v5 = vld [vmem:[#allocation2 + $0x120] sm:$0xff] }
 0x6c5   : > { %v7072_v22 = vld [vmem:[#allocation2 + $0x90] sm:$0xff]  ;;  %v7171_v20 = vunpack.c.h.bf16 %v7041_v39  ;;  %v7235_v11 = vunpack.c.h.bf16 %v7073_v63  ;;  %v7170_v32 = vunpack.c.l.bf16 %v7041_v39  ;;  %v7234_v18 = vunpack.c.l.bf16 %v7073_v63  ;;  %v7038_v3 = vld [vmem:[#allocation2 + $0x98] sm:$0xff]  ;;  %v7069_v29 = vld [vmem:[#allocation2 + $0xe8] sm:$0xff] }
 0x6c6   : > { %v7071_v2 = vld [vmem:[#allocation2 + $0x70] sm:$0xff]  ;;  %7292 = vmatprep.subr.mxu0 %v7173_v56  ;;  %7363 = vmatprep.subr.mxu1 %v7237_v15  ;;  %v7169_v52 = vunpack.c.h.bf16 %v7040_v14  ;;  %v7233_v0 = vunpack.c.h.bf16 %v7072_v22  ;;  %v7168_v47 = vunpack.c.l.bf16 %v7040_v14  ;;  %v7232_v12 = vunpack.c.l.bf16 %v7072_v22  ;;  %v7070_v54 = vld [vmem:[#allocation2 + $0x78] sm:$0xff]  ;;  %v7035_v26 = vld [vmem:[#allocation2 + $0x180] sm:$0xff] }
 0x6c7   : > { %7293 = vmatpush1.msra.mxu0 %v7172_v57  ;;  %7364 = vmatpush1.msra.mxu1 %v7236_v27  ;;  %v7167_v23 = vunpack.c.h.bf16 %v7039_v5  ;;  %v7231_v16 = vunpack.c.h.bf16 %v7071_v2  ;;  %v7166_v53 = vunpack.c.l.bf16 %v7039_v5  ;;  %v7230_v36 = vunpack.c.l.bf16 %v7071_v2  ;;  %v7037_v7 = vld [vmem:[#allocation2 + $0x118] sm:$0xff]  ;;  %v7036_v34 = vld [vmem:[#allocation2 + $0x110] sm:$0xff]  ;;  %v7067_v19 = vld [vmem:[#allocation2 + $0x1a0] sm:$0xff] }
 0x6c8   : > { %7294 = vmatprep.subr.mxu0 %v7171_v20  ;;  %7365 = vmatprep.subr.mxu1 %v7235_v11  ;;  %v7165_v59 = vunpack.c.h.bf16 %v7038_v3  ;;  %v7229_v46 = vunpack.c.h.bf16 %v7070_v54  ;;  %v7164_v8 = vunpack.c.l.bf16 %v7038_v3  ;;  %v7228_v38 = vunpack.c.l.bf16 %v7070_v54  ;;  %v7068_v62 = vld [vmem:[#allocation2 + $0x1f0] sm:$0xff]  ;;  %v7034_v37 = vld [vmem:[#allocation2 + $0x48] sm:$0xff]  ;;  %v7065_v48 = vld [vmem:[#allocation2 + $0x20] sm:$0xff] }
 0x6c9   : > { %7295 = vmatpush1.msra.mxu0 %v7170_v32  ;;  %7366 = vmatpush1.msra.mxu1 %v7234_v18  ;;  %v7163_v21 = vunpack.c.h.bf16 %v7037_v7  ;;  %v7227_v13 = vunpack.c.h.bf16 %v7069_v29  ;;  %v7162_v50 = vunpack.c.l.bf16 %v7037_v7  ;;  %v7226_v10 = vunpack.c.l.bf16 %v7069_v29  ;;  %v7066_v6 = vld [vmem:[#allocation2 + $0x128] sm:$0xff]  ;;  %v7033_v43 = vld [vmem:[#allocation2 + $0x130] sm:$0xff]  ;;  %v7064_v45 = vld [vmem:[#allocation2 + $0x1f8] sm:$0xff] }
 0x6ca   : > { %7296 = vmatprep.subr.mxu0 %v7169_v52  ;;  %7367 = vmatprep.subr.mxu1 %v7233_v0  ;;  %v7161_v40 = vunpack.c.h.bf16 %v7036_v34  ;;  %v7225_v35 = vunpack.c.h.bf16 %v7068_v62  ;;  %v7160_v33 = vunpack.c.l.bf16 %v7036_v34  ;;  %v7224_v61 = vunpack.c.l.bf16 %v7068_v62  ;;  %v7032_v44 = vld [vmem:[#allocation2 + $0x168] sm:$0xff]  ;;  %v7031_v60 = vld [vmem:[#allocation2 + $0x50] sm:$0xff]  ;;  %v7063_v49 = vld [vmem:[#allocation2 + $0x40] sm:$0xff] }
 0x6cb   : > { %7297 = vmatpush1.msra.mxu0 %v7168_v47  ;;  %7368 = vmatpush1.msra.mxu1 %v7232_v12  ;;  %v7159_v51 = vunpack.c.h.bf16 %v7035_v26  ;;  %v7223_v41 = vunpack.c.h.bf16 %v7067_v19  ;;  %v7158_v30 = vunpack.c.l.bf16 %v7035_v26  ;;  %v7222_v9 = vunpack.c.l.bf16 %v7067_v19  ;;  %v7030_v15 = vld [vmem:[#allocation2 + $0x18] sm:$0xff]  ;;  %v7062_v57 = vld [vmem:[#allocation2 + $0xc8] sm:$0xff]  ;;  %v7061_v11 = vld [vmem:[#allocation2 + $0x100] sm:$0xff] }
 0x6cc   : > { %7298 = vmatprep.subr.mxu0 %v7167_v23  ;;  %7369 = vmatprep.subr.mxu1 %v7231_v16  ;;  %v7157_v17 = vunpack.c.h.bf16 %v7034_v37  ;;  %v7221_v28 = vunpack.c.h.bf16 %v7066_v6  ;;  %v7156_v25 = vunpack.c.l.bf16 %v7034_v37  ;;  %v7220_v1 = vunpack.c.l.bf16 %v7066_v6  ;;  %v7029_v20 = vld [vmem:[#allocation2 + $0xd8] sm:$0xff]  ;;  %v7028_v52 = vld [vmem:[#allocation2 + $0x1b0] sm:$0xff]  ;;  %v7059_v16 = vld [vmem:[#allocation2 + $0x148] sm:$0xff] }
 0x6cd   : > { %7299 = vmatpush1.msra.mxu0 %v7166_v53  ;;  %7370 = vmatpush1.msra.mxu1 %v7230_v36  ;;  %v7155_v31 = vunpack.c.h.bf16 %v7033_v43  ;;  %v7219_v58 = vunpack.c.h.bf16 %v7065_v48  ;;  %v7154_v24 = vunpack.c.l.bf16 %v7033_v43  ;;  %v7218_v55 = vunpack.c.l.bf16 %v7065_v48  ;;  %v7060_v0 = vld [vmem:[#allocation2 + $0x1d0] sm:$0xff] }
 0x6ce   : > { %7300 = vmatprep.subr.mxu0 %v7165_v59  ;;  %7371 = vmatprep.subr.mxu1 %v7229_v46  ;;  %v7153_v4 = vunpack.c.h.bf16 %v7032_v44  ;;  %v7217_v42 = vunpack.c.h.bf16 %v7064_v45  ;;  %v7152_v39 = vunpack.c.l.bf16 %v7032_v44  ;;  %v7216_v56 = vunpack.c.l.bf16 %v7064_v45  ;;  %v7027_v23 = vld [vmem:[#allocation2 + $0xb0] sm:$0xff]  ;;  %v7058_v59 = vld [vmem:[#allocation2 + $0x8] sm:$0xff]  ;;  %v7090_v46 = vld [vmem:[#allocation2 + $0xa0] sm:$0xff] }
 0x6cf   : > { %7301 = vmatpush1.msra.mxu0 %v7164_v8  ;;  %7372 = vmatpush1.msra.mxu1 %v7228_v38  ;;  %v7151_v27 = vunpack.c.h.bf16 %v7031_v60  ;;  %v7215_v63 = vunpack.c.h.bf16 %v7063_v49  ;;  %v7150_v14 = vunpack.c.l.bf16 %v7031_v60  ;;  %v7214_v22 = vunpack.c.l.bf16 %v7063_v49 }
 0x6d0   : > { %7302 = vmatprep.subr.mxu0 %v7163_v21  ;;  %7373 = vmatprep.subr.mxu1 %v7227_v13  ;;  %v7149_v32 = vunpack.c.h.bf16 %v7030_v15  ;;  %v7213_v18 = vunpack.c.h.bf16 %v7062_v57  ;;  %v7148_v5 = vunpack.c.l.bf16 %v7030_v15  ;;  %v7212_v2 = vunpack.c.l.bf16 %v7062_v57  ;;  %v7057_v21 = vld [vmem:[#allocation2 + $0xf0] sm:$0xff]  ;;  %v7089_v13 = vld [vmem:[#allocation2 + $0x58] sm:$0xff] }
 0x6d1   : > { %7303 = vmatpush1.msra.mxu0 %v7162_v50  ;;  %7374 = vmatpush1.msra.mxu1 %v7226_v10  ;;  %v7147_v47 = vunpack.c.h.bf16 %v7029_v20  ;;  %v7211_v12 = vunpack.c.h.bf16 %v7061_v11  ;;  %v7146_v3 = vunpack.c.l.bf16 %v7029_v20  ;;  %v7210_v54 = vunpack.c.l.bf16 %v7061_v11 }
 0x6d2   : > { %7304 = vmatprep.subr.mxu0 %v7161_v40  ;;  %7375 = vmatprep.subr.mxu1 %v7225_v35  ;;  %v7145_v53 = vunpack.c.h.bf16 %v7028_v52  ;;  %v7209_v36 = vunpack.c.h.bf16 %v7060_v0  ;;  %v7144_v7 = vunpack.c.l.bf16 %v7028_v52  ;;  %v7208_v29 = vunpack.c.l.bf16 %v7060_v0  ;;  %v7056_v40 = vld [vmem:[#allocation2] sm:$0xff]  ;;  %v7088_v35 = vld [vmem:[#allocation2 + $0x10] sm:$0xff] }
 0x6d3   : > { %7305 = vmatpush1.msra.mxu0 %v7160_v33  ;;  %7376 = vmatpush1.msra.mxu1 %v7224_v61  ;;  %v7143_v8 = vunpack.c.h.bf16 %v7027_v23  ;;  %v7207_v38 = vunpack.c.h.bf16 %v7059_v16  ;;  %v7142_v34 = vunpack.c.l.bf16 %v7027_v23  ;;  %v7206_v62 = vunpack.c.l.bf16 %v7059_v16 }
 0x6d4   : > { %7306 = vmatprep.subr.mxu0 %v7159_v51  ;;  %7377 = vmatprep.subr.mxu1 %v7223_v41  ;;  %v7205_v50 = vunpack.c.h.bf16 %v7058_v59  ;;  %v7269_v10 = vunpack.c.h.bf16 %v7090_v46  ;;  %v7204_v26 = vunpack.c.l.bf16 %v7058_v59  ;;  %v7268_v19 = vunpack.c.l.bf16 %v7090_v46  ;;  %v7055_v51 = vld [vmem:[#allocation2 + $0x1e0] sm:$0xff]  ;;  %v7087_v41 = vld [vmem:[#allocation2 + $0x158] sm:$0xff] }
 0x6d5   : > { %7307 = vmatpush1.msra.mxu0 %v7158_v30  ;;  %7378 = vmatpush1.msra.mxu1 %v7222_v9  ;;  %v7203_v33 = vunpack.c.h.bf16 %v7057_v21  ;;  %v7267_v61 = vunpack.c.h.bf16 %v7089_v13  ;;  %v7202_v37 = vunpack.c.l.bf16 %v7057_v21  ;;  %v7266_v6 = vunpack.c.l.bf16 %v7089_v13 }
 0x6d6   : > { %7308 = vmatprep.subr.mxu0 %v7157_v17  ;;  %7379 = vmatprep.subr.mxu1 %v7221_v28  ;;  %v7201_v30 = vunpack.c.h.bf16 %v7056_v40  ;;  %v7265_v9 = vunpack.c.h.bf16 %v7088_v35  ;;  %v7200_v43 = vunpack.c.l.bf16 %v7056_v40  ;;  %v7264_v48 = vunpack.c.l.bf16 %v7088_v35  ;;  %v7054_v17 = vld [vmem:[#allocation2 + $0x30] sm:$0xff]  ;;  %v7086_v28 = vld [vmem:[#allocation2 + $0x1c0] sm:$0xff]  ;;  %v7078_v40 = vld [vmem:[#allocation2 + $0x1c8] sm:$0xff] }
 0x6d7   : > { %7309 = vmatpush1.msra.mxu0 %v7156_v25  ;;  %7380 = vmatpush1.msra.mxu1 %v7220_v1  ;;  %v7199_v25 = vunpack.c.h.bf16 %v7055_v51  ;;  %v7263_v1 = vunpack.c.h.bf16 %v7087_v41  ;;  %v7198_v44 = vunpack.c.l.bf16 %v7055_v51  ;;  %v7262_v45 = vunpack.c.l.bf16 %v7087_v41  ;;  %v7091_v35 = vld [vmem:[#allocation12] sm:$0xff]  ;;  %v7045_v51 = vld [vmem:[#allocation2 + $0x138] sm:$0xff]  ;;  %v7077_v41 = vld [vmem:[#allocation2 + $0xa8] sm:$0xff] }
 0x6d8   : > { %7310 = vmatprep.subr.mxu0 %v7155_v31  ;;  %7381 = vmatprep.subr.mxu1 %v7219_v58  ;;  %v7053_v31 = vld [vmem:[#allocation2 + $0x160] sm:$0xff]  ;;  %v7196_v60 = vunpack.c.l.bf16 %v7054_v17  ;;  %v7260_v49 = vunpack.c.l.bf16 %v7086_v28 }
 0x6d9   : > { %7311 = vmatpush1.msra.mxu0 %v7154_v24  ;;  %7382 = vmatpush1.msra.mxu1 %v7218_v55  ;;  %v7085_v58 = vld [vmem:[#allocation2 + $0xc0] sm:$0xff]  ;;  %v7197_v24 = vunpack.c.h.bf16 %v7054_v17  ;;  %v7261_v55 = vunpack.c.h.bf16 %v7086_v28  ;;  %v7194_v15 = vunpack.c.l.bf16 %v7053_v31  ;;  %v7271_v17 = vcombine.high %v7091_v35, %v7091_v35 }
 0x6da   : > { %7312 = vmatprep.subr.mxu0 %v7153_v4  ;;  %7383 = vmatprep.subr.mxu1 %v7217_v42  ;;  %v7052_v4 = vld [vmem:[#allocation2 + $0xf8] sm:$0xff]  ;;  %v7258_v57 = vunpack.c.l.bf16 %v7085_v58 }
 0x6db   : > { %7313 = vmatpush1.msra.mxu0 %v7152_v39  ;;  %7384 = vmatpush1.msra.mxu1 %v7216_v56  ;;  %v7084_v42 = vld [vmem:[#allocation2 + $0x38] sm:$0xff]  ;;  %v7195_v39 = vunpack.c.h.bf16 %v7053_v31  ;;  %v7259_v56 = vunpack.c.h.bf16 %v7085_v58  ;;  %v7192_v20 = vunpack.c.l.bf16 %v7052_v4  ;;  %v7243_v31 = vunpack.c.h.bf16 %v7077_v41 }
 0x6dc   : > { %7314 = vmatprep.subr.mxu0 %v7151_v27  ;;  %7385 = vmatprep.subr.mxu1 %v7215_v63  ;;  %v7051_v27 = vld [vmem:[#allocation2 + $0x1e8] sm:$0xff]  ;;  %v7083_v63 = vld [vmem:[#allocation2 + $0x198] sm:$0xff]  ;;  %v7256_v11 = vunpack.c.l.bf16 %v7084_v42  ;;  %v7178_v58 = vunpack.c.l.bf16 %v7045_v51 }
 0x6dd   : > { %7315 = vmatpush1.msra.mxu0 %v7150_v14  ;;  %7386 = vmatpush1.msra.mxu1 %v7214_v22  ;;  %v7193_v14 = vunpack.c.h.bf16 %v7052_v4  ;;  %v7257_v22 = vunpack.c.h.bf16 %v7084_v42  ;;  %v7190_v52 = vunpack.c.l.bf16 %v7051_v27  ;;  %v7254_v0 = vunpack.c.l.bf16 %v7083_v63 }
 0x6de   : > { %7316 = vmatprep.subr.mxu0 %v7149_v32  ;;  %7387 = vmatprep.subr.mxu1 %v7213_v18  ;;  %v7050_v32 = vld [vmem:[#allocation2 + $0x28] sm:$0xff]  ;;  %v7082_v18 = vld [vmem:[#allocation2 + $0x190] sm:$0xff] }
 0x6df   : > { %7317 = vmatpush1.msra.mxu0 %v7148_v5  ;;  %7388 = vmatpush1.msra.mxu1 %v7212_v2  ;;  %v7191_v5 = vunpack.c.h.bf16 %v7051_v27  ;;  %v7255_v2 = vunpack.c.h.bf16 %v7083_v63  ;;  %v7189_v23 = vunpack.c.h.bf16 %v7050_v32  ;;  %v7253_v16 = vunpack.c.h.bf16 %v7082_v18 }
 0x6e0   : > { %7318 = vmatprep.subr.mxu0 %v7147_v47  ;;  %7389 = vmatprep.subr.mxu1 %v7211_v12  ;;  %v7049_v47 = vld [vmem:[#allocation2 + $0x1b8] sm:$0xff]  ;;  %v7081_v12 = vld [vmem:[#allocation2 + $0x68] sm:$0xff] }
 0x6e1   : > { %7319 = vmatpush1.msra.mxu0 %v7146_v3  ;;  %7390 = vmatpush1.msra.mxu1 %v7210_v54  ;;  %v10064_v3 = vmov 1983009808   ;;  %v7187_v59 = vunpack.c.h.bf16 %v7049_v47  ;;  %v7251_v46 = vunpack.c.h.bf16 %v7081_v12 }
 0x6e2   : > { %7320 = vmatprep.subr.mxu0 %v7145_v53  ;;  %7391 = vmatprep.subr.mxu1 %v7209_v36  ;;  %v7273_v54 = vunpack.c.l.s4 %v10064_v3  ;;  %v7188_v53 = vunpack.c.l.bf16 %v7050_v32  ;;  %v7252_v36 = vunpack.c.l.bf16 %v7082_v18  ;;  %v7464_v32 = vld [vmem:[#allocation13 + $0xf0] sm:$0xff]  ;;  %v7463_v18 = vld [vmem:[#allocation13 + $0xe8] sm:$0xff] }
 0x6e3   : > { %7321 = vmatpush1.msra.mxu0 %v7144_v7  ;;  %7392 = vmatpush1.msra.mxu1 %v7208_v29  ;;  %v7048_v7 = vld [vmem:[#allocation2 + $0x1a8] sm:$0xff]  ;;  %v7080_v29 = vld [vmem:[#allocation2 + $0x178] sm:$0xff] }
 0x6e4   : > { %7322 = vmatprep.subr.mxu0 %v7143_v8  ;;  %7393 = vmatprep.subr.mxu1 %v7207_v38  ;;  %v7186_v8 = vunpack.c.l.bf16 %v7049_v47  ;;  %v7250_v38 = vunpack.c.l.bf16 %v7081_v12  ;;  %v7274_v21 = vunpack.c.0.s8 %v7273_v54  ;;  %v7185_v13 = vunpack.c.h.bf16 %v7048_v7  ;;  %v7458_v47 = vld [vmem:[#allocation13 + $0xc0] sm:$0xff]  ;;  %v7457_v12 = vld [vmem:[#allocation13 + $0xb8] sm:$0xff]  ;;  %v7456_v3 = vld [vmem:[#allocation13 + $0xb0] sm:$0xff] }
 0x6e5   : > { %7323 = vmatpush1.msra.mxu0 %v7142_v34  ;;  %7394 = vmatpush1.msra.mxu1 %v7206_v62  ;;  %v7047_v34 = vld [vmem:[#allocation2 + $0x80] sm:$0xff]  ;;  %v7079_v62 = vld [vmem:[#allocation2 + $0x170] sm:$0xff] }
 0x6e6   : > { %7324 = vmatprep.subr.mxu0 %v7205_v50  ;;  %7395 = vmatprep.subr.mxu1 %v7269_v10  ;;  %v7249_v50 = vunpack.c.h.bf16 %v7080_v29  ;;  %v7184_v10 = vunpack.c.l.bf16 %v7048_v7  ;;  %v7455_v54 = vld [vmem:[#allocation13 + $0xa8] sm:$0xff]  ;;  %v7450_v7 = vld [vmem:[#allocation13 + $0x80] sm:$0xff] }
 0x6e7   : > { %7325 = vmatpush2.msra.mxu0 %v7204_v26  ;;  %7396 = vmatpush2.msra.mxu1 %v7268_v19  ;;  %v7248_v26 = vunpack.c.l.bf16 %v7080_v29  ;;  %v7046_v19 = vld [vmem:[#allocation2 + $0x140] sm:$0xff]  ;;  %v7449_v29 = vld [vmem:[#allocation13 + $0x78] sm:$0xff] }
 0x6e8   : > { %7326 = vmatprep.subr.mxu0 %v7203_v33  ;;  %7397 = vmatprep.subr.mxu1 %v7267_v61  ;;  %v7183_v33 = vunpack.c.h.bf16 %v7047_v34  ;;  %v7247_v61 = vunpack.c.h.bf16 %v7079_v62  ;;  %v7180_v28 = vunpack.c.l.bf16 %v7046_v19 }
 0x6e9   : > { %7327 = vmatpush2.msra.mxu0 %v7202_v37  ;;  %7398 = vmatpush2.msra.mxu1 %v7266_v6  ;;  %v7182_v37 = vunpack.c.l.bf16 %v7047_v34  ;;  %v7246_v6 = vunpack.c.l.bf16 %v7079_v62  ;;  %v7444_v34 = vld [vmem:[#allocation13 + $0x50] sm:$0xff]  ;;  %v7443_v62 = vld [vmem:[#allocation13 + $0x48] sm:$0xff] }
 0x6ea   : > { %7328 = vmatprep.subr.mxu0 %v7201_v30  ;;  %7399 = vmatprep.subr.mxu1 %v7265_v9  ;;  %v17250_v30 = vld [vmem:[#allocation40_spill] sm:$0xff] }
 0x6eb   : > { %7329 = vmatpush2.msra.mxu0 %v7200_v43  ;;  %7400 = vmatpush2.msra.mxu1 %v7264_v48  ;;  %v7277_v9 = vsub.s32 %v7274_v21, %v17250_v30  ;;  %v7181_v43 = vunpack.c.h.bf16 %v7046_v19  ;;  %v7245_v48 = vunpack.c.h.bf16 %v7078_v40  ;;  %v7442_v21 = vld [vmem:[#allocation13 + $0x40] sm:$0xff]  ;;  %v7437_v19 = vld [vmem:[#allocation13 + $0x18] sm:$0xff]  ;;  %v7492_v30 = vld [vmem:[#allocation13 + $0x1d0] sm:$0xff] }
 0x6ec   : > { %7330 = vmatprep.subr.mxu0 %v7199_v25  ;;  %7401 = vmatprep.subr.mxu1 %v7263_v1  ;;  %v7244_v25 = vunpack.c.l.bf16 %v7078_v40  ;;  %v7044_v1 = vld [vmem:[#allocation2 + $0x188] sm:$0xff] }
 0x6ed   : > { %7331 = vmatpush2.msra.mxu0 %v7198_v44  ;;  %7402 = vmatpush2.msra.mxu1 %v7262_v45  ;;  %v7076_v44 = vld [vmem:[#allocation2 + $0x88] sm:$0xff]  ;;  %v7179_v45 = vunpack.c.h.bf16 %v7045_v51  ;;  %v7177_v4 = vunpack.c.h.bf16 %v7044_v1  ;;  %v7494_v51 = vld [vmem:[#allocation13 + $0x1e0] sm:$0xff] }
 0x6ee   : > { %7332 = vmatprep.subr.mxu0 %v7197_v24  ;;  %7403 = vmatprep.subr.mxu1 %v7261_v55  ;;  %v7242_v24 = vunpack.c.l.bf16 %v7077_v41  ;;  %v7043_v55 = vld [vmem:[#allocation2 + $0xe0] sm:$0xff]  ;;  %v7241_v42 = vunpack.c.h.bf16 %v7076_v44  ;;  %v7436_v40 = vld [vmem:[#allocation13 + $0x10] sm:$0xff]  ;;  %v7493_v41 = vld [vmem:[#allocation13 + $0x1d8] sm:$0xff] }
 0x6ef   : > { %7333 = vmatpush2.msra.mxu0 %v7196_v60  ;;  %7404 = vmatpush2.msra.mxu1 %v7260_v49  ;;  %v7075_v60 = vld [vmem:[#allocation2 + $0xb8] sm:$0xff]  ;;  %v7278_v49 = vrot.slane %v7091_v35, %v7277_v9  ;;  %v7174_v63 = vunpack.c.l.bf16 %v7043_v55  ;;  %v7435_v35 = vld [vmem:[#allocation13 + $0x8] sm:$0xff] }
 0x6f0   : > { %7334 = vmatprep.subr.mxu0 %v7195_v39  ;;  %7405 = vmatprep.subr.mxu1 %v7259_v56  ;;  %v7285_v39 = vrot.slane %v7271_v17, %v7277_v9  ;;  %v7176_v56 = vunpack.c.l.bf16 %v7044_v1  ;;  %v7239_v27 = vunpack.c.h.bf16 %v7075_v60  ;;  %v7491_v9 = vld [vmem:[#allocation13 + $0x1c8] sm:$0xff]  ;;  %v7488_v17 = vld [vmem:[#allocation13 + $0x1b0] sm:$0xff]  ;;  %v7485_v1 = vld [vmem:[#allocation13 + $0x198] sm:$0xff] }
 0x6f1   : > { %7335 = vmatpush2.msra.mxu0 %v7194_v15  ;;  %7406 = vmatpush2.msra.mxu1 %v7258_v57  ;;  %v7240_v15 = vunpack.c.l.bf16 %v7076_v44  ;;  %v7175_v57 = vunpack.c.h.bf16 %v7043_v55  ;;  %v7484_v44 = vld [vmem:[#allocation13 + $0x190] sm:$0xff]  ;;  %v7479_v55 = vld [vmem:[#allocation13 + $0x168] sm:$0xff] }
 0x6f2   : > { %7336 = vmatprep.subr.mxu0 %v7193_v14  ;;  %7407 = vmatprep.subr.mxu1 %v7257_v22  ;;  %v7286_v14 = vcombine.high %v7278_v49, %v7278_v49  ;;  %v7238_v22 = vunpack.c.l.bf16 %v7075_v60  ;;  %v7478_v60 = vld [vmem:[#allocation13 + $0x160] sm:$0xff] }
 0x6f3   : > { %7337 = vmatpush2.msra.mxu0 %v7192_v20  ;;  %7408 = vmatpush2.msra.mxu1 %v7256_v11  ;;  %v7287_v20 = vcombine.high %v7285_v39, %v7285_v39  ;;  %v7465_v11 = vld [vmem:[#allocation13 + $0xf8] sm:$0xff] }
 0x6f4   : > { %7338 = vmatprep.subr.mxu0 %v7191_v5  ;;  %7409 = vmatprep.subr.mxu1 %v7255_v2  ;;  %v7462_v5 = vld [vmem:[#allocation13 + $0xe0] sm:$0xff]  ;;  %v7461_v2 = vld [vmem:[#allocation13 + $0xd8] sm:$0xff] }
 0x6f5   : > { %7339 = vmatpush2.msra.mxu0 %v7190_v52  ;;  %7410 = vmatpush2.msra.mxu1 %v7254_v0  ;;  %v7460_v52 = vld [vmem:[#allocation13 + $0xd0] sm:$0xff]  ;;  %v7459_v0 = vld [vmem:[#allocation13 + $0xc8] sm:$0xff] }
 0x6f6   : > { %7340 = vmatprep.subr.mxu0 %v7189_v23  ;;  %7411 = vmatprep.subr.mxu1 %v7253_v16  ;;  %v7454_v23 = vld [vmem:[#allocation13 + $0xa0] sm:$0xff]  ;;  %v7453_v16 = vld [vmem:[#allocation13 + $0x98] sm:$0xff] }
 0x6f7   : > { %7341 = vmatpush2.msra.mxu0 %v7188_v53  ;;  %7412 = vmatpush2.msra.mxu1 %v7252_v36  ;;  %v7452_v53 = vld [vmem:[#allocation13 + $0x90] sm:$0xff]  ;;  %v7451_v36 = vld [vmem:[#allocation13 + $0x88] sm:$0xff] }
 0x6f8   : > { %7342 = vmatprep.subr.mxu0 %v7187_v59  ;;  %7413 = vmatprep.subr.mxu1 %v7251_v46  ;;  %v7448_v59 = vld [vmem:[#allocation13 + $0x70] sm:$0xff]  ;;  %v7447_v46 = vld [vmem:[#allocation13 + $0x68] sm:$0xff] }
 0x6f9   : > { %7343 = vmatpush2.msra.mxu0 %v7186_v8  ;;  %7414 = vmatpush2.msra.mxu1 %v7250_v38  ;;  %v7446_v8 = vld [vmem:[#allocation13 + $0x60] sm:$0xff]  ;;  %v7445_v38 = vld [vmem:[#allocation13 + $0x58] sm:$0xff] }
 0x6fa   : > { %7344 = vmatprep.subr.mxu0 %v7185_v13  ;;  %7415 = vmatprep.subr.mxu1 %v7249_v50  ;;  %v7441_v13 = vld [vmem:[#allocation13 + $0x38] sm:$0xff]  ;;  %v7440_v50 = vld [vmem:[#allocation13 + $0x30] sm:$0xff] }
 0x6fb   : > { %7345 = vmatpush2.msra.mxu0 %v7184_v10  ;;  %7416 = vmatpush2.msra.mxu1 %v7248_v26  ;;  %v7439_v10 = vld [vmem:[#allocation13 + $0x28] sm:$0xff]  ;;  %v7438_v26 = vld [vmem:[#allocation13 + $0x20] sm:$0xff] }
 0x6fc   : > { %7346 = vmatprep.subr.mxu0 %v7183_v33  ;;  %7417 = vmatprep.subr.mxu1 %v7247_v61  ;;  %v7434_v33 = vld [vmem:[#allocation13] sm:$0xff]  ;;  %v7497_v61 = vld [vmem:[#allocation13 + $0x1f8] sm:$0xff] }
 0x6fd   : > { %7347 = vmatpush2.msra.mxu0 %v7182_v37  ;;  %7418 = vmatpush2.msra.mxu1 %v7246_v6  ;;  %v7496_v37 = vld [vmem:[#allocation13 + $0x1f0] sm:$0xff]  ;;  %v7495_v6 = vld [vmem:[#allocation13 + $0x1e8] sm:$0xff] }
 0x6fe   : > { %7348 = vmatprep.subr.mxu0 %v7181_v43  ;;  %7419 = vmatprep.subr.mxu1 %v7245_v48  ;;  %v7490_v43 = vld [vmem:[#allocation13 + $0x1c0] sm:$0xff]  ;;  %v7489_v48 = vld [vmem:[#allocation13 + $0x1b8] sm:$0xff] }
 0x6ff   : > { %7349 = vmatpush2.msra.mxu0 %v7180_v28  ;;  %7420 = vmatpush2.msra.mxu1 %v7244_v25  ;;  %v7487_v28 = vld [vmem:[#allocation13 + $0x1a8] sm:$0xff]  ;;  %v7486_v25 = vld [vmem:[#allocation13 + $0x1a0] sm:$0xff] }
 0x700   : > { %7350 = vmatprep.subr.mxu0 %v7179_v45  ;;  %7421 = vmatprep.subr.mxu1 %v7243_v31  ;;  %v7483_v45 = vld [vmem:[#allocation13 + $0x188] sm:$0xff]  ;;  %v7482_v31 = vld [vmem:[#allocation13 + $0x180] sm:$0xff] }
 0x701   : > { %7351 = vmatpush2.msra.mxu0 %v7178_v58  ;;  %7422 = vmatpush2.msra.mxu1 %v7242_v24  ;;  %v7481_v58 = vld [vmem:[#allocation13 + $0x178] sm:$0xff]  ;;  %v7480_v24 = vld [vmem:[#allocation13 + $0x170] sm:$0xff] }
 0x702   : > { %7352 = vmatprep.subr.mxu0 %v7177_v4  ;;  %7423 = vmatprep.subr.mxu1 %v7241_v42  ;;  %v7476_v4 = vld [vmem:[#allocation13 + $0x150] sm:$0xff]  ;;  %v7475_v42 = vld [vmem:[#allocation13 + $0x148] sm:$0xff] }
 0x703   : > { %7353 = vmatpush2.msra.mxu0 %v7176_v56  ;;  %7424 = vmatpush2.msra.mxu1 %v7240_v15  ;;  %v7473_v56 = vld [vmem:[#allocation13 + $0x138] sm:$0xff]  ;;  %v7472_v15 = vld [vmem:[#allocation13 + $0x130] sm:$0xff] }
 0x704   : > { %7354 = vmatprep.subr.mxu0 %v7175_v57  ;;  %7425 = vmatprep.subr.mxu1 %v7239_v27  ;;  %v7471_v57 = vld [vmem:[#allocation13 + $0x128] sm:$0xff]  ;;  %v7470_v27 = vld [vmem:[#allocation13 + $0x120] sm:$0xff] }
 0x705   : > { %7355 = vmatpush2.msra.mxu0 %v7174_v63  ;;  %7356 = vmatprep.mubr.f32.mxu0 %v7286_v14  ;;  %v7469_v63 = vld [vmem:[#allocation13 + $0x118] sm:$0xff]  ;;  %v7468_v14 = vld [vmem:[#allocation13 + $0x110] sm:$0xff] }
 0x706   : > { %7426 = vmatpush2.msra.mxu1 %v7238_v22  ;;  %7427 = vmatprep.mubr.f32.mxu1 %v7287_v20  ;;  %v7467_v22 = vld [vmem:[#allocation13 + $0x108] sm:$0xff]  ;;  %v7466_v20 = vld [vmem:[#allocation13 + $0x100] sm:$0xff] }
 0x707   : > { %7357 = vmatmul.mubr.f32.vlgmr.msra.gmra.mxu0 %v7278_v49  ;;  %7428 = vmatmul.mubr.f32.vlgmr.msra.gmra.mxu1 %v7285_v39  ;;  %v7477_v49 = vld [vmem:[#allocation13 + $0x158] sm:$0xff]  ;;  %v7474_v39 = vld [vmem:[#allocation13 + $0x140] sm:$0xff] }
 0x708   : > { %7498 = vmatprep.subr.mxu0 %v7465_v11  ;;  %v7676_v11 = vld [vmem:[#allocation13 + $0x2f8] sm:$0xff] }
 0x709   : > { %7499 = vmatpush1.msra.mxu0 %v7464_v32  ;;  %v7675_v32 = vld [vmem:[#allocation13 + $0x2f0] sm:$0xff]  ;;  %7709 = vmatprep.subr.mxu1 %v7676_v11  ;;  %v7682_v11 = vld [vmem:[#allocation13 + $0x328] sm:$0xff] }
 0x70a   : > { %7500 = vmatprep.subr.mxu0 %v7463_v18  ;;  %7710 = vmatpush1.msra.mxu1 %v7675_v32  ;;  %v7681_v32 = vld [vmem:[#allocation13 + $0x320] sm:$0xff] }
 0x70b   : > { %7501 = vmatpush1.msra.mxu0 %v7462_v5 }
 0x70c   : > { %7502 = vmatprep.subr.mxu0 %v7461_v2 }
 0x70d   : > { %7503 = vmatpush1.msra.mxu0 %v7460_v52 }
 0x70e   : > { %7504 = vmatprep.subr.mxu0 %v7459_v0 }
 0x70f   : > { %7505 = vmatpush1.msra.mxu0 %v7458_v47 }
 0x710   : > { %7506 = vmatprep.subr.mxu0 %v7457_v12  ;;  %v7674_v12 = vld [vmem:[#allocation13 + $0x2e8] sm:$0xff] }
 0x711   : > { %7507 = vmatpush1.msra.mxu0 %v7456_v3  ;;  %7711 = vmatprep.subr.mxu1 %v7674_v12  ;;  %v7673_v3 = vld [vmem:[#allocation13 + $0x2e0] sm:$0xff] }
 0x712   : > { %7508 = vmatprep.subr.mxu0 %v7455_v54  ;;  %7712 = vmatpush1.msra.mxu1 %v7673_v3  ;;  %v7672_v54 = vld [vmem:[#allocation13 + $0x2d8] sm:$0xff] }
 0x713   : > { %7509 = vmatpush1.msra.mxu0 %v7454_v23  ;;  %7713 = vmatprep.subr.mxu1 %v7672_v54  ;;  %v7671_v23 = vld [vmem:[#allocation13 + $0x2d0] sm:$0xff] }
 0x714   : > { %7510 = vmatprep.subr.mxu0 %v7453_v16  ;;  %7714 = vmatpush1.msra.mxu1 %v7671_v23  ;;  %v7670_v16 = vld [vmem:[#allocation13 + $0x2c8] sm:$0xff] }
 0x715   : > { %7511 = vmatpush1.msra.mxu0 %v7452_v53  ;;  %7715 = vmatprep.subr.mxu1 %v7670_v16  ;;  %v7669_v53 = vld [vmem:[#allocation13 + $0x2c0] sm:$0xff] }
 0x716   : > { %7512 = vmatprep.subr.mxu0 %v7451_v36  ;;  %7716 = vmatpush1.msra.mxu1 %v7669_v53  ;;  %v7668_v36 = vld [vmem:[#allocation13 + $0x2b8] sm:$0xff] }
 0x717   : > { %7513 = vmatpush1.msra.mxu0 %v7450_v7  ;;  %7717 = vmatprep.subr.mxu1 %v7668_v36  ;;  %v7667_v7 = vld [vmem:[#allocation13 + $0x2b0] sm:$0xff] }
 0x718   : > { %7514 = vmatprep.subr.mxu0 %v7449_v29  ;;  %7718 = vmatpush1.msra.mxu1 %v7667_v7  ;;  %v7666_v29 = vld [vmem:[#allocation13 + $0x2a8] sm:$0xff] }
 0x719   : > { %7515 = vmatpush1.msra.mxu0 %v7448_v59  ;;  %7719 = vmatprep.subr.mxu1 %v7666_v29  ;;  %v7665_v59 = vld [vmem:[#allocation13 + $0x2a0] sm:$0xff] }
 0x71a   : > { %7516 = vmatprep.subr.mxu0 %v7447_v46  ;;  %7720 = vmatpush1.msra.mxu1 %v7665_v59  ;;  %v7664_v46 = vld [vmem:[#allocation13 + $0x298] sm:$0xff] }
 0x71b   : > { %7517 = vmatpush1.msra.mxu0 %v7446_v8  ;;  %7721 = vmatprep.subr.mxu1 %v7664_v46  ;;  %v7663_v8 = vld [vmem:[#allocation13 + $0x290] sm:$0xff] }
 0x71c   : > { %7518 = vmatprep.subr.mxu0 %v7445_v38  ;;  %7722 = vmatpush1.msra.mxu1 %v7663_v8  ;;  %v7662_v38 = vld [vmem:[#allocation13 + $0x288] sm:$0xff] }
 0x71d   : > { %7519 = vmatpush1.msra.mxu0 %v7444_v34  ;;  %7723 = vmatprep.subr.mxu1 %v7662_v38  ;;  %v7661_v34 = vld [vmem:[#allocation13 + $0x280] sm:$0xff] }
 0x71e   : > { %7520 = vmatprep.subr.mxu0 %v7443_v62  ;;  %7724 = vmatpush1.msra.mxu1 %v7661_v34  ;;  %v7660_v62 = vld [vmem:[#allocation13 + $0x278] sm:$0xff] }
 0x71f   : > { %7521 = vmatpush1.msra.mxu0 %v7442_v21  ;;  %7725 = vmatprep.subr.mxu1 %v7660_v62  ;;  %v7659_v21 = vld [vmem:[#allocation13 + $0x270] sm:$0xff] }
 0x720   : > { %7522 = vmatprep.subr.mxu0 %v7441_v13  ;;  %7726 = vmatpush1.msra.mxu1 %v7659_v21  ;;  %v7658_v13 = vld [vmem:[#allocation13 + $0x268] sm:$0xff] }
 0x721   : > { %7523 = vmatpush1.msra.mxu0 %v7440_v50  ;;  %7727 = vmatprep.subr.mxu1 %v7658_v13  ;;  %v7657_v50 = vld [vmem:[#allocation13 + $0x260] sm:$0xff] }
 0x722   : > { %7524 = vmatprep.subr.mxu0 %v7439_v10  ;;  %7728 = vmatpush1.msra.mxu1 %v7657_v50  ;;  %v7656_v10 = vld [vmem:[#allocation13 + $0x258] sm:$0xff] }
 0x723   : > { %7525 = vmatpush1.msra.mxu0 %v7438_v26  ;;  %7729 = vmatprep.subr.mxu1 %v7656_v10  ;;  %v7655_v26 = vld [vmem:[#allocation13 + $0x250] sm:$0xff] }
 0x724   : > { %7526 = vmatprep.subr.mxu0 %v7437_v19  ;;  %7730 = vmatpush1.msra.mxu1 %v7655_v26  ;;  %v7654_v19 = vld [vmem:[#allocation13 + $0x248] sm:$0xff] }
 0x725   : > { %7527 = vmatpush1.msra.mxu0 %v7436_v40  ;;  %7731 = vmatprep.subr.mxu1 %v7654_v19  ;;  %v7653_v40 = vld [vmem:[#allocation13 + $0x240] sm:$0xff] }
 0x726   : > { %7528 = vmatprep.subr.mxu0 %v7435_v35  ;;  %7732 = vmatpush1.msra.mxu1 %v7653_v40  ;;  %v7652_v35 = vld [vmem:[#allocation13 + $0x238] sm:$0xff] }
 0x727   : > { %7529 = vmatpush1.msra.mxu0 %v7434_v33  ;;  %7733 = vmatprep.subr.mxu1 %v7652_v35  ;;  %v7651_v33 = vld [vmem:[#allocation13 + $0x230] sm:$0xff] }
 0x728   : > { %7530 = vmatprep.subr.mxu0 %v7497_v61  ;;  %7734 = vmatpush1.msra.mxu1 %v7651_v33  ;;  %v7650_v61 = vld [vmem:[#allocation13 + $0x228] sm:$0xff] }
 0x729   : > { %7531 = vmatpush2.msra.mxu0 %v7496_v37  ;;  %7735 = vmatprep.subr.mxu1 %v7650_v61  ;;  %v7649_v37 = vld [vmem:[#allocation13 + $0x220] sm:$0xff] }
 0x72a   : > { %7532 = vmatprep.subr.mxu0 %v7495_v6  ;;  %7736 = vmatpush1.msra.mxu1 %v7649_v37  ;;  %v7648_v6 = vld [vmem:[#allocation13 + $0x218] sm:$0xff] }
 0x72b   : > { %7533 = vmatpush2.msra.mxu0 %v7494_v51  ;;  %7737 = vmatprep.subr.mxu1 %v7648_v6  ;;  %v7647_v51 = vld [vmem:[#allocation13 + $0x210] sm:$0xff] }
 0x72c   : > { %7534 = vmatprep.subr.mxu0 %v7493_v41  ;;  %7738 = vmatpush1.msra.mxu1 %v7647_v51  ;;  %v7646_v41 = vld [vmem:[#allocation13 + $0x208] sm:$0xff] }
 0x72d   : > { %7535 = vmatpush2.msra.mxu0 %v7492_v30  ;;  %7739 = vmatprep.subr.mxu1 %v7646_v41  ;;  %v7645_v30 = vld [vmem:[#allocation13 + $0x200] sm:$0xff] }
 0x72e   : > { %7536 = vmatprep.subr.mxu0 %v7491_v9  ;;  %7740 = vmatpush1.msra.mxu1 %v7645_v30  ;;  %v7708_v9 = vld [vmem:[#allocation13 + $0x3f8] sm:$0xff] }
 0x72f   : > { %7537 = vmatpush2.msra.mxu0 %v7490_v43  ;;  %7741 = vmatprep.subr.mxu1 %v7708_v9  ;;  %v7707_v43 = vld [vmem:[#allocation13 + $0x3f0] sm:$0xff] }
 0x730   : > { %7538 = vmatprep.subr.mxu0 %v7489_v48  ;;  %7742 = vmatpush2.msra.mxu1 %v7707_v43  ;;  %v7706_v48 = vld [vmem:[#allocation13 + $0x3e8] sm:$0xff] }
 0x731   : > { %7539 = vmatpush2.msra.mxu0 %v7488_v17  ;;  %7743 = vmatprep.subr.mxu1 %v7706_v48  ;;  %v7705_v17 = vld [vmem:[#allocation13 + $0x3e0] sm:$0xff] }
 0x732   : > { %7540 = vmatprep.subr.mxu0 %v7487_v28  ;;  %7744 = vmatpush2.msra.mxu1 %v7705_v17  ;;  %v7704_v28 = vld [vmem:[#allocation13 + $0x3d8] sm:$0xff] }
 0x733   : > { %7541 = vmatpush2.msra.mxu0 %v7486_v25  ;;  %7745 = vmatprep.subr.mxu1 %v7704_v28  ;;  %v7703_v25 = vld [vmem:[#allocation13 + $0x3d0] sm:$0xff] }
 0x734   : > { %7542 = vmatprep.subr.mxu0 %v7485_v1  ;;  %7746 = vmatpush2.msra.mxu1 %v7703_v25  ;;  %v7702_v1 = vld [vmem:[#allocation13 + $0x3c8] sm:$0xff] }
 0x735   : > { %7543 = vmatpush2.msra.mxu0 %v7484_v44  ;;  %7747 = vmatprep.subr.mxu1 %v7702_v1  ;;  %v7701_v44 = vld [vmem:[#allocation13 + $0x3c0] sm:$0xff] }
 0x736   : > { %7544 = vmatprep.subr.mxu0 %v7483_v45  ;;  %7748 = vmatpush2.msra.mxu1 %v7701_v44  ;;  %v7700_v45 = vld [vmem:[#allocation13 + $0x3b8] sm:$0xff] }
 0x737   : > { %7545 = vmatpush2.msra.mxu0 %v7482_v31  ;;  %7749 = vmatprep.subr.mxu1 %v7700_v45  ;;  %v7699_v31 = vld [vmem:[#allocation13 + $0x3b0] sm:$0xff] }
 0x738   : > { %7546 = vmatprep.subr.mxu0 %v7481_v58  ;;  %7750 = vmatpush2.msra.mxu1 %v7699_v31  ;;  %v7698_v58 = vld [vmem:[#allocation13 + $0x3a8] sm:$0xff] }
 0x739   : > { %7547 = vmatpush2.msra.mxu0 %v7480_v24  ;;  %7751 = vmatprep.subr.mxu1 %v7698_v58  ;;  %v7697_v24 = vld [vmem:[#allocation13 + $0x3a0] sm:$0xff] }
 0x73a   : > { %7548 = vmatprep.subr.mxu0 %v7479_v55  ;;  %7752 = vmatpush2.msra.mxu1 %v7697_v24  ;;  %v7696_v55 = vld [vmem:[#allocation13 + $0x398] sm:$0xff]  ;;  %v7569_v58 = vld [vmem:[#allocation15] ss:$2 sm:$0x3] }
 0x73b   : > { %7549 = vmatpush2.msra.mxu0 %v7478_v60  ;;  %7753 = vmatprep.subr.mxu1 %v7696_v55  ;;  %v7695_v60 = vld [vmem:[#allocation13 + $0x390] sm:$0xff]  ;;  %v17251_v24 = vld [vmem:[#allocation42_spill] sm:$0xff] }
 0x73c   : > { %7550 = vmatprep.subr.mxu0 %v7477_v49  ;;  %7754 = vmatpush2.msra.mxu1 %v7695_v60  ;;  %v7694_v49 = vld [vmem:[#allocation13 + $0x388] sm:$0xff]  ;;  %v7620_v55 = vrot.slane %v7569_v58, %v17251_v24  ;;  %v7571_v60 = vld [vmem:[#allocation15 + $0x1] ss:$2 sm:$0x3] }
 0x73d   : > { %7551 = vmatpush2.msra.mxu0 %v7476_v4  ;;  %7755 = vmatprep.subr.mxu1 %v7694_v49  ;;  %v7693_v4 = vld [vmem:[#allocation13 + $0x380] sm:$0xff] }
 0x73e   : > { %7552 = vmatprep.subr.mxu0 %v7475_v42  ;;  %7756 = vmatpush2.msra.mxu1 %v7693_v4  ;;  %v7692_v42 = vld [vmem:[#allocation13 + $0x378] sm:$0xff] }
 0x73f   : > { %7553 = vmatpush2.msra.mxu0 %v7474_v39  ;;  %7757 = vmatprep.subr.mxu1 %v7692_v42  ;;  %v7691_v39 = vld [vmem:[#allocation13 + $0x370] sm:$0xff]  ;;  %v17252_v42 = vld [vmem:[#allocation38_spill] sm:$0xff] }
 0x740   : > { %7554 = vmatprep.subr.mxu0 %v7473_v56  ;;  %7758 = vmatpush2.msra.mxu1 %v7691_v39  ;;  %v7690_v56 = vld [vmem:[#allocation13 + $0x368] sm:$0xff]  ;;  %v7624_v39 = vrot.slane %v7569_v58, %v17252_v42  ;;  %v7902_v58 = vld [vmem:[#allocation13 + $0x578] sm:$0xff] }
 0x741   : > { %7555 = vmatpush2.msra.mxu0 %v7472_v15  ;;  %7759 = vmatprep.subr.mxu1 %v7690_v56  ;;  %v7689_v15 = vld [vmem:[#allocation13 + $0x360] sm:$0xff] }
 0x742   : > { %7556 = vmatprep.subr.mxu0 %v7471_v57  ;;  %7760 = vmatpush2.msra.mxu1 %v7689_v15  ;;  %v7688_v57 = vld [vmem:[#allocation13 + $0x358] sm:$0xff]  ;;  %v7633_v15 = vrot.slane %v7571_v60, %v17251_v24 }
 0x743   : > { %7557 = vmatpush2.msra.mxu0 %v7470_v27  ;;  %7761 = vmatprep.subr.mxu1 %v7688_v57  ;;  %v7687_v27 = vld [vmem:[#allocation13 + $0x350] sm:$0xff] }
 0x744   : > { %7558 = vmatprep.subr.mxu0 %v7469_v63  ;;  %7762 = vmatpush2.msra.mxu1 %v7687_v27  ;;  %v7686_v63 = vld [vmem:[#allocation13 + $0x348] sm:$0xff] }
 0x745   : > { %7559 = vmatpush2.msra.mxu0 %v7468_v14  ;;  %7763 = vmatprep.subr.mxu1 %v7686_v63  ;;  %v7685_v14 = vld [vmem:[#allocation13 + $0x340] sm:$0xff]  ;;  %v7637_v63 = vrot.slane %v7571_v60, %v17252_v42  ;;  %v7900_v60 = vld [vmem:[#allocation13 + $0x568] sm:$0xff] }
 0x746   : > { %7560 = vmatprep.subr.mxu0 %v7467_v22  ;;  %7764 = vmatpush2.msra.mxu1 %v7685_v14  ;;  %v7684_v22 = vld [vmem:[#allocation13 + $0x338] sm:$0xff] }
 0x747   : > { %7561 = vmatpush2.msra.mxu0 %v7466_v20  ;;  %7765 = vmatprep.subr.mxu1 %v7684_v22  ;;  %v7683_v20 = vld [vmem:[#allocation13 + $0x330] sm:$0xff] }
 0x748   : > { %7766 = vmatpush2.msra.mxu1 %v7683_v20 }
 0x749   : > { %7767 = vmatprep.subr.mxu1 %v7682_v11 }
 0x74a   : > { %7768 = vmatpush2.msra.mxu1 %v7681_v32 }
 0x7c7   : > { %v7358_v18 = vpop.f32.mrf.mxu0  ;;  %v7429_v5 = vpop.f32.mrf.mxu1 }
 0x7c8   : > { %v7430_v47 = vadd.f32 %v7429_v5, %v7358_v18  ;;  %v7680_v18 = vld [vmem:[#allocation13 + $0x318] sm:$0xff]  ;;  %v7679_v5 = vld [vmem:[#allocation13 + $0x310] sm:$0xff] }
 0x7c9   : > { %v7360_v2 = vpop.f32.mrf.mxu0  ;;  %v7431_v52 = vpop.f32.mrf.mxu1  ;;  %7769 = vmatprep.subr.mxu1 %v7680_v18  ;;  %v7884_v18 = vld [vmem:[#allocation13 + $0x4e8] sm:$0xff] }
 0x7ca   : > { %v7432_v0 = vadd.f32 %v7431_v52, %v7360_v2  ;;  %v7678_v2 = vld [vmem:[#allocation13 + $0x308] sm:$0xff]  ;;  %v7677_v52 = vld [vmem:[#allocation13 + $0x300] sm:$0xff]  ;;  %7770 = vmatpush2.msra.mxu1 %v7679_v5 }
 0x7cb   : > { %7771 = vmatprep.subr.mxu1 %v7678_v2  ;;  %v7883_v5 = vld [vmem:[#allocation13 + $0x4e0] sm:$0xff]  ;;  %v7882_v2 = vld [vmem:[#allocation13 + $0x4d8] sm:$0xff] }
 0x7cc   : > { %7562 = vmatprep.mubr.f32.mxu0 %v7432_v0  ;;  %7772 = vmatpush2.msra.mxu1 %v7677_v52  ;;  %v7886_v0 = vld [vmem:[#allocation13 + $0x4f8] sm:$0xff]  ;;  %v7881_v52 = vld [vmem:[#allocation13 + $0x4d0] sm:$0xff] }
 0x7cd   : > { %7563 = vmatmul.mubr.f32.vlgmr.msra.gmra.mxu0 %v7430_v47  ;;  %v7885_v47 = vld [vmem:[#allocation13 + $0x4f0] sm:$0xff]  ;;  %7919 = vmatprep.subr.mxu0 %v7886_v0  ;;  %v7880_v0 = vld [vmem:[#allocation13 + $0x4c8] sm:$0xff] }
 0x7ce   : > { %7920 = vmatpush1.msra.mxu0 %v7885_v47  ;;  %v7879_v47 = vld [vmem:[#allocation13 + $0x4c0] sm:$0xff] }
 0x7cf   : > { %7921 = vmatprep.subr.mxu0 %v7884_v18 }
 0x7d0   : > { %7922 = vmatpush1.msra.mxu0 %v7883_v5 }
 0x7d1   : > { %7923 = vmatprep.subr.mxu0 %v7882_v2 }
 0x7d2   : > { %7924 = vmatpush1.msra.mxu0 %v7881_v52 }
 0x7d3   : > { %7925 = vmatprep.subr.mxu0 %v7880_v0 }
 0x7d4   : > { %7926 = vmatpush1.msra.mxu0 %v7879_v47 }
 0x88d   : > { %v7564_v12 = vpop.f32.mrf.mxu0 }
 0x88e   : > { %v7573_v3 = vsel %vm7572_vm0, %v7564_v12, 0.0 }
 0x88f   : > { %v7574_v54 = vrot.slane %v7573_v3, 4  ;;  %v7566_v23 = vpop.f32.mrf.mxu0 }
 0x890   : > { %v7580_v16 = vsel %vm7572_vm0, %v7566_v23, 0.0 }
 0x891   : > { %v7575_v53 = vadd.f32 %v7574_v54, %v7573_v3  ;;  %v7581_v36 = vrot.slane %v7580_v16, 4  ;;  %v7877_v3 = vld [vmem:[#allocation13 + $0x4b0] sm:$0xff]  ;;  %v7876_v54 = vld [vmem:[#allocation13 + $0x4a8] sm:$0xff] }
 0x893   : > { %v7576_v7 = vrot.slane %v7575_v53, 2  ;;  %v7582_v29 = vadd.f32 %v7581_v36, %v7580_v16  ;;  %v7874_v16 = vld [vmem:[#allocation13 + $0x498] sm:$0xff]  ;;  %v7872_v36 = vld [vmem:[#allocation13 + $0x488] sm:$0xff] }
 0x895   : > { %v7577_v59 = vadd.f32 %v7576_v7, %v7575_v53  ;;  %v7583_v46 = vrot.slane %v7582_v29, 2  ;;  %v7873_v53 = vld [vmem:[#allocation13 + $0x490] sm:$0xff]  ;;  %v7871_v7 = vld [vmem:[#allocation13 + $0x480] sm:$0xff] }
 0x897   : > { %v7578_v8 = vrot.slane %v7577_v59, 1  ;;  %v7584_v38 = vadd.f32 %v7583_v46, %v7582_v29  ;;  %v7870_v29 = vld [vmem:[#allocation13 + $0x478] sm:$0xff]  ;;  %v7868_v46 = vld [vmem:[#allocation13 + $0x468] sm:$0xff] }
 0x899   : > { %v7579_v34 = vadd.f32 %v7578_v8, %v7577_v59  ;;  %v7585_v62 = vrot.slane %v7584_v38, 1  ;;  %v7869_v59 = vld [vmem:[#allocation13 + $0x470] sm:$0xff]  ;;  %v7867_v8 = vld [vmem:[#allocation13 + $0x460] sm:$0xff] }
 0x89b   : > { %v7588_v21 = vmul.f32 0.5, %v7579_v34  ;;  %v7586_v13 = vadd.f32 %v7585_v62, %v7584_v38  ;;  %v7866_v38 = vld [vmem:[#allocation13 + $0x458] sm:$0xff]  ;;  %v7865_v34 = vld [vmem:[#allocation13 + $0x450] sm:$0xff]  ;;  %v7864_v62 = vld [vmem:[#allocation13 + $0x448] sm:$0xff] }
 0x89d   : > { %v7590_v50 = vsub.f32 %v7564_v12, %v7588_v21  ;;  %v7589_v10 = vmul.f32 0.5, %v7586_v13  ;;  %v7878_v12 = vld [vmem:[#allocation13 + $0x4b8] sm:$0xff]  ;;  %v7863_v21 = vld [vmem:[#allocation13 + $0x440] sm:$0xff] }
 0x89e   : > { %7927 = vmatprep.subr.mxu0 %v7878_v12  ;;  %v7862_v13 = vld [vmem:[#allocation13 + $0x438] sm:$0xff] }
 0x89f   : > { %v7592_v26 = vmul.f32 %v7590_v50, %v7590_v50  ;;  %v7591_v19 = vsub.f32 %v7566_v23, %v7589_v10  ;;  %7928 = vmatpush1.msra.mxu0 %v7877_v3  ;;  %v7875_v23 = vld [vmem:[#allocation13 + $0x4a0] sm:$0xff]  ;;  %v7860_v10 = vld [vmem:[#allocation13 + $0x428] sm:$0xff] }
 0x8a0   : > { %7929 = vmatprep.subr.mxu0 %v7876_v54 }
 0x8a1   : > { %v7594_v40 = vsel %vm7572_vm0, %v7592_v26, 0.0  ;;  %v7593_v35 = vmul.f32 %v7591_v19, %v7591_v19  ;;  %7930 = vmatpush1.msra.mxu0 %v7875_v23  ;;  %v7859_v26 = vld [vmem:[#allocation13 + $0x420] sm:$0xff] }
 0x8a2   : > { %v7595_v33 = vrot.slane %v7594_v40, 4  ;;  %7931 = vmatprep.subr.mxu0 %v7874_v16 }
 0x8a3   : > { %v7601_v61 = vsel %vm7572_vm0, %v7593_v35, 0.0  ;;  %7932 = vmatpush1.msra.mxu0 %v7873_v53  ;;  %v7856_v35 = vld [vmem:[#allocation13 + $0x408] sm:$0xff] }
 0x8a4   : > { %v7596_v37 = vadd.f32 %v7595_v33, %v7594_v40  ;;  %v7602_v6 = vrot.slane %v7601_v61, 4  ;;  %7933 = vmatprep.subr.mxu0 %v7872_v36  ;;  %v7857_v40 = vld [vmem:[#allocation13 + $0x410] sm:$0xff]  ;;  %v7855_v33 = vld [vmem:[#allocation13 + $0x400] sm:$0xff] }
 0x8a5   : > { %7934 = vmatpush1.msra.mxu0 %v7871_v7 }
 0x8a6   : > { %v7597_v51 = vrot.slane %v7596_v37, 2  ;;  %v7603_v41 = vadd.f32 %v7602_v6, %v7601_v61  ;;  %7935 = vmatprep.subr.mxu0 %v7870_v29  ;;  %v7918_v61 = vld [vmem:[#allocation13 + $0x5f8] sm:$0xff]  ;;  %v7916_v6 = vld [vmem:[#allocation13 + $0x5e8] sm:$0xff] }
 0x8a7   : > { %7936 = vmatpush1.msra.mxu0 %v7869_v59 }
 0x8a8   : > { %v7598_v30 = vadd.f32 %v7597_v51, %v7596_v37  ;;  %v7604_v9 = vrot.slane %v7603_v41, 2  ;;  %7937 = vmatprep.subr.mxu0 %v7868_v46  ;;  %v7917_v37 = vld [vmem:[#allocation13 + $0x5f0] sm:$0xff]  ;;  %v7915_v51 = vld [vmem:[#allocation13 + $0x5e0] sm:$0xff] }
 0x8a9   : > { %7938 = vmatpush1.msra.mxu0 %v7867_v8 }
 0x8aa   : > { %v7599_v43 = vrot.slane %v7598_v30, 1  ;;  %v7605_v48 = vadd.f32 %v7604_v9, %v7603_v41  ;;  %7939 = vmatprep.subr.mxu0 %v7866_v38  ;;  %v7914_v41 = vld [vmem:[#allocation13 + $0x5d8] sm:$0xff]  ;;  %v7912_v9 = vld [vmem:[#allocation13 + $0x5c8] sm:$0xff] }
 0x8ab   : > { %7940 = vmatpush1.msra.mxu0 %v7865_v34 }
 0x8ac   : > { %v7600_v17 = vadd.f32 %v7599_v43, %v7598_v30  ;;  %v7606_v28 = vrot.slane %v7605_v48, 1  ;;  %7941 = vmatprep.subr.mxu0 %v7864_v62  ;;  %v7913_v30 = vld [vmem:[#allocation13 + $0x5d0] sm:$0xff]  ;;  %v7911_v43 = vld [vmem:[#allocation13 + $0x5c0] sm:$0xff] }
 0x8ad   : > { %7942 = vmatpush1.msra.mxu0 %v7863_v21 }
 0x8ae   : > { %v7608_v25 = vmul.f32 0.5, %v7600_v17  ;;  %v7607_v1 = vadd.f32 %v7606_v28, %v7605_v48  ;;  %7943 = vmatprep.subr.mxu0 %v7862_v13  ;;  %v7910_v48 = vld [vmem:[#allocation13 + $0x5b8] sm:$0xff]  ;;  %v7909_v17 = vld [vmem:[#allocation13 + $0x5b0] sm:$0xff]  ;;  %v7908_v28 = vld [vmem:[#allocation13 + $0x5a8] sm:$0xff] }
 0x8b0   : > { %v7610_v44 = vadd.f32 1e-05, %v7608_v25  ;;  %v7609_v45 = vmul.f32 0.5, %v7607_v1  ;;  %v7907_v25 = vld [vmem:[#allocation13 + $0x5a0] sm:$0xff]  ;;  %v7906_v1 = vld [vmem:[#allocation13 + $0x598] sm:$0xff] }
 0x8b2   : > { %9622 = vrsqrt.f32 %v7610_v44  ;;  %v7611_v31 = vadd.f32 1e-05, %v7609_v45  ;;  %v7905_v44 = vld [vmem:[#allocation13 + $0x590] sm:$0xff]  ;;  %v7904_v45 = vld [vmem:[#allocation13 + $0x588] sm:$0xff] }
 0x8b4   : > { %9624 = vrsqrt.f32 %v7611_v31  ;;  %v7903_v31 = vld [vmem:[#allocation13 + $0x580] sm:$0xff] }
 0x8bf   : > { %v9623_v49 = vpop.eup %9622 }
 0x8c0   : > { %v7614_v4 = vmul.f32 %v9623_v49, %v7590_v50  ;;  %v7861_v50 = vld [vmem:[#allocation13 + $0x430] sm:$0xff]  ;;  %v7899_v49 = vld [vmem:[#allocation13 + $0x560] sm:$0xff] }
 0x8c1   : > { %v9625_v56 = vpop.eup %9624  ;;  %7944 = vmatpush1.msra.mxu0 %v7861_v50 }
 0x8c2   : > { %v7627_v57 = vmul.f32 %v7620_v55, %v7614_v4  ;;  %v7615_v27 = vmul.f32 %v9625_v56, %v7591_v19  ;;  %7945 = vmatprep.subr.mxu0 %v7860_v10  ;;  %v7858_v19 = vld [vmem:[#allocation13 + $0x418] sm:$0xff]  ;;  %v7901_v55 = vld [vmem:[#allocation13 + $0x570] sm:$0xff]  ;;  %v7896_v56 = vld [vmem:[#allocation13 + $0x548] sm:$0xff] }
 0x8c3   : > { %7946 = vmatpush1.msra.mxu0 %v7859_v26  ;;  %v7898_v4 = vld [vmem:[#allocation13 + $0x558] sm:$0xff] }
 0x8c4   : > { %v7628_v14 = vmul.f32 %v7624_v39, %v7615_v27  ;;  %v7640_v22 = vadd.f32 %v7633_v15, %v7627_v57  ;;  %7947 = vmatprep.subr.mxu0 %v7858_v19  ;;  %v7897_v39 = vld [vmem:[#allocation13 + $0x550] sm:$0xff]  ;;  %v7895_v15 = vld [vmem:[#allocation13 + $0x540] sm:$0xff]  ;;  %v7894_v57 = vld [vmem:[#allocation13 + $0x538] sm:$0xff] }
 0x8c5   : > { %7948 = vmatpush1.msra.mxu0 %v7857_v40  ;;  %v7893_v27 = vld [vmem:[#allocation13 + $0x530] sm:$0xff] }
 0x8c6   : > { %v7641_v20 = vadd.f32 %v7637_v63, %v7628_v14  ;;  %v7642_v32 = vmax.f32 %v7640_v22, 0.0  ;;  %7949 = vmatprep.subr.mxu0 %v7856_v35  ;;  %v7892_v63 = vld [vmem:[#allocation13 + $0x528] sm:$0xff]  ;;  %v7891_v14 = vld [vmem:[#allocation13 + $0x520] sm:$0xff]  ;;  %v7890_v22 = vld [vmem:[#allocation13 + $0x518] sm:$0xff] }
 0x8c7   : > { %7950 = vmatpush1.msra.mxu0 %v7855_v33 }
 0x8c8   : > { %v7643_v11 = vmax.f32 %v7641_v20, 0.0  ;;  %7951 = vmatprep.subr.mxu0 %v7918_v61  ;;  %v7889_v20 = vld [vmem:[#allocation13 + $0x510] sm:$0xff] }
 0x8c9   : > { %7952 = vmatpush2.msra.mxu0 %v7917_v37 }
 0x8ca   : > { %7773 = vmatprep.mubr.f32.mxu1 %v7643_v11  ;;  %7953 = vmatprep.subr.mxu0 %v7916_v6  ;;  %v7888_v11 = vld [vmem:[#allocation13 + $0x508] sm:$0xff] }
 0x8cb   : > { %7774 = vmatmul.mubr.f32.vlgmr.msra.gmra.mxu1 %v7642_v32  ;;  %7954 = vmatpush2.msra.mxu0 %v7915_v51  ;;  %v7887_v32 = vld [vmem:[#allocation13 + $0x500] sm:$0xff] }
 0x8cc   : > { %7955 = vmatprep.subr.mxu0 %v7914_v41 }
 0x8cd   : > { %7956 = vmatpush2.msra.mxu0 %v7913_v30 }
 0x8ce   : > { %7957 = vmatprep.subr.mxu0 %v7912_v9 }
 0x8cf   : > { %7958 = vmatpush2.msra.mxu0 %v7911_v43 }
 0x8d0   : > { %7959 = vmatprep.subr.mxu0 %v7910_v48 }
 0x8d1   : > { %7960 = vmatpush2.msra.mxu0 %v7909_v17 }
 0x8d2   : > { %7961 = vmatprep.subr.mxu0 %v7908_v28  ;;  %v7781_v28 = vld [vmem:[#allocation15 + $0x4] ss:$2 sm:$0x3] }
 0x8d3   : > { %7962 = vmatpush2.msra.mxu0 %v7907_v25  ;;  %v7830_v25 = vrot.slane %v7781_v28, %v17251_v24 }
 0x8d4   : > { %7963 = vmatprep.subr.mxu0 %v7906_v1  ;;  %v7783_v1 = vld [vmem:[#allocation15 + $0x5] ss:$2 sm:$0x3] }
 0x8d5   : > { %7964 = vmatpush2.msra.mxu0 %v7905_v44 }
 0x8d6   : > { %7965 = vmatprep.subr.mxu0 %v7904_v45 }
 0x8d7   : > { %7966 = vmatpush2.msra.mxu0 %v7903_v31  ;;  %v7834_v31 = vrot.slane %v7781_v28, %v17252_v42 }
 0x8d8   : > { %7967 = vmatprep.subr.mxu0 %v7902_v58 }
 0x8d9   : > { %7968 = vmatpush2.msra.mxu0 %v7901_v55  ;;  %v7843_v55 = vrot.slane %v7783_v1, %v17251_v24 }
 0x8da   : > { %7969 = vmatprep.subr.mxu0 %v7900_v60 }
 0x8db   : > { %7970 = vmatpush2.msra.mxu0 %v7899_v49 }
 0x8dc   : > { %7971 = vmatprep.subr.mxu0 %v7898_v4  ;;  %v7847_v4 = vrot.slane %v7783_v1, %v17252_v42 }
 0x8dd   : > { %7972 = vmatpush2.msra.mxu0 %v7897_v39 }
 0x8de   : > { %7973 = vmatprep.subr.mxu0 %v7896_v56 }
 0x8df   : > { %7974 = vmatpush2.msra.mxu0 %v7895_v15 }
 0x8e0   : > { %7975 = vmatprep.subr.mxu0 %v7894_v57 }
 0x8e1   : > { %7976 = vmatpush2.msra.mxu0 %v7893_v27 }
 0x8e2   : > { %7977 = vmatprep.subr.mxu0 %v7892_v63  ;;  %v7123_v63 = vld [vmem:[#allocation16 + $0xf8] sm:$0xff] }
 0x8e3   : > { %7978 = vmatpush2.msra.mxu0 %v7891_v14  ;;  %8923 = vmatprep.subr.mxu1 %v7123_v63  ;;  %v7107_v14 = vld [vmem:[#allocation16 + $0x78] sm:$0xff] }
 0x8e4   : > { %7979 = vmatprep.subr.mxu0 %v7890_v22  ;;  %8924 = vmatpush3.msra.mxu1 %v7107_v14  ;;  %v7122_v22 = vld [vmem:[#allocation16 + $0xf0] sm:$0xff] }
 0x8e5   : > { %7980 = vmatpush2.msra.mxu0 %v7889_v20  ;;  %8925 = vmatprep.subr.mxu1 %v7122_v22  ;;  %v7106_v20 = vld [vmem:[#allocation16 + $0x70] sm:$0xff] }
 0x8e6   : > { %7981 = vmatprep.subr.mxu0 %v7888_v11  ;;  %8926 = vmatpush3.msra.mxu1 %v7106_v20  ;;  %v7121_v11 = vld [vmem:[#allocation16 + $0xe8] sm:$0xff] }
 0x8e7   : > { %7982 = vmatpush2.msra.mxu0 %v7887_v32  ;;  %8927 = vmatprep.subr.mxu1 %v7121_v11  ;;  %v7105_v32 = vld [vmem:[#allocation16 + $0x68] sm:$0xff] }
 0x8e8   : > { %8928 = vmatpush3.msra.mxu1 %v7105_v32 }
 0x98b   : > { %v7775_v18 = vpop.f32.mrf.mxu1 }
 0x98c   : > { %v7784_v5 = vsel %vm7572_vm0, %v7775_v18, 0.0 }
 0x98d   : > { %v7785_v2 = vrot.slane %v7784_v5, 4  ;;  %v7777_v52 = vpop.f32.mrf.mxu1 }
 0x98e   : > { %v7791_v0 = vsel %vm7572_vm0, %v7777_v52, 0.0 }
 0x98f   : > { %v7786_v47 = vadd.f32 %v7785_v2, %v7784_v5  ;;  %v7792_v12 = vrot.slane %v7791_v0, 4  ;;  %v7104_v5 = vld [vmem:[#allocation16 + $0x60] sm:$0xff]  ;;  %v7119_v2 = vld [vmem:[#allocation16 + $0xd8] sm:$0xff] }
 0x991   : > { %v7787_v3 = vrot.slane %v7786_v47, 2  ;;  %v7793_v54 = vadd.f32 %v7792_v12, %v7791_v0  ;;  %v7118_v0 = vld [vmem:[#allocation16 + $0xd0] sm:$0xff]  ;;  %v7117_v12 = vld [vmem:[#allocation16 + $0xc8] sm:$0xff] }
 0x993   : > { %v7788_v23 = vadd.f32 %v7787_v3, %v7786_v47  ;;  %v7794_v16 = vrot.slane %v7793_v54, 2  ;;  %v7102_v47 = vld [vmem:[#allocation16 + $0x50] sm:$0xff]  ;;  %v7101_v3 = vld [vmem:[#allocation16 + $0x48] sm:$0xff] }
 0x995   : > { %v7789_v53 = vrot.slane %v7788_v23, 1  ;;  %v7795_v36 = vadd.f32 %v7794_v16, %v7793_v54  ;;  %v7116_v54 = vld [vmem:[#allocation16 + $0xc0] sm:$0xff]  ;;  %v7115_v16 = vld [vmem:[#allocation16 + $0xb8] sm:$0xff] }
 0x997   : > { %v7790_v7 = vadd.f32 %v7789_v53, %v7788_v23  ;;  %v7796_v29 = vrot.slane %v7795_v36, 1  ;;  %v7100_v23 = vld [vmem:[#allocation16 + $0x40] sm:$0xff]  ;;  %v7099_v53 = vld [vmem:[#allocation16 + $0x38] sm:$0xff] }
 0x999   : > { %v7798_v59 = vmul.f32 0.5, %v7790_v7  ;;  %v7797_v46 = vadd.f32 %v7796_v29, %v7795_v36  ;;  %v7114_v36 = vld [vmem:[#allocation16 + $0xb0] sm:$0xff]  ;;  %v7113_v29 = vld [vmem:[#allocation16 + $0xa8] sm:$0xff] }
 0x99a   : > { %v7098_v7 = vld [vmem:[#allocation16 + $0x30] sm:$0xff] }
 0x99b   : > { %v7800_v8 = vsub.f32 %v7775_v18, %v7798_v59  ;;  %v7799_v38 = vmul.f32 0.5, %v7797_v46  ;;  %v7120_v18 = vld [vmem:[#allocation16 + $0xe0] sm:$0xff]  ;;  %v7097_v59 = vld [vmem:[#allocation16 + $0x28] sm:$0xff] }
 0x99c   : > { %8929 = vmatprep.subr.mxu1 %v7120_v18  ;;  %v7112_v46 = vld [vmem:[#allocation16 + $0xa0] sm:$0xff] }
 0x99d   : > { %v7802_v34 = vmul.f32 %v7800_v8, %v7800_v8  ;;  %v7801_v62 = vsub.f32 %v7777_v52, %v7799_v38  ;;  %8930 = vmatpush3.msra.mxu1 %v7104_v5  ;;  %v7103_v52 = vld [vmem:[#allocation16 + $0x58] sm:$0xff] }
 0x99e   : > { %8931 = vmatprep.subr.mxu1 %v7119_v2  ;;  %v7111_v38 = vld [vmem:[#allocation16 + $0x98] sm:$0xff] }
 0x99f   : > { %v7804_v21 = vsel %vm7572_vm0, %v7802_v34, 0.0  ;;  %v7803_v13 = vmul.f32 %v7801_v62, %v7801_v62  ;;  %8932 = vmatpush3.msra.mxu1 %v7103_v52  ;;  %v7095_v34 = vld [vmem:[#allocation16 + $0x18] sm:$0xff] }
 0x9a0   : > { %v7805_v50 = vrot.slane %v7804_v21, 4  ;;  %8933 = vmatprep.subr.mxu1 %v7118_v0  ;;  %v7991_v0 = vld [vmem:[#allocation15 + $0x8] ss:$2 sm:$0x3] }
 0x9a1   : > { %v7811_v10 = vsel %vm7572_vm0, %v7803_v13, 0.0  ;;  %8934 = vmatpush3.msra.mxu1 %v7102_v47  ;;  %v7109_v13 = vld [vmem:[#allocation16 + $0x88] sm:$0xff] }
 0x9a2   : > { %v7806_v26 = vadd.f32 %v7805_v50, %v7804_v21  ;;  %v7812_v19 = vrot.slane %v7811_v10, 4  ;;  %8935 = vmatprep.subr.mxu1 %v7117_v12  ;;  %v7094_v21 = vld [vmem:[#allocation16 + $0x10] sm:$0xff]  ;;  %v7093_v50 = vld [vmem:[#allocation16 + $0x8] sm:$0xff]  ;;  %v8040_v12 = vrot.slane %v7991_v0, %v17251_v24 }
 0x9a3   : > { %8936 = vmatpush3.msra.mxu1 %v7101_v3 }
 0x9a4   : > { %v7807_v40 = vrot.slane %v7806_v26, 2  ;;  %v7813_v35 = vadd.f32 %v7812_v19, %v7811_v10  ;;  %8937 = vmatprep.subr.mxu1 %v7116_v54  ;;  %v7108_v10 = vld [vmem:[#allocation16 + $0x80] sm:$0xff]  ;;  %v8044_v54 = vrot.slane %v7991_v0, %v17252_v42 }
 0x9a5   : > { %8938 = vmatpush3.msra.mxu1 %v7100_v23  ;;  %v7993_v23 = vld [vmem:[#allocation15 + $0x9] ss:$2 sm:$0x3] }
 0x9a6   : > { %v7808_v33 = vadd.f32 %v7807_v40, %v7806_v26  ;;  %v7814_v61 = vrot.slane %v7813_v35, 2  ;;  %8939 = vmatprep.subr.mxu1 %v7115_v16  ;;  %v7092_v26 = vld [vmem:[#allocation16] sm:$0xff] }
 0x9a7   : > { %8940 = vmatpush3.msra.mxu1 %v7099_v53 }
 0x9a8   : > { %v7809_v37 = vrot.slane %v7808_v33, 1  ;;  %v7815_v6 = vadd.f32 %v7814_v61, %v7813_v35  ;;  %8941 = vmatprep.subr.mxu1 %v7114_v36  ;;  %v8057_v36 = vrot.slane %v7993_v23, %v17252_v42  ;;  %v7137_v42 = vld [vmem:[%s17254_s29 + $0x60] sm:$0xff] }
 0x9a9   : > { %8942 = vmatpush3.msra.mxu1 %v7098_v7 }
 0x9aa   : > { %v7810_v51 = vadd.f32 %v7809_v37, %v7808_v33  ;;  %v7816_v41 = vrot.slane %v7815_v6, 1  ;;  %8943 = vmatprep.subr.mxu1 %v7113_v29  ;;  %v8053_v29 = vrot.slane %v7993_v23, %v17251_v24  ;;  %v7138_v24 = vld [vmem:[%s17254_s29 + $0x68] sm:$0xff] }
 0x9ab   : > { %8944 = vmatpush3.msra.mxu1 %v7097_v59 }
 0x9ac   : > { %v7818_v30 = vmul.f32 0.5, %v7810_v51  ;;  %v7817_v9 = vadd.f32 %v7816_v41, %v7815_v6  ;;  %8945 = vmatprep.subr.mxu1 %v7112_v46 }
 0x9ae   : > { %v7820_v43 = vadd.f32 1e-05, %v7818_v30  ;;  %v7819_v48 = vmul.f32 0.5, %v7817_v9 }
 0x9b0   : > { %9626 = vrsqrt.f32 %v7820_v43  ;;  %v7821_v17 = vadd.f32 1e-05, %v7819_v48 }
 0x9b2   : > { %9628 = vrsqrt.f32 %v7821_v17 }
 0x9bd   : > { %v9627_v44 = vpop.eup %9626 }
 0x9be   : > { %v7824_v45 = vmul.f32 %v9627_v44, %v7800_v8  ;;  %v7096_v8 = vld [vmem:[#allocation16 + $0x20] sm:$0xff] }
 0x9bf   : > { %v9629_v58 = vpop.eup %9628  ;;  %8946 = vmatpush3.msra.mxu1 %v7096_v8 }
 0x9c0   : > { %v7837_v60 = vmul.f32 %v7830_v25, %v7824_v45  ;;  %v7825_v49 = vmul.f32 %v9629_v58, %v7801_v62  ;;  %8947 = vmatprep.subr.mxu1 %v7111_v38  ;;  %v7110_v62 = vld [vmem:[#allocation16 + $0x90] sm:$0xff] }
 0x9c1   : > { %8948 = vmatpush3.msra.mxu1 %v7095_v34  ;;  %v7140_v38 = vld [vmem:[%s17253_s28 + $0x78] sm:$0xff]  ;;  %v10065_v34 = vmov 0.0  }
 0x9c2   : > { %v7838_v39 = vmul.f32 %v7834_v31, %v7825_v49  ;;  %v7850_v56 = vadd.f32 %v7843_v55, %v7837_v60  ;;  %8949 = vmatprep.subr.mxu1 %v7110_v62  ;;  %v7139_v62 = vld [vmem:[%s17254_s29 + $0x70] sm:$0xff] }
 0x9c3   : > { %8950 = vmatpush3.msra.mxu1 %v7094_v21  ;;  %v7136_v21 = vld [vmem:[%s17254_s29 + $0x58] sm:$0xff] }
 0x9c4   : > { %v7851_v15 = vadd.f32 %v7847_v4, %v7838_v39  ;;  %v7852_v27 = vmax.f32 %v7850_v56, 0.0  ;;  %8951 = vmatprep.subr.mxu1 %v7109_v13  ;;  %v7135_v13 = vld [vmem:[%s17254_s29 + $0x50] sm:$0xff] }
 0x9c5   : > { %8952 = vmatpush3.msra.mxu1 %v7093_v50  ;;  %v7134_v50 = vld [vmem:[%s17254_s29 + $0x48] sm:$0xff] }
 0x9c6   : > { %v7853_v57 = vmax.f32 %v7851_v15, 0.0  ;;  %8953 = vmatprep.subr.mxu1 %v7108_v10  ;;  %v7133_v10 = vld [vmem:[%s17254_s29 + $0x40] sm:$0xff] }
 0x9c7   : > { %8954 = vmatpush3.msra.mxu1 %v7092_v26  ;;  %v7132_v26 = vld [vmem:[%s17254_s29 + $0x38] sm:$0xff] }
 0x9c8   : > { %7983 = vmatprep.mubr.f32.mxu0 %v7853_v57  ;;  %8975 = vmatprep.subr.mxu1 %v10065_v34 }
 0x9c9   : > { %7984 = vmatmul.mubr.f32.vlgmr.msra.gmra.mxu0 %v7852_v27 }
 0xa89   : > { %v7985_v19 = vpop.f32.mrf.mxu0 }
 0xa8a   : > { %v7994_v40 = vsel %vm7572_vm0, %v7985_v19, 0.0 }
 0xa8b   : > { %v7995_v35 = vrot.slane %v7994_v40, 4  ;;  %v7987_v33 = vpop.f32.mrf.mxu0 }
 0xa8c   : > { %v8001_v61 = vsel %vm7572_vm0, %v7987_v33, 0.0 }
 0xa8d   : > { %v7996_v37 = vadd.f32 %v7995_v35, %v7994_v40  ;;  %v8002_v6 = vrot.slane %v8001_v61, 4  ;;  %v7130_v40 = vld [vmem:[%s17254_s29 + $0x28] sm:$0xff]  ;;  %v7129_v35 = vld [vmem:[%s17254_s29 + $0x20] sm:$0xff] }
 0xa8f   : > { %v7997_v51 = vrot.slane %v7996_v37, 2  ;;  %v8003_v41 = vadd.f32 %v8002_v6, %v8001_v61  ;;  %v7127_v61 = vld [vmem:[%s17254_s29 + $0x10] sm:$0xff]  ;;  %v7125_v6 = vld [vmem:[%s17254_s29] sm:$0xff] }
 0xa91   : > { %v7998_v30 = vadd.f32 %v7997_v51, %v7996_v37  ;;  %v8004_v9 = vrot.slane %v8003_v41, 2  ;;  %v7126_v37 = vld [vmem:[%s17254_s29 + $0x8] sm:$0xff] }
 0xa93   : > { %v7999_v43 = vrot.slane %v7998_v30, 1  ;;  %v8005_v48 = vadd.f32 %v8004_v9, %v8003_v41  ;;  %v8849_v41 = vld [vmem:[#allocation18] ss:$0 sm:$0xff] }
 0xa95   : > { %v8000_v17 = vadd.f32 %v7999_v43, %v7998_v30  ;;  %v8006_v28 = vrot.slane %v8005_v48, 1 }
 0xa97   : > { %v8008_v25 = vmul.f32 0.5, %v8000_v17  ;;  %v8007_v1 = vadd.f32 %v8006_v28, %v8005_v48 }
 0xa99   : > { %v8010_v44 = vsub.f32 %v7985_v19, %v8008_v25  ;;  %v8009_v45 = vmul.f32 0.5, %v8007_v1  ;;  %v7131_v19 = vld [vmem:[%s17254_s29 + $0x30] sm:$0xff] }
 0xa9b   : > { %v8012_v31 = vmul.f32 %v8010_v44, %v8010_v44  ;;  %v8011_v58 = vsub.f32 %v7987_v33, %v8009_v45  ;;  %v7128_v33 = vld [vmem:[%s17254_s29 + $0x18] sm:$0xff] }
 0xa9d   : > { %v8014_v55 = vsel %vm7572_vm0, %v8012_v31, 0.0  ;;  %v8013_v60 = vmul.f32 %v8011_v58, %v8011_v58 }
 0xa9e   : > { %v8015_v49 = vrot.slane %v8014_v55, 4 }
 0xa9f   : > { %v8021_v4 = vsel %vm7572_vm0, %v8013_v60, 0.0 }
 0xaa0   : > { %v8016_v39 = vadd.f32 %v8015_v49, %v8014_v55  ;;  %v8022_v56 = vrot.slane %v8021_v4, 4 }
 0xaa2   : > { %v8017_v15 = vrot.slane %v8016_v39, 2  ;;  %v8023_v57 = vadd.f32 %v8022_v56, %v8021_v4  ;;  %v8850_v4 = vld [vmem:[#allocation19] ss:$0 sm:$0xff] }
 0xaa4   : > { %v8018_v27 = vadd.f32 %v8017_v15, %v8016_v39  ;;  %v8024_v63 = vrot.slane %v8023_v57, 2 }
 0xaa6   : > { %v8019_v14 = vrot.slane %v8018_v27, 1  ;;  %v8025_v22 = vadd.f32 %v8024_v63, %v8023_v57 }
 0xaa8   : > { %v8020_v20 = vadd.f32 %v8019_v14, %v8018_v27  ;;  %v8026_v11 = vrot.slane %v8025_v22, 1 }
 0xaaa   : > { %v8028_v32 = vmul.f32 0.5, %v8020_v20  ;;  %v8027_v18 = vadd.f32 %v8026_v11, %v8025_v22 }
 0xaac   : > { %v8030_v5 = vadd.f32 1e-05, %v8028_v32  ;;  %v8029_v2 = vmul.f32 0.5, %v8027_v18 }
 0xaae   : > { %9630 = vrsqrt.f32 %v8030_v5  ;;  %v8031_v52 = vadd.f32 1e-05, %v8029_v2 }
 0xab0   : > { %9632 = vrsqrt.f32 %v8031_v52 }
 0xabb   : > { %v9631_v47 = vpop.eup %9630 }
 0xabc   : > { %v8034_v3 = vmul.f32 %v9631_v47, %v8010_v44 }
 0xabd   : > { %v9633_v16 = vpop.eup %9632 }
 0xabe   : > { %v8035_v53 = vmul.f32 %v9633_v16, %v8011_v58  ;;  %v8047_v7 = vmul.f32 %v8040_v12, %v8034_v3 }
 0xac0   : > { %v8048_v59 = vmul.f32 %v8044_v54, %v8035_v53  ;;  %v8060_v8 = vadd.f32 %v8053_v29, %v8047_v7 }
 0xac2   : > { %v8061_v46 = vadd.f32 %v8057_v36, %v8048_v59 }
 0xac4   : > { %8132 = vmatprep.mubr.f32.mxu1 %v8061_v46 }
 0xac5   : > { %8133 = vmatmul.mubr.f32.vlgmr.msra.gmra.mxu1 %v8060_v8 }
 0xac6   : > { %9007 = vmatprep.mubr.msk.f32.mxu1 %vm10066_vm1, %v10065_v34  ;;  %8976 = vmatpush3.msra.mxu1 %v7140_v38 }
 0xac7   : > { %8977 = vmatprep.subr.mxu1 %v10065_v34 }
 0xac8   : > { %8978 = vmatpush3.msra.mxu1 %v7139_v62 }
 0xac9   : > { %8979 = vmatprep.subr.mxu1 %v10065_v34 }
 0xaca   : > { %8980 = vmatpush3.msra.mxu1 %v7138_v24 }
 0xacb   : > { %8981 = vmatprep.subr.mxu1 %v10065_v34 }
 0xacc   : > { %8982 = vmatpush3.msra.mxu1 %v7137_v42 }
 0xacd   : > { %8983 = vmatprep.subr.mxu1 %v10065_v34 }
 0xace   : > { %8984 = vmatpush3.msra.mxu1 %v7136_v21 }
 0xacf   : > { %8985 = vmatprep.subr.mxu1 %v10065_v34 }
 0xad0   : > { %8986 = vmatpush3.msra.mxu1 %v7135_v13 }
 0xad1   : > { %8987 = vmatprep.subr.mxu1 %v10065_v34 }
 0xad2   : > { %8988 = vmatpush3.msra.mxu1 %v7134_v50 }
 0xad3   : > { %8989 = vmatprep.subr.mxu1 %v10065_v34 }
 0xad4   : > { %8990 = vmatpush3.msra.mxu1 %v7133_v10 }
 0xad5   : > { %8991 = vmatprep.subr.mxu1 %v10065_v34 }
 0xad6   : > { %8992 = vmatpush3.msra.mxu1 %v7132_v26 }
 0xad7   : > { %8993 = vmatprep.subr.mxu1 %v10065_v34 }
 0xad8   : > { %8994 = vmatpush3.msra.mxu1 %v7131_v19 }
 0xad9   : > { %8995 = vmatprep.subr.mxu1 %v10065_v34 }
 0xada   : > { %8996 = vmatpush3.msra.mxu1 %v7130_v40 }
 0xadb   : > { %8997 = vmatprep.subr.mxu1 %v10065_v34 }
 0xadc   : > { %8998 = vmatpush3.msra.mxu1 %v7129_v35 }
 0xadd   : > { %8999 = vmatprep.subr.mxu1 %v10065_v34 }
 0xade   : > { %9000 = vmatpush3.msra.mxu1 %v7128_v33 }
 0xadf   : > { %9001 = vmatprep.subr.mxu1 %v10065_v34 }
 0xae0   : > { %9002 = vmatpush3.msra.mxu1 %v7127_v61 }
 0xae1   : > { %9003 = vmatprep.subr.mxu1 %v10065_v34 }
 0xae2   : > { %9004 = vmatpush3.msra.mxu1 %v7126_v37 }
 0xae3   : > { %9005 = vmatprep.subr.mxu1 %v10065_v34 }
 0xae4   : > { %9006 = vmatpush3.msra.mxu1 %v7125_v6 }
 0xb85   : > { %v8955_v51 = vpop.f32.mrf.mxu1 }
 0xb87   : > { %v8956_v30 = vpop.f32.mrf.mxu1 }
 0xb88   : > { %v8957_v9 = vadd.f32 %v8956_v30, %v8955_v51 }
 0xb8a   : > { %v8135_v43 = vadd.f32 %v8957_v9, %v8849_v41 }
 0xb8c   : > { %v8139_v48 = vmin.f32 %v8135_v43, 20.0  ;;  %vm8138_vm3 = vcmp.gt.f32.partialorder %v8135_v43, 20.0 }
 0xb8e   : > { %v8140_v17 = vmul.f32 1.442695, %v8139_v48 }
 0xb90   : > { %9634 = vpow2.f32 %v8140_v17 }
 0xb9d   : > { %v9635_v28 = vpop.eup %9634 }
 0xb9e   : > { %v8142_v25 = vadd.f32 1.0, %v9635_v28  ;;  %v8145_v1 = vmul.f32 -0.5, %v9635_v28  ;;  %v8148_v45 = vand.u32 2147483647, %v9635_v28 }
 0xba0   : > { %9636 = vlog2.f32 %v8142_v25  ;;  %v8146_v44 = vadd.f32 1.0, %v8145_v1  ;;  %vm8149_vm2 = vcmp.lt.f32.partialorder %v8148_v45, 0.0004427343 }
 0xba2   : > { %v8147_v55 = vmul.f32 %v9635_v28, %v8146_v44 }
 0xbad   : > { %v9637_v31 = vpop.eup %9636 }
 0xbae   : > { %v8144_v58 = vmul.f32 0.6931472, %v9637_v31 }
 0xbb0   : > { %v8150_v60 = vsel %vm8149_vm2, %v8147_v55, %v8144_v58 }
 0xbb1   : > { %v8151_v49 = vsel %vm8138_vm3, %v8135_v43, %v8150_v60 }
 0xbb2   : > { %9008 = vmatmul.mubr.f32.vlgmr.msra.gmra.mxu1 %v8151_v49 }
 0xc72   : > { %v8224_v39 = vpop.f32.mrf.mxu1 }
 0xc73   : > { %v8225_v56 = vadd.f32 %v8850_v4, %v8224_v39 }
 0xc74   : > { %v9009_v15 = vpop.f32.mrf.mxu1 }
 0xc75   : > { %8229 = vst.msk [vmem:[#allocation21] sm:$0x3] %vm8228_vm4, %v8225_v56 }
 0xc76 PF: > { %s17255_s26 = sld [smem:[#allocation31_spill]]  ;;  %s10067_s20 = smov [#allocation21]  }
 0xc77   : > { %s8237_s16 = sshll.u32 %s10067_s20, 4  ;;  %s8238_s16 = int_to_ptr.vmem [resolvable:$true] %s8237_s16 }
 0xc78   : > { %s9958_s17 = scalar_lea.vmem %s8238_s16, 32  ;;  %p9965_p7 = scmp.lt.s32.totalorder %s8238_s16, %s8238_s16 }
 0xc79   : > { %p9959_p5 = scmp.ne.s32.totalorder %s8238_s16, %s9958_s17  ;;  %p9966_p11 = scmp.lt.s32.totalorder %s9958_s17, %s9958_s17 }
 0xc7b   : > { %p9967_p8 = por %p9966_p11, %p9965_p7 }
 0xc7c   : > { %p9109_p13 = scmp.eq.s32.totalorder %s17255_s26, 4 }
 0xc7e   : > { %p9960_p1 = pnand %p9959_p5, %p9109_p13 }
 0xc80   : > { %p9961_p4 = pneg %p9960_p1 }
 0xc82   : > { %p9968_p10 = pnand %p9967_p8, %p9961_p4 }
 0xc84   : > { %9971 = shalt.err (!%p9968_p10)
}
 0xc85   : > { %s17256_s13 = sld [smem:[#allocation173_spill]] }
 0xc8b   : > { %9051 = dma.vmem_to_hbm [thread:$0]  (%p9109_p13), %s8238_s16, 32, %s17256_s13, [#allocation5]  }
 0xc8c   : > { %10027 = dma.done.wait (%p9109_p13), [#allocation5], 32  }
 0xc8d   : > { %10029 = vsyncadd (%p9109_p13), [#allocation5], 4294967264 }
 0xc8e PF: > { %s17257_s28 = sld [smem:[#allocation33_spill]]  ;;  %s17260_s26 = smov %s10040_s27 }
 0xc8f   : > { %s17258_s25 = sld [smem:[#allocation30_spill]] }
 0xc90   : > { %s17259_s19 = sld [smem:[#allocation34_spill]] }
 0xc94   : > { %p26_p0 = scmp.ge.s32.totalorder %s17257_s28, 7  }
 0xc96   : > { %s17261_s27 = smov %s17259_s19  ;;  %28 = sbr.rel (!%p26_p0) target bundleno = 13 (0xd), region = 190 }
 0xc9b   :  { %8250 = vsyncpa [#allocation4], 1 }
 0xc9c   :  { %8252 = vsyncpa [#allocation4 + $0x1], 1 }
 0xc9d   :  { %8253 = vsyncpa [#allocation7], 1 }
 0xc9e   :  { %8254 = vsyncpa [#allocation14], 1 }
 0xc9f   :  { %8255 = vsyncpa [#allocation17], 1 }
 0xca0   :  { %8256 = vsyncpa [#allocation20], 1 }
 0xca1   :  { %8257 = vsyncpa [#allocation5], 1 }
 0xca2   :  { %8259 = vsyncpa [#allocation5 + $0x1], 1 }

</bundles_post_ra>
